<compile_context>
chip_gen: v7x
topology: tpu7x:2x2x1
jax: 0.10.0
libtpu: 0.0.40
codegen_flags: <defaults>
</compile_context>

<pallas_src>
import functools

import jax
import jax.numpy as jnp
from jax import lax
from jax.experimental import pallas as pl
from jax.experimental.pallas import tpu as pltpu

NEG_SLOPE = 0.2
BIN_NUM = (1, 2, 4, 8, 16, 32)          # sum == 63
VMEM_LIMIT = 32 * 1024 * 1024           # explicit scoped-VMEM cap (fits v5e..v7x)


def _cparams(n_axes):
    return pltpu.CompilerParams(
        dimension_semantics=("parallel",) * n_axes,
        vmem_limit_bytes=VMEM_LIMIT)


def _tile_n(n, target=256):
    """Largest tile <= target that divides n (multiple of 8 when possible)."""
    if n <= target:
        return n
    for t in range(target, 7, -8):
        if n % t == 0:
            return t
    return n


# ----------------------------- Pallas kernels ------------------------------

def _pdist_kernel(xr_ref, xf_ref, sqc_ref, out_ref):
    """Negative squared pairwise distances, row-tiled.
    xr_ref: (1, TN, C) row tile   xf_ref: (1, N, C) all points
    sqc_ref: (1, 1, N) column squared norms (precomputed)
    out_ref: (1, TN, N), out[i, j] = -||x_i - x_j||^2."""
    xr = xr_ref[0]                                                     # (TN, C)
    xf = xf_ref[0]                                                     # (N, C)
    g = lax.dot_general(xr, xf, (((1,), (1,)), ((), ())),
                        preferred_element_type=jnp.float32)            # (TN, N)
    sq_r = jnp.sum(xr * xr, axis=-1, keepdims=True)                    # (TN, 1)
    out_ref[0] = 2.0 * g - sq_r - sqc_ref[0]


def _pointwise_pair_kernel(x_ref, wn_ref, wd_ref, shift_ref, yn_ref, cc_ref):
    """Two fused 1x1 convs with folded BN scale (in the weights) + shift.
    x_ref: (1, TN, C)   wn/wd: (C, Cout) bf16   shift: (1, Cout)
    yn_ref / cc_ref: (1, TN, Cout)  with yn = x@Wn, cc = x@Wd + shift."""
    x = x_ref[0].astype(jnp.bfloat16)                                  # bf16 MXU
    yn_ref[0] = jnp.dot(x, wn_ref[...], preferred_element_type=jnp.float32)
    cc_ref[0] = (jnp.dot(x, wd_ref[...], preferred_element_type=jnp.float32)
                 + shift_ref[...])


def _edge_max_kernel(g_ref, cc_ref, out_ref):
    """Per-neighbor add + LeakyReLU + running max over K (element-wise only).
    g_ref: (1, K, TN, Cout) gathered neighbor projections
    cc_ref: (1, TN, Cout) center term (BN shift already folded in)
    out_ref: (1, TN, Cout)."""
    cc = cc_ref[0]                                                     # (TN, Cout)
    K = g_ref.shape[1]
    acc = None
    for kk in range(K):                                                # static unroll
        h = g_ref[0, kk] + cc                                          # (TN, Cout)
        h = jnp.where(h >= 0, h, NEG_SLOPE * h)                        # LeakyReLU pre-max
        acc = h if acc is None else jnp.maximum(acc, h)
    out_ref[0] = acc


def _concat_pointwise_act_kernel(x1_ref, x2_ref, x3_ref, x4_ref,
                                 w1_ref, w2_ref, w3_ref, w4_ref,
                                 shift_ref, out_ref):
    """conv5 fused with the channel concat: LeakyReLU(sum_i xi@Wi + shift).
    xi_ref: (1, TN, Ci)   wi: (Ci, 512) bf16   shift: (1, 512)."""
    h = jnp.dot(x1_ref[0].astype(jnp.bfloat16), w1_ref[...],
                preferred_element_type=jnp.float32)
    h = h + jnp.dot(x2_ref[0].astype(jnp.bfloat16), w2_ref[...],
                    preferred_element_type=jnp.float32)
    h = h + jnp.dot(x3_ref[0].astype(jnp.bfloat16), w3_ref[...],
                    preferred_element_type=jnp.float32)
    h = h + jnp.dot(x4_ref[0].astype(jnp.bfloat16), w4_ref[...],
                    preferred_element_type=jnp.float32)
    h = h + shift_ref[...]
    out_ref[0] = jnp.where(h >= 0, h, NEG_SLOPE * h)


def _bin_transform_kernel(x_ref, w_ref, b_ref, out_ref, *, bins):
    """Multi-scale bin pooling (max + mean per bin) + Linear(63 -> 1).
    x_ref: (1, N, F), w_ref: (63, 1), b_ref: (1, 1), out_ref: (1, 1, F).
    Uses VPU broadcast-multiply + sublane sums instead of M=1 MXU matmuls."""
    x = x_ref[0]                                                       # (N, F)
    N, F = x.shape
    w_all = w_ref[...]                                                 # (63, 1)
    acc = jnp.zeros((1, F), jnp.float32) + b_ref[...]
    off = 0
    for nb in bins:
        z = x.reshape(nb, N // nb, F)
        zb = jnp.max(z, axis=1) + jnp.mean(z, axis=1)                  # (nb, F)
        w_seg = w_all[off:off + nb, :]                                 # (nb, 1)
        acc = acc + jnp.sum(zb * w_seg, axis=0, keepdims=True)
        off += nb
    out_ref[0] = acc


# --------------------------- pallas_call wrappers ---------------------------

def pairwise_neg_sqdist(x, tn):
    B, N, C = x.shape
    sq = jnp.sum(x * x, axis=-1)[:, None, :]                           # (B, 1, N)
    return pl.pallas_call(
        _pdist_kernel,
        out_shape=jax.ShapeDtypeStruct((B, N, N), jnp.float32),
        grid=(B, N // tn),
        in_specs=[
            pl.BlockSpec((1, tn, C), lambda b, i: (b, i, 0)),          # row tile
            pl.BlockSpec((1, N, C), lambda b, i: (b, 0, 0)),           # all points
            pl.BlockSpec((1, 1, N), lambda b, i: (b, 0, 0)),           # col norms
        ],
        out_specs=pl.BlockSpec((1, tn, N), lambda b, i: (b, i, 0)),
        compiler_params=_cparams(2),
    )(x, x, sq)


def pointwise_pair(x, wn, wd, shift, tn):
    B, N, C = x.shape
    Cout = wn.shape[1]
    return pl.pallas_call(
        _pointwise_pair_kernel,
        out_shape=(jax.ShapeDtypeStruct((B, N, Cout), jnp.float32),
                   jax.ShapeDtypeStruct((B, N, Cout), jnp.float32)),
        grid=(B, N // tn),
        in_specs=[
            pl.BlockSpec((1, tn, C), lambda b, i: (b, i, 0)),
            pl.BlockSpec((C, Cout), lambda b, i: (0, 0)),
            pl.BlockSpec((C, Cout), lambda b, i: (0, 0)),
            pl.BlockSpec((1, Cout), lambda b, i: (0, 0)),
        ],
        out_specs=(
            pl.BlockSpec((1, tn, Cout), lambda b, i: (b, i, 0)),
            pl.BlockSpec((1, tn, Cout), lambda b, i: (b, i, 0)),
        ),
        compiler_params=_cparams(2),
    )(x, wn, wd, shift)


def edge_max(g, cc, tn):
    B, K, N, Cout = g.shape
    return pl.pallas_call(
        _edge_max_kernel,
        out_shape=jax.ShapeDtypeStruct((B, N, Cout), jnp.float32),
        grid=(B, N // tn),
        in_specs=[
            pl.BlockSpec((1, K, tn, Cout), lambda b, i: (b, 0, i, 0)),
            pl.BlockSpec((1, tn, Cout), lambda b, i: (b, i, 0)),
        ],
        out_specs=pl.BlockSpec((1, tn, Cout), lambda b, i: (b, i, 0)),
        compiler_params=_cparams(2),
    )(g, cc)


def concat_pointwise_act(xs, ws, shift, tn):
    """conv5: concat(x1..x4) @ W5 + shift, LeakyReLU — concat fused away."""
    B, N, _ = xs[0].shape
    Cout = ws[0].shape[1]
    in_specs = [pl.BlockSpec((1, tn, x.shape[2]), lambda b, i: (b, i, 0))
                for x in xs]
    in_specs += [pl.BlockSpec((w.shape[0], Cout), lambda b, i: (0, 0))
                 for w in ws]
    in_specs.append(pl.BlockSpec((1, Cout), lambda b, i: (0, 0)))
    return pl.pallas_call(
        _concat_pointwise_act_kernel,
        out_shape=jax.ShapeDtypeStruct((B, N, Cout), jnp.float32),
        grid=(B, N // tn),
        in_specs=in_specs,
        out_specs=pl.BlockSpec((1, tn, Cout), lambda b, i: (b, i, 0)),
        compiler_params=_cparams(2),
    )(*xs, *ws, shift)


def bin_transform(x, w, b):
    B, N, F = x.shape
    out = pl.pallas_call(
        functools.partial(_bin_transform_kernel, bins=BIN_NUM),
        out_shape=jax.ShapeDtypeStruct((B, 1, F), jnp.float32),
        grid=(B,),
        in_specs=[
            pl.BlockSpec((1, N, F), lambda i: (i, 0, 0)),
            pl.BlockSpec((sum(BIN_NUM), 1), lambda i: (0, 0)),
            pl.BlockSpec((1, 1), lambda i: (0, 0)),
        ],
        out_specs=pl.BlockSpec((1, 1, F), lambda i: (i, 0, 0)),
        compiler_params=_cparams(1),
    )(x, w, b)
    return out[:, 0, :]                                                # (B, F)


# ------------------------------ glue (plain JAX) ----------------------------

def knn_indices(x, k, tn):
    """k nearest neighbors (self-inclusive), matching the torch knn()."""
    d = pairwise_neg_sqdist(x, tn)                    # (B, N, N) Pallas kernel
    # TODO(synk): fuse top-k selection into the pdist kernel (running top-k per
    # row tile) to avoid writing the (B, N, N) matrix to HBM.
    _, idx = lax.top_k(d, k)
    return idx                                        # (B, N, k)


def gather_neighbors(y, idx):
    """y: (B, N, F), idx: (B, N, K) -> (B, K, N, F) gathered neighbor rows."""
    # TODO(synk): the row gather stays in XLA; the (B,K,N,Cout) tensor is ~2x
    # smaller than the original (B,N,K,2C) graph-feature tensor for conv2-4.
    idx_t = jnp.transpose(idx, (0, 2, 1))             # (B, K, N)
    return jax.vmap(lambda pts, ind: pts[ind])(y, idx_t)


def edge_conv(x, idx, wn, wd, shift, tn):
    """Factored EdgeConv: max_k LeakyReLU( (x_j @ Wn) + (x_i @ Wd + shift) )."""
    yn, cc = pointwise_pair(x, wn, wd, shift, tn)     # (B, N, Cout) x2
    g = gather_neighbors(yn, idx)                     # (B, K, N, Cout)
    return edge_max(g, cc, tn)                        # (B, N, Cout)


def fold_bn(gamma, beta, mean, var, eps=1e-5):
    scale = gamma / jnp.sqrt(var + eps)
    shift = beta - mean * scale
    return scale, shift


def init_params(key):
    ks = jax.random.split(key, 20)
    edge_specs = [("conv1", 3, 64), ("conv2", 64, 64),
                  ("conv3", 64, 128), ("conv4", 128, 256)]
    params, i = {}, 0
    for name, c, cout in edge_specs:
        w = jax.random.normal(ks[i], (2 * c, cout), jnp.float32) / jnp.sqrt(2.0 * c)
        gamma = 1.0 + 0.1 * jax.random.normal(ks[i + 1], (cout,), jnp.float32)
        beta = 0.1 * jax.random.normal(ks[i + 2], (cout,), jnp.float32)
        scale, shift = fold_bn(gamma, beta, jnp.zeros((cout,)), jnp.ones((cout,)))
        # Factor W through the gather and fold the BN scale into the weights.
        # torch graph feature = cat(x_j - x_i, x_i): rows [:c] hit the diff.
        wn = (w[:c] * scale[None, :]).astype(jnp.bfloat16)             # neighbor part
        wd = ((w[c:] - w[:c]) * scale[None, :]).astype(jnp.bfloat16)   # center - neighbor
        params[name] = (wn, wd, shift[None, :].astype(jnp.float32))
        i += 3
    # conv5 (1x1 Conv1d 512 -> 512), split by the concat's input-channel blocks.
    w5 = jax.random.normal(ks[i], (512, 512), jnp.float32) / jnp.sqrt(512.0)
    gamma = 1.0 + 0.1 * jax.random.normal(ks[i + 1], (512,), jnp.float32)
    beta = 0.1 * jax.random.normal(ks[i + 2], (512,), jnp.float32)
    scale, shift = fold_bn(gamma, beta, jnp.zeros((512,)), jnp.ones((512,)))
    w5s = (w5 * scale[None, :]).astype(jnp.bfloat16)
    params["conv5"] = ((w5s[0:64], w5s[64:128], w5s[128:256], w5s[256:512]),
                       shift[None, :].astype(jnp.float32))
    i += 3
    # transform: nn.Linear(63, 1) -> stored as W.T (63, 1) and bias (1, 1)
    params["transform_w"] = jax.random.normal(ks[i], (63, 1), jnp.float32) / jnp.sqrt(63.0)
    params["transform_b"] = 0.01 * jax.random.normal(ks[i + 1], (1, 1), jnp.float32)
    return params


def dgcnn_cls_forward(params, x, k):
    """x: (B, N, 3) point cloud (torch input before its internal permute)."""
    B, N, _ = x.shape
    tn = _tile_n(N)

    idx = knn_indices(x, k, tn)
    x1 = edge_conv(x, idx, *params["conv1"], tn)       # (B, N, 64)
    idx = knn_indices(x1, k, tn)
    x2 = edge_conv(x1, idx, *params["conv2"], tn)      # (B, N, 64)
    idx = knn_indices(x2, k, tn)
    x3 = edge_conv(x2, idx, *params["conv3"], tn)      # (B, N, 128)
    idx = knn_indices(x3, k, tn)
    x4 = edge_conv(x3, idx, *params["conv4"], tn)      # (B, N, 256)

    w5s, shift5 = params["conv5"]
    x5 = concat_pointwise_act((x1, x2, x3, x4), w5s, shift5, tn)   # (B, N, 512)
    # multi-scale bin pooling + Linear(63 -> 1) + squeeze
    return bin_transform(x5, params["transform_w"], params["transform_b"])  # (B, 512)


if __name__ == "__main__":
    B, N, K_NN = 2, 32, 4            # N must be divisible by 32 (bin_num), like torch .view
    key = jax.random.PRNGKey(0)
    kx, kp = jax.random.split(key)
    x = jax.random.normal(kx, (B, N, 3), jnp.float32)
    params = init_params(kp)

    fwd = jax.jit(lambda p, xx: dgcnn_cls_forward(p, xx, K_NN))
    out = jax.block_until_ready(fwd(params, x))
    assert out.shape == (B, 512), out.shape
    assert jnp.all(jnp.isfinite(out))
    print("KERNEL_OK")
</pallas_src>

<mosaic_0001>
module attributes {stable_mosaic.version = 11 : i64} {
  func.func @_pdist_kernel(%arg0: i32, %arg1: i32, %arg2: memref<1x32x3xf32, #tpu.memory_space<vmem>>, %arg3: memref<1x32x3xf32, #tpu.memory_space<vmem>>, %arg4: memref<1x1x32xf32, #tpu.memory_space<vmem>>, %arg5: memref<1x32x32xf32, #tpu.memory_space<vmem>>) attributes {dimension_semantics = [#tpu.dimension_semantics<parallel>, #tpu.dimension_semantics<parallel>], iteration_bounds = array<i64: 2, 1>, scalar_prefetch = 0 : i64, scratch_operands = 0 : i64, tpu.core_type = #tpu.core_type<tc>, window_params = [{transform_indices = @transform_0, window_bounds = array<i64: 1, 32, 3>}, {transform_indices = @transform_1, window_bounds = array<i64: 1, 32, 3>}, {transform_indices = @transform_2, window_bounds = array<i64: 1, 1, 32>}, {transform_indices = @transform_3, window_bounds = array<i64: 1, 32, 32>}]} {
    %c0 = arith.constant 0 : index
    %c0_0 = arith.constant 0 : index
    %c0_1 = arith.constant 0 : index
    %0 = vector.load %arg2[%c0, %c0_0, %c0_1] : memref<1x32x3xf32, #tpu.memory_space<vmem>>, vector<1x32x3xf32>
    %1 = vector.shape_cast %0 : vector<1x32x3xf32> to vector<32x3xf32>
    %c0_2 = arith.constant 0 : index
    %c0_3 = arith.constant 0 : index
    %c0_4 = arith.constant 0 : index
    %2 = vector.load %arg3[%c0_2, %c0_3, %c0_4] : memref<1x32x3xf32, #tpu.memory_space<vmem>>, vector<1x32x3xf32>
    %3 = vector.shape_cast %2 : vector<1x32x3xf32> to vector<32x3xf32>
    %cst = arith.constant dense<0.000000e+00> : vector<32x32xf32>
    %4 = tpu.matmul %1, %3, %cst {dimension_numbers = #tpu.dot_dimension_numbers<[1], [1], [0], [0], [0, 0, 1, 0], [], []>} : vector<32x3xf32>, vector<32x3xf32>, vector<32x32xf32> -> vector<32x32xf32>
    %5 = arith.mulf %1, %1 : vector<32x3xf32>
    %cst_5 = arith.constant dense<0.000000e+00> : vector<32xf32>
    %6 = vector.multi_reduction <add>, %5, %cst_5 [1] : vector<32x3xf32> to vector<32xf32>
    %7 = vector.shape_cast %6 : vector<32xf32> to vector<32x1xf32>
    %cst_6 = arith.constant 2.000000e+00 : f32
    %8 = vector.broadcast %cst_6 : f32 to vector<32x32xf32>
    %9 = arith.mulf %8, %4 : vector<32x32xf32>
    %10 = vector.broadcast %7 : vector<32x1xf32> to vector<32x32xf32>
    %11 = arith.subf %9, %10 : vector<32x32xf32>
    %c0_7 = arith.constant 0 : index
    %c0_8 = arith.constant 0 : index
    %c0_9 = arith.constant 0 : index
    %12 = vector.load %arg4[%c0_7, %c0_8, %c0_9] : memref<1x1x32xf32, #tpu.memory_space<vmem>>, vector<1x1x32xf32>
    %13 = vector.shape_cast %12 : vector<1x1x32xf32> to vector<1x32xf32>
    %14 = vector.broadcast %13 : vector<1x32xf32> to vector<32x32xf32>
    %15 = arith.subf %11, %14 : vector<32x32xf32>
    %c0_10 = arith.constant 0 : index
    %c0_11 = arith.constant 0 : index
    %c0_12 = arith.constant 0 : index
    %16 = vector.load %arg5[%c0_10, %c0_11, %c0_12] : memref<1x32x32xf32, #tpu.memory_space<vmem>>, vector<1x32x32xf32>
    %17 = vector.shape_cast %16 : vector<1x32x32xf32> to vector<32x32xf32>
    %18 = vector.shape_cast %15 : vector<32x32xf32> to vector<1x32x32xf32>
    tpu.vector_store %arg5[%c0_10, %c0_11, %c0_12], %18 {strides = array<i32>} : memref<1x32x32xf32, #tpu.memory_space<vmem>>, vector<1x32x32xf32>,
    return
  }
  func.func @transform_0(%arg0: i32, %arg1: i32) -> (i32, i32, i32) {
    %c0_i32 = arith.constant 0 : i32
    %c0_i32_0 = arith.constant 0 : i32
    return %arg0, %arg1, %c0_i32 : i32, i32, i32
  }
  func.func @transform_1(%arg0: i32, %arg1: i32) -> (i32, i32, i32) {
    %c0_i32 = arith.constant 0 : i32
    %c0_i32_0 = arith.constant 0 : i32
    %c0_i32_1 = arith.constant 0 : i32
    return %arg0, %c0_i32, %c0_i32_0 : i32, i32, i32
  }
  func.func @transform_2(%arg0: i32, %arg1: i32) -> (i32, i32, i32) {
    %c0_i32 = arith.constant 0 : i32
    %c0_i32_0 = arith.constant 0 : i32
    %c0_i32_1 = arith.constant 0 : i32
    return %arg0, %c0_i32, %c0_i32_0 : i32, i32, i32
  }
  func.func @transform_3(%arg0: i32, %arg1: i32) -> (i32, i32, i32) {
    %c0_i32 = arith.constant 0 : i32
    %c0_i32_0 = arith.constant 0 : i32
    return %arg0, %arg1, %c0_i32 : i32, i32, i32
  }
}

module attributes {stable_mosaic.version = 11 : i64} {
  func.func @_pointwise_pair_kernel(%arg0: i32, %arg1: i32, %arg2: memref<1x32x3xf32, #tpu.memory_space<vmem>>, %arg3: memref<3x64xbf16, #tpu.memory_space<vmem>>, %arg4: memref<3x64xbf16, #tpu.memory_space<vmem>>, %arg5: memref<1x64xf32, #tpu.memory_space<vmem>>, %arg6: memref<1x32x64xf32, #tpu.memory_space<vmem>>, %arg7: memref<1x32x64xf32, #tpu.memory_space<vmem>>) attributes {dimension_semantics = [#tpu.dimension_semantics<parallel>, #tpu.dimension_semantics<parallel>], iteration_bounds = array<i64: 2, 1>, scalar_prefetch = 0 : i64, scratch_operands = 0 : i64, tpu.core_type = #tpu.core_type<tc>, window_params = [{transform_indices = @transform_0, window_bounds = array<i64: 1, 32, 3>}, {pipeline_mode = #tpu.pipeline_mode<synchronous>, transform_indices = @transform_1, window_bounds = array<i64: 3, 64>}, {pipeline_mode = #tpu.pipeline_mode<synchronous>, transform_indices = @transform_2, window_bounds = array<i64: 3, 64>}, {pipeline_mode = #tpu.pipeline_mode<synchronous>, transform_indices = @transform_3, window_bounds = array<i64: 1, 64>}, {transform_indices = @transform_4, window_bounds = array<i64: 1, 32, 64>}, {transform_indices = @transform_5, window_bounds = array<i64: 1, 32, 64>}]} {
    %c0 = arith.constant 0 : index
    %c0_0 = arith.constant 0 : index
    %c0_1 = arith.constant 0 : index
    %0 = vector.load %arg2[%c0, %c0_0, %c0_1] : memref<1x32x3xf32, #tpu.memory_space<vmem>>, vector<1x32x3xf32>
    %1 = vector.shape_cast %0 : vector<1x32x3xf32> to vector<32x3xf32>
    %2 = arith.truncf %1 : vector<32x3xf32> to vector<32x3xbf16>
    %c0_2 = arith.constant 0 : index
    %c0_3 = arith.constant 0 : index
    %3 = vector.load %arg3[%c0_2, %c0_3] : memref<3x64xbf16, #tpu.memory_space<vmem>>, vector<3x64xbf16>
    %cst = arith.constant dense<0.000000e+00> : vector<32x64xf32>
    %4 = tpu.matmul %2, %3, %cst {dimension_numbers = #tpu.dot_dimension_numbers<[1], [0], [0], [1], [0, 0, 1, 1], [], []>} : vector<32x3xbf16>, vector<3x64xbf16>, vector<32x64xf32> -> vector<32x64xf32>
    %c0_4 = arith.constant 0 : index
    %c0_5 = arith.constant 0 : index
    %c0_6 = arith.constant 0 : index
    %5 = vector.load %arg6[%c0_4, %c0_5, %c0_6] : memref<1x32x64xf32, #tpu.memory_space<vmem>>, vector<1x32x64xf32>
    %6 = vector.shape_cast %5 : vector<1x32x64xf32> to vector<32x64xf32>
    %7 = vector.shape_cast %4 : vector<32x64xf32> to vector<1x32x64xf32>
    tpu.vector_store %arg6[%c0_4, %c0_5, %c0_6], %7 {strides = array<i32>} : memref<1x32x64xf32, #tpu.memory_space<vmem>>, vector<1x32x64xf32>,
    %c0_7 = arith.constant 0 : index
    %c0_8 = arith.constant 0 : index
    %8 = vector.load %arg4[%c0_7, %c0_8] : memref<3x64xbf16, #tpu.memory_space<vmem>>, vector<3x64xbf16>
    %cst_9 = arith.constant dense<0.000000e+00> : vector<32x64xf32>
    %9 = tpu.matmul %2, %8, %cst_9 {dimension_numbers = #tpu.dot_dimension_numbers<[1], [0], [0], [1], [0, 0, 1, 1], [], []>} : vector<32x3xbf16>, vector<3x64xbf16>, vector<32x64xf32> -> vector<32x64xf32>
    %c0_10 = arith.constant 0 : index
    %c0_11 = arith.constant 0 : index
    %10 = vector.load %arg5[%c0_10, %c0_11] : memref<1x64xf32, #tpu.memory_space<vmem>>, vector<1x64xf32>
    %11 = vector.broadcast %10 : vector<1x64xf32> to vector<32x64xf32>
    %12 = arith.addf %9, %11 : vector<32x64xf32>
    %c0_12 = arith.constant 0 : index
    %c0_13 = arith.constant 0 : index
    %c0_14 = arith.constant 0 : index
    %13 = vector.load %arg7[%c0_12, %c0_13, %c0_14] : memref<1x32x64xf32, #tpu.memory_space<vmem>>, vector<1x32x64xf32>
    %14 = vector.shape_cast %13 : vector<1x32x64xf32> to vector<32x64xf32>
    %15 = vector.shape_cast %12 : vector<32x64xf32> to vector<1x32x64xf32>
    tpu.vector_store %arg7[%c0_12, %c0_13, %c0_14], %15 {strides = array<i32>} : memref<1x32x64xf32, #tpu.memory_space<vmem>>, vector<1x32x64xf32>,
    return
  }
  func.func @transform_0(%arg0: i32, %arg1: i32) -> (i32, i32, i32) {
    %c0_i32 = arith.constant 0 : i32
    %c0_i32_0 = arith.constant 0 : i32
    return %arg0, %arg1, %c0_i32 : i32, i32, i32
  }
  func.func @transform_1(%arg0: i32, %arg1: i32) -> (i32, i32) {
    %c0_i32 = arith.constant 0 : i32
    %c0_i32_0 = arith.constant 0 : i32
    %c0_i32_1 = arith.constant 0 : i32
    return %c0_i32, %c0_i32_0 : i32, i32
  }
  func.func @transform_2(%arg0: i32, %arg1: i32) -> (i32, i32) {
    %c0_i32 = arith.constant 0 : i32
    %c0_i32_0 = arith.constant 0 : i32
    %c0_i32_1 = arith.constant 0 : i32
    return %c0_i32, %c0_i32_0 : i32, i32
  }
  func.func @transform_3(%arg0: i32, %arg1: i32) -> (i32, i32) {
    %c0_i32 = arith.constant 0 : i32
    %c0_i32_0 = arith.constant 0 : i32
    %c0_i32_1 = arith.constant 0 : i32
    return %c0_i32, %c0_i32_0 : i32, i32
  }
  func.func @transform_4(%arg0: i32, %arg1: i32) -> (i32, i32, i32) {
    %c0_i32 = arith.constant 0 : i32
    %c0_i32_0 = arith.constant 0 : i32
    return %arg0, %arg1, %c0_i32 : i32, i32, i32
  }
  func.func @transform_5(%arg0: i32, %arg1: i32) -> (i32, i32, i32) {
    %c0_i32 = arith.constant 0 : i32
    %c0_i32_0 = arith.constant 0 : i32
    return %arg0, %arg1, %c0_i32 : i32, i32, i32
  }
}

module attributes {stable_mosaic.version = 11 : i64} {
  func.func @_edge_max_kernel(%arg0: i32, %arg1: i32, %arg2: memref<1x4x32x64xf32, #tpu.memory_space<vmem>>, %arg3: memref<1x32x64xf32, #tpu.memory_space<vmem>>, %arg4: memref<1x32x64xf32, #tpu.memory_space<vmem>>) attributes {dimension_semantics = [#tpu.dimension_semantics<parallel>, #tpu.dimension_semantics<parallel>], iteration_bounds = array<i64: 2, 1>, scalar_prefetch = 0 : i64, scratch_operands = 0 : i64, tpu.core_type = #tpu.core_type<tc>, window_params = [{transform_indices = @transform_0, window_bounds = array<i64: 1, 4, 32, 64>}, {transform_indices = @transform_1, window_bounds = array<i64: 1, 32, 64>}, {transform_indices = @transform_2, window_bounds = array<i64: 1, 32, 64>}]} {
    %c0 = arith.constant 0 : index
    %c0_0 = arith.constant 0 : index
    %c0_1 = arith.constant 0 : index
    %0 = vector.load %arg3[%c0, %c0_0, %c0_1] : memref<1x32x64xf32, #tpu.memory_space<vmem>>, vector<1x32x64xf32>
    %1 = vector.shape_cast %0 : vector<1x32x64xf32> to vector<32x64xf32>
    %c0_2 = arith.constant 0 : index
    %c0_3 = arith.constant 0 : index
    %c0_4 = arith.constant 0 : index
    %c0_5 = arith.constant 0 : index
    %2 = vector.load %arg2[%c0_2, %c0_3, %c0_4, %c0_5] : memref<1x4x32x64xf32, #tpu.memory_space<vmem>>, vector<1x1x32x64xf32>
    %3 = vector.shape_cast %2 : vector<1x1x32x64xf32> to vector<32x64xf32>
    %4 = arith.addf %3, %1 : vector<32x64xf32>
    %cst = arith.constant 0.000000e+00 : f32
    %5 = vector.broadcast %cst : f32 to vector<32x64xf32>
    %6 = arith.cmpf oge, %4, %5 : vector<32x64xf32>
    %cst_6 = arith.constant 2.000000e-01 : f32
    %7 = vector.broadcast %cst_6 : f32 to vector<32x64xf32>
    %8 = arith.mulf %7, %4 : vector<32x64xf32>
    %9 = arith.select %6, %4, %8 : vector<32x64xi1>, vector<32x64xf32>
    %c0_7 = arith.constant 0 : index
    %c1 = arith.constant 1 : index
    %c0_8 = arith.constant 0 : index
    %c0_9 = arith.constant 0 : index
    %10 = vector.load %arg2[%c0_7, %c1, %c0_8, %c0_9] : memref<1x4x32x64xf32, #tpu.memory_space<vmem>>, vector<1x1x32x64xf32>
    %11 = vector.shape_cast %10 : vector<1x1x32x64xf32> to vector<32x64xf32>
    %12 = arith.addf %11, %1 : vector<32x64xf32>
    %cst_10 = arith.constant 0.000000e+00 : f32
    %13 = vector.broadcast %cst_10 : f32 to vector<32x64xf32>
    %14 = arith.cmpf oge, %12, %13 : vector<32x64xf32>
    %cst_11 = arith.constant 2.000000e-01 : f32
    %15 = vector.broadcast %cst_11 : f32 to vector<32x64xf32>
    %16 = arith.mulf %15, %12 : vector<32x64xf32>
    %17 = arith.select %14, %12, %16 : vector<32x64xi1>, vector<32x64xf32>
    %18 = arith.maximumf %9, %17 : vector<32x64xf32>
    %c0_12 = arith.constant 0 : index
    %c2 = arith.constant 2 : index
    %c0_13 = arith.constant 0 : index
    %c0_14 = arith.constant 0 : index
    %19 = vector.load %arg2[%c0_12, %c2, %c0_13, %c0_14] : memref<1x4x32x64xf32, #tpu.memory_space<vmem>>, vector<1x1x32x64xf32>
    %20 = vector.shape_cast %19 : vector<1x1x32x64xf32> to vector<32x64xf32>
    %21 = arith.addf %20, %1 : vector<32x64xf32>
    %cst_15 = arith.constant 0.000000e+00 : f32
    %22 = vector.broadcast %cst_15 : f32 to vector<32x64xf32>
    %23 = arith.cmpf oge, %21, %22 : vector<32x64xf32>
    %cst_16 = arith.constant 2.000000e-01 : f32
    %24 = vector.broadcast %cst_16 : f32 to vector<32x64xf32>
    %25 = arith.mulf %24, %21 : vector<32x64xf32>
    %26 = arith.select %23, %21, %25 : vector<32x64xi1>, vector<32x64xf32>
    %27 = arith.maximumf %18, %26 : vector<32x64xf32>
    %c0_17 = arith.constant 0 : index
    %c3 = arith.constant 3 : index
    %c0_18 = arith.constant 0 : index
    %c0_19 = arith.constant 0 : index
    %28 = vector.load %arg2[%c0_17, %c3, %c0_18, %c0_19] : memref<1x4x32x64xf32, #tpu.memory_space<vmem>>, vector<1x1x32x64xf32>
    %29 = vector.shape_cast %28 : vector<1x1x32x64xf32> to vector<32x64xf32>
    %30 = arith.addf %29, %1 : vector<32x64xf32>
    %cst_20 = arith.constant 0.000000e+00 : f32
    %31 = vector.broadcast %cst_20 : f32 to vector<32x64xf32>
    %32 = arith.cmpf oge, %30, %31 : vector<32x64xf32>
    %cst_21 = arith.constant 2.000000e-01 : f32
    %33 = vector.broadcast %cst_21 : f32 to vector<32x64xf32>
    %34 = arith.mulf %33, %30 : vector<32x64xf32>
    %35 = arith.select %32, %30, %34 : vector<32x64xi1>, vector<32x64xf32>
    %36 = arith.maximumf %27, %35 : vector<32x64xf32>
    %c0_22 = arith.constant 0 : index
    %c0_23 = arith.constant 0 : index
    %c0_24 = arith.constant 0 : index
    %37 = vector.load %arg4[%c0_22, %c0_23, %c0_24] : memref<1x32x64xf32, #tpu.memory_space<vmem>>, vector<1x32x64xf32>
    %38 = vector.shape_cast %37 : vector<1x32x64xf32> to vector<32x64xf32>
    %39 = vector.shape_cast %36 : vector<32x64xf32> to vector<1x32x64xf32>
    tpu.vector_store %arg4[%c0_22, %c0_23, %c0_24], %39 {strides = array<i32>} : memref<1x32x64xf32, #tpu.memory_space<vmem>>, vector<1x32x64xf32>,
    return
  }
  func.func @transform_0(%arg0: i32, %arg1: i32) -> (i32, i32, i32, i32) {
    %c0_i32 = arith.constant 0 : i32
    %c0_i32_0 = arith.constant 0 : i32
    %c0_i32_1 = arith.constant 0 : i32
    return %arg0, %c0_i32, %arg1, %c0_i32_0 : i32, i32, i32, i32
  }
  func.func @transform_1(%arg0: i32, %arg1: i32) -> (i32, i32, i32) {
    %c0_i32 = arith.constant 0 : i32
    %c0_i32_0 = arith.constant 0 : i32
    return %arg0, %arg1, %c0_i32 : i32, i32, i32
  }
  func.func @transform_2(%arg0: i32, %arg1: i32) -> (i32, i32, i32) {
    %c0_i32 = arith.constant 0 : i32
    %c0_i32_0 = arith.constant 0 : i32
    return %arg0, %arg1, %c0_i32 : i32, i32, i32
  }
}

module attributes {stable_mosaic.version = 11 : i64} {
  func.func @_pdist_kernel(%arg0: i32, %arg1: i32, %arg2: memref<1x32x64xf32, #tpu.memory_space<vmem>>, %arg3: memref<1x32x64xf32, #tpu.memory_space<vmem>>, %arg4: memref<1x1x32xf32, #tpu.memory_space<vmem>>, %arg5: memref<1x32x32xf32, #tpu.memory_space<vmem>>) attributes {dimension_semantics = [#tpu.dimension_semantics<parallel>, #tpu.dimension_semantics<parallel>], iteration_bounds = array<i64: 2, 1>, scalar_prefetch = 0 : i64, scratch_operands = 0 : i64, tpu.core_type = #tpu.core_type<tc>, window_params = [{transform_indices = @transform_0, window_bounds = array<i64: 1, 32, 64>}, {transform_indices = @transform_1, window_bounds = array<i64: 1, 32, 64>}, {transform_indices = @transform_2, window_bounds = array<i64: 1, 1, 32>}, {transform_indices = @transform_3, window_bounds = array<i64: 1, 32, 32>}]} {
    %c0 = arith.constant 0 : index
    %c0_0 = arith.constant 0 : index
    %c0_1 = arith.constant 0 : index
    %0 = vector.load %arg2[%c0, %c0_0, %c0_1] : memref<1x32x64xf32, #tpu.memory_space<vmem>>, vector<1x32x64xf32>
    %1 = vector.shape_cast %0 : vector<1x32x64xf32> to vector<32x64xf32>
    %c0_2 = arith.constant 0 : index
    %c0_3 = arith.constant 0 : index
    %c0_4 = arith.constant 0 : index
    %2 = vector.load %arg3[%c0_2, %c0_3, %c0_4] : memref<1x32x64xf32, #tpu.memory_space<vmem>>, vector<1x32x64xf32>
    %3 = vector.shape_cast %2 : vector<1x32x64xf32> to vector<32x64xf32>
    %cst = arith.constant dense<0.000000e+00> : vector<32x32xf32>
    %4 = tpu.matmul %1, %3, %cst {dimension_numbers = #tpu.dot_dimension_numbers<[1], [1], [0], [0], [0, 0, 1, 0], [], []>} : vector<32x64xf32>, vector<32x64xf32>, vector<32x32xf32> -> vector<32x32xf32>
    %5 = arith.mulf %1, %1 : vector<32x64xf32>
    %cst_5 = arith.constant dense<0.000000e+00> : vector<32xf32>
    %6 = vector.multi_reduction <add>, %5, %cst_5 [1] : vector<32x64xf32> to vector<32xf32>
    %7 = vector.shape_cast %6 : vector<32xf32> to vector<32x1xf32>
    %cst_6 = arith.constant 2.000000e+00 : f32
    %8 = vector.broadcast %cst_6 : f32 to vector<32x32xf32>
    %9 = arith.mulf %8, %4 : vector<32x32xf32>
    %10 = vector.broadcast %7 : vector<32x1xf32> to vector<32x32xf32>
    %11 = arith.subf %9, %10 : vector<32x32xf32>
    %c0_7 = arith.constant 0 : index
    %c0_8 = arith.constant 0 : index
    %c0_9 = arith.constant 0 : index
    %12 = vector.load %arg4[%c0_7, %c0_8, %c0_9] : memref<1x1x32xf32, #tpu.memory_space<vmem>>, vector<1x1x32xf32>
    %13 = vector.shape_cast %12 : vector<1x1x32xf32> to vector<1x32xf32>
    %14 = vector.broadcast %13 : vector<1x32xf32> to vector<32x32xf32>
    %15 = arith.subf %11, %14 : vector<32x32xf32>
    %c0_10 = arith.constant 0 : index
    %c0_11 = arith.constant 0 : index
    %c0_12 = arith.constant 0 : index
    %16 = vector.load %arg5[%c0_10, %c0_11, %c0_12] : memref<1x32x32xf32, #tpu.memory_space<vmem>>, vector<1x32x32xf32>
    %17 = vector.shape_cast %16 : vector<1x32x32xf32> to vector<32x32xf32>
    %18 = vector.shape_cast %15 : vector<32x32xf32> to vector<1x32x32xf32>
    tpu.vector_store %arg5[%c0_10, %c0_11, %c0_12], %18 {strides = array<i32>} : memref<1x32x32xf32, #tpu.memory_space<vmem>>, vector<1x32x32xf32>,
    return
  }
  func.func @transform_0(%arg0: i32, %arg1: i32) -> (i32, i32, i32) {
    %c0_i32 = arith.constant 0 : i32
    %c0_i32_0 = arith.constant 0 : i32
    return %arg0, %arg1, %c0_i32 : i32, i32, i32
  }
  func.func @transform_1(%arg0: i32, %arg1: i32) -> (i32, i32, i32) {
    %c0_i32 = arith.constant 0 : i32
    %c0_i32_0 = arith.constant 0 : i32
    %c0_i32_1 = arith.constant 0 : i32
    return %arg0, %c0_i32, %c0_i32_0 : i32, i32, i32
  }
  func.func @transform_2(%arg0: i32, %arg1: i32) -> (i32, i32, i32) {
    %c0_i32 = arith.constant 0 : i32
    %c0_i32_0 = arith.constant 0 : i32
    %c0_i32_1 = arith.constant 0 : i32
    return %arg0, %c0_i32, %c0_i32_0 : i32, i32, i32
  }
  func.func @transform_3(%arg0: i32, %arg1: i32) -> (i32, i32, i32) {
    %c0_i32 = arith.constant 0 : i32
    %c0_i32_0 = arith.constant 0 : i32
    return %arg0, %arg1, %c0_i32 : i32, i32, i32
  }
}

module attributes {stable_mosaic.version = 11 : i64} {
  func.func @_pointwise_pair_kernel(%arg0: i32, %arg1: i32, %arg2: memref<1x32x64xf32, #tpu.memory_space<vmem>>, %arg3: memref<64x64xbf16, #tpu.memory_space<vmem>>, %arg4: memref<64x64xbf16, #tpu.memory_space<vmem>>, %arg5: memref<1x64xf32, #tpu.memory_space<vmem>>, %arg6: memref<1x32x64xf32, #tpu.memory_space<vmem>>, %arg7: memref<1x32x64xf32, #tpu.memory_space<vmem>>) attributes {dimension_semantics = [#tpu.dimension_semantics<parallel>, #tpu.dimension_semantics<parallel>], iteration_bounds = array<i64: 2, 1>, scalar_prefetch = 0 : i64, scratch_operands = 0 : i64, tpu.core_type = #tpu.core_type<tc>, window_params = [{transform_indices = @transform_0, window_bounds = array<i64: 1, 32, 64>}, {pipeline_mode = #tpu.pipeline_mode<synchronous>, transform_indices = @transform_1, window_bounds = array<i64: 64, 64>}, {pipeline_mode = #tpu.pipeline_mode<synchronous>, transform_indices = @transform_2, window_bounds = array<i64: 64, 64>}, {pipeline_mode = #tpu.pipeline_mode<synchronous>, transform_indices = @transform_3, window_bounds = array<i64: 1, 64>}, {transform_indices = @transform_4, window_bounds = array<i64: 1, 32, 64>}, {transform_indices = @transform_5, window_bounds = array<i64: 1, 32, 64>}]} {
    %c0 = arith.constant 0 : index
    %c0_0 = arith.constant 0 : index
    %c0_1 = arith.constant 0 : index
    %0 = vector.load %arg2[%c0, %c0_0, %c0_1] : memref<1x32x64xf32, #tpu.memory_space<vmem>>, vector<1x32x64xf32>
    %1 = vector.shape_cast %0 : vector<1x32x64xf32> to vector<32x64xf32>
    %2 = arith.truncf %1 : vector<32x64xf32> to vector<32x64xbf16>
    %c0_2 = arith.constant 0 : index
    %c0_3 = arith.constant 0 : index
    %3 = vector.load %arg3[%c0_2, %c0_3] : memref<64x64xbf16, #tpu.memory_space<vmem>>, vector<64x64xbf16>
    %cst = arith.constant dense<0.000000e+00> : vector<32x64xf32>
    %4 = tpu.matmul %2, %3, %cst {dimension_numbers = #tpu.dot_dimension_numbers<[1], [0], [0], [1], [0, 0, 1, 1], [], []>} : vector<32x64xbf16>, vector<64x64xbf16>, vector<32x64xf32> -> vector<32x64xf32>
    %c0_4 = arith.constant 0 : index
    %c0_5 = arith.constant 0 : index
    %c0_6 = arith.constant 0 : index
    %5 = vector.load %arg6[%c0_4, %c0_5, %c0_6] : memref<1x32x64xf32, #tpu.memory_space<vmem>>, vector<1x32x64xf32>
    %6 = vector.shape_cast %5 : vector<1x32x64xf32> to vector<32x64xf32>
    %7 = vector.shape_cast %4 : vector<32x64xf32> to vector<1x32x64xf32>
    tpu.vector_store %arg6[%c0_4, %c0_5, %c0_6], %7 {strides = array<i32>} : memref<1x32x64xf32, #tpu.memory_space<vmem>>, vector<1x32x64xf32>,
    %c0_7 = arith.constant 0 : index
    %c0_8 = arith.constant 0 : index
    %8 = vector.load %arg4[%c0_7, %c0_8] : memref<64x64xbf16, #tpu.memory_space<vmem>>, vector<64x64xbf16>
    %cst_9 = arith.constant dense<0.000000e+00> : vector<32x64xf32>
    %9 = tpu.matmul %2, %8, %cst_9 {dimension_numbers = #tpu.dot_dimension_numbers<[1], [0], [0], [1], [0, 0, 1, 1], [], []>} : vector<32x64xbf16>, vector<64x64xbf16>, vector<32x64xf32> -> vector<32x64xf32>
    %c0_10 = arith.constant 0 : index
    %c0_11 = arith.constant 0 : index
    %10 = vector.load %arg5[%c0_10, %c0_11] : memref<1x64xf32, #tpu.memory_space<vmem>>, vector<1x64xf32>
    %11 = vector.broadcast %10 : vector<1x64xf32> to vector<32x64xf32>
    %12 = arith.addf %9, %11 : vector<32x64xf32>
    %c0_12 = arith.constant 0 : index
    %c0_13 = arith.constant 0 : index
    %c0_14 = arith.constant 0 : index
    %13 = vector.load %arg7[%c0_12, %c0_13, %c0_14] : memref<1x32x64xf32, #tpu.memory_space<vmem>>, vector<1x32x64xf32>
    %14 = vector.shape_cast %13 : vector<1x32x64xf32> to vector<32x64xf32>
    %15 = vector.shape_cast %12 : vector<32x64xf32> to vector<1x32x64xf32>
    tpu.vector_store %arg7[%c0_12, %c0_13, %c0_14], %15 {strides = array<i32>} : memref<1x32x64xf32, #tpu.memory_space<vmem>>, vector<1x32x64xf32>,
    return
  }
  func.func @transform_0(%arg0: i32, %arg1: i32) -> (i32, i32, i32) {
    %c0_i32 = arith.constant 0 : i32
    %c0_i32_0 = arith.constant 0 : i32
    return %arg0, %arg1, %c0_i32 : i32, i32, i32
  }
  func.func @transform_1(%arg0: i32, %arg1: i32) -> (i32, i32) {
    %c0_i32 = arith.constant 0 : i32
    %c0_i32_0 = arith.constant 0 : i32
    %c0_i32_1 = arith.constant 0 : i32
    return %c0_i32, %c0_i32_0 : i32, i32
  }
  func.func @transform_2(%arg0: i32, %arg1: i32) -> (i32, i32) {
    %c0_i32 = arith.constant 0 : i32
    %c0_i32_0 = arith.constant 0 : i32
    %c0_i32_1 = arith.constant 0 : i32
    return %c0_i32, %c0_i32_0 : i32, i32
  }
  func.func @transform_3(%arg0: i32, %arg1: i32) -> (i32, i32) {
    %c0_i32 = arith.constant 0 : i32
    %c0_i32_0 = arith.constant 0 : i32
    %c0_i32_1 = arith.constant 0 : i32
    return %c0_i32, %c0_i32_0 : i32, i32
  }
  func.func @transform_4(%arg0: i32, %arg1: i32) -> (i32, i32, i32) {
    %c0_i32 = arith.constant 0 : i32
    %c0_i32_0 = arith.constant 0 : i32
    return %arg0, %arg1, %c0_i32 : i32, i32, i32
  }
  func.func @transform_5(%arg0: i32, %arg1: i32) -> (i32, i32, i32) {
    %c0_i32 = arith.constant 0 : i32
    %c0_i32_0 = arith.constant 0 : i32
    return %arg0, %arg1, %c0_i32 : i32, i32, i32
  }
}

module attributes {stable_mosaic.version = 11 : i64} {
  func.func @_pointwise_pair_kernel(%arg0: i32, %arg1: i32, %arg2: memref<1x32x64xf32, #tpu.memory_space<vmem>>, %arg3: memref<64x128xbf16, #tpu.memory_space<vmem>>, %arg4: memref<64x128xbf16, #tpu.memory_space<vmem>>, %arg5: memref<1x128xf32, #tpu.memory_space<vmem>>, %arg6: memref<1x32x128xf32, #tpu.memory_space<vmem>>, %arg7: memref<1x32x128xf32, #tpu.memory_space<vmem>>) attributes {dimension_semantics = [#tpu.dimension_semantics<parallel>, #tpu.dimension_semantics<parallel>], iteration_bounds = array<i64: 2, 1>, scalar_prefetch = 0 : i64, scratch_operands = 0 : i64, tpu.core_type = #tpu.core_type<tc>, window_params = [{transform_indices = @transform_0, window_bounds = array<i64: 1, 32, 64>}, {pipeline_mode = #tpu.pipeline_mode<synchronous>, transform_indices = @transform_1, window_bounds = array<i64: 64, 128>}, {pipeline_mode = #tpu.pipeline_mode<synchronous>, transform_indices = @transform_2, window_bounds = array<i64: 64, 128>}, {pipeline_mode = #tpu.pipeline_mode<synchronous>, transform_indices = @transform_3, window_bounds = array<i64: 1, 128>}, {transform_indices = @transform_4, window_bounds = array<i64: 1, 32, 128>}, {transform_indices = @transform_5, window_bounds = array<i64: 1, 32, 128>}]} {
    %c0 = arith.constant 0 : index
    %c0_0 = arith.constant 0 : index
    %c0_1 = arith.constant 0 : index
    %0 = vector.load %arg2[%c0, %c0_0, %c0_1] : memref<1x32x64xf32, #tpu.memory_space<vmem>>, vector<1x32x64xf32>
    %1 = vector.shape_cast %0 : vector<1x32x64xf32> to vector<32x64xf32>
    %2 = arith.truncf %1 : vector<32x64xf32> to vector<32x64xbf16>
    %c0_2 = arith.constant 0 : index
    %c0_3 = arith.constant 0 : index
    %3 = vector.load %arg3[%c0_2, %c0_3] : memref<64x128xbf16, #tpu.memory_space<vmem>>, vector<64x128xbf16>
    %cst = arith.constant dense<0.000000e+00> : vector<32x128xf32>
    %4 = tpu.matmul %2, %3, %cst {dimension_numbers = #tpu.dot_dimension_numbers<[1], [0], [0], [1], [0, 0, 1, 1], [], []>} : vector<32x64xbf16>, vector<64x128xbf16>, vector<32x128xf32> -> vector<32x128xf32>
    %c0_4 = arith.constant 0 : index
    %c0_5 = arith.constant 0 : index
    %c0_6 = arith.constant 0 : index
    %5 = vector.load %arg6[%c0_4, %c0_5, %c0_6] : memref<1x32x128xf32, #tpu.memory_space<vmem>>, vector<1x32x128xf32>
    %6 = vector.shape_cast %5 : vector<1x32x128xf32> to vector<32x128xf32>
    %7 = vector.shape_cast %4 : vector<32x128xf32> to vector<1x32x128xf32>
    tpu.vector_store %arg6[%c0_4, %c0_5, %c0_6], %7 {strides = array<i32>} : memref<1x32x128xf32, #tpu.memory_space<vmem>>, vector<1x32x128xf32>,
    %c0_7 = arith.constant 0 : index
    %c0_8 = arith.constant 0 : index
    %8 = vector.load %arg4[%c0_7, %c0_8] : memref<64x128xbf16, #tpu.memory_space<vmem>>, vector<64x128xbf16>
    %cst_9 = arith.constant dense<0.000000e+00> : vector<32x128xf32>
    %9 = tpu.matmul %2, %8, %cst_9 {dimension_numbers = #tpu.dot_dimension_numbers<[1], [0], [0], [1], [0, 0, 1, 1], [], []>} : vector<32x64xbf16>, vector<64x128xbf16>, vector<32x128xf32> -> vector<32x128xf32>
    %c0_10 = arith.constant 0 : index
    %c0_11 = arith.constant 0 : index
    %10 = vector.load %arg5[%c0_10, %c0_11] : memref<1x128xf32, #tpu.memory_space<vmem>>, vector<1x128xf32>
    %11 = vector.broadcast %10 : vector<1x128xf32> to vector<32x128xf32>
    %12 = arith.addf %9, %11 : vector<32x128xf32>
    %c0_12 = arith.constant 0 : index
    %c0_13 = arith.constant 0 : index
    %c0_14 = arith.constant 0 : index
    %13 = vector.load %arg7[%c0_12, %c0_13, %c0_14] : memref<1x32x128xf32, #tpu.memory_space<vmem>>, vector<1x32x128xf32>
    %14 = vector.shape_cast %13 : vector<1x32x128xf32> to vector<32x128xf32>
    %15 = vector.shape_cast %12 : vector<32x128xf32> to vector<1x32x128xf32>
    tpu.vector_store %arg7[%c0_12, %c0_13, %c0_14], %15 {strides = array<i32>} : memref<1x32x128xf32, #tpu.memory_space<vmem>>, vector<1x32x128xf32>,
    return
  }
  func.func @transform_0(%arg0: i32, %arg1: i32) -> (i32, i32, i32) {
    %c0_i32 = arith.constant 0 : i32
    %c0_i32_0 = arith.constant 0 : i32
    return %arg0, %arg1, %c0_i32 : i32, i32, i32
  }
  func.func @transform_1(%arg0: i32, %arg1: i32) -> (i32, i32) {
    %c0_i32 = arith.constant 0 : i32
    %c0_i32_0 = arith.constant 0 : i32
    %c0_i32_1 = arith.constant 0 : i32
    return %c0_i32, %c0_i32_0 : i32, i32
  }
  func.func @transform_2(%arg0: i32, %arg1: i32) -> (i32, i32) {
    %c0_i32 = arith.constant 0 : i32
    %c0_i32_0 = arith.constant 0 : i32
    %c0_i32_1 = arith.constant 0 : i32
    return %c0_i32, %c0_i32_0 : i32, i32
  }
  func.func @transform_3(%arg0: i32, %arg1: i32) -> (i32, i32) {
    %c0_i32 = arith.constant 0 : i32
    %c0_i32_0 = arith.constant 0 : i32
    %c0_i32_1 = arith.constant 0 : i32
    return %c0_i32, %c0_i32_0 : i32, i32
  }
  func.func @transform_4(%arg0: i32, %arg1: i32) -> (i32, i32, i32) {
    %c0_i32 = arith.constant 0 : i32
    %c0_i32_0 = arith.constant 0 : i32
    return %arg0, %arg1, %c0_i32 : i32, i32, i32
  }
  func.func @transform_5(%arg0: i32, %arg1: i32) -> (i32, i32, i32) {
    %c0_i32 = arith.constant 0 : i32
    %c0_i32_0 = arith.constant 0 : i32
    return %arg0, %arg1, %c0_i32 : i32, i32, i32
  }
}

module attributes {stable_mosaic.version = 11 : i64} {
  func.func @_edge_max_kernel(%arg0: i32, %arg1: i32, %arg2: memref<1x4x32x128xf32, #tpu.memory_space<vmem>>, %arg3: memref<1x32x128xf32, #tpu.memory_space<vmem>>, %arg4: memref<1x32x128xf32, #tpu.memory_space<vmem>>) attributes {dimension_semantics = [#tpu.dimension_semantics<parallel>, #tpu.dimension_semantics<parallel>], iteration_bounds = array<i64: 2, 1>, scalar_prefetch = 0 : i64, scratch_operands = 0 : i64, tpu.core_type = #tpu.core_type<tc>, window_params = [{transform_indices = @transform_0, window_bounds = array<i64: 1, 4, 32, 128>}, {transform_indices = @transform_1, window_bounds = array<i64: 1, 32, 128>}, {transform_indices = @transform_2, window_bounds = array<i64: 1, 32, 128>}]} {
    %c0 = arith.constant 0 : index
    %c0_0 = arith.constant 0 : index
    %c0_1 = arith.constant 0 : index
    %0 = vector.load %arg3[%c0, %c0_0, %c0_1] : memref<1x32x128xf32, #tpu.memory_space<vmem>>, vector<1x32x128xf32>
    %1 = vector.shape_cast %0 : vector<1x32x128xf32> to vector<32x128xf32>
    %c0_2 = arith.constant 0 : index
    %c0_3 = arith.constant 0 : index
    %c0_4 = arith.constant 0 : index
    %c0_5 = arith.constant 0 : index
    %2 = vector.load %arg2[%c0_2, %c0_3, %c0_4, %c0_5] : memref<1x4x32x128xf32, #tpu.memory_space<vmem>>, vector<1x1x32x128xf32>
    %3 = vector.shape_cast %2 : vector<1x1x32x128xf32> to vector<32x128xf32>
    %4 = arith.addf %3, %1 : vector<32x128xf32>
    %cst = arith.constant 0.000000e+00 : f32
    %5 = vector.broadcast %cst : f32 to vector<32x128xf32>
    %6 = arith.cmpf oge, %4, %5 : vector<32x128xf32>
    %cst_6 = arith.constant 2.000000e-01 : f32
    %7 = vector.broadcast %cst_6 : f32 to vector<32x128xf32>
    %8 = arith.mulf %7, %4 : vector<32x128xf32>
    %9 = arith.select %6, %4, %8 : vector<32x128xi1>, vector<32x128xf32>
    %c0_7 = arith.constant 0 : index
    %c1 = arith.constant 1 : index
    %c0_8 = arith.constant 0 : index
    %c0_9 = arith.constant 0 : index
    %10 = vector.load %arg2[%c0_7, %c1, %c0_8, %c0_9] : memref<1x4x32x128xf32, #tpu.memory_space<vmem>>, vector<1x1x32x128xf32>
    %11 = vector.shape_cast %10 : vector<1x1x32x128xf32> to vector<32x128xf32>
    %12 = arith.addf %11, %1 : vector<32x128xf32>
    %cst_10 = arith.constant 0.000000e+00 : f32
    %13 = vector.broadcast %cst_10 : f32 to vector<32x128xf32>
    %14 = arith.cmpf oge, %12, %13 : vector<32x128xf32>
    %cst_11 = arith.constant 2.000000e-01 : f32
    %15 = vector.broadcast %cst_11 : f32 to vector<32x128xf32>
    %16 = arith.mulf %15, %12 : vector<32x128xf32>
    %17 = arith.select %14, %12, %16 : vector<32x128xi1>, vector<32x128xf32>
    %18 = arith.maximumf %9, %17 : vector<32x128xf32>
    %c0_12 = arith.constant 0 : index
    %c2 = arith.constant 2 : index
    %c0_13 = arith.constant 0 : index
    %c0_14 = arith.constant 0 : index
    %19 = vector.load %arg2[%c0_12, %c2, %c0_13, %c0_14] : memref<1x4x32x128xf32, #tpu.memory_space<vmem>>, vector<1x1x32x128xf32>
    %20 = vector.shape_cast %19 : vector<1x1x32x128xf32> to vector<32x128xf32>
    %21 = arith.addf %20, %1 : vector<32x128xf32>
    %cst_15 = arith.constant 0.000000e+00 : f32
    %22 = vector.broadcast %cst_15 : f32 to vector<32x128xf32>
    %23 = arith.cmpf oge, %21, %22 : vector<32x128xf32>
    %cst_16 = arith.constant 2.000000e-01 : f32
    %24 = vector.broadcast %cst_16 : f32 to vector<32x128xf32>
    %25 = arith.mulf %24, %21 : vector<32x128xf32>
    %26 = arith.select %23, %21, %25 : vector<32x128xi1>, vector<32x128xf32>
    %27 = arith.maximumf %18, %26 : vector<32x128xf32>
    %c0_17 = arith.constant 0 : index
    %c3 = arith.constant 3 : index
    %c0_18 = arith.constant 0 : index
    %c0_19 = arith.constant 0 : index
    %28 = vector.load %arg2[%c0_17, %c3, %c0_18, %c0_19] : memref<1x4x32x128xf32, #tpu.memory_space<vmem>>, vector<1x1x32x128xf32>
    %29 = vector.shape_cast %28 : vector<1x1x32x128xf32> to vector<32x128xf32>
    %30 = arith.addf %29, %1 : vector<32x128xf32>
    %cst_20 = arith.constant 0.000000e+00 : f32
    %31 = vector.broadcast %cst_20 : f32 to vector<32x128xf32>
    %32 = arith.cmpf oge, %30, %31 : vector<32x128xf32>
    %cst_21 = arith.constant 2.000000e-01 : f32
    %33 = vector.broadcast %cst_21 : f32 to vector<32x128xf32>
    %34 = arith.mulf %33, %30 : vector<32x128xf32>
    %35 = arith.select %32, %30, %34 : vector<32x128xi1>, vector<32x128xf32>
    %36 = arith.maximumf %27, %35 : vector<32x128xf32>
    %c0_22 = arith.constant 0 : index
    %c0_23 = arith.constant 0 : index
    %c0_24 = arith.constant 0 : index
    %37 = vector.load %arg4[%c0_22, %c0_23, %c0_24] : memref<1x32x128xf32, #tpu.memory_space<vmem>>, vector<1x32x128xf32>
    %38 = vector.shape_cast %37 : vector<1x32x128xf32> to vector<32x128xf32>
    %39 = vector.shape_cast %36 : vector<32x128xf32> to vector<1x32x128xf32>
    tpu.vector_store %arg4[%c0_22, %c0_23, %c0_24], %39 {strides = array<i32>} : memref<1x32x128xf32, #tpu.memory_space<vmem>>, vector<1x32x128xf32>,
    return
  }
  func.func @transform_0(%arg0: i32, %arg1: i32) -> (i32, i32, i32, i32) {
    %c0_i32 = arith.constant 0 : i32
    %c0_i32_0 = arith.constant 0 : i32
    %c0_i32_1 = arith.constant 0 : i32
    return %arg0, %c0_i32, %arg1, %c0_i32_0 : i32, i32, i32, i32
  }
  func.func @transform_1(%arg0: i32, %arg1: i32) -> (i32, i32, i32) {
    %c0_i32 = arith.constant 0 : i32
    %c0_i32_0 = arith.constant 0 : i32
    return %arg0, %arg1, %c0_i32 : i32, i32, i32
  }
  func.func @transform_2(%arg0: i32, %arg1: i32) -> (i32, i32, i32) {
    %c0_i32 = arith.constant 0 : i32
    %c0_i32_0 = arith.constant 0 : i32
    return %arg0, %arg1, %c0_i32 : i32, i32, i32
  }
}

module attributes {stable_mosaic.version = 11 : i64} {
  func.func @_pdist_kernel(%arg0: i32, %arg1: i32, %arg2: memref<1x32x128xf32, #tpu.memory_space<vmem>>, %arg3: memref<1x32x128xf32, #tpu.memory_space<vmem>>, %arg4: memref<1x1x32xf32, #tpu.memory_space<vmem>>, %arg5: memref<1x32x32xf32, #tpu.memory_space<vmem>>) attributes {dimension_semantics = [#tpu.dimension_semantics<parallel>, #tpu.dimension_semantics<parallel>], iteration_bounds = array<i64: 2, 1>, scalar_prefetch = 0 : i64, scratch_operands = 0 : i64, tpu.core_type = #tpu.core_type<tc>, window_params = [{transform_indices = @transform_0, window_bounds = array<i64: 1, 32, 128>}, {transform_indices = @transform_1, window_bounds = array<i64: 1, 32, 128>}, {transform_indices = @transform_2, window_bounds = array<i64: 1, 1, 32>}, {transform_indices = @transform_3, window_bounds = array<i64: 1, 32, 32>}]} {
    %c0 = arith.constant 0 : index
    %c0_0 = arith.constant 0 : index
    %c0_1 = arith.constant 0 : index
    %0 = vector.load %arg2[%c0, %c0_0, %c0_1] : memref<1x32x128xf32, #tpu.memory_space<vmem>>, vector<1x32x128xf32>
    %1 = vector.shape_cast %0 : vector<1x32x128xf32> to vector<32x128xf32>
    %c0_2 = arith.constant 0 : index
    %c0_3 = arith.constant 0 : index
    %c0_4 = arith.constant 0 : index
    %2 = vector.load %arg3[%c0_2, %c0_3, %c0_4] : memref<1x32x128xf32, #tpu.memory_space<vmem>>, vector<1x32x128xf32>
    %3 = vector.shape_cast %2 : vector<1x32x128xf32> to vector<32x128xf32>
    %cst = arith.constant dense<0.000000e+00> : vector<32x32xf32>
    %4 = tpu.matmul %1, %3, %cst {dimension_numbers = #tpu.dot_dimension_numbers<[1], [1], [0], [0], [0, 0, 1, 0], [], []>} : vector<32x128xf32>, vector<32x128xf32>, vector<32x32xf32> -> vector<32x32xf32>
    %5 = arith.mulf %1, %1 : vector<32x128xf32>
    %cst_5 = arith.constant dense<0.000000e+00> : vector<32xf32>
    %6 = vector.multi_reduction <add>, %5, %cst_5 [1] : vector<32x128xf32> to vector<32xf32>
    %7 = vector.shape_cast %6 : vector<32xf32> to vector<32x1xf32>
    %cst_6 = arith.constant 2.000000e+00 : f32
    %8 = vector.broadcast %cst_6 : f32 to vector<32x32xf32>
    %9 = arith.mulf %8, %4 : vector<32x32xf32>
    %10 = vector.broadcast %7 : vector<32x1xf32> to vector<32x32xf32>
    %11 = arith.subf %9, %10 : vector<32x32xf32>
    %c0_7 = arith.constant 0 : index
    %c0_8 = arith.constant 0 : index
    %c0_9 = arith.constant 0 : index
    %12 = vector.load %arg4[%c0_7, %c0_8, %c0_9] : memref<1x1x32xf32, #tpu.memory_space<vmem>>, vector<1x1x32xf32>
    %13 = vector.shape_cast %12 : vector<1x1x32xf32> to vector<1x32xf32>
    %14 = vector.broadcast %13 : vector<1x32xf32> to vector<32x32xf32>
    %15 = arith.subf %11, %14 : vector<32x32xf32>
    %c0_10 = arith.constant 0 : index
    %c0_11 = arith.constant 0 : index
    %c0_12 = arith.constant 0 : index
    %16 = vector.load %arg5[%c0_10, %c0_11, %c0_12] : memref<1x32x32xf32, #tpu.memory_space<vmem>>, vector<1x32x32xf32>
    %17 = vector.shape_cast %16 : vector<1x32x32xf32> to vector<32x32xf32>
    %18 = vector.shape_cast %15 : vector<32x32xf32> to vector<1x32x32xf32>
    tpu.vector_store %arg5[%c0_10, %c0_11, %c0_12], %18 {strides = array<i32>} : memref<1x32x32xf32, #tpu.memory_space<vmem>>, vector<1x32x32xf32>,
    return
  }
  func.func @transform_0(%arg0: i32, %arg1: i32) -> (i32, i32, i32) {
    %c0_i32 = arith.constant 0 : i32
    %c0_i32_0 = arith.constant 0 : i32
    return %arg0, %arg1, %c0_i32 : i32, i32, i32
  }
  func.func @transform_1(%arg0: i32, %arg1: i32) -> (i32, i32, i32) {
    %c0_i32 = arith.constant 0 : i32
    %c0_i32_0 = arith.constant 0 : i32
    %c0_i32_1 = arith.constant 0 : i32
    return %arg0, %c0_i32, %c0_i32_0 : i32, i32, i32
  }
  func.func @transform_2(%arg0: i32, %arg1: i32) -> (i32, i32, i32) {
    %c0_i32 = arith.constant 0 : i32
    %c0_i32_0 = arith.constant 0 : i32
    %c0_i32_1 = arith.constant 0 : i32
    return %arg0, %c0_i32, %c0_i32_0 : i32, i32, i32
  }
  func.func @transform_3(%arg0: i32, %arg1: i32) -> (i32, i32, i32) {
    %c0_i32 = arith.constant 0 : i32
    %c0_i32_0 = arith.constant 0 : i32
    return %arg0, %arg1, %c0_i32 : i32, i32, i32
  }
}

module attributes {stable_mosaic.version = 11 : i64} {
  func.func @_pointwise_pair_kernel(%arg0: i32, %arg1: i32, %arg2: memref<1x32x128xf32, #tpu.memory_space<vmem>>, %arg3: memref<128x256xbf16, #tpu.memory_space<vmem>>, %arg4: memref<128x256xbf16, #tpu.memory_space<vmem>>, %arg5: memref<1x256xf32, #tpu.memory_space<vmem>>, %arg6: memref<1x32x256xf32, #tpu.memory_space<vmem>>, %arg7: memref<1x32x256xf32, #tpu.memory_space<vmem>>) attributes {dimension_semantics = [#tpu.dimension_semantics<parallel>, #tpu.dimension_semantics<parallel>], iteration_bounds = array<i64: 2, 1>, scalar_prefetch = 0 : i64, scratch_operands = 0 : i64, tpu.core_type = #tpu.core_type<tc>, window_params = [{transform_indices = @transform_0, window_bounds = array<i64: 1, 32, 128>}, {pipeline_mode = #tpu.pipeline_mode<synchronous>, transform_indices = @transform_1, window_bounds = array<i64: 128, 256>}, {pipeline_mode = #tpu.pipeline_mode<synchronous>, transform_indices = @transform_2, window_bounds = array<i64: 128, 256>}, {pipeline_mode = #tpu.pipeline_mode<synchronous>, transform_indices = @transform_3, window_bounds = array<i64: 1, 256>}, {transform_indices = @transform_4, window_bounds = array<i64: 1, 32, 256>}, {transform_indices = @transform_5, window_bounds = array<i64: 1, 32, 256>}]} {
    %c0 = arith.constant 0 : index
    %c0_0 = arith.constant 0 : index
    %c0_1 = arith.constant 0 : index
    %0 = vector.load %arg2[%c0, %c0_0, %c0_1] : memref<1x32x128xf32, #tpu.memory_space<vmem>>, vector<1x32x128xf32>
    %1 = vector.shape_cast %0 : vector<1x32x128xf32> to vector<32x128xf32>
    %2 = arith.truncf %1 : vector<32x128xf32> to vector<32x128xbf16>
    %c0_2 = arith.constant 0 : index
    %c0_3 = arith.constant 0 : index
    %3 = vector.load %arg3[%c0_2, %c0_3] : memref<128x256xbf16, #tpu.memory_space<vmem>>, vector<128x256xbf16>
    %cst = arith.constant dense<0.000000e+00> : vector<32x256xf32>
    %4 = tpu.matmul %2, %3, %cst {dimension_numbers = #tpu.dot_dimension_numbers<[1], [0], [0], [1], [0, 0, 1, 1], [], []>} : vector<32x128xbf16>, vector<128x256xbf16>, vector<32x256xf32> -> vector<32x256xf32>
    %c0_4 = arith.constant 0 : index
    %c0_5 = arith.constant 0 : index
    %c0_6 = arith.constant 0 : index
    %5 = vector.load %arg6[%c0_4, %c0_5, %c0_6] : memref<1x32x256xf32, #tpu.memory_space<vmem>>, vector<1x32x256xf32>
    %6 = vector.shape_cast %5 : vector<1x32x256xf32> to vector<32x256xf32>
    %7 = vector.shape_cast %4 : vector<32x256xf32> to vector<1x32x256xf32>
    tpu.vector_store %arg6[%c0_4, %c0_5, %c0_6], %7 {strides = array<i32>} : memref<1x32x256xf32, #tpu.memory_space<vmem>>, vector<1x32x256xf32>,
    %c0_7 = arith.constant 0 : index
    %c0_8 = arith.constant 0 : index
    %8 = vector.load %arg4[%c0_7, %c0_8] : memref<128x256xbf16, #tpu.memory_space<vmem>>, vector<128x256xbf16>
    %cst_9 = arith.constant dense<0.000000e+00> : vector<32x256xf32>
    %9 = tpu.matmul %2, %8, %cst_9 {dimension_numbers = #tpu.dot_dimension_numbers<[1], [0], [0], [1], [0, 0, 1, 1], [], []>} : vector<32x128xbf16>, vector<128x256xbf16>, vector<32x256xf32> -> vector<32x256xf32>
    %c0_10 = arith.constant 0 : index
    %c0_11 = arith.constant 0 : index
    %10 = vector.load %arg5[%c0_10, %c0_11] : memref<1x256xf32, #tpu.memory_space<vmem>>, vector<1x256xf32>
    %11 = vector.broadcast %10 : vector<1x256xf32> to vector<32x256xf32>
    %12 = arith.addf %9, %11 : vector<32x256xf32>
    %c0_12 = arith.constant 0 : index
    %c0_13 = arith.constant 0 : index
    %c0_14 = arith.constant 0 : index
    %13 = vector.load %arg7[%c0_12, %c0_13, %c0_14] : memref<1x32x256xf32, #tpu.memory_space<vmem>>, vector<1x32x256xf32>
    %14 = vector.shape_cast %13 : vector<1x32x256xf32> to vector<32x256xf32>
    %15 = vector.shape_cast %12 : vector<32x256xf32> to vector<1x32x256xf32>
    tpu.vector_store %arg7[%c0_12, %c0_13, %c0_14], %15 {strides = array<i32>} : memref<1x32x256xf32, #tpu.memory_space<vmem>>, vector<1x32x256xf32>,
    return
  }
  func.func @transform_0(%arg0: i32, %arg1: i32) -> (i32, i32, i32) {
    %c0_i32 = arith.constant 0 : i32
    %c0_i32_0 = arith.constant 0 : i32
    return %arg0, %arg1, %c0_i32 : i32, i32, i32
  }
  func.func @transform_1(%arg0: i32, %arg1: i32) -> (i32, i32) {
    %c0_i32 = arith.constant 0 : i32
    %c0_i32_0 = arith.constant 0 : i32
    %c0_i32_1 = arith.constant 0 : i32
    return %c0_i32, %c0_i32_0 : i32, i32
  }
  func.func @transform_2(%arg0: i32, %arg1: i32) -> (i32, i32) {
    %c0_i32 = arith.constant 0 : i32
    %c0_i32_0 = arith.constant 0 : i32
    %c0_i32_1 = arith.constant 0 : i32
    return %c0_i32, %c0_i32_0 : i32, i32
  }
  func.func @transform_3(%arg0: i32, %arg1: i32) -> (i32, i32) {
    %c0_i32 = arith.constant 0 : i32
    %c0_i32_0 = arith.constant 0 : i32
    %c0_i32_1 = arith.constant 0 : i32
    return %c0_i32, %c0_i32_0 : i32, i32
  }
  func.func @transform_4(%arg0: i32, %arg1: i32) -> (i32, i32, i32) {
    %c0_i32 = arith.constant 0 : i32
    %c0_i32_0 = arith.constant 0 : i32
    return %arg0, %arg1, %c0_i32 : i32, i32, i32
  }
  func.func @transform_5(%arg0: i32, %arg1: i32) -> (i32, i32, i32) {
    %c0_i32 = arith.constant 0 : i32
    %c0_i32_0 = arith.constant 0 : i32
    return %arg0, %arg1, %c0_i32 : i32, i32, i32
  }
}

module attributes {stable_mosaic.version = 11 : i64} {
  func.func @_edge_max_kernel(%arg0: i32, %arg1: i32, %arg2: memref<1x4x32x256xf32, #tpu.memory_space<vmem>>, %arg3: memref<1x32x256xf32, #tpu.memory_space<vmem>>, %arg4: memref<1x32x256xf32, #tpu.memory_space<vmem>>) attributes {dimension_semantics = [#tpu.dimension_semantics<parallel>, #tpu.dimension_semantics<parallel>], iteration_bounds = array<i64: 2, 1>, scalar_prefetch = 0 : i64, scratch_operands = 0 : i64, tpu.core_type = #tpu.core_type<tc>, window_params = [{transform_indices = @transform_0, window_bounds = array<i64: 1, 4, 32, 256>}, {transform_indices = @transform_1, window_bounds = array<i64: 1, 32, 256>}, {transform_indices = @transform_2, window_bounds = array<i64: 1, 32, 256>}]} {
    %c0 = arith.constant 0 : index
    %c0_0 = arith.constant 0 : index
    %c0_1 = arith.constant 0 : index
    %0 = vector.load %arg3[%c0, %c0_0, %c0_1] : memref<1x32x256xf32, #tpu.memory_space<vmem>>, vector<1x32x256xf32>
    %1 = vector.shape_cast %0 : vector<1x32x256xf32> to vector<32x256xf32>
    %c0_2 = arith.constant 0 : index
    %c0_3 = arith.constant 0 : index
    %c0_4 = arith.constant 0 : index
    %c0_5 = arith.constant 0 : index
    %2 = vector.load %arg2[%c0_2, %c0_3, %c0_4, %c0_5] : memref<1x4x32x256xf32, #tpu.memory_space<vmem>>, vector<1x1x32x256xf32>
    %3 = vector.shape_cast %2 : vector<1x1x32x256xf32> to vector<32x256xf32>
    %4 = arith.addf %3, %1 : vector<32x256xf32>
    %cst = arith.constant 0.000000e+00 : f32
    %5 = vector.broadcast %cst : f32 to vector<32x256xf32>
    %6 = arith.cmpf oge, %4, %5 : vector<32x256xf32>
    %cst_6 = arith.constant 2.000000e-01 : f32
    %7 = vector.broadcast %cst_6 : f32 to vector<32x256xf32>
    %8 = arith.mulf %7, %4 : vector<32x256xf32>
    %9 = arith.select %6, %4, %8 : vector<32x256xi1>, vector<32x256xf32>
    %c0_7 = arith.constant 0 : index
    %c1 = arith.constant 1 : index
    %c0_8 = arith.constant 0 : index
    %c0_9 = arith.constant 0 : index
    %10 = vector.load %arg2[%c0_7, %c1, %c0_8, %c0_9] : memref<1x4x32x256xf32, #tpu.memory_space<vmem>>, vector<1x1x32x256xf32>
    %11 = vector.shape_cast %10 : vector<1x1x32x256xf32> to vector<32x256xf32>
    %12 = arith.addf %11, %1 : vector<32x256xf32>
    %cst_10 = arith.constant 0.000000e+00 : f32
    %13 = vector.broadcast %cst_10 : f32 to vector<32x256xf32>
    %14 = arith.cmpf oge, %12, %13 : vector<32x256xf32>
    %cst_11 = arith.constant 2.000000e-01 : f32
    %15 = vector.broadcast %cst_11 : f32 to vector<32x256xf32>
    %16 = arith.mulf %15, %12 : vector<32x256xf32>
    %17 = arith.select %14, %12, %16 : vector<32x256xi1>, vector<32x256xf32>
    %18 = arith.maximumf %9, %17 : vector<32x256xf32>
    %c0_12 = arith.constant 0 : index
    %c2 = arith.constant 2 : index
    %c0_13 = arith.constant 0 : index
    %c0_14 = arith.constant 0 : index
    %19 = vector.load %arg2[%c0_12, %c2, %c0_13, %c0_14] : memref<1x4x32x256xf32, #tpu.memory_space<vmem>>, vector<1x1x32x256xf32>
    %20 = vector.shape_cast %19 : vector<1x1x32x256xf32> to vector<32x256xf32>
    %21 = arith.addf %20, %1 : vector<32x256xf32>
    %cst_15 = arith.constant 0.000000e+00 : f32
    %22 = vector.broadcast %cst_15 : f32 to vector<32x256xf32>
    %23 = arith.cmpf oge, %21, %22 : vector<32x256xf32>
    %cst_16 = arith.constant 2.000000e-01 : f32
    %24 = vector.broadcast %cst_16 : f32 to vector<32x256xf32>
    %25 = arith.mulf %24, %21 : vector<32x256xf32>
    %26 = arith.select %23, %21, %25 : vector<32x256xi1>, vector<32x256xf32>
    %27 = arith.maximumf %18, %26 : vector<32x256xf32>
    %c0_17 = arith.constant 0 : index
    %c3 = arith.constant 3 : index
    %c0_18 = arith.constant 0 : index
    %c0_19 = arith.constant 0 : index
    %28 = vector.load %arg2[%c0_17, %c3, %c0_18, %c0_19] : memref<1x4x32x256xf32, #tpu.memory_space<vmem>>, vector<1x1x32x256xf32>
    %29 = vector.shape_cast %28 : vector<1x1x32x256xf32> to vector<32x256xf32>
    %30 = arith.addf %29, %1 : vector<32x256xf32>
    %cst_20 = arith.constant 0.000000e+00 : f32
    %31 = vector.broadcast %cst_20 : f32 to vector<32x256xf32>
    %32 = arith.cmpf oge, %30, %31 : vector<32x256xf32>
    %cst_21 = arith.constant 2.000000e-01 : f32
    %33 = vector.broadcast %cst_21 : f32 to vector<32x256xf32>
    %34 = arith.mulf %33, %30 : vector<32x256xf32>
    %35 = arith.select %32, %30, %34 : vector<32x256xi1>, vector<32x256xf32>
    %36 = arith.maximumf %27, %35 : vector<32x256xf32>
    %c0_22 = arith.constant 0 : index
    %c0_23 = arith.constant 0 : index
    %c0_24 = arith.constant 0 : index
    %37 = vector.load %arg4[%c0_22, %c0_23, %c0_24] : memref<1x32x256xf32, #tpu.memory_space<vmem>>, vector<1x32x256xf32>
    %38 = vector.shape_cast %37 : vector<1x32x256xf32> to vector<32x256xf32>
    %39 = vector.shape_cast %36 : vector<32x256xf32> to vector<1x32x256xf32>
    tpu.vector_store %arg4[%c0_22, %c0_23, %c0_24], %39 {strides = array<i32>} : memref<1x32x256xf32, #tpu.memory_space<vmem>>, vector<1x32x256xf32>,
    return
  }
  func.func @transform_0(%arg0: i32, %arg1: i32) -> (i32, i32, i32, i32) {
    %c0_i32 = arith.constant 0 : i32
    %c0_i32_0 = arith.constant 0 : i32
    %c0_i32_1 = arith.constant 0 : i32
    return %arg0, %c0_i32, %arg1, %c0_i32_0 : i32, i32, i32, i32
  }
  func.func @transform_1(%arg0: i32, %arg1: i32) -> (i32, i32, i32) {
    %c0_i32 = arith.constant 0 : i32
    %c0_i32_0 = arith.constant 0 : i32
    return %arg0, %arg1, %c0_i32 : i32, i32, i32
  }
  func.func @transform_2(%arg0: i32, %arg1: i32) -> (i32, i32, i32) {
    %c0_i32 = arith.constant 0 : i32
    %c0_i32_0 = arith.constant 0 : i32
    return %arg0, %arg1, %c0_i32 : i32, i32, i32
  }
}

module attributes {stable_mosaic.version = 11 : i64} {
  func.func @_concat_pointwise_act_kernel(%arg0: i32, %arg1: i32, %arg2: memref<1x32x64xf32, #tpu.memory_space<vmem>>, %arg3: memref<1x32x64xf32, #tpu.memory_space<vmem>>, %arg4: memref<1x32x128xf32, #tpu.memory_space<vmem>>, %arg5: memref<1x32x256xf32, #tpu.memory_space<vmem>>, %arg6: memref<64x512xbf16, #tpu.memory_space<vmem>>, %arg7: memref<64x512xbf16, #tpu.memory_space<vmem>>, %arg8: memref<128x512xbf16, #tpu.memory_space<vmem>>, %arg9: memref<256x512xbf16, #tpu.memory_space<vmem>>, %arg10: memref<1x512xf32, #tpu.memory_space<vmem>>, %arg11: memref<1x32x512xf32, #tpu.memory_space<vmem>>) attributes {dimension_semantics = [#tpu.dimension_semantics<parallel>, #tpu.dimension_semantics<parallel>], iteration_bounds = array<i64: 2, 1>, scalar_prefetch = 0 : i64, scratch_operands = 0 : i64, tpu.core_type = #tpu.core_type<tc>, window_params = [{transform_indices = @transform_0, window_bounds = array<i64: 1, 32, 64>}, {transform_indices = @transform_1, window_bounds = array<i64: 1, 32, 64>}, {transform_indices = @transform_2, window_bounds = array<i64: 1, 32, 128>}, {transform_indices = @transform_3, window_bounds = array<i64: 1, 32, 256>}, {pipeline_mode = #tpu.pipeline_mode<synchronous>, transform_indices = @transform_4, window_bounds = array<i64: 64, 512>}, {pipeline_mode = #tpu.pipeline_mode<synchronous>, transform_indices = @transform_5, window_bounds = array<i64: 64, 512>}, {pipeline_mode = #tpu.pipeline_mode<synchronous>, transform_indices = @transform_6, window_bounds = array<i64: 128, 512>}, {pipeline_mode = #tpu.pipeline_mode<synchronous>, transform_indices = @transform_7, window_bounds = array<i64: 256, 512>}, {pipeline_mode = #tpu.pipeline_mode<synchronous>, transform_indices = @transform_8, window_bounds = array<i64: 1, 512>}, {transform_indices = @transform_9, window_bounds = array<i64: 1, 32, 512>}]} {
    %c0 = arith.constant 0 : index
    %c0_0 = arith.constant 0 : index
    %c0_1 = arith.constant 0 : index
    %0 = vector.load %arg2[%c0, %c0_0, %c0_1] : memref<1x32x64xf32, #tpu.memory_space<vmem>>, vector<1x32x64xf32>
    %1 = vector.shape_cast %0 : vector<1x32x64xf32> to vector<32x64xf32>
    %2 = arith.truncf %1 : vector<32x64xf32> to vector<32x64xbf16>
    %c0_2 = arith.constant 0 : index
    %c0_3 = arith.constant 0 : index
    %3 = vector.load %arg6[%c0_2, %c0_3] : memref<64x512xbf16, #tpu.memory_space<vmem>>, vector<64x512xbf16>
    %cst = arith.constant dense<0.000000e+00> : vector<32x512xf32>
    %4 = tpu.matmul %2, %3, %cst {dimension_numbers = #tpu.dot_dimension_numbers<[1], [0], [0], [1], [0, 0, 1, 1], [], []>} : vector<32x64xbf16>, vector<64x512xbf16>, vector<32x512xf32> -> vector<32x512xf32>
    %c0_4 = arith.constant 0 : index
    %c0_5 = arith.constant 0 : index
    %c0_6 = arith.constant 0 : index
    %5 = vector.load %arg3[%c0_4, %c0_5, %c0_6] : memref<1x32x64xf32, #tpu.memory_space<vmem>>, vector<1x32x64xf32>
    %6 = vector.shape_cast %5 : vector<1x32x64xf32> to vector<32x64xf32>
    %7 = arith.truncf %6 : vector<32x64xf32> to vector<32x64xbf16>
    %c0_7 = arith.constant 0 : index
    %c0_8 = arith.constant 0 : index
    %8 = vector.load %arg7[%c0_7, %c0_8] : memref<64x512xbf16, #tpu.memory_space<vmem>>, vector<64x512xbf16>
    %cst_9 = arith.constant dense<0.000000e+00> : vector<32x512xf32>
    %9 = tpu.matmul %7, %8, %cst_9 {dimension_numbers = #tpu.dot_dimension_numbers<[1], [0], [0], [1], [0, 0, 1, 1], [], []>} : vector<32x64xbf16>, vector<64x512xbf16>, vector<32x512xf32> -> vector<32x512xf32>
    %10 = arith.addf %4, %9 : vector<32x512xf32>
    %c0_10 = arith.constant 0 : index
    %c0_11 = arith.constant 0 : index
    %c0_12 = arith.constant 0 : index
    %11 = vector.load %arg4[%c0_10, %c0_11, %c0_12] : memref<1x32x128xf32, #tpu.memory_space<vmem>>, vector<1x32x128xf32>
    %12 = vector.shape_cast %11 : vector<1x32x128xf32> to vector<32x128xf32>
    %13 = arith.truncf %12 : vector<32x128xf32> to vector<32x128xbf16>
    %c0_13 = arith.constant 0 : index
    %c0_14 = arith.constant 0 : index
    %14 = vector.load %arg8[%c0_13, %c0_14] : memref<128x512xbf16, #tpu.memory_space<vmem>>, vector<128x512xbf16>
    %cst_15 = arith.constant dense<0.000000e+00> : vector<32x512xf32>
    %15 = tpu.matmul %13, %14, %cst_15 {dimension_numbers = #tpu.dot_dimension_numbers<[1], [0], [0], [1], [0, 0, 1, 1], [], []>} : vector<32x128xbf16>, vector<128x512xbf16>, vector<32x512xf32> -> vector<32x512xf32>
    %16 = arith.addf %10, %15 : vector<32x512xf32>
    %c0_16 = arith.constant 0 : index
    %c0_17 = arith.constant 0 : index
    %c0_18 = arith.constant 0 : index
    %17 = vector.load %arg5[%c0_16, %c0_17, %c0_18] : memref<1x32x256xf32, #tpu.memory_space<vmem>>, vector<1x32x256xf32>
    %18 = vector.shape_cast %17 : vector<1x32x256xf32> to vector<32x256xf32>
    %19 = arith.truncf %18 : vector<32x256xf32> to vector<32x256xbf16>
    %c0_19 = arith.constant 0 : index
    %c0_20 = arith.constant 0 : index
    %20 = vector.load %arg9[%c0_19, %c0_20] : memref<256x512xbf16, #tpu.memory_space<vmem>>, vector<256x512xbf16>
    %cst_21 = arith.constant dense<0.000000e+00> : vector<32x512xf32>
    %21 = tpu.matmul %19, %20, %cst_21 {dimension_numbers = #tpu.dot_dimension_numbers<[1], [0], [0], [1], [0, 0, 1, 1], [], []>} : vector<32x256xbf16>, vector<256x512xbf16>, vector<32x512xf32> -> vector<32x512xf32>
    %22 = arith.addf %16, %21 : vector<32x512xf32>
    %c0_22 = arith.constant 0 : index
    %c0_23 = arith.constant 0 : index
    %23 = vector.load %arg10[%c0_22, %c0_23] : memref<1x512xf32, #tpu.memory_space<vmem>>, vector<1x512xf32>
    %24 = vector.broadcast %23 : vector<1x512xf32> to vector<32x512xf32>
    %25 = arith.addf %22, %24 : vector<32x512xf32>
    %cst_24 = arith.constant 0.000000e+00 : f32
    %26 = vector.broadcast %cst_24 : f32 to vector<32x512xf32>
    %27 = arith.cmpf oge, %25, %26 : vector<32x512xf32>
    %cst_25 = arith.constant 2.000000e-01 : f32
    %28 = vector.broadcast %cst_25 : f32 to vector<32x512xf32>
    %29 = arith.mulf %28, %25 : vector<32x512xf32>
    %30 = arith.select %27, %25, %29 : vector<32x512xi1>, vector<32x512xf32>
    %c0_26 = arith.constant 0 : index
    %c0_27 = arith.constant 0 : index
    %c0_28 = arith.constant 0 : index
    %31 = vector.load %arg11[%c0_26, %c0_27, %c0_28] : memref<1x32x512xf32, #tpu.memory_space<vmem>>, vector<1x32x512xf32>
    %32 = vector.shape_cast %31 : vector<1x32x512xf32> to vector<32x512xf32>
    %33 = vector.shape_cast %30 : vector<32x512xf32> to vector<1x32x512xf32>
    tpu.vector_store %arg11[%c0_26, %c0_27, %c0_28], %33 {strides = array<i32>} : memref<1x32x512xf32, #tpu.memory_space<vmem>>, vector<1x32x512xf32>,
    return
  }
  func.func @transform_0(%arg0: i32, %arg1: i32) -> (i32, i32, i32) {
    %c0_i32 = arith.constant 0 : i32
    %c0_i32_0 = arith.constant 0 : i32
    return %arg0, %arg1, %c0_i32 : i32, i32, i32
  }
  func.func @transform_1(%arg0: i32, %arg1: i32) -> (i32, i32, i32) {
    %c0_i32 = arith.constant 0 : i32
    %c0_i32_0 = arith.constant 0 : i32
    return %arg0, %arg1, %c0_i32 : i32, i32, i32
  }
  func.func @transform_2(%arg0: i32, %arg1: i32) -> (i32, i32, i32) {
    %c0_i32 = arith.constant 0 : i32
    %c0_i32_0 = arith.constant 0 : i32
    return %arg0, %arg1, %c0_i32 : i32, i32, i32
  }
  func.func @transform_3(%arg0: i32, %arg1: i32) -> (i32, i32, i32) {
    %c0_i32 = arith.constant 0 : i32
    %c0_i32_0 = arith.constant 0 : i32
    return %arg0, %arg1, %c0_i32 : i32, i32, i32
  }
  func.func @transform_4(%arg0: i32, %arg1: i32) -> (i32, i32) {
    %c0_i32 = arith.constant 0 : i32
    %c0_i32_0 = arith.constant 0 : i32
    %c0_i32_1 = arith.constant 0 : i32
    return %c0_i32, %c0_i32_0 : i32, i32
  }
  func.func @transform_5(%arg0: i32, %arg1: i32) -> (i32, i32) {
    %c0_i32 = arith.constant 0 : i32
    %c0_i32_0 = arith.constant 0 : i32
    %c0_i32_1 = arith.constant 0 : i32
    return %c0_i32, %c0_i32_0 : i32, i32
  }
  func.func @transform_6(%arg0: i32, %arg1: i32) -> (i32, i32) {
    %c0_i32 = arith.constant 0 : i32
    %c0_i32_0 = arith.constant 0 : i32
    %c0_i32_1 = arith.constant 0 : i32
    return %c0_i32, %c0_i32_0 : i32, i32
  }
  func.func @transform_7(%arg0: i32, %arg1: i32) -> (i32, i32) {
    %c0_i32 = arith.constant 0 : i32
    %c0_i32_0 = arith.constant 0 : i32
    %c0_i32_1 = arith.constant 0 : i32
    return %c0_i32, %c0_i32_0 : i32, i32
  }
  func.func @transform_8(%arg0: i32, %arg1: i32) -> (i32, i32) {
    %c0_i32 = arith.constant 0 : i32
    %c0_i32_0 = arith.constant 0 : i32
    %c0_i32_1 = arith.constant 0 : i32
    return %c0_i32, %c0_i32_0 : i32, i32
  }
  func.func @transform_9(%arg0: i32, %arg1: i32) -> (i32, i32, i32) {
    %c0_i32 = arith.constant 0 : i32
    %c0_i32_0 = arith.constant 0 : i32
    return %arg0, %arg1, %c0_i32 : i32, i32, i32
  }
}

module attributes {stable_mosaic.version = 11 : i64} {
  func.func @_bin_transform_kernel(%arg0: i32, %arg1: memref<1x32x512xf32, #tpu.memory_space<vmem>>, %arg2: memref<63x1xf32, #tpu.memory_space<vmem>>, %arg3: memref<1x1xf32, #tpu.memory_space<vmem>>, %arg4: memref<1x1x512xf32, #tpu.memory_space<vmem>>) attributes {dimension_semantics = [#tpu.dimension_semantics<parallel>], iteration_bounds = array<i64: 2>, scalar_prefetch = 0 : i64, scratch_operands = 0 : i64, tpu.core_type = #tpu.core_type<tc>, window_params = [{transform_indices = @transform_0, window_bounds = array<i64: 1, 32, 512>}, {pipeline_mode = #tpu.pipeline_mode<synchronous>, transform_indices = @transform_1, window_bounds = array<i64: 63, 1>}, {pipeline_mode = #tpu.pipeline_mode<synchronous>, transform_indices = @transform_2, window_bounds = array<i64: 1, 1>}, {transform_indices = @transform_3, window_bounds = array<i64: 1, 1, 512>}]} {
    %c0 = arith.constant 0 : index
    %c0_0 = arith.constant 0 : index
    %c0_1 = arith.constant 0 : index
    %0 = vector.load %arg1[%c0, %c0_0, %c0_1] : memref<1x32x512xf32, #tpu.memory_space<vmem>>, vector<1x32x512xf32>
    %1 = vector.shape_cast %0 : vector<1x32x512xf32> to vector<32x512xf32>
    %c0_2 = arith.constant 0 : index
    %c0_3 = arith.constant 0 : index
    %2 = vector.load %arg2[%c0_2, %c0_3] : memref<63x1xf32, #tpu.memory_space<vmem>>, vector<63x1xf32>
    %cst = arith.constant 0.000000e+00 : f32
    %3 = vector.broadcast %cst : f32 to vector<1x512xf32>
    %c0_4 = arith.constant 0 : index
    %c0_5 = arith.constant 0 : index
    %4 = vector.load %arg3[%c0_4, %c0_5] : memref<1x1xf32, #tpu.memory_space<vmem>>, vector<1x1xf32>
    %5 = vector.broadcast %4 : vector<1x1xf32> to vector<1x512xf32>
    %6 = arith.addf %3, %5 : vector<1x512xf32>
    %7 = vector.shape_cast %1 : vector<32x512xf32> to vector<1x32x512xf32>
    %cst_6 = arith.constant dense<0xFF800000> : vector<1x512xf32>
    %8 = vector.multi_reduction <maximumf>, %7, %cst_6 [1] : vector<1x32x512xf32> to vector<1x512xf32>
    %cst_7 = arith.constant dense<0.000000e+00> : vector<1x512xf32>
    %9 = vector.multi_reduction <add>, %7, %cst_7 [1] : vector<1x32x512xf32> to vector<1x512xf32>
    %cst_8 = arith.constant 3.200000e+01 : f32
    %10 = vector.broadcast %cst_8 : f32 to vector<1x512xf32>
    %11 = arith.divf %9, %10 : vector<1x512xf32>
    %12 = arith.addf %8, %11 : vector<1x512xf32>
    %13 = vector.extract_strided_slice %2 {offsets = [0, 0], sizes = [1, 1], strides = [1, 1]} : vector<63x1xf32> to vector<1x1xf32>
    %14 = vector.broadcast %13 : vector<1x1xf32> to vector<1x512xf32>
    %15 = arith.mulf %12, %14 : vector<1x512xf32>
    %cst_9 = arith.constant dense<0.000000e+00> : vector<512xf32>
    %16 = vector.multi_reduction <add>, %15, %cst_9 [0] : vector<1x512xf32> to vector<512xf32>
    %17 = vector.shape_cast %16 : vector<512xf32> to vector<1x512xf32>
    %18 = arith.addf %6, %17 : vector<1x512xf32>
    %19 = vector.shape_cast %1 : vector<32x512xf32> to vector<2x16x512xf32>
    %cst_10 = arith.constant dense<0xFF800000> : vector<2x512xf32>
    %20 = vector.multi_reduction <maximumf>, %19, %cst_10 [1] : vector<2x16x512xf32> to vector<2x512xf32>
    %cst_11 = arith.constant dense<0.000000e+00> : vector<2x512xf32>
    %21 = vector.multi_reduction <add>, %19, %cst_11 [1] : vector<2x16x512xf32> to vector<2x512xf32>
    %cst_12 = arith.constant 1.600000e+01 : f32
    %22 = vector.broadcast %cst_12 : f32 to vector<2x512xf32>
    %23 = arith.divf %21, %22 : vector<2x512xf32>
    %24 = arith.addf %20, %23 : vector<2x512xf32>
    %25 = vector.extract_strided_slice %2 {offsets = [1, 0], sizes = [2, 1], strides = [1, 1]} : vector<63x1xf32> to vector<2x1xf32>
    %26 = vector.broadcast %25 : vector<2x1xf32> to vector<2x512xf32>
    %27 = arith.mulf %24, %26 : vector<2x512xf32>
    %cst_13 = arith.constant dense<0.000000e+00> : vector<512xf32>
    %28 = vector.multi_reduction <add>, %27, %cst_13 [0] : vector<2x512xf32> to vector<512xf32>
    %29 = vector.shape_cast %28 : vector<512xf32> to vector<1x512xf32>
    %30 = arith.addf %18, %29 : vector<1x512xf32>
    %31 = vector.shape_cast %1 : vector<32x512xf32> to vector<4x8x512xf32>
    %cst_14 = arith.constant dense<0xFF800000> : vector<4x512xf32>
    %32 = vector.multi_reduction <maximumf>, %31, %cst_14 [1] : vector<4x8x512xf32> to vector<4x512xf32>
    %cst_15 = arith.constant dense<0.000000e+00> : vector<4x512xf32>
    %33 = vector.multi_reduction <add>, %31, %cst_15 [1] : vector<4x8x512xf32> to vector<4x512xf32>
    %cst_16 = arith.constant 8.000000e+00 : f32
    %34 = vector.broadcast %cst_16 : f32 to vector<4x512xf32>
    %35 = arith.divf %33, %34 : vector<4x512xf32>
    %36 = arith.addf %32, %35 : vector<4x512xf32>
    %37 = vector.extract_strided_slice %2 {offsets = [3, 0], sizes = [4, 1], strides = [1, 1]} : vector<63x1xf32> to vector<4x1xf32>
    %38 = vector.broadcast %37 : vector<4x1xf32> to vector<4x512xf32>
    %39 = arith.mulf %36, %38 : vector<4x512xf32>
    %cst_17 = arith.constant dense<0.000000e+00> : vector<512xf32>
    %40 = vector.multi_reduction <add>, %39, %cst_17 [0] : vector<4x512xf32> to vector<512xf32>
    %41 = vector.shape_cast %40 : vector<512xf32> to vector<1x512xf32>
    %42 = arith.addf %30, %41 : vector<1x512xf32>
    %43 = vector.shape_cast %1 : vector<32x512xf32> to vector<8x4x512xf32>
    %cst_18 = arith.constant dense<0xFF800000> : vector<8x512xf32>
    %44 = vector.multi_reduction <maximumf>, %43, %cst_18 [1] : vector<8x4x512xf32> to vector<8x512xf32>
    %cst_19 = arith.constant dense<0.000000e+00> : vector<8x512xf32>
    %45 = vector.multi_reduction <add>, %43, %cst_19 [1] : vector<8x4x512xf32> to vector<8x512xf32>
    %cst_20 = arith.constant 4.000000e+00 : f32
    %46 = vector.broadcast %cst_20 : f32 to vector<8x512xf32>
    %47 = arith.divf %45, %46 : vector<8x512xf32>
    %48 = arith.addf %44, %47 : vector<8x512xf32>
    %49 = vector.extract_strided_slice %2 {offsets = [7, 0], sizes = [8, 1], strides = [1, 1]} : vector<63x1xf32> to vector<8x1xf32>
    %50 = vector.broadcast %49 : vector<8x1xf32> to vector<8x512xf32>
    %51 = arith.mulf %48, %50 : vector<8x512xf32>
    %cst_21 = arith.constant dense<0.000000e+00> : vector<512xf32>
    %52 = vector.multi_reduction <add>, %51, %cst_21 [0] : vector<8x512xf32> to vector<512xf32>
    %53 = vector.shape_cast %52 : vector<512xf32> to vector<1x512xf32>
    %54 = arith.addf %42, %53 : vector<1x512xf32>
    %55 = vector.shape_cast %1 : vector<32x512xf32> to vector<16x2x512xf32>
    %cst_22 = arith.constant dense<0xFF800000> : vector<16x512xf32>
    %56 = vector.multi_reduction <maximumf>, %55, %cst_22 [1] : vector<16x2x512xf32> to vector<16x512xf32>
    %cst_23 = arith.constant dense<0.000000e+00> : vector<16x512xf32>
    %57 = vector.multi_reduction <add>, %55, %cst_23 [1] : vector<16x2x512xf32> to vector<16x512xf32>
    %cst_24 = arith.constant 2.000000e+00 : f32
    %58 = vector.broadcast %cst_24 : f32 to vector<16x512xf32>
    %59 = arith.divf %57, %58 : vector<16x512xf32>
    %60 = arith.addf %56, %59 : vector<16x512xf32>
    %61 = vector.extract_strided_slice %2 {offsets = [15, 0], sizes = [16, 1], strides = [1, 1]} : vector<63x1xf32> to vector<16x1xf32>
    %62 = vector.broadcast %61 : vector<16x1xf32> to vector<16x512xf32>
    %63 = arith.mulf %60, %62 : vector<16x512xf32>
    %cst_25 = arith.constant dense<0.000000e+00> : vector<512xf32>
    %64 = vector.multi_reduction <add>, %63, %cst_25 [0] : vector<16x512xf32> to vector<512xf32>
    %65 = vector.shape_cast %64 : vector<512xf32> to vector<1x512xf32>
    %66 = arith.addf %54, %65 : vector<1x512xf32>
    %67 = vector.shape_cast %1 : vector<32x512xf32> to vector<32x1x512xf32>
    %cst_26 = arith.constant dense<0xFF800000> : vector<32x512xf32>
    %68 = vector.multi_reduction <maximumf>, %67, %cst_26 [1] : vector<32x1x512xf32> to vector<32x512xf32>
    %cst_27 = arith.constant dense<0.000000e+00> : vector<32x512xf32>
    %69 = vector.multi_reduction <add>, %67, %cst_27 [1] : vector<32x1x512xf32> to vector<32x512xf32>
    %cst_28 = arith.constant 1.000000e+00 : f32
    %70 = vector.broadcast %cst_28 : f32 to vector<32x512xf32>
    %71 = arith.divf %69, %70 : vector<32x512xf32>
    %72 = arith.addf %68, %71 : vector<32x512xf32>
    %73 = vector.extract_strided_slice %2 {offsets = [31, 0], sizes = [32, 1], strides = [1, 1]} : vector<63x1xf32> to vector<32x1xf32>
    %74 = vector.broadcast %73 : vector<32x1xf32> to vector<32x512xf32>
    %75 = arith.mulf %72, %74 : vector<32x512xf32>
    %cst_29 = arith.constant dense<0.000000e+00> : vector<512xf32>
    %76 = vector.multi_reduction <add>, %75, %cst_29 [0] : vector<32x512xf32> to vector<512xf32>
    %77 = vector.shape_cast %76 : vector<512xf32> to vector<1x512xf32>
    %78 = arith.addf %66, %77 : vector<1x512xf32>
    %c0_30 = arith.constant 0 : index
    %c0_31 = arith.constant 0 : index
    %c0_32 = arith.constant 0 : index
    %79 = vector.load %arg4[%c0_30, %c0_31, %c0_32] : memref<1x1x512xf32, #tpu.memory_space<vmem>>, vector<1x1x512xf32>
    %80 = vector.shape_cast %79 : vector<1x1x512xf32> to vector<1x512xf32>
    %81 = vector.shape_cast %78 : vector<1x512xf32> to vector<1x1x512xf32>
    tpu.vector_store %arg4[%c0_30, %c0_31, %c0_32], %81 {strides = array<i32>} : memref<1x1x512xf32, #tpu.memory_space<vmem>>, vector<1x1x512xf32>,
    return
  }
  func.func @transform_0(%arg0: i32) -> (i32, i32, i32) {
    %c0_i32 = arith.constant 0 : i32
    %c0_i32_0 = arith.constant 0 : i32
    %c0_i32_1 = arith.constant 0 : i32
    return %arg0, %c0_i32, %c0_i32_0 : i32, i32, i32
  }
  func.func @transform_1(%arg0: i32) -> (i32, i32) {
    %c0_i32 = arith.constant 0 : i32
    %c0_i32_0 = arith.constant 0 : i32
    %c0_i32_1 = arith.constant 0 : i32
    return %c0_i32, %c0_i32_0 : i32, i32
  }
  func.func @transform_2(%arg0: i32) -> (i32, i32) {
    %c0_i32 = arith.constant 0 : i32
    %c0_i32_0 = arith.constant 0 : i32
    %c0_i32_1 = arith.constant 0 : i32
    return %c0_i32, %c0_i32_0 : i32, i32
  }
  func.func @transform_3(%arg0: i32) -> (i32, i32, i32) {
    %c0_i32 = arith.constant 0 : i32
    %c0_i32_0 = arith.constant 0 : i32
    %c0_i32_1 = arith.constant 0 : i32
    return %arg0, %c0_i32, %c0_i32_0 : i32, i32, i32
  }
}

</mosaic_0001>

<bundles_post_ra>
// kernel: _lambda_.14
= control target key start
LH: loop header
LB: loop body
LE: loop exit
PB: predicated region body
PF: predicated region fallthrough
CT: control target
= control target key end

     0   :  { %s641_s12 = smov 0   ;;  %s643_s13 = smov 0   ;;  %s719_s0 = inlined_call_operand.vmem [shape: f32[2,32,3], index: 0, kind: input, shape index: {}, may-alias: {0,1}]   ;;  %s720_s1 = inlined_call_operand.vmem [shape: f32[2,32,3], index: 1, kind: input, shape index: {}, may-alias: {0,1}]   ;;  %s721_s2 = inlined_call_operand.vmem [shape: f32[2,1,32], index: 2, kind: input, shape index: {}]   ;;  %s722_s3 = inlined_call_operand.vmem [shape: f32[2,32,32], index: 3, kind: output, shape index: {}]  }
   0x1   :  { %s645_s14 = smov 0  }
   0x2 LB: > { %s25_s15 = sadd.s32 1, %s615_s13  ;;  %p514_p0 = scmp.ge.s32.totalorder %s619_s14, 1  ;;  %s619_s14 = sphi %s645_s14, %s13_s14   ;;  %s615_s13 = sphi %s643_s13, %s726_s13   ;;  %s611_s12 = sphi %s641_s12, %s725_s12  }
   0x3   : > { %p27_p1 = scmp.ge.s32.totalorder %s25_s15, 2  ;;  %p176_p2 = scmp.lt.s32.totalorder %s619_s14, 3 }
   0x5   : > { %s728_s15 = smov (%p27_p1, %s25_s15), 0  ;;  %p177_p3 = pnand %p514_p0, %p176_p2 }
   0x6   : > { %p217_p4 = scmp.lt.s32.totalorder (!%p177_p3), %s611_s12, 1  ;;  %vm252_vm0 = vcmask (!%p177_p3), 23552   ;;  %vm397_vm2 = vcmask (!%p177_p3), 261120  }
   0x7   : > { %180 = sbr.rel (%p177_p3) target bundleno = 256 (0x100), region = 32  ;;  %vm670_vm1 = vmpackc.low (!%p177_p3), %vm252_vm0, %vm252_vm0 }
   0xe   : > { %s730_s12 = smov (!%p217_p4, %s611_s12), 1 }
   0xf   : > { %s662_s16 = sshll.u32 %s730_s12, 5  ;;  %s233_s25 = scalar_lea.vmem %s721_s2, %s730_s12 }
  0x10   : > { %s230_s19 = scalar_lea.vmem %s720_s1, %s662_s16  ;;  %s224_s22 = scalar_lea.vmem %s719_s0, %s662_s16  ;;  %v529_v30 = vld [vmem:[%s233_s25] ss:$0 sm:$0xff] }
  0x11   : > { %v248_v1 = vld [vmem:[%s230_s19] sm:$0xff]  ;;  %v249_v2 = vld [vmem:[%s230_s19 + $0x8] sm:$0xff]  ;;  %v250_v3 = vld [vmem:[%s230_s19 + $0x10] sm:$0xff]  ;;  %s242_s28 = scalar_lea.vmem %s722_s3, %s662_s16 }
  0x12   : > { %v557_v4 = vpack.c.bf16 %v249_v2, %v248_v1  ;;  %v251_v5 = vld [vmem:[%s230_s19 + $0x18] sm:$0xff]  ;;  %v244_v6 = vld [vmem:[%s224_s22] sm:$0xff]  ;;  %v246_v7 = vld [vmem:[%s224_s22 + $0x10] sm:$0xff] }
  0x13   : > { %v563_v8 = vpack.c.bf16 %v251_v5, %v250_v3  ;;  %551 = vmatprep.mubr.msk.f32.mxu0 %vm252_vm0, %v244_v6  ;;  %v362_v9 = vmul.f32 %v244_v6, %v244_v6  ;;  %554 = vmatprep.mubr.msk.f32.mxu1 %vm252_vm0, %v246_v7  ;;  %v364_v10 = vmul.f32 %v246_v7, %v246_v7  ;;  %v245_v11 = vld [vmem:[%s224_s22 + $0x8] sm:$0xff]  ;;  %v247_v12 = vld [vmem:[%s224_s22 + $0x18] sm:$0xff] }
  0x14   : > { %559 = vmatprep.subr.msk.bf16.mxu0 %vm670_vm1, %v557_v4  ;;  %569 = vmatprep.subr.msk.bf16.mxu1 %vm670_vm1, %v557_v4  ;;  %v365_v13 = vmul.f32 %v247_v12, %v247_v12  ;;  %v363_v14 = vmul.f32 %v245_v11, %v245_v11 }
  0x15   : > { %562 = vmatpush3.bf16.xpose.msk.msra.mxu0 %vm670_vm1, %v557_v4  ;;  %571 = vmatpush3.bf16.xpose.msk.msra.mxu1 %vm670_vm1, %v557_v4  ;;  %v372_v15 = vsel %vm252_vm0, %v364_v10, 0.0  ;;  %v366_v16 = vsel %vm252_vm0, %v362_v9, 0.0 }
  0x16   : > { %565 = vmatprep.subr.msk.bf16.mxu0 %vm670_vm1, %v563_v8  ;;  %570 = vmatprep.subr.msk.bf16.mxu1 %vm670_vm1, %v563_v8  ;;  %v375_v17 = vsel %vm252_vm0, %v365_v13, 0.0  ;;  %v369_v18 = vsel %vm252_vm0, %v363_v14, 0.0 }
  0x17   : > { %373 = vadd.xlane.f32.xlu1 %v372_v15  ;;  %367 = vadd.xlane.f32.xlu0 %v366_v16 }
  0x1b   : > { %376 = vadd.xlane.f32.xlu1 %v375_v17  ;;  %370 = vadd.xlane.f32.xlu0 %v369_v18 }
  0x1d   : > { %568 = vmatpush3.bf16.xpose.msk.msra.mxu0 %vm670_vm1, %v563_v8  ;;  %572 = vmatpush3.bf16.xpose.msk.msra.mxu1 %vm670_vm1, %v563_v8 }
  0x24   : > { %552 = vmatmul.mubr.msk.f32.vlgmr.msra.gmra.mrb[0].mxu0 %vm252_vm0, %v245_v11  ;;  %555 = vmatmul.mubr.msk.f32.vlgmr.msra.gmra.mrb[0].mxu1 %vm252_vm0, %v247_v12 }
  0xa4   : > { %v374_v19 = vpop.xlane.xlu1 %373  ;;  %v368_v20 = vpop.xlane.xlu0 %367 }
  0xa8   : > { %v377_v21 = vpop.xlane.xlu1 %376  ;;  %v371_v22 = vpop.xlane.xlu0 %370 }
  0xf7   : > { %v553_v23 = vpop.f32.mrb[0].mxu0  ;;  %v556_v24 = vpop.f32.mrb[0].mxu1 }
  0xf8   : > { %v379_v25 = vmul.f32 2.0, %v553_v23  ;;  %v381_v26 = vmul.f32 2.0, %v556_v24  ;;  %v343_v27 = vpop.f32.mrb[1].mxu0  ;;  %v353_v28 = vpop.f32.mrb[1].mxu1 }
  0xf9   : > { %v378_v29 = vmul.f32 2.0, %v343_v27  ;;  %v380_v31 = vmul.f32 2.0, %v353_v28 }
  0xfa   : > { %v385_v32 = vsub.f32 %v381_v26, %v377_v21  ;;  %v383_v33 = vsub.f32 %v379_v25, %v371_v22 }
  0xfb   : > { %v382_v34 = vsub.f32 %v378_v29, %v368_v20  ;;  %v384_v35 = vsub.f32 %v380_v31, %v374_v19 }
  0xfc   : > { %v396_v36 = vsub.f32 %v385_v32, %v529_v30  ;;  %v394_v37 = vsub.f32 %v383_v33, %v529_v30 }
  0xfd   : > { %v393_v38 = vsub.f32 %v382_v34, %v529_v30  ;;  %v395_v39 = vsub.f32 %v384_v35, %v529_v30 }
  0xfe   : > { %401 = vst.msk [vmem:[%s242_s28 + $0x18] sm:$0xff] %vm397_vm2, %v396_v36  ;;  %399 = vst.msk [vmem:[%s242_s28 + $0x8] sm:$0xff] %vm397_vm2, %v394_v37 }
  0xff   : > { %398 = vst.msk [vmem:[%s242_s28] sm:$0xff] %vm397_vm2, %v393_v38  ;;  %400 = vst.msk [vmem:[%s242_s28 + $0x10] sm:$0xff] %vm397_vm2, %v395_v39 }
 0x100 PF: > { %s13_s14 = sadd.s32 1, %s619_s14   ;;  %s725_s12 = smov %s615_s13 }
 0x101   : > { %p10_p5 = scmp.ge.s32.totalorder %s13_s14, 4   ;;  %s726_s13 = smov %s728_s15 }
 0x103   :  { %12 = sbr.rel (!%p10_p5) target bundleno = 2 (0x2), region = 68 }

// kernel: _lambda_.15
= control target key start
LH: loop header
LB: loop body
LE: loop exit
PB: predicated region body
PF: predicated region fallthrough
CT: control target
= control target key end

     0   :  { %s684_s18 = smov 0   ;;  %s686_s19 = smov 0   ;;  %s737_s0 = inlined_call_operand.vmem [shape: f32[2,32,3], index: 0, kind: input, shape index: {}]   ;;  %s738_s1 = inlined_call_operand.vmem [shape: bf16[3,64], index: 1, kind: input, shape index: {}]   ;;  %s739_s2 = inlined_call_operand.vmem [shape: bf16[3,64], index: 2, kind: input, shape index: {}]   ;;  %s740_s3 = inlined_call_operand.vmem [shape: f32[1,64], index: 3, kind: input, shape index: {}]   ;;  %s741_s4 = inlined_call_operand.vmem [shape: f32[2,32,64], index: 4, kind: output, shape index: {0}]   ;;  %s742_s5 = inlined_call_operand.vmem [shape: f32[2,32,64], index: 5, kind: output, shape index: {1}]  }
   0x1   :  { %s688_s20 = smov 0  }
   0x2 LB: > { %s28_s21 = sadd.s32 1, %s647_s19  ;;  %p569_p0 = scmp.ge.s32.totalorder %s651_s20, 1  ;;  %s651_s20 = sphi %s688_s20, %s16_s20   ;;  %s647_s19 = sphi %s686_s19, %s744_s19   ;;  %s643_s18 = sphi %s684_s18, %s743_s18  }
   0x3   : > { %p30_p1 = scmp.ge.s32.totalorder %s28_s21, 2  ;;  %p213_p2 = scmp.lt.s32.totalorder %s651_s20, 3 }
   0x5   : > { %s746_s21 = smov (%p30_p1, %s28_s21), 0  ;;  %p214_p3 = pnand %p569_p0, %p213_p2 }
   0x6   : > { %v295_v0 = vld [vmem:[%s738_s1] sm:$0x3] (!%p214_p3)  ;;  %vm303_vm0 = vcmask (!%p214_p3), 1040384   ;;  %vm304_vm1 = vcmask (!%p214_p3), 1041408   ;;  %p259_p4 = scmp.lt.s32.totalorder (!%p214_p3), %s643_s18, 1  ;;  %v653_v1 = vmov (!%p214_p3), 65535  }
   0x7   : > { %217 = sbr.rel (%p214_p3) target bundleno = 239 (0xef), region = 36  ;;  %v305_v2 = vsel (!%p214_p3), %vm303_vm0, 4294967295, %v653_v1  ;;  %v364_v3 = vld [vmem:[%s739_s2] sm:$0x3] (!%p214_p3)  ;;  %vm296_vm2 = vcmask (!%p214_p3), 23552   ;;  %vm359_vm3 = vcmask (!%p214_p3), 523264  }
   0x8   : > { %v306_v4 = vsel (!%p214_p3), %vm304_vm1, %v305_v2, 0  ;;  %v578_v13 = vld [vmem:[%s740_s3] ss:$0 sm:$0xff] (!%p214_p3) }
   0x9   : > { %v308_v5 = vand.u32 (!%p214_p3), %v306_v4, %v295_v0  ;;  %v373_v6 = vand.u32 (!%p214_p3), %v364_v3, %v306_v4 }
   0xb   : > { %592 = vmatprep.subr.bf16.mxu0 (!%p214_p3), %v308_v5  ;;  %598 = vmatprep.subr.bf16.mxu1 (!%p214_p3), %v373_v6 }
   0xc   : > { %593 = vmatpush3.bf16.msra.mxu0 (!%p214_p3), %v308_v5  ;;  %599 = vmatpush3.bf16.msra.mxu1 (!%p214_p3), %v373_v6 }
   0xe   : > { %s748_s18 = smov (!%p259_p4, %s643_s18), 1 }
   0xf   : > { %s583_s26 = sshll.u32 %s748_s18, 5 }
  0x10   : > { %s266_s29 = scalar_lea.vmem %s737_s0, %s583_s26  ;;  %s276_s7 = scalar_lea.vmem %s741_s4, %s583_s26 }
  0x11   : > { %v289_v7 = vld [vmem:[%s266_s29] sm:$0xff]  ;;  %v290_v8 = vld [vmem:[%s266_s29 + $0x8] sm:$0xff]  ;;  %v291_v9 = vld [vmem:[%s266_s29 + $0x10] sm:$0xff]  ;;  %s286_s12 = scalar_lea.vmem %s742_s5, %s583_s26 }
  0x12   : > { %v293_v10 = vpack.c.bf16 %v290_v8, %v289_v7  ;;  %v292_v11 = vld [vmem:[%s266_s29 + $0x18] sm:$0xff] }
  0x13   : > { %v294_v12 = vpack.c.bf16 %v292_v11, %v291_v9 }
  0x14   : > { %594 = vmatprep.mubr.msk.bf16.mxu0 %vm296_vm2, %v293_v10  ;;  %600 = vmatprep.mubr.msk.bf16.mxu1 %vm296_vm2, %v293_v10 }
  0x15   : > { %595 = vmatmul.mubr.msk.bf16.vlgmr.msra.gmra.mrb[0].mxu0 %vm296_vm2, %v294_v12  ;;  %601 = vmatmul.mubr.msk.bf16.vlgmr.msra.gmra.mrb[0].mxu1 %vm296_vm2, %v294_v12 }
  0xe8   : > { %v596_v14 = vpop.f32.mrb[0].mxu0  ;;  %v602_v15 = vpop.f32.mrb[0].mxu1 }
  0xe9   : > { %362 = vst.msk [vmem:[%s276_s7 + $0x10] sm:$0xff] %vm359_vm3, %v596_v14  ;;  %v418_v16 = vadd.f32 %v602_v15, %v578_v13  ;;  %v344_v17 = vpop.f32.mrb[1].mxu0  ;;  %v409_v18 = vpop.f32.mrb[1].mxu1 }
  0xea   : > { %360 = vst.msk [vmem:[%s276_s7] sm:$0xff] %vm359_vm3, %v344_v17  ;;  %v410_v19 = vadd.f32 %v578_v13, %v409_v18  ;;  %v597_v20 = vpop.f32.mrb[2].mxu0  ;;  %v603_v21 = vpop.f32.mrb[2].mxu1 }
  0xeb   : > { %426 = vst.msk [vmem:[%s286_s12 + $0x10] sm:$0xff] %vm359_vm3, %v418_v16  ;;  %363 = vst.msk [vmem:[%s276_s7 + $0x18] sm:$0xff] %vm359_vm3, %v597_v20  ;;  %v421_v22 = vadd.f32 %v603_v21, %v578_v13  ;;  %v347_v23 = vpop.f32.mrb[3].mxu0  ;;  %v412_v24 = vpop.f32.mrb[3].mxu1 }
  0xec   : > { %424 = vst.msk [vmem:[%s286_s12] sm:$0xff] %vm359_vm3, %v410_v19  ;;  %361 = vst.msk [vmem:[%s276_s7 + $0x8] sm:$0xff] %vm359_vm3, %v347_v23  ;;  %v413_v25 = vadd.f32 %v578_v13, %v412_v24 }
  0xed   : > { %427 = vst.msk [vmem:[%s286_s12 + $0x18] sm:$0xff] %vm359_vm3, %v421_v22 }
  0xee   : > { %425 = vst.msk [vmem:[%s286_s12 + $0x8] sm:$0xff] %vm359_vm3, %v413_v25 }
  0xef PF: > { %s16_s20 = sadd.s32 1, %s651_s20   ;;  %s743_s18 = smov %s647_s19 }
  0xf0   : > { %p13_p5 = scmp.ge.s32.totalorder %s16_s20, 4   ;;  %s744_s19 = smov %s746_s21 }
  0xf2   :  { %15 = sbr.rel (!%p13_p5) target bundleno = 2 (0x2), region = 78 }

// kernel: _lambda_.16
= control target key start
LH: loop header
LB: loop body
LE: loop exit
PB: predicated region body
PF: predicated region fallthrough
CT: control target
= control target key end

     0   :  { %s519_s9 = smov 0   ;;  %s521_s10 = smov 0   ;;  %s597_s0 = inlined_call_operand.vmem [shape: f32[2,4,32,64], index: 0, kind: input, shape index: {}]   ;;  %s598_s1 = inlined_call_operand.vmem [shape: f32[2,32,64], index: 1, kind: input, shape index: {}]   ;;  %s599_s2 = inlined_call_operand.vmem [shape: f32[2,32,64], index: 2, kind: output, shape index: {}]  }
   0x1   :  { %s523_s11 = smov 0  }
   0x2 LB: > { %s24_s12 = sadd.s32 1, %s498_s10  ;;  %p432_p0 = scmp.ge.s32.totalorder %s502_s11, 1  ;;  %s502_s11 = sphi %s523_s11, %s12_s11   ;;  %s498_s10 = sphi %s521_s10, %s601_s10   ;;  %s494_s9 = sphi %s519_s9, %s600_s9  }
   0x3   : > { %p26_p1 = scmp.ge.s32.totalorder %s24_s12, 2  ;;  %p150_p2 = scmp.lt.s32.totalorder %s502_s11, 3 }
   0x5   : > { %s603_s12 = smov (%p26_p1, %s24_s12), 0  ;;  %p151_p3 = pnand %p432_p0, %p150_p2 }
   0x6   : > { %p190_p4 = scmp.lt.s32.totalorder (!%p151_p3), %s494_s9, 1  ;;  %vm318_vm0 = vcmask (!%p151_p3), 523264  }
   0x7   : > { %154 = sbr.rel (%p151_p3) target bundleno = 44 (0x2c), region = 28 }
   0xe   : > { %s605_s9 = smov (!%p190_p4, %s494_s9), 1 }
   0xf   : > { %s453_s13 = sshll.u32 %s605_s9, 7  ;;  %s454_s14 = sshll.u32 %s605_s9, 5 }
  0x10   : > { %s544_s17 = scalar_lea.vmem %s597_s0, %s453_s13  ;;  %s551_s20 = scalar_lea.vmem %s598_s1, %s454_s14 }
  0x11   : > { %v219_v0 = vld [vmem:[%s551_s20] sm:$0xff]  ;;  %v220_v1 = vld [vmem:[%s551_s20 + $0x8] sm:$0xff]  ;;  %v221_v9 = vld [vmem:[%s551_s20 + $0x10] sm:$0xff]  ;;  %s574_s23 = scalar_lea.vmem %s599_s2, %s454_s14 }
  0x12   : > { %v223_v2 = vld [vmem:[%s544_s17] sm:$0xff]  ;;  %v224_v8 = vld [vmem:[%s544_s17 + $0x8] sm:$0xff]  ;;  %v225_v23 = vld [vmem:[%s544_s17 + $0x10] sm:$0xff] }
  0x13   : > { %v439_v3 = vld [vmem:[%s544_s17 + $0x20] sm:$0xff]  ;;  %v227_v4 = vadd.f32 %v223_v2, %v219_v0  ;;  %v228_v12 = vadd.f32 %v224_v8, %v220_v1  ;;  %v440_v13 = vld [vmem:[%s544_s17 + $0x28] sm:$0xff]  ;;  %v441_v24 = vld [vmem:[%s544_s17 + $0x30] sm:$0xff]  ;;  %v229_v32 = vadd.f32 %v225_v23, %v221_v9 }
  0x14   : > { %v248_v5 = vadd.f32 %v439_v3, %v219_v0  ;;  %v443_v6 = vld [vmem:[%s544_s17 + $0x40] sm:$0xff]  ;;  %v444_v14 = vld [vmem:[%s544_s17 + $0x48] sm:$0xff]  ;;  %v249_v28 = vadd.f32 %v440_v13, %v220_v1  ;;  %v222_v33 = vld [vmem:[%s551_s20 + $0x18] sm:$0xff]  ;;  %v250_v36 = vadd.f32 %v441_v24, %v221_v9 }
  0x15   : > { %v447_v7 = vld [vmem:[%s544_s17 + $0x60] sm:$0xff]  ;;  %v273_v10 = vadd.f32 %v443_v6, %v219_v0  ;;  %v448_v15 = vld [vmem:[%s544_s17 + $0x68] sm:$0xff]  ;;  %vm231_vm1 = vcmp.ge.f32.partialorder %v227_v4, 0.0  ;;  %v235_v16 = vmul.f32 0.2, %v227_v4  ;;  %vm232_vm5 = vcmp.ge.f32.partialorder %v228_v12, 0.0 }
  0x16   : > { %v298_v11 = vadd.f32 %v447_v7, %v219_v0  ;;  %vm252_vm2 = vcmp.ge.f32.partialorder %v248_v5, 0.0  ;;  %v256_v17 = vmul.f32 0.2, %v248_v5  ;;  %v236_v22 = vmul.f32 0.2, %v228_v12  ;;  %v445_v37 = vld [vmem:[%s544_s17 + $0x50] sm:$0xff] }
  0x17   : > { %vm277_vm3 = vcmp.ge.f32.partialorder %v273_v10, 0.0  ;;  %v281_v18 = vmul.f32 0.2, %v273_v10  ;;  %v239_v20 = vsel %vm231_vm1, %v227_v4, %v235_v16  ;;  %v274_v30 = vadd.f32 %v444_v14, %v220_v1  ;;  %v449_v38 = vld [vmem:[%s544_s17 + $0x70] sm:$0xff]  ;;  %v226_v44 = vld [vmem:[%s544_s17 + $0x18] sm:$0xff] }
  0x18   : > { %vm302_vm4 = vcmp.ge.f32.partialorder %v298_v11, 0.0  ;;  %v306_v19 = vmul.f32 0.2, %v298_v11  ;;  %v260_v21 = vsel %vm252_vm2, %v248_v5, %v256_v17  ;;  %v240_v29 = vsel %vm232_vm5, %v228_v12, %v236_v22  ;;  %v442_v45 = vld [vmem:[%s544_s17 + $0x38] sm:$0xff] }
  0x19   : > { %v264_v25 = vmax.f32 %v239_v20, %v260_v21  ;;  %v285_v26 = vsel %vm277_vm3, %v273_v10, %v281_v18  ;;  %v299_v31 = vadd.f32 %v448_v15, %v220_v1  ;;  %vm253_vm6 = vcmp.ge.f32.partialorder %v249_v28, 0.0  ;;  %v446_v46 = vld [vmem:[%s544_s17 + $0x58] sm:$0xff] }
  0x1a   : > { %v310_v27 = vsel %vm302_vm4, %v298_v11, %v306_v19  ;;  %v257_v35 = vmul.f32 0.2, %v249_v28  ;;  %vm278_vm7 = vcmp.ge.f32.partialorder %v274_v30, 0.0  ;;  %v282_v39 = vmul.f32 0.2, %v274_v30  ;;  %v450_v63 = vld [vmem:[%s544_s17 + $0x78] sm:$0xff] }
  0x1b   : > { %v289_v34 = vmax.f32 %v264_v25, %v285_v26  ;;  %vm303_vm8 = vcmp.ge.f32.partialorder %v299_v31, 0.0  ;;  %v307_v40 = vmul.f32 0.2, %v299_v31  ;;  %vm233_vm9 = vcmp.ge.f32.partialorder %v229_v32, 0.0 }
  0x1c   : > { %v261_v42 = vsel %vm253_vm6, %v249_v28, %v257_v35  ;;  %v237_v43 = vmul.f32 0.2, %v229_v32  ;;  %v286_v48 = vsel %vm278_vm7, %v274_v30, %v282_v39  ;;  %vm254_vm10 = vcmp.ge.f32.partialorder %v250_v36, 0.0 }
  0x1d   : > { %v314_v41 = vmax.f32 %v289_v34, %v310_v27  ;;  %v265_v47 = vmax.f32 %v240_v29, %v261_v42  ;;  %v311_v49 = vsel %vm303_vm8, %v299_v31, %v307_v40  ;;  %v258_v51 = vmul.f32 0.2, %v250_v36 }
  0x1e   : > { %v241_v50 = vsel %vm233_vm9, %v229_v32, %v237_v43  ;;  %v275_v52 = vadd.f32 %v445_v37, %v221_v9  ;;  %v300_v53 = vadd.f32 %v449_v38, %v221_v9  ;;  %v230_v55 = vadd.f32 %v226_v44, %v222_v33 }
  0x1f   : > { %319 = vst.msk [vmem:[%s574_s23] sm:$0xff] %vm318_vm0, %v314_v41  ;;  %v290_v54 = vmax.f32 %v265_v47, %v286_v48  ;;  %v251_v56 = vadd.f32 %v442_v45, %v222_v33  ;;  %v276_v57 = vadd.f32 %v446_v46, %v222_v33  ;;  %v262_v58 = vsel %vm254_vm10, %v250_v36, %v258_v51 }
  0x20   : > { %vm279_vm11 = vcmp.ge.f32.partialorder %v275_v52, 0.0  ;;  %v283_v59 = vmul.f32 0.2, %v275_v52  ;;  %vm304_vm12 = vcmp.ge.f32.partialorder %v300_v53, 0.0  ;;  %v266_v61 = vmax.f32 %v241_v50, %v262_v58 }
  0x21   : > { %v315_v60 = vmax.f32 %v290_v54, %v311_v49  ;;  %v308_v62 = vmul.f32 0.2, %v300_v53  ;;  %vm234_vm13 = vcmp.ge.f32.partialorder %v230_v55, 0.0  ;;  %v238_v1 = vmul.f32 0.2, %v230_v55 }
  0x22   : > { %v287_v0 = vsel %vm279_vm11, %v275_v52, %v283_v59  ;;  %vm255_vm14 = vcmp.ge.f32.partialorder %v251_v56, 0.0  ;;  %v259_v2 = vmul.f32 0.2, %v251_v56  ;;  %vm280_vm15 = vcmp.ge.f32.partialorder %v276_v57, 0.0 }
  0x23   : > { %320 = vst.msk [vmem:[%s574_s23 + $0x8] sm:$0xff] %vm318_vm0, %v315_v60  ;;  %v291_v3 = vmax.f32 %v266_v61, %v287_v0  ;;  %v312_v4 = vsel %vm304_vm12, %v300_v53, %v308_v62  ;;  %v284_v5 = vmul.f32 0.2, %v276_v57  ;;  %v242_v6 = vsel %vm234_vm13, %v230_v55, %v238_v1 }
  0x24   : > { %v263_v7 = vsel %vm255_vm14, %v251_v56, %v259_v2  ;;  %v301_v8 = vadd.f32 %v450_v63, %v222_v33 }
  0x25   : > { %v316_v9 = vmax.f32 %v291_v3, %v312_v4  ;;  %v267_v10 = vmax.f32 %v242_v6, %v263_v7  ;;  %v288_v11 = vsel %vm280_vm15, %v276_v57, %v284_v5 }
  0x26   : > { %vm305_vm1 = vcmp.ge.f32.partialorder %v301_v8, 0.0  ;;  %v309_v12 = vmul.f32 0.2, %v301_v8 }
  0x27   : > { %321 = vst.msk [vmem:[%s574_s23 + $0x10] sm:$0xff] %vm318_vm0, %v316_v9  ;;  %v292_v13 = vmax.f32 %v267_v10, %v288_v11 }
  0x28   : > { %v313_v14 = vsel %vm305_vm1, %v301_v8, %v309_v12 }
  0x29   : > { %v317_v15 = vmax.f32 %v292_v13, %v313_v14 }
  0x2b   : > { %322 = vst.msk [vmem:[%s574_s23 + $0x18] sm:$0xff] %vm318_vm0, %v317_v15 }
  0x2c PF: > { %s12_s11 = sadd.s32 1, %s502_s11   ;;  %s600_s9 = smov %s498_s10 }
  0x2d   : > { %p9_p5 = scmp.ge.s32.totalorder %s12_s11, 4   ;;  %s601_s10 = smov %s603_s12 }
  0x2f   :  { %11 = sbr.rel (!%p9_p5) target bundleno = 2 (0x2), region = 64 }

// kernel: _lambda_.17
= control target key start
LH: loop header
LB: loop body
LE: loop exit
PB: predicated region body
PF: predicated region fallthrough
CT: control target
= control target key end

     0   :  { %s641_s12 = smov 0   ;;  %s643_s13 = smov 0   ;;  %s719_s0 = inlined_call_operand.vmem [shape: f32[2,32,64], index: 0, kind: input, shape index: {}, may-alias: {0,1}]   ;;  %s720_s1 = inlined_call_operand.vmem [shape: f32[2,32,64], index: 1, kind: input, shape index: {}, may-alias: {0,1}]   ;;  %s721_s2 = inlined_call_operand.vmem [shape: f32[2,1,32], index: 2, kind: input, shape index: {}]   ;;  %s722_s3 = inlined_call_operand.vmem [shape: f32[2,32,32], index: 3, kind: output, shape index: {}]  }
   0x1   :  { %s645_s14 = smov 0  }
   0x2 LB: > { %s25_s15 = sadd.s32 1, %s615_s13  ;;  %p514_p0 = scmp.ge.s32.totalorder %s619_s14, 1  ;;  %s619_s14 = sphi %s645_s14, %s13_s14   ;;  %s615_s13 = sphi %s643_s13, %s726_s13   ;;  %s611_s12 = sphi %s641_s12, %s725_s12  }
   0x3   : > { %p27_p1 = scmp.ge.s32.totalorder %s25_s15, 2  ;;  %p176_p2 = scmp.lt.s32.totalorder %s619_s14, 3 }
   0x5   : > { %s728_s15 = smov (%p27_p1, %s25_s15), 0  ;;  %p177_p3 = pnand %p514_p0, %p176_p2 }
   0x6   : > { %p217_p4 = scmp.lt.s32.totalorder (!%p177_p3), %s611_s12, 1  ;;  %vm252_vm0 = vcmask (!%p177_p3), 523264   ;;  %vm397_vm2 = vcmask (!%p177_p3), 261120  }
   0x7   : > { %180 = sbr.rel (%p177_p3) target bundleno = 256 (0x100), region = 32  ;;  %vm670_vm1 = vmpackc.low (!%p177_p3), %vm252_vm0, %vm252_vm0 }
   0xe   : > { %s730_s12 = smov (!%p217_p4, %s611_s12), 1 }
   0xf   : > { %s662_s16 = sshll.u32 %s730_s12, 5  ;;  %s233_s25 = scalar_lea.vmem %s721_s2, %s730_s12 }
  0x10   : > { %s230_s19 = scalar_lea.vmem %s720_s1, %s662_s16  ;;  %s224_s22 = scalar_lea.vmem %s719_s0, %s662_s16  ;;  %v529_v30 = vld [vmem:[%s233_s25] ss:$0 sm:$0xff] }
  0x11   : > { %v248_v1 = vld [vmem:[%s230_s19] sm:$0xff]  ;;  %v249_v2 = vld [vmem:[%s230_s19 + $0x8] sm:$0xff]  ;;  %v250_v3 = vld [vmem:[%s230_s19 + $0x10] sm:$0xff]  ;;  %s242_s28 = scalar_lea.vmem %s722_s3, %s662_s16 }
  0x12   : > { %v557_v4 = vpack.c.bf16 %v249_v2, %v248_v1  ;;  %v251_v5 = vld [vmem:[%s230_s19 + $0x18] sm:$0xff]  ;;  %v244_v6 = vld [vmem:[%s224_s22] sm:$0xff]  ;;  %v246_v7 = vld [vmem:[%s224_s22 + $0x10] sm:$0xff] }
  0x13   : > { %v563_v8 = vpack.c.bf16 %v251_v5, %v250_v3  ;;  %551 = vmatprep.mubr.msk.f32.mxu0 %vm252_vm0, %v244_v6  ;;  %v362_v9 = vmul.f32 %v244_v6, %v244_v6  ;;  %554 = vmatprep.mubr.msk.f32.mxu1 %vm252_vm0, %v246_v7  ;;  %v364_v10 = vmul.f32 %v246_v7, %v246_v7  ;;  %v245_v11 = vld [vmem:[%s224_s22 + $0x8] sm:$0xff]  ;;  %v247_v12 = vld [vmem:[%s224_s22 + $0x18] sm:$0xff] }
  0x14   : > { %559 = vmatprep.subr.msk.bf16.mxu0 %vm670_vm1, %v557_v4  ;;  %569 = vmatprep.subr.msk.bf16.mxu1 %vm670_vm1, %v557_v4  ;;  %v365_v13 = vmul.f32 %v247_v12, %v247_v12  ;;  %v363_v14 = vmul.f32 %v245_v11, %v245_v11 }
  0x15   : > { %562 = vmatpush3.bf16.xpose.msk.msra.mxu0 %vm670_vm1, %v557_v4  ;;  %571 = vmatpush3.bf16.xpose.msk.msra.mxu1 %vm670_vm1, %v557_v4  ;;  %v372_v15 = vsel %vm252_vm0, %v364_v10, 0.0  ;;  %v366_v16 = vsel %vm252_vm0, %v362_v9, 0.0 }
  0x16   : > { %565 = vmatprep.subr.msk.bf16.mxu0 %vm670_vm1, %v563_v8  ;;  %570 = vmatprep.subr.msk.bf16.mxu1 %vm670_vm1, %v563_v8  ;;  %v375_v17 = vsel %vm252_vm0, %v365_v13, 0.0  ;;  %v369_v18 = vsel %vm252_vm0, %v363_v14, 0.0 }
  0x17   : > { %373 = vadd.xlane.f32.xlu1 %v372_v15  ;;  %367 = vadd.xlane.f32.xlu0 %v366_v16 }
  0x1b   : > { %376 = vadd.xlane.f32.xlu1 %v375_v17  ;;  %370 = vadd.xlane.f32.xlu0 %v369_v18 }
  0x1d   : > { %568 = vmatpush3.bf16.xpose.msk.msra.mxu0 %vm670_vm1, %v563_v8  ;;  %572 = vmatpush3.bf16.xpose.msk.msra.mxu1 %vm670_vm1, %v563_v8 }
  0x24   : > { %552 = vmatmul.mubr.msk.f32.vlgmr.msra.gmra.mrb[0].mxu0 %vm252_vm0, %v245_v11  ;;  %555 = vmatmul.mubr.msk.f32.vlgmr.msra.gmra.mrb[0].mxu1 %vm252_vm0, %v247_v12 }
  0xa4   : > { %v374_v19 = vpop.xlane.xlu1 %373  ;;  %v368_v20 = vpop.xlane.xlu0 %367 }
  0xa8   : > { %v377_v21 = vpop.xlane.xlu1 %376  ;;  %v371_v22 = vpop.xlane.xlu0 %370 }
  0xf7   : > { %v553_v23 = vpop.f32.mrb[0].mxu0  ;;  %v556_v24 = vpop.f32.mrb[0].mxu1 }
  0xf8   : > { %v379_v25 = vmul.f32 2.0, %v553_v23  ;;  %v381_v26 = vmul.f32 2.0, %v556_v24  ;;  %v343_v27 = vpop.f32.mrb[1].mxu0  ;;  %v353_v28 = vpop.f32.mrb[1].mxu1 }
  0xf9   : > { %v378_v29 = vmul.f32 2.0, %v343_v27  ;;  %v380_v31 = vmul.f32 2.0, %v353_v28 }
  0xfa   : > { %v385_v32 = vsub.f32 %v381_v26, %v377_v21  ;;  %v383_v33 = vsub.f32 %v379_v25, %v371_v22 }
  0xfb   : > { %v382_v34 = vsub.f32 %v378_v29, %v368_v20  ;;  %v384_v35 = vsub.f32 %v380_v31, %v374_v19 }
  0xfc   : > { %v396_v36 = vsub.f32 %v385_v32, %v529_v30  ;;  %v394_v37 = vsub.f32 %v383_v33, %v529_v30 }
  0xfd   : > { %v393_v38 = vsub.f32 %v382_v34, %v529_v30  ;;  %v395_v39 = vsub.f32 %v384_v35, %v529_v30 }
  0xfe   : > { %401 = vst.msk [vmem:[%s242_s28 + $0x18] sm:$0xff] %vm397_vm2, %v396_v36  ;;  %399 = vst.msk [vmem:[%s242_s28 + $0x8] sm:$0xff] %vm397_vm2, %v394_v37 }
  0xff   : > { %398 = vst.msk [vmem:[%s242_s28] sm:$0xff] %vm397_vm2, %v393_v38  ;;  %400 = vst.msk [vmem:[%s242_s28 + $0x10] sm:$0xff] %vm397_vm2, %v395_v39 }
 0x100 PF: > { %s13_s14 = sadd.s32 1, %s619_s14   ;;  %s725_s12 = smov %s615_s13 }
 0x101   : > { %p10_p5 = scmp.ge.s32.totalorder %s13_s14, 4   ;;  %s726_s13 = smov %s728_s15 }
 0x103   :  { %12 = sbr.rel (!%p10_p5) target bundleno = 2 (0x2), region = 68 }

// kernel: _lambda_.18
= control target key start
LH: loop header
LB: loop body
LE: loop exit
PB: predicated region body
PF: predicated region fallthrough
CT: control target
= control target key end

     0   :  { %s767_s18 = smov 0   ;;  %s769_s19 = smov 0   ;;  %s847_s0 = inlined_call_operand.vmem [shape: f32[2,32,64], index: 0, kind: input, shape index: {}]   ;;  %s848_s1 = inlined_call_operand.vmem [shape: bf16[64,64], index: 1, kind: input, shape index: {}]   ;;  %s849_s2 = inlined_call_operand.vmem [shape: bf16[64,64], index: 2, kind: input, shape index: {}]   ;;  %s850_s3 = inlined_call_operand.vmem [shape: f32[1,64], index: 3, kind: input, shape index: {}]   ;;  %s851_s4 = inlined_call_operand.vmem [shape: f32[2,32,64], index: 4, kind: output, shape index: {0}]   ;;  %s852_s5 = inlined_call_operand.vmem [shape: f32[2,32,64], index: 5, kind: output, shape index: {1}]  }
   0x1   :  { %s771_s20 = smov 0  }
   0x2 LB: > { %s28_s21 = sadd.s32 1, %s731_s19  ;;  %p620_p0 = scmp.ge.s32.totalorder %s735_s20, 1  ;;  %s735_s20 = sphi %s771_s20, %s16_s20   ;;  %s731_s19 = sphi %s769_s19, %s854_s19   ;;  %s727_s18 = sphi %s767_s18, %s853_s18  }
   0x3   : > { %p30_p1 = scmp.ge.s32.totalorder %s28_s21, 2  ;;  %p213_p2 = scmp.lt.s32.totalorder %s735_s20, 3 }
   0x5   : > { %s856_s21 = smov (%p30_p1, %s28_s21), 0  ;;  %p214_p3 = pnand %p620_p0, %p213_p2 }
   0x6   : > { %v705_v0 = vld [vmem:[%s848_s1] sm:$0xff] (!%p214_p3)   ;;  %p259_p4 = scmp.lt.s32.totalorder (!%p214_p3), %s727_s18, 1  ;;  %v707_v2 = vld [vmem:[%s848_s1 + $0x8] sm:$0xff] (!%p214_p3)   ;;  %v709_v4 = vld [vmem:[%s848_s1 + $0x10] sm:$0xff] (!%p214_p3)   ;;  %vm327_vm0 = vcmask (!%p214_p3), 523264  }
   0x7   : > { %217 = sbr.rel (%p214_p3) target bundleno = 242 (0xf2), region = 36  ;;  %v706_v1 = vld [vmem:[%s849_s2] sm:$0xff] (!%p214_p3)   ;;  %657 = vmatprep.subr.bf16.mxu0 (!%p214_p3), %v705_v0  ;;  %v708_v3 = vld [vmem:[%s849_s2 + $0x8] sm:$0xff] (!%p214_p3)   ;;  %v710_v5 = vld [vmem:[%s849_s2 + $0x10] sm:$0xff] (!%p214_p3)  }
   0x8   : > { %669 = vmatprep.subr.bf16.mxu1 (!%p214_p3), %v706_v1  ;;  %658 = vmatpush3.bf16.msra.mxu0 (!%p214_p3), %v705_v0  ;;  %v711_v6 = vld [vmem:[%s848_s1 + $0x18] sm:$0xff] (!%p214_p3)   ;;  %v633_v14 = vld [vmem:[%s850_s3] ss:$0 sm:$0xff] (!%p214_p3) }
   0x9   : > { %670 = vmatpush3.bf16.msra.mxu1 (!%p214_p3), %v706_v1  ;;  %659 = vmatprep.subr.bf16.mxu0 (!%p214_p3), %v707_v2  ;;  %v712_v9 = vld [vmem:[%s849_s2 + $0x18] sm:$0xff] (!%p214_p3)  }
   0xa   : > { %671 = vmatprep.subr.bf16.mxu1 (!%p214_p3), %v708_v3 }
   0xc   : > { %660 = vmatpush3.bf16.msra.mxu0 (!%p214_p3), %v707_v2 }
   0xd   : > { %672 = vmatpush3.bf16.msra.mxu1 (!%p214_p3), %v708_v3  ;;  %661 = vmatprep.subr.bf16.mxu0 (!%p214_p3), %v709_v4 }
   0xe   : > { %s858_s18 = smov (!%p259_p4, %s727_s18), 1  ;;  %673 = vmatprep.subr.bf16.mxu1 %v710_v5 }
   0xf   : > { %s800_s7 = sshll.u32 %s858_s18, 5 }
  0x10   : > { %s266_s12 = scalar_lea.vmem %s847_s0, %s800_s7  ;;  %662 = vmatpush3.bf16.msra.mxu0 %v709_v4  ;;  %s276_s22 = scalar_lea.vmem %s851_s4, %s800_s7 }
  0x11   : > { %v289_v7 = vld [vmem:[%s266_s12] sm:$0xff]  ;;  %v290_v8 = vld [vmem:[%s266_s12 + $0x8] sm:$0xff]  ;;  %v291_v11 = vld [vmem:[%s266_s12 + $0x10] sm:$0xff]  ;;  %674 = vmatpush3.bf16.msra.mxu1 %v710_v5  ;;  %663 = vmatprep.subr.bf16.mxu0 %v711_v6  ;;  %s286_s27 = scalar_lea.vmem %s852_s5, %s800_s7 }
  0x12   : > { %v293_v10 = vpack.c.bf16 %v290_v8, %v289_v7  ;;  %v292_v12 = vld [vmem:[%s266_s12 + $0x18] sm:$0xff]  ;;  %675 = vmatprep.subr.bf16.mxu1 %v712_v9 }
  0x13   : > { %v294_v13 = vpack.c.bf16 %v292_v12, %v291_v11 }
  0x14   : > { %665 = vmatprep.mubr.msk.bf16.mxu0 %vm327_vm0, %v293_v10  ;;  %677 = vmatprep.mubr.msk.bf16.mxu1 %vm327_vm0, %v293_v10 }
  0x15   : > { %664 = vmatpush3.bf16.msra.mxu0 %v711_v6  ;;  %676 = vmatpush3.bf16.msra.mxu1 %v712_v9 }
  0x18   : > { %666 = vmatmul.mubr.msk.bf16.vlgmr.msra.gmra.mrb[0].mxu0 %vm327_vm0, %v294_v13  ;;  %678 = vmatmul.mubr.msk.bf16.vlgmr.msra.gmra.mrb[0].mxu1 %vm327_vm0, %v294_v13 }
  0xeb   : > { %v667_v15 = vpop.f32.mrb[0].mxu0  ;;  %v679_v16 = vpop.f32.mrb[0].mxu1 }
  0xec   : > { %385 = vst.msk [vmem:[%s276_s22 + $0x10] sm:$0xff] %vm327_vm0, %v667_v15  ;;  %v368_v17 = vpop.f32.mrb[1].mxu0  ;;  %v469_v18 = vadd.f32 %v679_v16, %v633_v14  ;;  %v460_v19 = vpop.f32.mrb[1].mxu1 }
  0xed   : > { %383 = vst.msk [vmem:[%s276_s22] sm:$0xff] %vm327_vm0, %v368_v17  ;;  %v668_v20 = vpop.f32.mrb[2].mxu0  ;;  %v461_v21 = vadd.f32 %v633_v14, %v460_v19  ;;  %v680_v22 = vpop.f32.mrb[2].mxu1 }
  0xee   : > { %386 = vst.msk [vmem:[%s276_s22 + $0x18] sm:$0xff] %vm327_vm0, %v668_v20  ;;  %v371_v23 = vpop.f32.mrb[3].mxu0  ;;  %477 = vst.msk [vmem:[%s286_s27 + $0x10] sm:$0xff] %vm327_vm0, %v469_v18  ;;  %v472_v24 = vadd.f32 %v680_v22, %v633_v14  ;;  %v463_v25 = vpop.f32.mrb[3].mxu1 }
  0xef   : > { %384 = vst.msk [vmem:[%s276_s22 + $0x8] sm:$0xff] %vm327_vm0, %v371_v23  ;;  %475 = vst.msk [vmem:[%s286_s27] sm:$0xff] %vm327_vm0, %v461_v21  ;;  %v464_v26 = vadd.f32 %v633_v14, %v463_v25 }
  0xf0   : > { %478 = vst.msk [vmem:[%s286_s27 + $0x18] sm:$0xff] %vm327_vm0, %v472_v24 }
  0xf1   : > { %476 = vst.msk [vmem:[%s286_s27 + $0x8] sm:$0xff] %vm327_vm0, %v464_v26 }
  0xf2 PF: > { %s16_s20 = sadd.s32 1, %s735_s20   ;;  %s853_s18 = smov %s731_s19 }
  0xf3   : > { %p13_p5 = scmp.ge.s32.totalorder %s16_s20, 4   ;;  %s854_s19 = smov %s856_s21 }
  0xf5   :  { %15 = sbr.rel (!%p13_p5) target bundleno = 2 (0x2), region = 78 }

// kernel: _lambda_.21
= control target key start
LH: loop header
LB: loop body
LE: loop exit
PB: predicated region body
PF: predicated region fallthrough
CT: control target
= control target key end

     0   :  { %s767_s18 = smov 0   ;;  %s769_s19 = smov 0   ;;  %s839_s0 = inlined_call_operand.vmem [shape: f32[2,32,64], index: 0, kind: input, shape index: {}]   ;;  %s840_s1 = inlined_call_operand.vmem [shape: bf16[64,128], index: 1, kind: input, shape index: {}]   ;;  %s841_s2 = inlined_call_operand.vmem [shape: bf16[64,128], index: 2, kind: input, shape index: {}]   ;;  %s842_s3 = inlined_call_operand.vmem [shape: f32[1,128], index: 3, kind: input, shape index: {}]   ;;  %s843_s4 = inlined_call_operand.vmem [shape: f32[2,32,128], index: 4, kind: output, shape index: {0}]   ;;  %s844_s5 = inlined_call_operand.vmem [shape: f32[2,32,128], index: 5, kind: output, shape index: {1}]  }
   0x1   :  { %s771_s20 = smov 0  }
   0x2 LB: > { %s28_s21 = sadd.s32 1, %s731_s19  ;;  %p620_p0 = scmp.ge.s32.totalorder %s735_s20, 1  ;;  %s735_s20 = sphi %s771_s20, %s16_s20   ;;  %s731_s19 = sphi %s769_s19, %s846_s19   ;;  %s727_s18 = sphi %s767_s18, %s845_s18  }
   0x3   : > { %p30_p1 = scmp.ge.s32.totalorder %s28_s21, 2  ;;  %p213_p2 = scmp.lt.s32.totalorder %s735_s20, 3 }
   0x5   : > { %s848_s21 = smov (%p30_p1, %s28_s21), 0  ;;  %p214_p3 = pnand %p620_p0, %p213_p2 }
   0x6   : > { %v705_v0 = vld [vmem:[%s840_s1] sm:$0xff] (!%p214_p3)   ;;  %p259_p4 = scmp.lt.s32.totalorder (!%p214_p3), %s727_s18, 1  ;;  %v707_v2 = vld [vmem:[%s840_s1 + $0x8] sm:$0xff] (!%p214_p3)   ;;  %v709_v4 = vld [vmem:[%s840_s1 + $0x10] sm:$0xff] (!%p214_p3)   ;;  %vm327_vm0 = vcmask (!%p214_p3), 523264  }
   0x7   : > { %217 = sbr.rel (%p214_p3) target bundleno = 242 (0xf2), region = 36  ;;  %v706_v1 = vld [vmem:[%s841_s2] sm:$0xff] (!%p214_p3)   ;;  %657 = vmatprep.subr.bf16.mxu0 (!%p214_p3), %v705_v0  ;;  %v708_v3 = vld [vmem:[%s841_s2 + $0x8] sm:$0xff] (!%p214_p3)   ;;  %v710_v5 = vld [vmem:[%s841_s2 + $0x10] sm:$0xff] (!%p214_p3)  }
   0x8   : > { %669 = vmatprep.subr.bf16.mxu1 (!%p214_p3), %v706_v1  ;;  %658 = vmatpush3.bf16.msra.mxu0 (!%p214_p3), %v705_v0  ;;  %v711_v6 = vld [vmem:[%s840_s1 + $0x18] sm:$0xff] (!%p214_p3)   ;;  %v633_v14 = vld [vmem:[%s842_s3] ss:$0 sm:$0xff] (!%p214_p3) }
   0x9   : > { %670 = vmatpush3.bf16.msra.mxu1 (!%p214_p3), %v706_v1  ;;  %659 = vmatprep.subr.bf16.mxu0 (!%p214_p3), %v707_v2  ;;  %v712_v9 = vld [vmem:[%s841_s2 + $0x18] sm:$0xff] (!%p214_p3)  }
   0xa   : > { %671 = vmatprep.subr.bf16.mxu1 (!%p214_p3), %v708_v3 }
   0xc   : > { %660 = vmatpush3.bf16.msra.mxu0 (!%p214_p3), %v707_v2 }
   0xd   : > { %672 = vmatpush3.bf16.msra.mxu1 (!%p214_p3), %v708_v3  ;;  %661 = vmatprep.subr.bf16.mxu0 (!%p214_p3), %v709_v4 }
   0xe   : > { %s850_s18 = smov (!%p259_p4, %s727_s18), 1  ;;  %673 = vmatprep.subr.bf16.mxu1 %v710_v5 }
   0xf   : > { %s800_s7 = sshll.u32 %s850_s18, 5 }
  0x10   : > { %s266_s12 = scalar_lea.vmem %s839_s0, %s800_s7  ;;  %662 = vmatpush3.bf16.msra.mxu0 %v709_v4  ;;  %s276_s22 = scalar_lea.vmem %s843_s4, %s800_s7 }
  0x11   : > { %v289_v7 = vld [vmem:[%s266_s12] sm:$0xff]  ;;  %v290_v8 = vld [vmem:[%s266_s12 + $0x8] sm:$0xff]  ;;  %v291_v11 = vld [vmem:[%s266_s12 + $0x10] sm:$0xff]  ;;  %674 = vmatpush3.bf16.msra.mxu1 %v710_v5  ;;  %663 = vmatprep.subr.bf16.mxu0 %v711_v6  ;;  %s286_s27 = scalar_lea.vmem %s844_s5, %s800_s7 }
  0x12   : > { %v293_v10 = vpack.c.bf16 %v290_v8, %v289_v7  ;;  %v292_v12 = vld [vmem:[%s266_s12 + $0x18] sm:$0xff]  ;;  %675 = vmatprep.subr.bf16.mxu1 %v712_v9 }
  0x13   : > { %v294_v13 = vpack.c.bf16 %v292_v12, %v291_v11 }
  0x14   : > { %665 = vmatprep.mubr.msk.bf16.mxu0 %vm327_vm0, %v293_v10  ;;  %677 = vmatprep.mubr.msk.bf16.mxu1 %vm327_vm0, %v293_v10 }
  0x15   : > { %664 = vmatpush3.bf16.msra.mxu0 %v711_v6  ;;  %676 = vmatpush3.bf16.msra.mxu1 %v712_v9 }
  0x18   : > { %666 = vmatmul.mubr.msk.bf16.vlgmr.msra.gmra.mrb[0].mxu0 %vm327_vm0, %v294_v13  ;;  %678 = vmatmul.mubr.msk.bf16.vlgmr.msra.gmra.mrb[0].mxu1 %vm327_vm0, %v294_v13 }
  0xeb   : > { %v667_v15 = vpop.f32.mrb[0].mxu0  ;;  %v679_v16 = vpop.f32.mrb[0].mxu1 }
  0xec   : > { %385 = vst [vmem:[%s276_s22 + $0x10] sm:$0xff] %v667_v15  ;;  %v368_v17 = vpop.f32.mrb[1].mxu0  ;;  %v469_v18 = vadd.f32 %v679_v16, %v633_v14  ;;  %v460_v19 = vpop.f32.mrb[1].mxu1 }
  0xed   : > { %383 = vst [vmem:[%s276_s22] sm:$0xff] %v368_v17  ;;  %v668_v20 = vpop.f32.mrb[2].mxu0  ;;  %v461_v21 = vadd.f32 %v633_v14, %v460_v19  ;;  %v680_v22 = vpop.f32.mrb[2].mxu1 }
  0xee   : > { %386 = vst [vmem:[%s276_s22 + $0x18] sm:$0xff] %v668_v20  ;;  %v371_v23 = vpop.f32.mrb[3].mxu0  ;;  %477 = vst [vmem:[%s286_s27 + $0x10] sm:$0xff] %v469_v18  ;;  %v472_v24 = vadd.f32 %v680_v22, %v633_v14  ;;  %v463_v25 = vpop.f32.mrb[3].mxu1 }
  0xef   : > { %384 = vst [vmem:[%s276_s22 + $0x8] sm:$0xff] %v371_v23  ;;  %475 = vst [vmem:[%s286_s27] sm:$0xff] %v461_v21  ;;  %v464_v26 = vadd.f32 %v633_v14, %v463_v25 }
  0xf0   : > { %478 = vst [vmem:[%s286_s27 + $0x18] sm:$0xff] %v472_v24 }
  0xf1   : > { %476 = vst [vmem:[%s286_s27 + $0x8] sm:$0xff] %v464_v26 }
  0xf2 PF: > { %s16_s20 = sadd.s32 1, %s735_s20   ;;  %s845_s18 = smov %s731_s19 }
  0xf3   : > { %p13_p5 = scmp.ge.s32.totalorder %s16_s20, 4   ;;  %s846_s19 = smov %s848_s21 }
  0xf5   :  { %15 = sbr.rel (!%p13_p5) target bundleno = 2 (0x2), region = 78 }

// kernel: _lambda_.22
= control target key start
LH: loop header
LB: loop body
LE: loop exit
PB: predicated region body
PF: predicated region fallthrough
CT: control target
= control target key end

     0   :  { %s518_s9 = smov 0   ;;  %s520_s10 = smov 0   ;;  %s592_s0 = inlined_call_operand.vmem [shape: f32[2,4,32,128], index: 0, kind: input, shape index: {}]   ;;  %s593_s1 = inlined_call_operand.vmem [shape: f32[2,32,128], index: 1, kind: input, shape index: {}]   ;;  %s594_s2 = inlined_call_operand.vmem [shape: f32[2,32,128], index: 2, kind: output, shape index: {}]  }
   0x1   :  { %s522_s11 = smov 0  }
   0x2 LB: > { %s24_s12 = sadd.s32 1, %s497_s10  ;;  %p431_p0 = scmp.ge.s32.totalorder %s501_s11, 1  ;;  %s501_s11 = sphi %s522_s11, %s12_s11   ;;  %s497_s10 = sphi %s520_s10, %s596_s10   ;;  %s493_s9 = sphi %s518_s9, %s595_s9  }
   0x3   : > { %p26_p1 = scmp.ge.s32.totalorder %s24_s12, 2  ;;  %p150_p2 = scmp.lt.s32.totalorder %s501_s11, 3 }
   0x5   : > { %s598_s12 = smov (%p26_p1, %s24_s12), 0  ;;  %p151_p3 = pnand %p431_p0, %p150_p2 }
   0x6   : > { %p190_p4 = scmp.lt.s32.totalorder (!%p151_p3), %s493_s9, 1 }
   0x7   : > { %154 = sbr.rel (%p151_p3) target bundleno = 44 (0x2c), region = 28 }
   0xe   : > { %s600_s9 = smov (!%p190_p4, %s493_s9), 1 }
   0xf   : > { %s452_s13 = sshll.u32 %s600_s9, 7  ;;  %s453_s14 = sshll.u32 %s600_s9, 5 }
  0x10   : > { %s543_s17 = scalar_lea.vmem %s592_s0, %s452_s13  ;;  %s550_s20 = scalar_lea.vmem %s593_s1, %s453_s14 }
  0x11   : > { %v219_v0 = vld [vmem:[%s550_s20] sm:$0xff]  ;;  %v220_v1 = vld [vmem:[%s550_s20 + $0x8] sm:$0xff]  ;;  %v221_v9 = vld [vmem:[%s550_s20 + $0x10] sm:$0xff]  ;;  %s573_s23 = scalar_lea.vmem %s594_s2, %s453_s14 }
  0x12   : > { %v223_v2 = vld [vmem:[%s543_s17] sm:$0xff]  ;;  %v224_v8 = vld [vmem:[%s543_s17 + $0x8] sm:$0xff]  ;;  %v225_v23 = vld [vmem:[%s543_s17 + $0x10] sm:$0xff] }
  0x13   : > { %v438_v3 = vld [vmem:[%s543_s17 + $0x20] sm:$0xff]  ;;  %v227_v4 = vadd.f32 %v223_v2, %v219_v0  ;;  %v228_v12 = vadd.f32 %v224_v8, %v220_v1  ;;  %v439_v13 = vld [vmem:[%s543_s17 + $0x28] sm:$0xff]  ;;  %v440_v24 = vld [vmem:[%s543_s17 + $0x30] sm:$0xff]  ;;  %v229_v32 = vadd.f32 %v225_v23, %v221_v9 }
  0x14   : > { %v248_v5 = vadd.f32 %v438_v3, %v219_v0  ;;  %v442_v6 = vld [vmem:[%s543_s17 + $0x40] sm:$0xff]  ;;  %v443_v14 = vld [vmem:[%s543_s17 + $0x48] sm:$0xff]  ;;  %v249_v28 = vadd.f32 %v439_v13, %v220_v1  ;;  %v222_v33 = vld [vmem:[%s550_s20 + $0x18] sm:$0xff]  ;;  %v250_v36 = vadd.f32 %v440_v24, %v221_v9 }
  0x15   : > { %v446_v7 = vld [vmem:[%s543_s17 + $0x60] sm:$0xff]  ;;  %v273_v10 = vadd.f32 %v442_v6, %v219_v0  ;;  %v447_v15 = vld [vmem:[%s543_s17 + $0x68] sm:$0xff]  ;;  %vm231_vm0 = vcmp.ge.f32.partialorder %v227_v4, 0.0  ;;  %v235_v16 = vmul.f32 0.2, %v227_v4  ;;  %vm232_vm4 = vcmp.ge.f32.partialorder %v228_v12, 0.0 }
  0x16   : > { %v298_v11 = vadd.f32 %v446_v7, %v219_v0  ;;  %vm252_vm1 = vcmp.ge.f32.partialorder %v248_v5, 0.0  ;;  %v256_v17 = vmul.f32 0.2, %v248_v5  ;;  %v236_v22 = vmul.f32 0.2, %v228_v12  ;;  %v444_v37 = vld [vmem:[%s543_s17 + $0x50] sm:$0xff] }
  0x17   : > { %vm277_vm2 = vcmp.ge.f32.partialorder %v273_v10, 0.0  ;;  %v281_v18 = vmul.f32 0.2, %v273_v10  ;;  %v239_v20 = vsel %vm231_vm0, %v227_v4, %v235_v16  ;;  %v274_v30 = vadd.f32 %v443_v14, %v220_v1  ;;  %v448_v38 = vld [vmem:[%s543_s17 + $0x70] sm:$0xff]  ;;  %v226_v44 = vld [vmem:[%s543_s17 + $0x18] sm:$0xff] }
  0x18   : > { %vm302_vm3 = vcmp.ge.f32.partialorder %v298_v11, 0.0  ;;  %v306_v19 = vmul.f32 0.2, %v298_v11  ;;  %v260_v21 = vsel %vm252_vm1, %v248_v5, %v256_v17  ;;  %v240_v29 = vsel %vm232_vm4, %v228_v12, %v236_v22  ;;  %v441_v45 = vld [vmem:[%s543_s17 + $0x38] sm:$0xff] }
  0x19   : > { %v264_v25 = vmax.f32 %v239_v20, %v260_v21  ;;  %v285_v26 = vsel %vm277_vm2, %v273_v10, %v281_v18  ;;  %v299_v31 = vadd.f32 %v447_v15, %v220_v1  ;;  %vm253_vm5 = vcmp.ge.f32.partialorder %v249_v28, 0.0  ;;  %v445_v46 = vld [vmem:[%s543_s17 + $0x58] sm:$0xff] }
  0x1a   : > { %v310_v27 = vsel %vm302_vm3, %v298_v11, %v306_v19  ;;  %v257_v35 = vmul.f32 0.2, %v249_v28  ;;  %vm278_vm6 = vcmp.ge.f32.partialorder %v274_v30, 0.0  ;;  %v282_v39 = vmul.f32 0.2, %v274_v30  ;;  %v449_v63 = vld [vmem:[%s543_s17 + $0x78] sm:$0xff] }
  0x1b   : > { %v289_v34 = vmax.f32 %v264_v25, %v285_v26  ;;  %vm303_vm7 = vcmp.ge.f32.partialorder %v299_v31, 0.0  ;;  %v307_v40 = vmul.f32 0.2, %v299_v31  ;;  %vm233_vm8 = vcmp.ge.f32.partialorder %v229_v32, 0.0 }
  0x1c   : > { %v261_v42 = vsel %vm253_vm5, %v249_v28, %v257_v35  ;;  %v237_v43 = vmul.f32 0.2, %v229_v32  ;;  %v286_v48 = vsel %vm278_vm6, %v274_v30, %v282_v39  ;;  %vm254_vm9 = vcmp.ge.f32.partialorder %v250_v36, 0.0 }
  0x1d   : > { %v314_v41 = vmax.f32 %v289_v34, %v310_v27  ;;  %v265_v47 = vmax.f32 %v240_v29, %v261_v42  ;;  %v311_v49 = vsel %vm303_vm7, %v299_v31, %v307_v40  ;;  %v258_v51 = vmul.f32 0.2, %v250_v36 }
  0x1e   : > { %v241_v50 = vsel %vm233_vm8, %v229_v32, %v237_v43  ;;  %v275_v52 = vadd.f32 %v444_v37, %v221_v9  ;;  %v300_v53 = vadd.f32 %v448_v38, %v221_v9  ;;  %v230_v55 = vadd.f32 %v226_v44, %v222_v33 }
  0x1f   : > { %318 = vst [vmem:[%s573_s23] sm:$0xff] %v314_v41  ;;  %v290_v54 = vmax.f32 %v265_v47, %v286_v48  ;;  %v251_v56 = vadd.f32 %v441_v45, %v222_v33  ;;  %v276_v57 = vadd.f32 %v445_v46, %v222_v33  ;;  %v262_v58 = vsel %vm254_vm9, %v250_v36, %v258_v51 }
  0x20   : > { %vm279_vm10 = vcmp.ge.f32.partialorder %v275_v52, 0.0  ;;  %v283_v59 = vmul.f32 0.2, %v275_v52  ;;  %vm304_vm11 = vcmp.ge.f32.partialorder %v300_v53, 0.0  ;;  %v266_v61 = vmax.f32 %v241_v50, %v262_v58 }
  0x21   : > { %v315_v60 = vmax.f32 %v290_v54, %v311_v49  ;;  %v308_v62 = vmul.f32 0.2, %v300_v53  ;;  %vm234_vm12 = vcmp.ge.f32.partialorder %v230_v55, 0.0  ;;  %v238_v1 = vmul.f32 0.2, %v230_v55 }
  0x22   : > { %v287_v0 = vsel %vm279_vm10, %v275_v52, %v283_v59  ;;  %vm255_vm13 = vcmp.ge.f32.partialorder %v251_v56, 0.0  ;;  %v259_v2 = vmul.f32 0.2, %v251_v56  ;;  %vm280_vm14 = vcmp.ge.f32.partialorder %v276_v57, 0.0 }
  0x23   : > { %319 = vst [vmem:[%s573_s23 + $0x8] sm:$0xff] %v315_v60  ;;  %v291_v3 = vmax.f32 %v266_v61, %v287_v0  ;;  %v312_v4 = vsel %vm304_vm11, %v300_v53, %v308_v62  ;;  %v284_v5 = vmul.f32 0.2, %v276_v57  ;;  %v242_v6 = vsel %vm234_vm12, %v230_v55, %v238_v1 }
  0x24   : > { %v263_v7 = vsel %vm255_vm13, %v251_v56, %v259_v2  ;;  %v301_v8 = vadd.f32 %v449_v63, %v222_v33 }
  0x25   : > { %v316_v9 = vmax.f32 %v291_v3, %v312_v4  ;;  %v267_v10 = vmax.f32 %v242_v6, %v263_v7  ;;  %v288_v11 = vsel %vm280_vm14, %v276_v57, %v284_v5 }
  0x26   : > { %vm305_vm15 = vcmp.ge.f32.partialorder %v301_v8, 0.0  ;;  %v309_v12 = vmul.f32 0.2, %v301_v8 }
  0x27   : > { %320 = vst [vmem:[%s573_s23 + $0x10] sm:$0xff] %v316_v9  ;;  %v292_v13 = vmax.f32 %v267_v10, %v288_v11 }
  0x28   : > { %v313_v14 = vsel %vm305_vm15, %v301_v8, %v309_v12 }
  0x29   : > { %v317_v15 = vmax.f32 %v292_v13, %v313_v14 }
  0x2b   : > { %321 = vst [vmem:[%s573_s23 + $0x18] sm:$0xff] %v317_v15 }
  0x2c PF: > { %s12_s11 = sadd.s32 1, %s501_s11   ;;  %s595_s9 = smov %s497_s10 }
  0x2d   : > { %p9_p5 = scmp.ge.s32.totalorder %s12_s11, 4   ;;  %s596_s10 = smov %s598_s12 }
  0x2f   :  { %11 = sbr.rel (!%p9_p5) target bundleno = 2 (0x2), region = 64 }

// kernel: _lambda_.23
= control target key start
LH: loop header
LB: loop body
LE: loop exit
PB: predicated region body
PF: predicated region fallthrough
CT: control target
= control target key end

     0   :  { %s600_s12 = smov 0   ;;  %s602_s13 = smov 0   ;;  %s648_s0 = inlined_call_operand.vmem [shape: f32[2,32,128], index: 0, kind: input, shape index: {}, may-alias: {0,1}]   ;;  %s649_s1 = inlined_call_operand.vmem [shape: f32[2,32,128], index: 1, kind: input, shape index: {}, may-alias: {0,1}]   ;;  %s650_s2 = inlined_call_operand.vmem [shape: f32[2,1,32], index: 2, kind: input, shape index: {}]   ;;  %s651_s3 = inlined_call_operand.vmem [shape: f32[2,32,32], index: 3, kind: output, shape index: {}]  }
   0x1   :  { %s604_s14 = smov 0  }
   0x2 LB: > { %s25_s15 = sadd.s32 1, %s574_s13  ;;  %p485_p0 = scmp.ge.s32.totalorder %s578_s14, 1  ;;  %s578_s14 = sphi %s604_s14, %s13_s14   ;;  %s574_s13 = sphi %s602_s13, %s653_s13   ;;  %s570_s12 = sphi %s600_s12, %s652_s12  }
   0x3   : > { %p27_p1 = scmp.ge.s32.totalorder %s25_s15, 2  ;;  %p176_p2 = scmp.lt.s32.totalorder %s578_s14, 3 }
   0x5   : > { %s655_s15 = smov (%p27_p1, %s25_s15), 0  ;;  %p177_p3 = pnand %p485_p0, %p176_p2 }
   0x6   : > { %p217_p4 = scmp.lt.s32.totalorder (!%p177_p3), %s570_s12, 1  ;;  %vm368_vm0 = vcmask (!%p177_p3), 261120  }
   0x7   : > { %180 = sbr.rel (%p177_p3) target bundleno = 256 (0x100), region = 32 }
   0xe   : > { %s657_s12 = smov (!%p217_p4, %s570_s12), 1 }
   0xf   : > { %s621_s16 = sshll.u32 %s657_s12, 5  ;;  %s233_s25 = scalar_lea.vmem %s650_s2, %s657_s12 }
  0x10   : > { %s230_s19 = scalar_lea.vmem %s649_s1, %s621_s16  ;;  %s224_s22 = scalar_lea.vmem %s648_s0, %s621_s16  ;;  %v492_v25 = vld [vmem:[%s233_s25] ss:$0 sm:$0xff] }
  0x11   : > { %v248_v0 = vld [vmem:[%s230_s19] sm:$0xff]  ;;  %v249_v1 = vld [vmem:[%s230_s19 + $0x8] sm:$0xff]  ;;  %v250_v2 = vld [vmem:[%s230_s19 + $0x10] sm:$0xff]  ;;  %s242_s28 = scalar_lea.vmem %s651_s3, %s621_s16 }
  0x12   : > { %v520_v3 = vpack.c.bf16 %v249_v1, %v248_v0  ;;  %v251_v4 = vld [vmem:[%s230_s19 + $0x18] sm:$0xff]  ;;  %v244_v5 = vld [vmem:[%s224_s22] sm:$0xff]  ;;  %v246_v6 = vld [vmem:[%s224_s22 + $0x10] sm:$0xff] }
  0x13   : > { %v524_v7 = vpack.c.bf16 %v251_v4, %v250_v2  ;;  %514 = vmatprep.mubr.f32.mxu0 %v244_v5  ;;  %517 = vmatprep.mubr.f32.mxu1 %v246_v6  ;;  %v339_v8 = vmul.f32 %v246_v6, %v246_v6  ;;  %v337_v9 = vmul.f32 %v244_v5, %v244_v5  ;;  %v245_v10 = vld [vmem:[%s224_s22 + $0x8] sm:$0xff]  ;;  %v247_v11 = vld [vmem:[%s224_s22 + $0x18] sm:$0xff] }
  0x14   : > { %521 = vmatprep.subr.bf16.mxu0 %v520_v3  ;;  %528 = vmatprep.subr.bf16.mxu1 %v520_v3  ;;  %v340_v12 = vmul.f32 %v247_v11, %v247_v11  ;;  %v338_v13 = vmul.f32 %v245_v10, %v245_v10 }
  0x15   : > { %523 = vmatpush3.bf16.xpose.msra.mxu0 %v520_v3  ;;  %530 = vmatpush3.bf16.xpose.msra.mxu1 %v520_v3 }
  0x16   : > { %525 = vmatprep.subr.bf16.mxu0 %v524_v7  ;;  %529 = vmatprep.subr.bf16.mxu1 %v524_v7 }
  0x17   : > { %345 = vadd.xlane.f32.xlu1 %v339_v8  ;;  %341 = vadd.xlane.f32.xlu0 %v337_v9 }
  0x1b   : > { %347 = vadd.xlane.f32.xlu1 %v340_v12  ;;  %343 = vadd.xlane.f32.xlu0 %v338_v13 }
  0x1d   : > { %527 = vmatpush3.bf16.xpose.msra.mxu0 %v524_v7  ;;  %531 = vmatpush3.bf16.xpose.msra.mxu1 %v524_v7 }
  0x24   : > { %515 = vmatmul.mubr.f32.vlgmr.msra.gmra.mrb[0].mxu0 %v245_v10  ;;  %518 = vmatmul.mubr.f32.vlgmr.msra.gmra.mrb[0].mxu1 %v247_v11 }
  0xa4   : > { %v346_v14 = vpop.xlane.xlu1 %345  ;;  %v342_v15 = vpop.xlane.xlu0 %341 }
  0xa8   : > { %v348_v16 = vpop.xlane.xlu1 %347  ;;  %v344_v17 = vpop.xlane.xlu0 %343 }
  0xf7   : > { %v516_v18 = vpop.f32.mrb[0].mxu0  ;;  %v519_v19 = vpop.f32.mrb[0].mxu1 }
  0xf8   : > { %v350_v20 = vmul.f32 2.0, %v516_v18  ;;  %v352_v21 = vmul.f32 2.0, %v519_v19  ;;  %v318_v22 = vpop.f32.mrb[1].mxu0  ;;  %v328_v23 = vpop.f32.mrb[1].mxu1 }
  0xf9   : > { %v349_v24 = vmul.f32 2.0, %v318_v22  ;;  %v351_v26 = vmul.f32 2.0, %v328_v23 }
  0xfa   : > { %v356_v27 = vsub.f32 %v352_v21, %v348_v16  ;;  %v354_v28 = vsub.f32 %v350_v20, %v344_v17 }
  0xfb   : > { %v353_v29 = vsub.f32 %v349_v24, %v342_v15  ;;  %v355_v30 = vsub.f32 %v351_v26, %v346_v14 }
  0xfc   : > { %v367_v31 = vsub.f32 %v356_v27, %v492_v25  ;;  %v365_v32 = vsub.f32 %v354_v28, %v492_v25 }
  0xfd   : > { %v364_v33 = vsub.f32 %v353_v29, %v492_v25  ;;  %v366_v34 = vsub.f32 %v355_v30, %v492_v25 }
  0xfe   : > { %372 = vst.msk [vmem:[%s242_s28 + $0x18] sm:$0xff] %vm368_vm0, %v367_v31  ;;  %370 = vst.msk [vmem:[%s242_s28 + $0x8] sm:$0xff] %vm368_vm0, %v365_v32 }
  0xff   : > { %369 = vst.msk [vmem:[%s242_s28] sm:$0xff] %vm368_vm0, %v364_v33  ;;  %371 = vst.msk [vmem:[%s242_s28 + $0x10] sm:$0xff] %vm368_vm0, %v366_v34 }
 0x100 PF: > { %s13_s14 = sadd.s32 1, %s578_s14   ;;  %s652_s12 = smov %s574_s13 }
 0x101   : > { %p10_p5 = scmp.ge.s32.totalorder %s13_s14, 4   ;;  %s653_s13 = smov %s655_s15 }
 0x103   :  { %12 = sbr.rel (!%p10_p5) target bundleno = 2 (0x2), region = 68 }

// kernel: _lambda_.24
= control target key start
LH: loop header
LB: loop body
LE: loop exit
PB: predicated region body
PF: predicated region fallthrough
CT: control target
= control target key end

     0   :  { %s950_s18 = smov 0   ;;  %s952_s19 = smov 0   ;;  %s1117_s0 = inlined_call_operand.vmem [shape: f32[2,32,128], index: 0, kind: input, shape index: {}]   ;;  %s1118_s1 = inlined_call_operand.vmem [shape: bf16[128,256], index: 1, kind: input, shape index: {}]   ;;  %s1119_s2 = inlined_call_operand.vmem [shape: bf16[128,256], index: 2, kind: input, shape index: {}]   ;;  %s1120_s3 = inlined_call_operand.vmem [shape: f32[1,256], index: 3, kind: input, shape index: {}]   ;;  %s1121_s4 = inlined_call_operand.vmem [shape: f32[2,32,256], index: 4, kind: output, shape index: {0}]   ;;  %s1122_s5 = inlined_call_operand.vmem [shape: f32[2,32,256], index: 5, kind: output, shape index: {1}]  }
   0x1   :  { %s954_s20 = smov 0  }
   0x2 LB: > { %s28_s21 = sadd.s32 1, %s913_s19  ;;  %p778_p0 = scmp.ge.s32.totalorder %s917_s20, 1  ;;  %s917_s20 = sphi %s954_s20, %s16_s20   ;;  %s913_s19 = sphi %s952_s19, %s1124_s19   ;;  %s909_s18 = sphi %s950_s18, %s1123_s18  }
   0x3   : > { %p30_p1 = scmp.ge.s32.totalorder %s28_s21, 2  ;;  %p213_p2 = scmp.lt.s32.totalorder %s917_s20, 3 }
   0x5   : > { %s1126_s21 = smov (%p30_p1, %s28_s21), 0  ;;  %p214_p3 = pnand %p778_p0, %p213_p2 }
   0x6   : > { %v847_v0 = vld [vmem:[%s1118_s1 + $0x4] ss:$8 sps:$4 sm:$0xff] (!%p214_p3)   ;;  %v919_v2 = vmov (!%p214_p3), 0   ;;  %v851_v3 = vld [vmem:[%s1118_s1] ss:$8 sps:$4 sm:$0xff] (!%p214_p3)   ;;  %p261_p4 = scmp.lt.s32.totalorder (!%p214_p3), %s909_s18, 1  ;;  %v474_v39 = vlaneseq (!%p214_p3) }
   0x7   : > { %217 = sbr.rel (%p214_p3) target bundleno = 266 (0x10a), region = 36  ;;  %v849_v1 = vld [vmem:[%s1119_s2 + $0x4] ss:$8 sps:$4 sm:$0xff] (!%p214_p3)   ;;  %427 = vmatprep.mubr.bf16.mxu0 (!%p214_p3), %v919_v2  ;;  %596 = vmatprep.mubr.bf16.mxu1 (!%p214_p3), %v919_v2  ;;  %v852_v4 = vld [vmem:[%s1119_s2] ss:$8 sps:$4 sm:$0xff] (!%p214_p3)  }
   0x8   : > { %395 = vmatprep.subr.bf16.mxu0 (!%p214_p3), %v847_v0  ;;  %564 = vmatprep.subr.bf16.mxu1 (!%p214_p3), %v849_v1  ;;  %v853_v5 = vld [vmem:[%s1118_s1 + $0x14] ss:$8 sps:$4 sm:$0xff] (!%p214_p3)   ;;  %v857_v7 = vld [vmem:[%s1118_s1 + $0x10] ss:$8 sps:$4 sm:$0xff] (!%p214_p3)   ;;  %v859_v9 = vld [vmem:[%s1118_s1 + $0x24] ss:$8 sps:$4 sm:$0xff] (!%p214_p3)  }
   0x9   : > { %396 = vmatpush1.bf16.msra.mxu0 (!%p214_p3), %v851_v3  ;;  %565 = vmatpush1.bf16.msra.mxu1 (!%p214_p3), %v852_v4  ;;  %v855_v6 = vld [vmem:[%s1119_s2 + $0x14] ss:$8 sps:$4 sm:$0xff] (!%p214_p3)   ;;  %v858_v8 = vld [vmem:[%s1119_s2 + $0x10] ss:$8 sps:$4 sm:$0xff] (!%p214_p3)   ;;  %v861_v10 = vld [vmem:[%s1119_s2 + $0x24] ss:$8 sps:$4 sm:$0xff] (!%p214_p3)  }
   0xa   : > { %397 = vmatprep.subr.bf16.mxu0 (!%p214_p3), %v853_v5  ;;  %566 = vmatprep.subr.bf16.mxu1 (!%p214_p3), %v855_v6  ;;  %v863_v11 = vld [vmem:[%s1118_s1 + $0x20] ss:$8 sps:$4 sm:$0xff] (!%p214_p3)   ;;  %v865_v13 = vld [vmem:[%s1118_s1 + $0x34] ss:$8 sps:$4 sm:$0xff] (!%p214_p3)   ;;  %v869_v15 = vld [vmem:[%s1118_s1 + $0x30] ss:$8 sps:$4 sm:$0xff] (!%p214_p3)  }
   0xb   : > { %v864_v12 = vld [vmem:[%s1119_s2 + $0x20] ss:$8 sps:$4 sm:$0xff] (!%p214_p3)   ;;  %v867_v14 = vld [vmem:[%s1119_s2 + $0x34] ss:$8 sps:$4 sm:$0xff] (!%p214_p3)   ;;  %v870_v16 = vld [vmem:[%s1119_s2 + $0x30] ss:$8 sps:$4 sm:$0xff] (!%p214_p3)  }
   0xc   : > { %v871_v17 = vld [vmem:[%s1118_s1 + $0x44] ss:$8 sps:$4 sm:$0xff] (!%p214_p3)   ;;  %v875_v19 = vld [vmem:[%s1118_s1 + $0x40] ss:$8 sps:$4 sm:$0xff] (!%p214_p3)   ;;  %v877_v21 = vld [vmem:[%s1118_s1 + $0x54] ss:$8 sps:$4 sm:$0xff] (!%p214_p3)  }
   0xd   : > { %398 = vmatpush1.bf16.msra.mxu0 (!%p214_p3), %v857_v7  ;;  %567 = vmatpush1.bf16.msra.mxu1 (!%p214_p3), %v858_v8  ;;  %v873_v18 = vld [vmem:[%s1119_s2 + $0x44] ss:$8 sps:$4 sm:$0xff] (!%p214_p3)   ;;  %v876_v20 = vld [vmem:[%s1119_s2 + $0x40] ss:$8 sps:$4 sm:$0xff] (!%p214_p3)   ;;  %v879_v22 = vld [vmem:[%s1119_s2 + $0x54] ss:$8 sps:$4 sm:$0xff] (!%p214_p3)  }
   0xe   : > { %399 = vmatprep.subr.bf16.mxu0 %v859_v9  ;;  %568 = vmatprep.subr.bf16.mxu1 %v861_v10  ;;  %s1128_s18 = smov (!%p261_p4, %s909_s18), 1  ;;  %v881_v23 = vld [vmem:[%s1118_s1 + $0x50] ss:$8 sps:$4 sm:$0xff]   ;;  %v883_v25 = vld [vmem:[%s1118_s1 + $0x64] ss:$8 sps:$4 sm:$0xff]   ;;  %v475_v40 = vshrl.u32 %v474_v39, 7 }
   0xf   : > { %v882_v24 = vld [vmem:[%s1119_s2 + $0x50] ss:$8 sps:$4 sm:$0xff]   ;;  %v885_v26 = vld [vmem:[%s1119_s2 + $0x64] ss:$8 sps:$4 sm:$0xff]   ;;  %s819_s7 = sshll.u32 %s1128_s18, 5  ;;  %s820_s29 = sshll.u32 %s1128_s18, 6 }
  0x10   : > { %v887_v27 = vld [vmem:[%s1118_s1 + $0x60] ss:$8 sps:$4 sm:$0xff]   ;;  %v889_v29 = vld [vmem:[%s1118_s1 + $0x74] ss:$8 sps:$4 sm:$0xff]   ;;  %s268_s22 = scalar_lea.vmem %s1117_s0, %s819_s7  ;;  %v893_v31 = vld [vmem:[%s1118_s1 + $0x70] ss:$8 sps:$4 sm:$0xff]   ;;  %s1085_s7 = scalar_lea.vmem %s1121_s4, %s820_s29 }
  0x11   : > { %400 = vmatpush1.bf16.msra.mxu0 %v863_v11  ;;  %569 = vmatpush1.bf16.msra.mxu1 %v864_v12  ;;  %v888_v28 = vld [vmem:[%s1119_s2 + $0x60] ss:$8 sps:$4 sm:$0xff]   ;;  %v891_v30 = vld [vmem:[%s1119_s2 + $0x74] ss:$8 sps:$4 sm:$0xff]   ;;  %v894_v32 = vld [vmem:[%s1119_s2 + $0x70] ss:$8 sps:$4 sm:$0xff]   ;;  %s1090_s10 = scalar_lea.vmem %s1122_s5, %s820_s29 }
  0x12   : > { %401 = vmatprep.subr.bf16.mxu0 %v865_v13  ;;  %570 = vmatprep.subr.bf16.mxu1 %v867_v14  ;;  %v293_v33 = vld [vmem:[%s268_s22] sm:$0xff]  ;;  %v294_v34 = vld [vmem:[%s268_s22 + $0x8] sm:$0xff]  ;;  %v295_v36 = vld [vmem:[%s268_s22 + $0x10] sm:$0xff]  ;;  %v476_v41 = vsub.s32 0, %v475_v40  ;;  %v480_v43 = vsub.s32 1, %v475_v40 }
  0x13   : > { %v297_v35 = vpack.c.bf16 %v294_v34, %v293_v33  ;;  %v296_v37 = vld [vmem:[%s268_s22 + $0x18] sm:$0xff]  ;;  %v472_v42 = vld [vmem:[%s1120_s3] sm:$0x3] }
  0x14   : > { %v298_v38 = vpack.c.bf16 %v296_v37, %v295_v36  ;;  %v477_v44 = vrot.slane %v472_v42, %v476_v41  ;;  %v481_v45 = vrot.slane %v472_v42, %v480_v43 }
  0x15   : > { %402 = vmatpush1.bf16.msra.mxu0 %v869_v15  ;;  %571 = vmatpush1.bf16.msra.mxu1 %v870_v16 }
  0x16   : > { %403 = vmatprep.subr.bf16.mxu0 %v871_v17  ;;  %572 = vmatprep.subr.bf16.mxu1 %v873_v18 }
  0x19   : > { %404 = vmatpush1.bf16.msra.mxu0 %v875_v19  ;;  %573 = vmatpush1.bf16.msra.mxu1 %v876_v20 }
  0x1a   : > { %405 = vmatprep.subr.bf16.mxu0 %v877_v21  ;;  %574 = vmatprep.subr.bf16.mxu1 %v879_v22 }
  0x1d   : > { %406 = vmatpush1.bf16.msra.mxu0 %v881_v23  ;;  %575 = vmatpush1.bf16.msra.mxu1 %v882_v24 }
  0x1e   : > { %407 = vmatprep.subr.bf16.mxu0 %v883_v25  ;;  %576 = vmatprep.subr.bf16.mxu1 %v885_v26 }
  0x21   : > { %408 = vmatpush1.bf16.msra.mxu0 %v887_v27  ;;  %577 = vmatpush1.bf16.msra.mxu1 %v888_v28 }
  0x22   : > { %409 = vmatprep.subr.bf16.mxu0 %v889_v29  ;;  %578 = vmatprep.subr.bf16.mxu1 %v891_v30 }
  0x25   : > { %410 = vmatpush1.bf16.msra.mxu0 %v893_v31  ;;  %579 = vmatpush1.bf16.msra.mxu1 %v894_v32 }
  0x28   : > { %428 = vmatmul.mubr.bf16.vlgmr.msra.gmra.mrb[0].mxu0 %v297_v35  ;;  %597 = vmatmul.mubr.bf16.vlgmr.msra.gmra.mrb[0].mxu1 %v297_v35 }
  0x29   : > { %437 = vmatprep.mubr.bf16.mxu0 %v919_v2  ;;  %606 = vmatprep.mubr.bf16.mxu1 %v919_v2 }
  0x30   : > { %438 = vmatmul.mubr.bf16.gmra.mrb[4].mxu0 %v298_v38  ;;  %607 = vmatmul.mubr.bf16.gmra.mrb[4].mxu1 %v298_v38 }
  0xfb   : > { %v429_v46 = vpop.f32.mrb[0].mxu0  ;;  %v598_v47 = vpop.f32.mrb[0].mxu1 }
  0xfc   : > { %448 = vst [vmem:[%s1085_s7] sm:$0xff] %v429_v46  ;;  %v599_v48 = vadd.f32 %v598_v47, %v477_v44  ;;  %v431_v49 = vpop.f32.mrb[1].mxu0  ;;  %v600_v50 = vpop.f32.mrb[1].mxu1 }
  0xfd   : > { %449 = vst [vmem:[%s1085_s7 + $0x8] sm:$0xff] %v431_v49  ;;  %v601_v51 = vadd.f32 %v600_v50, %v481_v45  ;;  %v433_v52 = vpop.f32.mrb[2].mxu0  ;;  %v602_v53 = vpop.f32.mrb[2].mxu1 }
  0xfe   : > { %617 = vst [vmem:[%s1090_s10] sm:$0xff] %v599_v48  ;;  %450 = vst [vmem:[%s1085_s7 + $0x10] sm:$0xff] %v433_v52  ;;  %v603_v54 = vadd.f32 %v602_v53, %v477_v44  ;;  %v435_v55 = vpop.f32.mrb[3].mxu0  ;;  %v604_v56 = vpop.f32.mrb[3].mxu1 }
  0xff   : > { %618 = vst [vmem:[%s1090_s10 + $0x8] sm:$0xff] %v601_v51  ;;  %451 = vst [vmem:[%s1085_s7 + $0x18] sm:$0xff] %v435_v55  ;;  %v605_v57 = vadd.f32 %v604_v56, %v481_v45 }
 0x100   : > { %619 = vst [vmem:[%s1090_s10 + $0x10] sm:$0xff] %v603_v54 }
 0x101   : > { %620 = vst [vmem:[%s1090_s10 + $0x18] sm:$0xff] %v605_v57 }
 0x103   : > { %v439_v58 = vpop.f32.mrb[4].mxu0  ;;  %v608_v59 = vpop.f32.mrb[4].mxu1 }
 0x104   : > { %452 = vst [vmem:[%s1085_s7 + $0x20] sm:$0xff] %v439_v58  ;;  %v609_v60 = vadd.f32 %v608_v59, %v477_v44  ;;  %v441_v61 = vpop.f32.mrb[5].mxu0  ;;  %v610_v62 = vpop.f32.mrb[5].mxu1 }
 0x105   : > { %453 = vst [vmem:[%s1085_s7 + $0x28] sm:$0xff] %v441_v61  ;;  %v611_v63 = vadd.f32 %v610_v62, %v481_v45  ;;  %v443_v0 = vpop.f32.mrb[6].mxu0  ;;  %v612_v1 = vpop.f32.mrb[6].mxu1 }
 0x106   : > { %621 = vst [vmem:[%s1090_s10 + $0x20] sm:$0xff] %v609_v60  ;;  %454 = vst [vmem:[%s1085_s7 + $0x30] sm:$0xff] %v443_v0  ;;  %v613_v2 = vadd.f32 %v612_v1, %v477_v44  ;;  %v445_v3 = vpop.f32.mrb[7].mxu0  ;;  %v614_v4 = vpop.f32.mrb[7].mxu1 }
 0x107   : > { %622 = vst [vmem:[%s1090_s10 + $0x28] sm:$0xff] %v611_v63  ;;  %455 = vst [vmem:[%s1085_s7 + $0x38] sm:$0xff] %v445_v3  ;;  %v615_v5 = vadd.f32 %v614_v4, %v481_v45 }
 0x108   : > { %623 = vst [vmem:[%s1090_s10 + $0x30] sm:$0xff] %v613_v2 }
 0x109   : > { %624 = vst [vmem:[%s1090_s10 + $0x38] sm:$0xff] %v615_v5 }
 0x10a PF: > { %s16_s20 = sadd.s32 1, %s917_s20   ;;  %s1123_s18 = smov %s913_s19 }
 0x10b   : > { %p13_p5 = scmp.ge.s32.totalorder %s16_s20, 4   ;;  %s1124_s19 = smov %s1126_s21 }
 0x10d   :  { %15 = sbr.rel (!%p13_p5) target bundleno = 2 (0x2), region = 78 }

// kernel: _lambda_.25
= control target key start
LH: loop header
LB: loop body
LE: loop exit
PB: predicated region body
PF: predicated region fallthrough
CT: control target
= control target key end

     0   :  { %s650_s9 = smov 0   ;;  %s652_s10 = smov 0   ;;  %s748_s0 = inlined_call_operand.vmem [shape: f32[2,4,32,256], index: 0, kind: input, shape index: {}]   ;;  %s749_s1 = inlined_call_operand.vmem [shape: f32[2,32,256], index: 1, kind: input, shape index: {}]   ;;  %s750_s2 = inlined_call_operand.vmem [shape: f32[2,32,256], index: 2, kind: output, shape index: {}]  }
   0x1   :  { %s654_s11 = smov 0  }
   0x2 LB: > { %s24_s12 = sadd.s32 1, %s629_s10  ;;  %p551_p0 = scmp.ge.s32.totalorder %s633_s11, 1  ;;  %s633_s11 = sphi %s654_s11, %s12_s11   ;;  %s629_s10 = sphi %s652_s10, %s752_s10   ;;  %s625_s9 = sphi %s650_s9, %s751_s9  }
   0x3   : > { %p26_p1 = scmp.ge.s32.totalorder %s24_s12, 2  ;;  %p152_p2 = scmp.lt.s32.totalorder %s633_s11, 3 }
   0x5   : > { %s754_s12 = smov (%p26_p1, %s24_s12), 0  ;;  %p153_p3 = pnand %p551_p0, %p152_p2 }
   0x6   : > { %p195_p4 = scmp.lt.s32.totalorder (!%p153_p3), %s625_s9, 1 }
   0x7   : > { %156 = sbr.rel (%p153_p3) target bundleno = 63 (0x3f), region = 28 }
   0xe   : > { %s756_s9 = smov (!%p195_p4, %s625_s9), 1 }
   0xf   : > { %s584_s13 = sshll.u32 %s756_s9, 8  ;;  %s585_s14 = sshll.u32 %s756_s9, 6 }
  0x10   : > { %s675_s17 = scalar_lea.vmem %s748_s0, %s584_s13  ;;  %s682_s20 = scalar_lea.vmem %s749_s1, %s585_s14 }
  0x11   : > { %v227_v0 = vld [vmem:[%s682_s20] sm:$0xff]  ;;  %v228_v7 = vld [vmem:[%s682_s20 + $0x8] sm:$0xff]  ;;  %v229_v26 = vld [vmem:[%s682_s20 + $0x10] sm:$0xff]  ;;  %s702_s23 = scalar_lea.vmem %s750_s2, %s585_s14 }
  0x12   : > { %v235_v1 = vld [vmem:[%s675_s17] sm:$0xff]  ;;  %v236_v10 = vld [vmem:[%s675_s17 + $0x8] sm:$0xff]  ;;  %v237_v27 = vld [vmem:[%s675_s17 + $0x10] sm:$0xff] }
  0x13   : > { %v558_v2 = vld [vmem:[%s675_s17 + $0x40] sm:$0xff]  ;;  %v243_v3 = vadd.f32 %v235_v1, %v227_v0  ;;  %v559_v11 = vld [vmem:[%s675_s17 + $0x48] sm:$0xff]  ;;  %v244_v19 = vadd.f32 %v236_v10, %v228_v7  ;;  %v560_v28 = vld [vmem:[%s675_s17 + $0x50] sm:$0xff]  ;;  %v245_v36 = vadd.f32 %v237_v27, %v229_v26 }
  0x14   : > { %v284_v4 = vadd.f32 %v558_v2, %v227_v0  ;;  %v566_v5 = vld [vmem:[%s675_s17 + $0x80] sm:$0xff]  ;;  %v567_v12 = vld [vmem:[%s675_s17 + $0x88] sm:$0xff]  ;;  %v285_v20 = vadd.f32 %v559_v11, %v228_v7  ;;  %v286_v37 = vadd.f32 %v560_v28, %v229_v26  ;;  %v568_v38 = vld [vmem:[%s675_s17 + $0x90] sm:$0xff] }
  0x15   : > { %v574_v6 = vld [vmem:[%s675_s17 + $0xc0] sm:$0xff]  ;;  %v333_v8 = vadd.f32 %v566_v5, %v227_v0  ;;  %vm251_vm0 = vcmp.ge.f32.partialorder %v243_v3, 0.0  ;;  %v259_v13 = vmul.f32 0.2, %v243_v3  ;;  %v575_v21 = vld [vmem:[%s675_s17 + $0xc8] sm:$0xff]  ;;  %v334_v25 = vadd.f32 %v567_v12, %v228_v7  ;;  %v576_v39 = vld [vmem:[%s675_s17 + $0xd0] sm:$0xff] }
  0x16   : > { %v382_v9 = vadd.f32 %v574_v6, %v227_v0  ;;  %vm292_vm1 = vcmp.ge.f32.partialorder %v284_v4, 0.0  ;;  %v300_v14 = vmul.f32 0.2, %v284_v4  ;;  %vm252_vm4 = vcmp.ge.f32.partialorder %v244_v19, 0.0  ;;  %v230_v43 = vld [vmem:[%s682_s20 + $0x18] sm:$0xff]  ;;  %v231_v61 = vld [vmem:[%s682_s20 + $0x20] sm:$0xff] }
  0x17   : > { %vm341_vm2 = vcmp.ge.f32.partialorder %v333_v8, 0.0  ;;  %v349_v15 = vmul.f32 0.2, %v333_v8  ;;  %v267_v17 = vsel %vm251_vm0, %v243_v3, %v259_v13  ;;  %v260_v29 = vmul.f32 0.2, %v244_v19  ;;  %v238_v44 = vld [vmem:[%s675_s17 + $0x18] sm:$0xff] }
  0x18   : > { %vm390_vm3 = vcmp.ge.f32.partialorder %v382_v9, 0.0  ;;  %v398_v16 = vmul.f32 0.2, %v382_v9  ;;  %v308_v18 = vsel %vm292_vm1, %v284_v4, %v300_v14  ;;  %vm293_vm5 = vcmp.ge.f32.partialorder %v285_v20, 0.0  ;;  %v561_v45 = vld [vmem:[%s675_s17 + $0x58] sm:$0xff]  ;;  %v239_v0 = vld [vmem:[%s675_s17 + $0x20] sm:$0xff] }
  0x19   : > { %v316_v22 = vmax.f32 %v267_v17, %v308_v18  ;;  %v357_v23 = vsel %vm341_vm2, %v333_v8, %v349_v15  ;;  %v301_v30 = vmul.f32 0.2, %v285_v20  ;;  %vm342_vm6 = vcmp.ge.f32.partialorder %v334_v25, 0.0  ;;  %v569_v59 = vld [vmem:[%s675_s17 + $0x98] sm:$0xff]  ;;  %v562_v1 = vld [vmem:[%s675_s17 + $0x60] sm:$0xff]  ;;  %v232_v18 = vld [vmem:[%s682_s20 + $0x28] sm:$0xff] }
  0x1a   : > { %v406_v24 = vsel %vm390_vm3, %v382_v9, %v398_v16  ;;  %v350_v32 = vmul.f32 0.2, %v334_v25  ;;  %v383_v33 = vadd.f32 %v575_v21, %v228_v7  ;;  %v268_v34 = vsel %vm252_vm4, %v244_v19, %v260_v29  ;;  %v577_v60 = vld [vmem:[%s675_s17 + $0xd8] sm:$0xff]  ;;  %v570_v13 = vld [vmem:[%s675_s17 + $0xa0] sm:$0xff]  ;;  %v240_v19 = vld [vmem:[%s675_s17 + $0x28] sm:$0xff] }
  0x1b   : > { %v365_v31 = vmax.f32 %v316_v22, %v357_v23  ;;  %v309_v35 = vsel %vm293_vm5, %v285_v20, %v301_v30  ;;  %vm253_vm8 = vcmp.ge.f32.partialorder %v245_v36, 0.0  ;;  %v261_v47 = vmul.f32 0.2, %v245_v36  ;;  %v578_v17 = vld [vmem:[%s675_s17 + $0xe0] sm:$0xff]  ;;  %v563_v29 = vld [vmem:[%s675_s17 + $0x68] sm:$0xff] }
  0x1c   : > { %v317_v41 = vmax.f32 %v268_v34, %v309_v35  ;;  %v358_v42 = vsel %vm342_vm6, %v334_v25, %v350_v32  ;;  %vm391_vm7 = vcmp.ge.f32.partialorder %v383_v33, 0.0  ;;  %v399_v46 = vmul.f32 0.2, %v383_v33  ;;  %v579_v34 = vld [vmem:[%s675_s17 + $0xe8] sm:$0xff] }
  0x1d   : > { %v414_v40 = vmax.f32 %v365_v31, %v406_v24  ;;  %vm294_vm9 = vcmp.ge.f32.partialorder %v286_v37, 0.0  ;;  %v302_v49 = vmul.f32 0.2, %v286_v37  ;;  %v335_v50 = vadd.f32 %v568_v38, %v229_v26  ;;  %v233_v38 = vld [vmem:[%s682_s20 + $0x30] sm:$0xff] }
  0x1e   : > { %v366_v48 = vmax.f32 %v317_v41, %v358_v42  ;;  %v384_v51 = vadd.f32 %v576_v39, %v229_v26  ;;  %v407_v52 = vsel %vm391_vm7, %v383_v33, %v399_v46  ;;  %v269_v53 = vsel %vm253_vm8, %v245_v36, %v261_v47  ;;  %v571_v33 = vld [vmem:[%s675_s17 + $0xa8] sm:$0xff]  ;;  %v241_v39 = vld [vmem:[%s675_s17 + $0x30] sm:$0xff] }
  0x1f   : > { %422 = vst [vmem:[%s702_s23] sm:$0xff] %v414_v40  ;;  %v246_v54 = vadd.f32 %v238_v44, %v230_v43  ;;  %v287_v55 = vadd.f32 %v561_v45, %v230_v43  ;;  %v310_v57 = vsel %vm294_vm9, %v286_v37, %v302_v49  ;;  %vm343_vm10 = vcmp.ge.f32.partialorder %v335_v50, 0.0 }
  0x20   : > { %v415_v56 = vmax.f32 %v366_v48, %v407_v52  ;;  %v351_v58 = vmul.f32 0.2, %v335_v50  ;;  %v318_v62 = vmax.f32 %v269_v53, %v310_v57  ;;  %vm392_vm11 = vcmp.ge.f32.partialorder %v384_v51, 0.0  ;;  %v580_v52 = vld [vmem:[%s675_s17 + $0xf0] sm:$0xff] }
  0x21   : > { %v400_v63 = vmul.f32 0.2, %v384_v51  ;;  %vm254_vm12 = vcmp.ge.f32.partialorder %v246_v54, 0.0  ;;  %v262_v3 = vmul.f32 0.2, %v246_v54  ;;  %vm295_vm13 = vcmp.ge.f32.partialorder %v287_v55, 0.0 }
  0x22   : > { %423 = vst [vmem:[%s702_s23 + $0x8] sm:$0xff] %v415_v56  ;;  %v359_v2 = vsel %vm343_vm10, %v335_v50, %v351_v58  ;;  %v303_v4 = vmul.f32 0.2, %v287_v55  ;;  %v336_v7 = vadd.f32 %v569_v59, %v230_v43  ;;  %v385_v8 = vadd.f32 %v577_v60, %v230_v43  ;;  %v564_v50 = vld [vmem:[%s675_s17 + $0x70] sm:$0xff]  ;;  %v242_v56 = vld [vmem:[%s675_s17 + $0x38] sm:$0xff] }
  0x23   : > { %v367_v5 = vmax.f32 %v318_v62, %v359_v2  ;;  %v408_v6 = vsel %vm392_vm11, %v384_v51, %v400_v63  ;;  %v270_v9 = vsel %vm254_vm12, %v246_v54, %v262_v3  ;;  %v247_v11 = vadd.f32 %v239_v0, %v231_v61  ;;  %v572_v51 = vld [vmem:[%s675_s17 + $0xb0] sm:$0xff] }
  0x24   : > { %v311_v10 = vsel %vm295_vm13, %v287_v55, %v303_v4  ;;  %v288_v12 = vadd.f32 %v562_v1, %v231_v61  ;;  %vm344_vm14 = vcmp.ge.f32.partialorder %v336_v7, 0.0  ;;  %v352_v16 = vmul.f32 0.2, %v336_v7  ;;  %v234_v55 = vld [vmem:[%s682_s20 + $0x38] sm:$0xff] }
  0x25   : > { %v416_v14 = vmax.f32 %v367_v5, %v408_v6  ;;  %v319_v15 = vmax.f32 %v270_v9, %v311_v10  ;;  %vm393_vm15 = vcmp.ge.f32.partialorder %v385_v8, 0.0  ;;  %v401_v20 = vmul.f32 0.2, %v385_v8  ;;  %v565_v4 = vld [vmem:[%s675_s17 + $0x78] sm:$0xff] }
  0x26   : > { %vm255_vm0 = vcmp.ge.f32.partialorder %v247_v11, 0.0  ;;  %v263_v21 = vmul.f32 0.2, %v247_v11  ;;  %v360_v22 = vsel %vm344_vm14, %v336_v7, %v352_v16  ;;  %vm296_vm1 = vcmp.ge.f32.partialorder %v288_v12, 0.0  ;;  %v573_v7 = vld [vmem:[%s675_s17 + $0xb8] sm:$0xff] }
  0x27   : > { %424 = vst [vmem:[%s702_s23 + $0x10] sm:$0xff] %v416_v14  ;;  %v304_v23 = vmul.f32 0.2, %v288_v12  ;;  %v337_v24 = vadd.f32 %v570_v13, %v231_v61  ;;  %v368_v25 = vmax.f32 %v319_v15, %v360_v22  ;;  %v409_v26 = vsel %vm393_vm15, %v385_v8, %v401_v20  ;;  %v581_v8 = vld [vmem:[%s675_s17 + $0xf8] sm:$0xff] }
  0x28   : > { %v271_v27 = vsel %vm255_vm0, %v247_v11, %v263_v21  ;;  %v386_v28 = vadd.f32 %v578_v17, %v231_v61  ;;  %v248_v32 = vadd.f32 %v240_v19, %v232_v18  ;;  %v289_v42 = vadd.f32 %v563_v29, %v232_v18 }
  0x29   : > { %v312_v30 = vsel %vm296_vm1, %v288_v12, %v304_v23  ;;  %vm345_vm2 = vcmp.ge.f32.partialorder %v337_v24, 0.0  ;;  %v353_v31 = vmul.f32 0.2, %v337_v24  ;;  %v417_v35 = vmax.f32 %v368_v25, %v409_v26 }
  0x2a   : > { %v320_v36 = vmax.f32 %v271_v27, %v312_v30  ;;  %vm394_vm3 = vcmp.ge.f32.partialorder %v386_v28, 0.0  ;;  %v402_v37 = vmul.f32 0.2, %v386_v28  ;;  %vm256_vm4 = vcmp.ge.f32.partialorder %v248_v32, 0.0 }
  0x2b   : > { %v361_v40 = vsel %vm345_vm2, %v337_v24, %v353_v31  ;;  %v264_v41 = vmul.f32 0.2, %v248_v32  ;;  %425 = vst [vmem:[%s702_s23 + $0x18] sm:$0xff] %v417_v35  ;;  %v338_v45 = vadd.f32 %v571_v33, %v232_v18  ;;  %v387_v46 = vadd.f32 %v579_v34, %v232_v18 }
  0x2c   : > { %v369_v43 = vmax.f32 %v320_v36, %v361_v40  ;;  %v410_v44 = vsel %vm394_vm3, %v386_v28, %v402_v37  ;;  %vm297_vm5 = vcmp.ge.f32.partialorder %v289_v42, 0.0  ;;  %v305_v48 = vmul.f32 0.2, %v289_v42 }
  0x2d   : > { %v272_v47 = vsel %vm256_vm4, %v248_v32, %v264_v41  ;;  %v249_v49 = vadd.f32 %v241_v39, %v233_v38  ;;  %vm346_vm6 = vcmp.ge.f32.partialorder %v338_v45, 0.0  ;;  %v354_v54 = vmul.f32 0.2, %v338_v45 }
  0x2e   : > { %v418_v53 = vmax.f32 %v369_v43, %v410_v44  ;;  %vm395_vm7 = vcmp.ge.f32.partialorder %v387_v46, 0.0  ;;  %v313_v57 = vsel %vm297_vm5, %v289_v42, %v305_v48  ;;  %v403_v58 = vmul.f32 0.2, %v387_v46 }
  0x2f   : > { %vm257_vm8 = vcmp.ge.f32.partialorder %v249_v49, 0.0  ;;  %v265_v59 = vmul.f32 0.2, %v249_v49  ;;  %v321_v60 = vmax.f32 %v272_v47, %v313_v57  ;;  %v362_v61 = vsel %vm346_vm6, %v338_v45, %v354_v54 }
  0x30   : > { %426 = vst [vmem:[%s702_s23 + $0x20] sm:$0xff] %v418_v53  ;;  %v290_v62 = vadd.f32 %v564_v50, %v233_v38  ;;  %v339_v63 = vadd.f32 %v572_v51, %v233_v38  ;;  %v411_v0 = vsel %vm395_vm7, %v387_v46, %v403_v58  ;;  %v388_v2 = vadd.f32 %v580_v52, %v233_v38 }
  0x31   : > { %v273_v1 = vsel %vm257_vm8, %v249_v49, %v265_v59  ;;  %v250_v3 = vadd.f32 %v242_v56, %v234_v55  ;;  %v370_v5 = vmax.f32 %v321_v60, %v362_v61  ;;  %v291_v14 = vadd.f32 %v565_v4, %v234_v55 }
  0x32   : > { %vm298_vm9 = vcmp.ge.f32.partialorder %v290_v62, 0.0  ;;  %v306_v6 = vmul.f32 0.2, %v290_v62  ;;  %vm347_vm10 = vcmp.ge.f32.partialorder %v339_v63, 0.0  ;;  %v355_v9 = vmul.f32 0.2, %v339_v63 }
  0x33   : > { %vm396_vm11 = vcmp.ge.f32.partialorder %v388_v2, 0.0  ;;  %v404_v10 = vmul.f32 0.2, %v388_v2  ;;  %vm258_vm12 = vcmp.ge.f32.partialorder %v250_v3, 0.0  ;;  %v419_v11 = vmax.f32 %v370_v5, %v411_v0 }
  0x34   : > { %v314_v12 = vsel %vm298_vm9, %v290_v62, %v306_v6  ;;  %v266_v13 = vmul.f32 0.2, %v250_v3  ;;  %v363_v16 = vsel %vm347_vm10, %v339_v63, %v355_v9  ;;  %v340_v18 = vadd.f32 %v573_v7, %v234_v55 }
  0x35   : > { %v322_v15 = vmax.f32 %v273_v1, %v314_v12  ;;  %v412_v17 = vsel %vm396_vm11, %v388_v2, %v404_v10  ;;  %427 = vst [vmem:[%s702_s23 + $0x28] sm:$0xff] %v419_v11  ;;  %vm299_vm13 = vcmp.ge.f32.partialorder %v291_v14, 0.0  ;;  %v307_v20 = vmul.f32 0.2, %v291_v14 }
  0x36   : > { %v274_v19 = vsel %vm258_vm12, %v250_v3, %v266_v13  ;;  %v389_v21 = vadd.f32 %v581_v8, %v234_v55  ;;  %vm348_vm14 = vcmp.ge.f32.partialorder %v340_v18, 0.0  ;;  %v356_v23 = vmul.f32 0.2, %v340_v18 }
  0x37   : > { %v371_v22 = vmax.f32 %v322_v15, %v363_v16  ;;  %v315_v24 = vsel %vm299_vm13, %v291_v14, %v307_v20 }
  0x38   : > { %vm397_vm15 = vcmp.ge.f32.partialorder %v389_v21, 0.0  ;;  %v405_v25 = vmul.f32 0.2, %v389_v21  ;;  %v323_v27 = vmax.f32 %v274_v19, %v315_v24  ;;  %v364_v28 = vsel %vm348_vm14, %v340_v18, %v356_v23 }
  0x39   : > { %v420_v26 = vmax.f32 %v371_v22, %v412_v17 }
  0x3a   : > { %v413_v29 = vsel %vm397_vm15, %v389_v21, %v405_v25  ;;  %v372_v30 = vmax.f32 %v323_v27, %v364_v28 }
  0x3b   : > { %428 = vst [vmem:[%s702_s23 + $0x30] sm:$0xff] %v420_v26 }
  0x3c   : > { %v421_v31 = vmax.f32 %v372_v30, %v413_v29 }
  0x3e   : > { %429 = vst [vmem:[%s702_s23 + $0x38] sm:$0xff] %v421_v31 }
  0x3f PF: > { %s12_s11 = sadd.s32 1, %s633_s11   ;;  %s751_s9 = smov %s629_s10 }
  0x40   : > { %p9_p5 = scmp.ge.s32.totalorder %s12_s11, 4   ;;  %s752_s10 = smov %s754_s12 }
  0x42   :  { %11 = sbr.rel (!%p9_p5) target bundleno = 2 (0x2), region = 64 }

// kernel: _lambda_.26
= control target key start
LH: loop header
LB: loop body
LE: loop exit
PB: predicated region body
PF: predicated region fallthrough
CT: control target
= control target key end

     0   :  { %s2503_s30 = smov 0   ;;  %s2505_s10 = smov 0   ;;  %s3026_s0 = inlined_call_operand.vmem [shape: f32[2,32,64], index: 0, kind: input, shape index: {}]   ;;  %s3027_s1 = inlined_call_operand.vmem [shape: f32[2,32,64], index: 1, kind: input, shape index: {}]   ;;  %s3028_s2 = inlined_call_operand.vmem [shape: f32[2,32,128], index: 2, kind: input, shape index: {}]   ;;  %s3029_s3 = inlined_call_operand.vmem [shape: f32[2,32,256], index: 3, kind: input, shape index: {}]   ;;  %s3030_s4 = inlined_call_operand.vmem [shape: bf16[64,512], index: 4, kind: input, shape index: {}]   ;;  %s3031_s5 = inlined_call_operand.vmem [shape: bf16[64,512], index: 5, kind: input, shape index: {}]   ;;  %s3032_s6 = inlined_call_operand.vmem [shape: bf16[128,512], index: 6, kind: input, shape index: {}]   ;;  %s3033_s7 = inlined_call_operand.vmem [shape: bf16[256,512], index: 7, kind: input, shape index: {}]   ;;  %s3034_s8 = inlined_call_operand.vmem [shape: f32[1,512], index: 8, kind: input, shape index: {}]   ;;  %s3035_s9 = inlined_call_operand.vmem [shape: f32[2,32,512], index: 9, kind: output, shape index: {}]  }
   0x1   :  { %s2507_s11 = smov 0  }
   0x2 LB: > { %s31_s12 = sadd.s32 1, %s2446_s10  ;;  %p2009_p0 = scmp.ge.s32.totalorder %s2450_s11, 1  ;;  %s2450_s11 = sphi %s2507_s11, %s19_s11   ;;  %s2446_s10 = sphi %s2505_s10, %s3037_s10   ;;  %s2442_s30 = sphi %s2503_s30, %s3036_s30  }
   0x3   : > { %p33_p1 = scmp.ge.s32.totalorder %s31_s12, 2  ;;  %p360_p2 = scmp.lt.s32.totalorder %s2450_s11, 3 }
   0x5   : > { %s3039_s12 = smov (%p33_p1, %s31_s12), 0  ;;  %p361_p3 = pnand %p2009_p0, %p360_p2 }
   0x6   : > { %v2236_v0 = vld [vmem:[%s3031_s5 + $0x4] ss:$16 sps:$4 sm:$0xff] (!%p361_p3)   ;;  %p434_p4 = scmp.lt.s32.totalorder (!%p361_p3), %s2442_s30, 1  ;;  %v2238_v1 = vld [vmem:[%s3031_s5 + $0xc] ss:$16 sps:$4 sm:$0xff] (!%p361_p3)   ;;  %v2452_v2 = vmov (!%p361_p3), 0  }
   0x7   : > { %364 = sbr.rel (%p361_p3) target bundleno = 368 (0x170), region = 56  ;;  %649 = vmatprep.mubr.bf16.mxu0 (!%p361_p3), %v2452_v2  ;;  %702 = vmatprep.mubr.bf16.mxu1 (!%p361_p3), %v2452_v2  ;;  %v2240_v3 = vld [vmem:[%s3031_s5] ss:$16 sps:$4 sm:$0xff] (!%p361_p3)   ;;  %v2241_v4 = vld [vmem:[%s3031_s5 + $0x8] ss:$16 sps:$4 sm:$0xff] (!%p361_p3)   ;;  %vm610_vm0 = vcmask (!%p361_p3), 523264  }
   0x8   : > { %617 = vmatprep.subr.bf16.mxu0 (!%p361_p3), %v2236_v0  ;;  %670 = vmatprep.subr.bf16.mxu1 (!%p361_p3), %v2238_v1  ;;  %v2242_v5 = vld [vmem:[%s3031_s5 + $0x24] ss:$16 sps:$4 sm:$0xff] (!%p361_p3)   ;;  %v2244_v6 = vld [vmem:[%s3031_s5 + $0x2c] ss:$16 sps:$4 sm:$0xff] (!%p361_p3)   ;;  %v2246_v7 = vld [vmem:[%s3031_s5 + $0x20] ss:$16 sps:$4 sm:$0xff] (!%p361_p3)  }
   0x9   : > { %618 = vmatpush1.bf16.msra.mxu0 (!%p361_p3), %v2240_v3  ;;  %671 = vmatpush1.bf16.msra.mxu1 (!%p361_p3), %v2241_v4  ;;  %v2247_v8 = vld [vmem:[%s3031_s5 + $0x28] ss:$16 sps:$4 sm:$0xff] (!%p361_p3)   ;;  %v2248_v9 = vld [vmem:[%s3031_s5 + $0x44] ss:$16 sps:$4 sm:$0xff] (!%p361_p3)   ;;  %v2250_v10 = vld [vmem:[%s3031_s5 + $0x4c] ss:$16 sps:$4 sm:$0xff] (!%p361_p3)  }
   0xa   : > { %619 = vmatprep.subr.bf16.mxu0 (!%p361_p3), %v2242_v5  ;;  %672 = vmatprep.subr.bf16.mxu1 (!%p361_p3), %v2244_v6  ;;  %v2252_v11 = vld [vmem:[%s3031_s5 + $0x40] ss:$16 sps:$4 sm:$0xff] (!%p361_p3)   ;;  %v2253_v12 = vld [vmem:[%s3031_s5 + $0x48] ss:$16 sps:$4 sm:$0xff] (!%p361_p3)   ;;  %v2254_v13 = vld [vmem:[%s3031_s5 + $0x64] ss:$16 sps:$4 sm:$0xff] (!%p361_p3)  }
   0xb   : > { %v2256_v14 = vld [vmem:[%s3031_s5 + $0x6c] ss:$16 sps:$4 sm:$0xff] (!%p361_p3)   ;;  %v2258_v15 = vld [vmem:[%s3031_s5 + $0x60] ss:$16 sps:$4 sm:$0xff] (!%p361_p3)   ;;  %v2259_v16 = vld [vmem:[%s3031_s5 + $0x68] ss:$16 sps:$4 sm:$0xff] (!%p361_p3)  }
   0xc   : > { %v2262_v17 = vld [vmem:[%s3030_s4 + $0x4] ss:$16 sps:$4 sm:$0xff] (!%p361_p3)   ;;  %v2265_v18 = vld [vmem:[%s3030_s4 + $0xc] ss:$16 sps:$4 sm:$0xff] (!%p361_p3)   ;;  %v2260_v22 = vld [vmem:[%s3030_s4] ss:$16 sps:$4 sm:$0xff] (!%p361_p3)  }
   0xd   : > { %620 = vmatpush1.bf16.msra.mxu0 (!%p361_p3), %v2246_v7  ;;  %673 = vmatpush1.bf16.msra.mxu1 (!%p361_p3), %v2247_v8  ;;  %v2263_v23 = vld [vmem:[%s3030_s4 + $0x8] ss:$16 sps:$4 sm:$0xff] (!%p361_p3)   ;;  %v2268_v24 = vld [vmem:[%s3030_s4 + $0x24] ss:$16 sps:$4 sm:$0xff] (!%p361_p3)   ;;  %v2271_v25 = vld [vmem:[%s3030_s4 + $0x2c] ss:$16 sps:$4 sm:$0xff] (!%p361_p3)  }
   0xe   : > { %s3041_s30 = smov (!%p434_p4, %s2442_s30), 1  ;;  %621 = vmatprep.subr.bf16.mxu0 %v2248_v9  ;;  %674 = vmatprep.subr.bf16.mxu1 %v2250_v10  ;;  %v2266_v26 = vld [vmem:[%s3030_s4 + $0x20] ss:$16 sps:$4 sm:$0xff]   ;;  %v2269_v27 = vld [vmem:[%s3030_s4 + $0x28] ss:$16 sps:$4 sm:$0xff]  }
   0xf   : > { %s2553_s14 = sshll.u32 %s3041_s30, 5  ;;  %v2274_v28 = vld [vmem:[%s3030_s4 + $0x44] ss:$16 sps:$4 sm:$0xff]   ;;  %v2277_v31 = vld [vmem:[%s3030_s4 + $0x4c] ss:$16 sps:$4 sm:$0xff]  }
  0x10   : > { %s451_s27 = scalar_lea.vmem %s3027_s1, %s2553_s14  ;;  %v2272_v32 = vld [vmem:[%s3030_s4 + $0x40] ss:$16 sps:$4 sm:$0xff]   ;;  %v2275_v34 = vld [vmem:[%s3030_s4 + $0x48] ss:$16 sps:$4 sm:$0xff]   ;;  %s2624_s26 = scalar_lea.vmem %s3026_s0, %s2553_s14  ;;  %v2280_v35 = vld [vmem:[%s3030_s4 + $0x64] ss:$16 sps:$4 sm:$0xff]  }
  0x11   : > { %622 = vmatpush1.bf16.msra.mxu0 %v2252_v11  ;;  %675 = vmatpush1.bf16.msra.mxu1 %v2253_v12  ;;  %v508_v19 = vld [vmem:[%s451_s27] sm:$0xff]  ;;  %v509_v20 = vld [vmem:[%s451_s27 + $0x8] sm:$0xff]  ;;  %v510_v29 = vld [vmem:[%s451_s27 + $0x10] sm:$0xff]  ;;  %s2748_s20 = scalar_lea.vmem %s3028_s2, %s2553_s14 }
  0x12   : > { %623 = vmatprep.subr.bf16.mxu0 %v2254_v13  ;;  %676 = vmatprep.subr.bf16.mxu1 %v2256_v14  ;;  %v512_v21 = vpack.c.bf16 %v509_v20, %v508_v19  ;;  %v511_v30 = vld [vmem:[%s451_s27 + $0x18] sm:$0xff]  ;;  %v2278_v37 = vld [vmem:[%s3030_s4 + $0x60] ss:$16 sps:$4 sm:$0xff]   ;;  %v487_v40 = vld [vmem:[%s2624_s26 + $0x8] sm:$0xff]  ;;  %s2161_s27 = sshll.u32 %s3041_s30, 6 }
  0x13   : > { %v513_v33 = vpack.c.bf16 %v511_v30, %v510_v29  ;;  %v2283_v36 = vld [vmem:[%s3030_s4 + $0x6c] ss:$16 sps:$4 sm:$0xff]   ;;  %v2281_v38 = vld [vmem:[%s3030_s4 + $0x68] ss:$16 sps:$4 sm:$0xff]   ;;  %v486_v39 = vld [vmem:[%s2624_s26] sm:$0xff] }
  0x14   : > { %v2286_v41 = vld [vmem:[%s3032_s6 + $0x4] ss:$16 sps:$4 sm:$0xff]   ;;  %v2289_v42 = vld [vmem:[%s3032_s6 + $0xc] ss:$16 sps:$4 sm:$0xff]   ;;  %v490_v43 = vpack.c.bf16 %v487_v40, %v486_v39  ;;  %v2284_v44 = vld [vmem:[%s3032_s6] ss:$16 sps:$4 sm:$0xff]  }
  0x15   : > { %624 = vmatpush1.bf16.msra.mxu0 %v2258_v15  ;;  %677 = vmatpush1.bf16.msra.mxu1 %v2259_v16  ;;  %v2287_v45 = vld [vmem:[%s3032_s6 + $0x8] ss:$16 sps:$4 sm:$0xff]   ;;  %v2292_v46 = vld [vmem:[%s3032_s6 + $0x24] ss:$16 sps:$4 sm:$0xff]   ;;  %v2295_v47 = vld [vmem:[%s3032_s6 + $0x2c] ss:$16 sps:$4 sm:$0xff]  }
  0x16   : > { %809 = vmatprep.subr.bf16.mxu0 %v2262_v17  ;;  %862 = vmatprep.subr.bf16.mxu1 %v2265_v18  ;;  %v2290_v48 = vld [vmem:[%s3032_s6 + $0x20] ss:$16 sps:$4 sm:$0xff]   ;;  %v2293_v49 = vld [vmem:[%s3032_s6 + $0x28] ss:$16 sps:$4 sm:$0xff]   ;;  %v2298_v50 = vld [vmem:[%s3032_s6 + $0x44] ss:$16 sps:$4 sm:$0xff]  }
  0x17   : > { %v2301_v51 = vld [vmem:[%s3032_s6 + $0x4c] ss:$16 sps:$4 sm:$0xff]   ;;  %v2296_v52 = vld [vmem:[%s3032_s6 + $0x40] ss:$16 sps:$4 sm:$0xff]   ;;  %v2299_v53 = vld [vmem:[%s3032_s6 + $0x48] ss:$16 sps:$4 sm:$0xff]  }
  0x18   : > { %2036 = vmatmul.mubr.msk.bf16.vlgmr.msra.gmra.mrb[0].mxu0 %vm610_vm0, %v512_v21  ;;  %2038 = vmatmul.mubr.msk.bf16.vlgmr.msra.gmra.mrb[0].mxu1 %vm610_vm0, %v512_v21  ;;  %v2304_v54 = vld [vmem:[%s3032_s6 + $0x64] ss:$16 sps:$4 sm:$0xff]   ;;  %v2307_v55 = vld [vmem:[%s3032_s6 + $0x6c] ss:$16 sps:$4 sm:$0xff]   ;;  %v2302_v58 = vld [vmem:[%s3032_s6 + $0x60] ss:$16 sps:$4 sm:$0xff]  }
  0x19   : > { %810 = vmatpush1.bf16.msra.mxu0 %v2260_v22  ;;  %863 = vmatpush1.bf16.msra.mxu1 %v2263_v23  ;;  %v488_v56 = vld [vmem:[%s2624_s26 + $0x10] sm:$0xff]  ;;  %v489_v57 = vld [vmem:[%s2624_s26 + $0x18] sm:$0xff]  ;;  %v915_v14 = vld [vmem:[%s2748_s20] sm:$0xff] }
  0x1a   : > { %811 = vmatprep.subr.bf16.mxu0 %v2268_v24  ;;  %864 = vmatprep.subr.bf16.mxu1 %v2271_v25  ;;  %v2305_v59 = vld [vmem:[%s3032_s6 + $0x68] ss:$16 sps:$4 sm:$0xff]   ;;  %v491_v60 = vpack.c.bf16 %v489_v57, %v488_v56  ;;  %v2310_v61 = vld [vmem:[%s3032_s6 + $0x84] ss:$16 sps:$4 sm:$0xff]   ;;  %v2313_v62 = vld [vmem:[%s3032_s6 + $0x8c] ss:$16 sps:$4 sm:$0xff]  }
  0x1b   : > { %659 = vmatprep.mubr.bf16.mxu0 %v2452_v2  ;;  %712 = vmatprep.mubr.bf16.mxu1 %v2452_v2  ;;  %v2308_v63 = vld [vmem:[%s3032_s6 + $0x80] ss:$16 sps:$4 sm:$0xff]   ;;  %v2311_v0 = vld [vmem:[%s3032_s6 + $0x88] ss:$16 sps:$4 sm:$0xff]   ;;  %v2316_v1 = vld [vmem:[%s3032_s6 + $0xa4] ss:$16 sps:$4 sm:$0xff]  }
  0x1c   : > { %v2319_v3 = vld [vmem:[%s3032_s6 + $0xac] ss:$16 sps:$4 sm:$0xff]   ;;  %v2314_v4 = vld [vmem:[%s3032_s6 + $0xa0] ss:$16 sps:$4 sm:$0xff]   ;;  %v2317_v5 = vld [vmem:[%s3032_s6 + $0xa8] ss:$16 sps:$4 sm:$0xff]  }
  0x1d   : > { %812 = vmatpush1.bf16.msra.mxu0 %v2266_v26  ;;  %865 = vmatpush1.bf16.msra.mxu1 %v2269_v27  ;;  %v2322_v6 = vld [vmem:[%s3032_s6 + $0xc4] ss:$16 sps:$4 sm:$0xff]   ;;  %v2325_v7 = vld [vmem:[%s3032_s6 + $0xcc] ss:$16 sps:$4 sm:$0xff]   ;;  %v2320_v8 = vld [vmem:[%s3032_s6 + $0xc0] ss:$16 sps:$4 sm:$0xff]  }
  0x1e   : > { %813 = vmatprep.subr.bf16.mxu0 %v2274_v28  ;;  %866 = vmatprep.subr.bf16.mxu1 %v2277_v31  ;;  %v2323_v9 = vld [vmem:[%s3032_s6 + $0xc8] ss:$16 sps:$4 sm:$0xff]   ;;  %v2328_v10 = vld [vmem:[%s3032_s6 + $0xe4] ss:$16 sps:$4 sm:$0xff]   ;;  %v2331_v11 = vld [vmem:[%s3032_s6 + $0xec] ss:$16 sps:$4 sm:$0xff]  }
  0x1f   : > { %v2326_v12 = vld [vmem:[%s3032_s6 + $0xe0] ss:$16 sps:$4 sm:$0xff]   ;;  %v2329_v13 = vld [vmem:[%s3032_s6 + $0xe8] ss:$16 sps:$4 sm:$0xff]   ;;  %v2334_v16 = vld [vmem:[%s3033_s7 + $0x4] ss:$16 sps:$4 sm:$0xff]  }
  0x20   : > { %2037 = vmatmul.mubr.msk.bf16.gmra.mrb[4].mxu0 %vm610_vm0, %v513_v33  ;;  %2039 = vmatmul.mubr.msk.bf16.gmra.mrb[4].mxu1 %vm610_vm0, %v513_v33  ;;  %v916_v15 = vld [vmem:[%s2748_s20 + $0x8] sm:$0xff]  ;;  %v2332_v19 = vld [vmem:[%s3033_s7] ss:$16 sps:$4 sm:$0xff]   ;;  %v2340_v21 = vld [vmem:[%s3033_s7 + $0x24] ss:$16 sps:$4 sm:$0xff]  }
  0x21   : > { %814 = vmatpush1.bf16.msra.mxu0 %v2272_v32  ;;  %867 = vmatpush1.bf16.msra.mxu1 %v2275_v34  ;;  %v2337_v17 = vld [vmem:[%s3033_s7 + $0xc] ss:$16 sps:$4 sm:$0xff]   ;;  %v919_v18 = vpack.c.bf16 %v916_v15, %v915_v14  ;;  %v2335_v20 = vld [vmem:[%s3033_s7 + $0x8] ss:$16 sps:$4 sm:$0xff]   ;;  %v2338_v23 = vld [vmem:[%s3033_s7 + $0x20] ss:$16 sps:$4 sm:$0xff]  }
  0x22   : > { %815 = vmatprep.subr.bf16.mxu0 %v2280_v35  ;;  %868 = vmatprep.subr.bf16.mxu1 %v2283_v36  ;;  %v2343_v22 = vld [vmem:[%s3033_s7 + $0x2c] ss:$16 sps:$4 sm:$0xff]   ;;  %v2341_v24 = vld [vmem:[%s3033_s7 + $0x28] ss:$16 sps:$4 sm:$0xff]   ;;  %v2346_v25 = vld [vmem:[%s3033_s7 + $0x44] ss:$16 sps:$4 sm:$0xff]  }
  0x23   : > { %841 = vmatprep.mubr.bf16.mxu0 %v2452_v2  ;;  %894 = vmatprep.mubr.bf16.mxu1 %v2452_v2  ;;  %v2349_v26 = vld [vmem:[%s3033_s7 + $0x4c] ss:$16 sps:$4 sm:$0xff]   ;;  %v2344_v27 = vld [vmem:[%s3033_s7 + $0x40] ss:$16 sps:$4 sm:$0xff]   ;;  %v2347_v28 = vld [vmem:[%s3033_s7 + $0x48] ss:$16 sps:$4 sm:$0xff]  }
  0x24   : > { %v2352_v29 = vld [vmem:[%s3033_s7 + $0x64] ss:$16 sps:$4 sm:$0xff]   ;;  %v2350_v30 = vld [vmem:[%s3033_s7 + $0x60] ss:$16 sps:$4 sm:$0xff]   ;;  %v2353_v31 = vld [vmem:[%s3033_s7 + $0x68] ss:$16 sps:$4 sm:$0xff]  }
  0x25   : > { %816 = vmatpush1.bf16.msra.mxu0 %v2278_v37  ;;  %869 = vmatpush1.bf16.msra.mxu1 %v2281_v38  ;;  %v2358_v32 = vld [vmem:[%s3033_s7 + $0x84] ss:$16 sps:$4 sm:$0xff]   ;;  %v2361_v33 = vld [vmem:[%s3033_s7 + $0x8c] ss:$16 sps:$4 sm:$0xff]   ;;  %v2356_v34 = vld [vmem:[%s3033_s7 + $0x80] ss:$16 sps:$4 sm:$0xff]  }
  0x26   : > { %1113 = vmatprep.subr.bf16.mxu0 %v2286_v41  ;;  %1166 = vmatprep.subr.bf16.mxu1 %v2289_v42  ;;  %v2359_v35 = vld [vmem:[%s3033_s7 + $0x88] ss:$16 sps:$4 sm:$0xff]   ;;  %v2364_v36 = vld [vmem:[%s3033_s7 + $0xa4] ss:$16 sps:$4 sm:$0xff]   ;;  %v2367_v37 = vld [vmem:[%s3033_s7 + $0xac] ss:$16 sps:$4 sm:$0xff]  }
  0x27   : > { %v2362_v38 = vld [vmem:[%s3033_s7 + $0xa0] ss:$16 sps:$4 sm:$0xff]   ;;  %v2365_v39 = vld [vmem:[%s3033_s7 + $0xa8] ss:$16 sps:$4 sm:$0xff]   ;;  %v2370_v42 = vld [vmem:[%s3033_s7 + $0xc4] ss:$16 sps:$4 sm:$0xff]  }
  0x28   : > { %2056 = vmatmul.mubr.msk.bf16.vlgmr.msra.gmra.mrb[0].mxu0 %vm610_vm0, %v490_v43  ;;  %2058 = vmatmul.mubr.msk.bf16.vlgmr.msra.gmra.mrb[0].mxu1 %vm610_vm0, %v490_v43  ;;  %v917_v40 = vld [vmem:[%s2748_s20 + $0x10] sm:$0xff]  ;;  %v918_v41 = vld [vmem:[%s2748_s20 + $0x18] sm:$0xff]  ;;  %s2844_s20 = scalar_lea.vmem %s3029_s3, %s2161_s27 }
  0x29   : > { %1114 = vmatpush1.bf16.msra.mxu0 %v2284_v44  ;;  %1167 = vmatpush1.bf16.msra.mxu1 %v2287_v45  ;;  %v920_v43 = vpack.c.bf16 %v918_v41, %v917_v40  ;;  %v2373_v44 = vld [vmem:[%s3033_s7 + $0xcc] ss:$16 sps:$4 sm:$0xff]   ;;  %v2368_v45 = vld [vmem:[%s3033_s7 + $0xc0] ss:$16 sps:$4 sm:$0xff]   ;;  %v2383_v57 = vld [vmem:[%s3033_s7 + $0x108] ss:$16 sps:$4 sm:$0xff]  }
  0x2a   : > { %1115 = vmatprep.subr.bf16.mxu0 %v2292_v46  ;;  %1168 = vmatprep.subr.bf16.mxu1 %v2295_v47  ;;  %v2371_v46 = vld [vmem:[%s3033_s7 + $0xc8] ss:$16 sps:$4 sm:$0xff]   ;;  %v2376_v47 = vld [vmem:[%s3033_s7 + $0xe4] ss:$16 sps:$4 sm:$0xff]   ;;  %v2380_v56 = vld [vmem:[%s3033_s7 + $0x100] ss:$16 sps:$4 sm:$0xff]  }
  0x2b   : > { %851 = vmatprep.mubr.bf16.mxu0 %v2452_v2  ;;  %904 = vmatprep.mubr.bf16.mxu1 %v2452_v2  ;;  %v2413_v14 = vld [vmem:[%s3033_s7 + $0x1a8] ss:$16 sps:$4 sm:$0xff]   ;;  %v2418_v15 = vld [vmem:[%s3033_s7 + $0x1c4] ss:$16 sps:$4 sm:$0xff]  }
  0x2d   : > { %1116 = vmatpush1.bf16.msra.mxu0 %v2290_v48  ;;  %1169 = vmatpush1.bf16.msra.mxu1 %v2293_v49  ;;  %v2379_v48 = vld [vmem:[%s3033_s7 + $0xec] ss:$16 sps:$4 sm:$0xff]  }
  0x2e   : > { %1117 = vmatprep.subr.bf16.mxu0 %v2298_v50  ;;  %1170 = vmatprep.subr.bf16.mxu1 %v2301_v51  ;;  %v1236_v49 = vld [vmem:[%s2844_s20 + $0x8] sm:$0xff]  ;;  %v1238_v50 = vld [vmem:[%s2844_s20 + $0x18] sm:$0xff] }
  0x2f   : > { %v1244_v51 = vpack.c.bf16 %v1238_v50, %v1236_v49 }
  0x30   : > { %2057 = vmatmul.mubr.msk.bf16.gmra.mrb[4].mxu0 %vm610_vm0, %v491_v60  ;;  %2059 = vmatmul.mubr.msk.bf16.gmra.mrb[4].mxu1 %vm610_vm0, %v491_v60  ;;  %v2386_v60 = vld [vmem:[%s3033_s7 + $0x120] ss:$16 sps:$4 sm:$0xff]  }
  0x31   : > { %1118 = vmatpush1.bf16.msra.mxu0 %v2296_v52  ;;  %1171 = vmatpush1.bf16.msra.mxu1 %v2299_v53  ;;  %v2374_v52 = vld [vmem:[%s3033_s7 + $0xe0] ss:$16 sps:$4 sm:$0xff]   ;;  %v2377_v53 = vld [vmem:[%s3033_s7 + $0xe8] ss:$16 sps:$4 sm:$0xff]  }
  0x32   : > { %1119 = vmatprep.subr.bf16.mxu0 %v2304_v54  ;;  %1172 = vmatprep.subr.bf16.mxu1 %v2307_v55  ;;  %v2382_v54 = vld [vmem:[%s3033_s7 + $0x104] ss:$16 sps:$4 sm:$0xff]   ;;  %v2385_v55 = vld [vmem:[%s3033_s7 + $0x10c] ss:$16 sps:$4 sm:$0xff]  }
  0x33   : > { %1145 = vmatprep.mubr.bf16.mxu0 %v2452_v2  ;;  %1198 = vmatprep.mubr.bf16.mxu1 %v2452_v2 }
  0x35   : > { %1120 = vmatpush1.bf16.msra.mxu0 %v2302_v58  ;;  %1173 = vmatpush1.bf16.msra.mxu1 %v2305_v59  ;;  %v2388_v58 = vld [vmem:[%s3033_s7 + $0x124] ss:$16 sps:$4 sm:$0xff]   ;;  %v2391_v59 = vld [vmem:[%s3033_s7 + $0x12c] ss:$16 sps:$4 sm:$0xff]  }
  0x36   : > { %1121 = vmatprep.subr.bf16.mxu0 %v2310_v61  ;;  %1174 = vmatprep.subr.bf16.mxu1 %v2313_v62  ;;  %v2389_v61 = vld [vmem:[%s3033_s7 + $0x128] ss:$16 sps:$4 sm:$0xff]   ;;  %v2394_v62 = vld [vmem:[%s3033_s7 + $0x144] ss:$16 sps:$4 sm:$0xff]  }
  0x39   : > { %1122 = vmatpush1.bf16.msra.mxu0 %v2308_v63  ;;  %1175 = vmatpush1.bf16.msra.mxu1 %v2311_v0  ;;  %v2397_v63 = vld [vmem:[%s3033_s7 + $0x14c] ss:$16 sps:$4 sm:$0xff]   ;;  %v2392_v0 = vld [vmem:[%s3033_s7 + $0x140] ss:$16 sps:$4 sm:$0xff]  }
  0x3a   : > { %1123 = vmatprep.subr.bf16.mxu0 %v2316_v1  ;;  %1176 = vmatprep.subr.bf16.mxu1 %v2319_v3  ;;  %v2395_v1 = vld [vmem:[%s3033_s7 + $0x148] ss:$16 sps:$4 sm:$0xff]   ;;  %v2400_v3 = vld [vmem:[%s3033_s7 + $0x164] ss:$16 sps:$4 sm:$0xff]  }
  0x3d   : > { %1124 = vmatpush1.bf16.msra.mxu0 %v2314_v4  ;;  %1177 = vmatpush1.bf16.msra.mxu1 %v2317_v5  ;;  %v2403_v4 = vld [vmem:[%s3033_s7 + $0x16c] ss:$16 sps:$4 sm:$0xff]   ;;  %v2398_v5 = vld [vmem:[%s3033_s7 + $0x160] ss:$16 sps:$4 sm:$0xff]  }
  0x3e   : > { %1125 = vmatprep.subr.bf16.mxu0 %v2322_v6  ;;  %1178 = vmatprep.subr.bf16.mxu1 %v2325_v7  ;;  %v2401_v6 = vld [vmem:[%s3033_s7 + $0x168] ss:$16 sps:$4 sm:$0xff]   ;;  %v2406_v7 = vld [vmem:[%s3033_s7 + $0x184] ss:$16 sps:$4 sm:$0xff]  }
  0x41   : > { %1126 = vmatpush1.bf16.msra.mxu0 %v2320_v8  ;;  %1179 = vmatpush1.bf16.msra.mxu1 %v2323_v9  ;;  %v2409_v8 = vld [vmem:[%s3033_s7 + $0x18c] ss:$16 sps:$4 sm:$0xff]   ;;  %v2404_v9 = vld [vmem:[%s3033_s7 + $0x180] ss:$16 sps:$4 sm:$0xff]  }
  0x42   : > { %1127 = vmatprep.subr.bf16.mxu0 %v2328_v10  ;;  %1180 = vmatprep.subr.bf16.mxu1 %v2331_v11  ;;  %v2407_v10 = vld [vmem:[%s3033_s7 + $0x188] ss:$16 sps:$4 sm:$0xff]   ;;  %v2412_v11 = vld [vmem:[%s3033_s7 + $0x1a4] ss:$16 sps:$4 sm:$0xff]  }
  0x45   : > { %1128 = vmatpush1.bf16.msra.mxu0 %v2326_v12  ;;  %1181 = vmatpush1.bf16.msra.mxu1 %v2329_v13  ;;  %v2415_v12 = vld [vmem:[%s3033_s7 + $0x1ac] ss:$16 sps:$4 sm:$0xff]   ;;  %v2410_v13 = vld [vmem:[%s3033_s7 + $0x1a0] ss:$16 sps:$4 sm:$0xff]  }
  0x46   : > { %1631 = vmatprep.subr.bf16.mxu0 %v2334_v16  ;;  %1684 = vmatprep.subr.bf16.mxu1 %v2337_v17  ;;  %v2421_v16 = vld [vmem:[%s3033_s7 + $0x1cc] ss:$16 sps:$4 sm:$0xff]   ;;  %v2416_v17 = vld [vmem:[%s3033_s7 + $0x1c0] ss:$16 sps:$4 sm:$0xff]  }
  0x48   : > { %1146 = vmatmul.mubr.bf16.vlgmr.msra.gmra.mrb[0].mxu0 %v919_v18  ;;  %1199 = vmatmul.mubr.bf16.vlgmr.msra.gmra.mrb[0].mxu1 %v919_v18  ;;  %v2419_v18 = vld [vmem:[%s3033_s7 + $0x1c8] ss:$16 sps:$4 sm:$0xff]  }
  0x49   : > { %1632 = vmatpush1.bf16.msra.mxu0 %v2332_v19  ;;  %1685 = vmatpush1.bf16.msra.mxu1 %v2335_v20  ;;  %v2424_v19 = vld [vmem:[%s3033_s7 + $0x1e4] ss:$16 sps:$4 sm:$0xff]   ;;  %v2427_v20 = vld [vmem:[%s3033_s7 + $0x1ec] ss:$16 sps:$4 sm:$0xff]  }
  0x4a   : > { %1633 = vmatprep.subr.bf16.mxu0 %v2340_v21  ;;  %1686 = vmatprep.subr.bf16.mxu1 %v2343_v22  ;;  %v2422_v21 = vld [vmem:[%s3033_s7 + $0x1e0] ss:$16 sps:$4 sm:$0xff]   ;;  %v2425_v22 = vld [vmem:[%s3033_s7 + $0x1e8] ss:$16 sps:$4 sm:$0xff]  }
  0x4b   : > { %1155 = vmatprep.mubr.bf16.mxu0 %v2452_v2  ;;  %1208 = vmatprep.mubr.bf16.mxu1 %v2452_v2  ;;  %v2355_v2 = vld [vmem:[%s3033_s7 + $0x6c] ss:$16 sps:$4 sm:$0xff]  }
  0x4d   : > { %1634 = vmatpush1.bf16.msra.mxu0 %v2338_v23  ;;  %1687 = vmatpush1.bf16.msra.mxu1 %v2341_v24  ;;  %v1235_v23 = vld [vmem:[%s2844_s20] sm:$0xff]  ;;  %v1237_v24 = vld [vmem:[%s2844_s20 + $0x10] sm:$0xff] }
  0x4e   : > { %1635 = vmatprep.subr.bf16.mxu0 %v2346_v25  ;;  %1688 = vmatprep.subr.bf16.mxu1 %v2349_v26  ;;  %v1240_v25 = vld [vmem:[%s2844_s20 + $0x28] sm:$0xff]  ;;  %v1242_v26 = vld [vmem:[%s2844_s20 + $0x38] sm:$0xff] }
  0x50   : > { %1156 = vmatmul.mubr.bf16.gmra.mrb[4].mxu0 %v920_v43  ;;  %1209 = vmatmul.mubr.bf16.gmra.mrb[4].mxu1 %v920_v43 }
  0x51   : > { %1636 = vmatpush1.bf16.msra.mxu0 %v2344_v27  ;;  %1689 = vmatpush1.bf16.msra.mxu1 %v2347_v28  ;;  %v1243_v27 = vpack.c.bf16 %v1237_v24, %v1235_v23  ;;  %v1246_v28 = vpack.c.bf16 %v1242_v26, %v1240_v25 }
  0x52   : > { %1637 = vmatprep.subr.bf16.mxu0 %v2352_v29  ;;  %1690 = vmatprep.subr.bf16.mxu1 %v2355_v2  ;;  %v1239_v29 = vld [vmem:[%s2844_s20 + $0x20] sm:$0xff]  ;;  %v1241_v2 = vld [vmem:[%s2844_s20 + $0x30] sm:$0xff]  ;;  %s2162_s20 = sshll.u32 %s3041_s30, 7 }
  0x53   : > { %1663 = vmatprep.mubr.bf16.mxu0 %v1244_v51  ;;  %1716 = vmatprep.mubr.bf16.mxu1 %v1244_v51  ;;  %s2987_s15 = scalar_lea.vmem %s3035_s9, %s2162_s20 }
  0x55   : > { %1638 = vmatpush1.bf16.msra.mxu0 %v2350_v30  ;;  %1691 = vmatpush1.bf16.msra.mxu1 %v2353_v31  ;;  %v1245_v30 = vpack.c.bf16 %v1241_v2, %v1239_v29  ;;  %v1755_v31 = vlaneseq }
  0x56   : > { %1639 = vmatprep.subr.bf16.mxu0 %v2358_v32  ;;  %1692 = vmatprep.subr.bf16.mxu1 %v2361_v33 }
  0x57   : > { %v1756_v32 = vshrl.u32 %v1755_v31, 7 }
  0x59   : > { %1640 = vmatpush1.bf16.msra.mxu0 %v2356_v34  ;;  %1693 = vmatpush1.bf16.msra.mxu1 %v2359_v35  ;;  %v1757_v33 = vsub.s32 0, %v1756_v32  ;;  %v1765_v34 = vsub.s32 2, %v1756_v32  ;;  %v1753_v35 = vld [vmem:[%s3034_s8] sm:$0xf] }
  0x5a   : > { %1641 = vmatprep.subr.bf16.mxu0 %v2364_v36  ;;  %1694 = vmatprep.subr.bf16.mxu1 %v2367_v37  ;;  %v1761_v36 = vsub.s32 1, %v1756_v32  ;;  %v1769_v37 = vsub.s32 3, %v1756_v32 }
  0x5c   : > { %v2975_v40 = vrot.slane %v1753_v35, %v1761_v36  ;;  %v2977_v41 = vrot.slane %v1753_v35, %v1769_v37 }
  0x5d   : > { %1642 = vmatpush1.bf16.msra.mxu0 %v2362_v38  ;;  %1695 = vmatpush1.bf16.msra.mxu1 %v2365_v39  ;;  %v2971_v38 = vrot.slane %v1753_v35, %v1757_v33  ;;  %v2973_v39 = vrot.slane %v1753_v35, %v1765_v34 }
  0x5e   : > { %1643 = vmatprep.subr.bf16.mxu0 %v2370_v42  ;;  %1696 = vmatprep.subr.bf16.mxu1 %v2373_v44 }
  0x61   : > { %1644 = vmatpush1.bf16.msra.mxu0 %v2368_v45  ;;  %1697 = vmatpush1.bf16.msra.mxu1 %v2371_v46 }
  0x62   : > { %1645 = vmatprep.subr.bf16.mxu0 %v2376_v47  ;;  %1698 = vmatprep.subr.bf16.mxu1 %v2379_v48 }
  0x65   : > { %1646 = vmatpush1.bf16.msra.mxu0 %v2374_v52  ;;  %1699 = vmatpush1.bf16.msra.mxu1 %v2377_v53 }
  0x66   : > { %1647 = vmatprep.subr.bf16.mxu0 %v2382_v54  ;;  %1700 = vmatprep.subr.bf16.mxu1 %v2385_v55 }
  0x69   : > { %1648 = vmatpush1.bf16.msra.mxu0 %v2380_v56  ;;  %1701 = vmatpush1.bf16.msra.mxu1 %v2383_v57 }
  0x6a   : > { %1649 = vmatprep.subr.bf16.mxu0 %v2388_v58  ;;  %1702 = vmatprep.subr.bf16.mxu1 %v2391_v59 }
  0x6d   : > { %1650 = vmatpush1.bf16.msra.mxu0 %v2386_v60  ;;  %1703 = vmatpush1.bf16.msra.mxu1 %v2389_v61 }
  0x6e   : > { %1651 = vmatprep.subr.bf16.mxu0 %v2394_v62  ;;  %1704 = vmatprep.subr.bf16.mxu1 %v2397_v63 }
  0x71   : > { %1652 = vmatpush1.bf16.msra.mxu0 %v2392_v0  ;;  %1705 = vmatpush1.bf16.msra.mxu1 %v2395_v1 }
  0x72   : > { %1653 = vmatprep.subr.bf16.mxu0 %v2400_v3  ;;  %1706 = vmatprep.subr.bf16.mxu1 %v2403_v4 }
  0x75   : > { %1654 = vmatpush1.bf16.msra.mxu0 %v2398_v5  ;;  %1707 = vmatpush1.bf16.msra.mxu1 %v2401_v6 }
  0x76   : > { %1655 = vmatprep.subr.bf16.mxu0 %v2406_v7  ;;  %1708 = vmatprep.subr.bf16.mxu1 %v2409_v8 }
  0x79   : > { %1656 = vmatpush1.bf16.msra.mxu0 %v2404_v9  ;;  %1709 = vmatpush1.bf16.msra.mxu1 %v2407_v10 }
  0x7a   : > { %1657 = vmatprep.subr.bf16.mxu0 %v2412_v11  ;;  %1710 = vmatprep.subr.bf16.mxu1 %v2415_v12 }
  0x7d   : > { %1658 = vmatpush1.bf16.msra.mxu0 %v2410_v13  ;;  %1711 = vmatpush1.bf16.msra.mxu1 %v2413_v14 }
  0x7e   : > { %1659 = vmatprep.subr.bf16.mxu0 %v2418_v15  ;;  %1712 = vmatprep.subr.bf16.mxu1 %v2421_v16 }
  0x81   : > { %1660 = vmatpush1.bf16.msra.mxu0 %v2416_v17  ;;  %1713 = vmatpush1.bf16.msra.mxu1 %v2419_v18 }
  0x82   : > { %1661 = vmatprep.subr.bf16.mxu0 %v2424_v19  ;;  %1714 = vmatprep.subr.bf16.mxu1 %v2427_v20 }
  0x85   : > { %1662 = vmatpush1.bf16.msra.mxu0 %v2422_v21  ;;  %1715 = vmatpush1.bf16.msra.mxu1 %v2425_v22 }
  0x88   : > { %1664 = vmatmul.mubr.bf16.vlgmr.msra.gmra.mrb[0].mxu0 %v1243_v27  ;;  %1717 = vmatmul.mubr.bf16.vlgmr.msra.gmra.mrb[0].mxu1 %v1243_v27 }
  0x89   : > { %1673 = vmatprep.mubr.bf16.mxu0 %v1246_v28  ;;  %1726 = vmatprep.mubr.bf16.mxu1 %v1246_v28 }
  0x90   : > { %1674 = vmatmul.mubr.bf16.gmra.mrb[4].mxu0 %v1245_v30  ;;  %1727 = vmatmul.mubr.bf16.gmra.mrb[4].mxu1 %v1245_v30 }
 0x15b   : > { %v1665_v42 = vpop.f32.mrb[0].mxu0  ;;  %v1718_v43 = vpop.f32.mrb[0].mxu1 }
 0x15c   : > { %v1775_v44 = vadd.f32 %v2971_v38, %v1665_v42  ;;  %v1777_v45 = vadd.f32 %v2973_v39, %v1718_v43  ;;  %v1667_v46 = vpop.f32.mrb[1].mxu0  ;;  %v1720_v47 = vpop.f32.mrb[1].mxu1 }
 0x15d   : > { %v1776_v48 = vadd.f32 %v2975_v40, %v1667_v46  ;;  %v1778_v49 = vadd.f32 %v2977_v41, %v1720_v47  ;;  %v1669_v50 = vpop.f32.mrb[2].mxu0  ;;  %v1722_v51 = vpop.f32.mrb[2].mxu1 }
 0x15e   : > { %vm1791_vm1 = vcmp.ge.f32.partialorder %v1775_v44, 0.0  ;;  %v1807_v52 = vmul.f32 0.2, %v1775_v44  ;;  %vm1793_vm2 = vcmp.ge.f32.partialorder %v1777_v45, 0.0  ;;  %v1809_v53 = vmul.f32 0.2, %v1777_v45 }
 0x15f   : > { %vm1792_vm3 = vcmp.ge.f32.partialorder %v1776_v48, 0.0  ;;  %v1808_v54 = vmul.f32 0.2, %v1776_v48  ;;  %vm1794_vm4 = vcmp.ge.f32.partialorder %v1778_v49, 0.0  ;;  %v1810_v55 = vmul.f32 0.2, %v1778_v49 }
 0x160   : > { %v1823_v56 = vsel %vm1791_vm1, %v1775_v44, %v1807_v52  ;;  %v1825_v57 = vsel %vm1793_vm2, %v1777_v45, %v1809_v53  ;;  %v1779_v58 = vadd.f32 %v2971_v38, %v1669_v50  ;;  %v1781_v59 = vadd.f32 %v2973_v39, %v1722_v51  ;;  %v1671_v60 = vpop.f32.mrb[3].mxu0  ;;  %v1724_v61 = vpop.f32.mrb[3].mxu1 }
 0x161   : > { %1839 = vst [vmem:[%s2987_s15] sm:$0xff] %v1823_v56  ;;  %1841 = vst [vmem:[%s2987_s15 + $0x10] sm:$0xff] %v1825_v57  ;;  %v1824_v62 = vsel %vm1792_vm3, %v1776_v48, %v1808_v54  ;;  %v1826_v63 = vsel %vm1794_vm4, %v1778_v49, %v1810_v55  ;;  %v1780_v0 = vadd.f32 %v2975_v40, %v1671_v60 }
 0x162   : > { %v1782_v1 = vadd.f32 %v2977_v41, %v1724_v61  ;;  %1840 = vst [vmem:[%s2987_s15 + $0x8] sm:$0xff] %v1824_v62  ;;  %1842 = vst [vmem:[%s2987_s15 + $0x18] sm:$0xff] %v1826_v63  ;;  %vm1795_vm5 = vcmp.ge.f32.partialorder %v1779_v58, 0.0  ;;  %v1811_v3 = vmul.f32 0.2, %v1779_v58  ;;  %vm1797_vm6 = vcmp.ge.f32.partialorder %v1781_v59, 0.0 }
 0x163   : > { %v1813_v4 = vmul.f32 0.2, %v1781_v59  ;;  %vm1796_vm7 = vcmp.ge.f32.partialorder %v1780_v0, 0.0  ;;  %v1812_v5 = vmul.f32 0.2, %v1780_v0  ;;  %v1675_v9 = vpop.f32.mrb[4].mxu0 }
 0x164   : > { %vm1798_vm8 = vcmp.ge.f32.partialorder %v1782_v1, 0.0  ;;  %v1814_v6 = vmul.f32 0.2, %v1782_v1  ;;  %v1827_v7 = vsel %vm1795_vm5, %v1779_v58, %v1811_v3  ;;  %v1728_v10 = vpop.f32.mrb[4].mxu1  ;;  %v1783_v13 = vadd.f32 %v2971_v38, %v1675_v9  ;;  %v1677_v15 = vpop.f32.mrb[5].mxu0 }
 0x165   : > { %v1829_v8 = vsel %vm1797_vm6, %v1781_v59, %v1813_v4  ;;  %1843 = vst [vmem:[%s2987_s15 + $0x20] sm:$0xff] %v1827_v7  ;;  %v1828_v11 = vsel %vm1796_vm7, %v1780_v0, %v1812_v5  ;;  %v1785_v14 = vadd.f32 %v2973_v39, %v1728_v10  ;;  %v1730_v16 = vpop.f32.mrb[5].mxu1  ;;  %v1784_v17 = vadd.f32 %v2975_v40, %v1677_v15  ;;  %v1679_v19 = vpop.f32.mrb[6].mxu0 }
 0x166   : > { %1845 = vst [vmem:[%s2987_s15 + $0x30] sm:$0xff] %v1829_v8  ;;  %v1830_v12 = vsel %vm1798_vm8, %v1782_v1, %v1814_v6  ;;  %1844 = vst [vmem:[%s2987_s15 + $0x28] sm:$0xff] %v1828_v11  ;;  %v1786_v18 = vadd.f32 %v2977_v41, %v1730_v16  ;;  %v1732_v20 = vpop.f32.mrb[6].mxu1  ;;  %vm1799_vm9 = vcmp.ge.f32.partialorder %v1783_v13, 0.0  ;;  %v1815_v21 = vmul.f32 0.2, %v1783_v13 }
 0x167   : > { %1846 = vst [vmem:[%s2987_s15 + $0x38] sm:$0xff] %v1830_v12  ;;  %vm1801_vm10 = vcmp.ge.f32.partialorder %v1785_v14, 0.0  ;;  %v1817_v22 = vmul.f32 0.2, %v1785_v14  ;;  %vm1800_vm11 = vcmp.ge.f32.partialorder %v1784_v17, 0.0  ;;  %v1787_v27 = vadd.f32 %v2971_v38, %v1679_v19  ;;  %v1681_v29 = vpop.f32.mrb[7].mxu0 }
 0x168   : > { %v1816_v23 = vmul.f32 0.2, %v1784_v17  ;;  %vm1802_vm12 = vcmp.ge.f32.partialorder %v1786_v18, 0.0  ;;  %v1818_v24 = vmul.f32 0.2, %v1786_v18  ;;  %v1831_v25 = vsel %vm1799_vm9, %v1783_v13, %v1815_v21  ;;  %v1734_v2 = vpop.f32.mrb[7].mxu1 }
 0x169   : > { %v1833_v26 = vsel %vm1801_vm10, %v1785_v14, %v1817_v22  ;;  %v1789_v28 = vadd.f32 %v2973_v39, %v1732_v20  ;;  %1847 = vst [vmem:[%s2987_s15 + $0x40] sm:$0xff] %v1831_v25  ;;  %v1788_v32 = vadd.f32 %v2975_v40, %v1681_v29  ;;  %v1790_v33 = vadd.f32 %v2977_v41, %v1734_v2 }
 0x16a   : > { %1849 = vst [vmem:[%s2987_s15 + $0x50] sm:$0xff] %v1833_v26  ;;  %v1832_v30 = vsel %vm1800_vm11, %v1784_v17, %v1816_v23  ;;  %v1834_v31 = vsel %vm1802_vm12, %v1786_v18, %v1818_v24  ;;  %vm1803_vm13 = vcmp.ge.f32.partialorder %v1787_v27, 0.0  ;;  %v1819_v34 = vmul.f32 0.2, %v1787_v27 }
 0x16b   : > { %1848 = vst [vmem:[%s2987_s15 + $0x48] sm:$0xff] %v1832_v30  ;;  %1850 = vst [vmem:[%s2987_s15 + $0x58] sm:$0xff] %v1834_v31  ;;  %vm1805_vm14 = vcmp.ge.f32.partialorder %v1789_v28, 0.0  ;;  %v1821_v35 = vmul.f32 0.2, %v1789_v28  ;;  %vm1804_vm15 = vcmp.ge.f32.partialorder %v1788_v32, 0.0 }
 0x16c   : > { %v1820_v36 = vmul.f32 0.2, %v1788_v32  ;;  %vm1806_vm0 = vcmp.ge.f32.partialorder %v1790_v33, 0.0  ;;  %v1822_v37 = vmul.f32 0.2, %v1790_v33  ;;  %v1835_v38 = vsel %vm1803_vm13, %v1787_v27, %v1819_v34 }
 0x16d   : > { %v1837_v39 = vsel %vm1805_vm14, %v1789_v28, %v1821_v35  ;;  %1851 = vst [vmem:[%s2987_s15 + $0x60] sm:$0xff] %v1835_v38 }
 0x16e   : > { %1853 = vst [vmem:[%s2987_s15 + $0x70] sm:$0xff] %v1837_v39  ;;  %v1836_v42 = vsel %vm1804_vm15, %v1788_v32, %v1820_v36  ;;  %v1838_v40 = vsel %vm1806_vm0, %v1790_v33, %v1822_v37 }
 0x16f   : > { %1852 = vst [vmem:[%s2987_s15 + $0x68] sm:$0xff] %v1836_v42  ;;  %1854 = vst [vmem:[%s2987_s15 + $0x78] sm:$0xff] %v1838_v40 }
 0x170 PF: > { %s19_s11 = sadd.s32 1, %s2450_s11   ;;  %s3036_s30 = smov %s2446_s10 }
 0x171   : > { %p16_p5 = scmp.ge.s32.totalorder %s19_s11, 4   ;;  %s3037_s10 = smov %s3039_s12 }
 0x173   :  { %18 = sbr.rel (!%p16_p5) target bundleno = 2 (0x2), region = 95 }

// kernel: _lambda_.27
= control target key start
LH: loop header
LB: loop body
LE: loop exit
PB: predicated region body
PF: predicated region fallthrough
CT: control target
= control target key end

     0   :  { %s3737_s14 = smov 0   ;;  %s6486_s0 = inlined_call_operand.vmem [shape: f32[2,32,512], index: 0, kind: input, shape index: {}]   ;;  %s6487_s1 = inlined_call_operand.vmem [shape: f32[63,1], index: 1, kind: input, shape index: {}]   ;;  %s6488_s2 = inlined_call_operand.<no memory space> [shape: f32[1,1], index: 2, kind: input, shape index: {}]   ;;  %s6489_s3 = inlined_call_operand.vmem [shape: f32[2,1,512], index: 3, kind: output, shape index: {}]  }
   0x1   :  { %v8_v0 = vstv %s6488_s2 }
   0x2   :  { %9 = vst [vmem:[#allocation2] sm:$0x1] %v8_v0 }
   0x3 LB: > { %s3599_s15 = sadd.s32 4294967295, %s3709_s14   ;;  %p3603_p0 = scmp.ge.s32.totalorder %s3709_s14, 1  ;;  %s3709_s14 = sphi %s3737_s14, %s15_s14  }
   0x4   : > { %p139_p1 = scmp.lt.s32.totalorder %s3709_s14, 3 }
   0x6   : > { %p140_p2 = pnand %p3603_p0, %p139_p1 }
   0x8   : > { %143 = sbr.rel (%p140_p2) target bundleno = 720 (0x2d0), region = 32 }
   0xf   : > { %v189_v1 = vld [vmem:[%s6487_s1 + $0x10] sm:$0xff]  ;;  %v187_v2 = vld [vmem:[%s6487_s1] sm:$0xff]  ;;  %p162_p3 = scmp.lt.s32.totalorder %s3599_s15, 1  ;;  %v3711_v3 = vmov 0   ;;  %v190_v4 = vld [vmem:[%s6487_s1 + $0x18] sm:$0xff]  ;;  %vm786_vm0 = vcmask 1043456  }
  0x10   : > { %3654 = vset.pattern.permute.xlu1 %v3711_v3  ;;  %3653 = vset.pattern.permute.xlu0 %v3711_v3  ;;  %v188_v5 = vld [vmem:[%s6487_s1 + $0x8] sm:$0xff]  ;;  %v191_v7 = vld [vmem:[%s6487_s1 + $0x20] sm:$0xff]  ;;  %v194_v26 = vld [vmem:[%s6487_s1 + $0x38] sm:$0x7f]  ;;  %vm446_vm1 = vcmask 1041409   ;;  %vm458_vm2 = vcmask 1041408  }
  0x11   : > { %3078 = vperm.xlu1 %3654, %v189_v1   ;;  %289 = vperm.xlu0 %3653, %v187_v2   ;;  %s7284_s15 = smov (!%p162_p3, %s3599_s15), 1  ;;  %v192_v6 = vld [vmem:[%s6487_s1 + $0x28] sm:$0xff]  ;;  %v193_v32 = vld [vmem:[%s6487_s1 + $0x30] sm:$0xff]  ;;  %v195_v53 = vld [vmem:[#allocation2] sm:$0x1]  ;;  %vm759_vm3 = vcmask 1042434  }
  0x12   : > { %s3641_s23 = sshll.u32 %s7284_s15, 7  ;;  %vm762_vm4 = vcmask 1043459   ;;  %vm1502_vm5 = vcmask 1044484   ;;  %vm1505_vm6 = vcmask 1045509   ;;  %vm1508_vm7 = vcmask 1046534   ;;  %s3606_s8 = sshll.u32 %s7284_s15, 2 }
  0x13   : > { %s3766_s28 = scalar_lea.vmem %s6486_s0, %s3641_s23  ;;  %vm1511_vm8 = vcmask 1047559   ;;  %vm3442_vm9 = vcmask 1040384   ;;  %s170_s11 = scalar_lea.vmem %s6489_s3, %s3606_s8 }
  0x14   : > { %v3772_v8 = vld [vmem:[%s3766_s28] sm:$0xff]  ;;  %v3775_v9 = vld [vmem:[%s3766_s28 + $0x8] sm:$0xff]  ;;  %v3778_v10 = vld [vmem:[%s3766_s28 + $0x10] sm:$0xff] }
  0x15   : > { %3082 = vperm.xlu1 %3654, %v190_v4   ;;  %1414 = vperm.xlu0 %3653, %v188_v5   ;;  %6650 = vst [vmem:[#allocation3_spill] sm:$0xff] %v3772_v8  ;;  %6651 = vst [vmem:[#allocation4_spill] sm:$0xff] %v3775_v9  ;;  %v3781_v11 = vld [vmem:[%s3766_s28 + $0x20] sm:$0xff]  ;;  %v3784_v12 = vld [vmem:[%s3766_s28 + $0x28] sm:$0xff] }
  0x16   : > { %6652 = vst [vmem:[#allocation5_spill] sm:$0xff] %v3778_v10  ;;  %6653 = vst [vmem:[#allocation6_spill] sm:$0xff] %v3781_v11  ;;  %v3787_v13 = vld [vmem:[%s3766_s28 + $0x18] sm:$0xff]  ;;  %v3790_v14 = vld [vmem:[%s3766_s28 + $0x30] sm:$0xff]  ;;  %v3797_v16 = vmax.f32 %v3772_v8, %v3781_v11  ;;  %v3801_v17 = vmax.f32 %v3775_v9, %v3784_v12  ;;  %v3805_v18 = vadd.f32 %v3781_v11, %v3772_v8 }
  0x17   : > { %6654 = vst [vmem:[#allocation7_spill] sm:$0xff] %v3784_v12  ;;  %6655 = vst [vmem:[#allocation8_spill] sm:$0xff] %v3787_v13  ;;  %v3793_v15 = vld [vmem:[%s3766_s28 + $0x38] sm:$0xff]  ;;  %v3809_v19 = vadd.f32 %v3784_v12, %v3775_v9  ;;  %v3812_v20 = vld [vmem:[%s3766_s28 + $0x40] sm:$0xff]  ;;  %v3819_v22 = vmax.f32 %v3778_v10, %v3790_v14  ;;  %v3827_v24 = vadd.f32 %v3790_v14, %v3778_v10 }
  0x18   : > { %6656 = vst [vmem:[#allocation9_spill] sm:$0xff] %v3790_v14  ;;  %6657 = vst [vmem:[#allocation10_spill] sm:$0xff] %v3793_v15  ;;  %v3815_v21 = vld [vmem:[%s3766_s28 + $0x48] sm:$0xff]  ;;  %v3823_v23 = vmax.f32 %v3787_v13, %v3793_v15  ;;  %v3831_v25 = vadd.f32 %v3793_v15, %v3787_v13  ;;  %v3837_v27 = vld [vmem:[%s3766_s28 + $0x50] sm:$0xff]  ;;  %v207_v29 = vmax.f32 %v3797_v16, %v3812_v20 }
  0x19   : > { %6658 = vst [vmem:[#allocation11_spill] sm:$0xff] %v3812_v20  ;;  %6659 = vst [vmem:[#allocation12_spill] sm:$0xff] %v3815_v21  ;;  %3432 = vperm.xlu1 %3654, %v192_v6   ;;  %3428 = vperm.xlu0 %3653, %v191_v7   ;;  %v3840_v28 = vld [vmem:[%s3766_s28 + $0x58] sm:$0xff]  ;;  %v216_v30 = vmax.f32 %v3801_v17, %v3815_v21  ;;  %v243_v31 = vadd.f32 %v3805_v18, %v3812_v20  ;;  %v3852_v33 = vld [vmem:[%s3766_s28 + $0x60] sm:$0xff] }
  0x1a   : > { %6660 = vst [vmem:[#allocation13_spill] sm:$0xff] %v3837_v27  ;;  %6661 = vst [vmem:[#allocation14_spill] sm:$0xff] %v3840_v28  ;;  %v3855_v34 = vld [vmem:[%s3766_s28 + $0x68] sm:$0xff]  ;;  %v225_v35 = vmax.f32 %v3819_v22, %v3837_v27  ;;  %v234_v36 = vmax.f32 %v3823_v23, %v3840_v28  ;;  %v252_v37 = vadd.f32 %v3809_v19, %v3815_v21  ;;  %v3866_v39 = vld [vmem:[%s3766_s28 + $0x70] sm:$0xff] }
  0x1b   : > { %6662 = vst [vmem:[#allocation15_spill] sm:$0xff] %v3852_v33  ;;  %6663 = vst [vmem:[#allocation16_spill] sm:$0xff] %v3855_v34  ;;  %v261_v38 = vadd.f32 %v3827_v24, %v3837_v27  ;;  %v3869_v40 = vld [vmem:[%s3766_s28 + $0x78] sm:$0xff]  ;;  %v208_v41 = vmax.f32 %v207_v29, %v3852_v33  ;;  %v217_v42 = vmax.f32 %v216_v30, %v3855_v34 }
  0x1c   : > { %6664 = vst [vmem:[#allocation17_spill] sm:$0xff] %v3866_v39  ;;  %6665 = vst [vmem:[#allocation18_spill] sm:$0xff] %v3869_v40  ;;  %v244_v43 = vadd.f32 %v243_v31, %v3852_v33  ;;  %v270_v44 = vadd.f32 %v3831_v25, %v3840_v28  ;;  %v226_v45 = vmax.f32 %v225_v35, %v3866_v39 }
  0x1d   : > { %v235_v46 = vmax.f32 %v234_v36, %v3869_v40  ;;  %v253_v47 = vadd.f32 %v252_v37, %v3855_v34  ;;  %v262_v48 = vadd.f32 %v261_v38, %v3866_v39  ;;  %3440 = vperm.xlu1 %3654, %v194_v26   ;;  %3436 = vperm.xlu0 %3653, %v193_v32   ;;  %v209_v49 = vrot.slane %v208_v41, 4 }
  0x1e   : > { %v218_v50 = vrot.slane %v217_v42, 4  ;;  %v245_v51 = vrot.slane %v244_v43, 4  ;;  %v271_v52 = vadd.f32 %v270_v44, %v3869_v40  ;;  %v227_v54 = vrot.slane %v226_v45, 4 }
  0x1f   : > { %v236_v55 = vrot.slane %v235_v46, 4  ;;  %v254_v56 = vrot.slane %v253_v47, 4  ;;  %v263_v57 = vrot.slane %v262_v48, 4  ;;  %v210_v58 = vmax.f32 %v208_v41, %v209_v49 }
  0x20   : > { %v246_v59 = vadd.f32 %v245_v51, %v244_v43  ;;  %v219_v62 = vmax.f32 %v217_v42, %v218_v50  ;;  %v272_v0 = vrot.slane %v271_v52, 4  ;;  %v228_v1 = vmax.f32 %v226_v45, %v227_v54 }
  0x21   : > { %v255_v60 = vadd.f32 %v254_v56, %v253_v47  ;;  %v264_v61 = vadd.f32 %v263_v57, %v262_v48  ;;  %198 = vperm.xlu0 %3653, %v195_v53   ;;  %v237_v2 = vmax.f32 %v235_v46, %v236_v55  ;;  %v211_v4 = vrot.slane %v210_v58, 2 }
  0x22   : > { %v247_v63 = vrot.slane %v246_v59, 2  ;;  %v273_v7 = vadd.f32 %v272_v0, %v271_v52  ;;  %v220_v26 = vrot.slane %v219_v62, 2  ;;  %v229_v30 = vrot.slane %v228_v1, 2 }
  0x23   : > { %v256_v3 = vrot.slane %v255_v60, 2  ;;  %v265_v6 = vrot.slane %v264_v61, 2  ;;  %v238_v31 = vrot.slane %v237_v2, 2  ;;  %v212_v35 = vmax.f32 %v210_v58, %v211_v4 }
  0x24   : > { %v248_v5 = vadd.f32 %v247_v63, %v246_v59  ;;  %v274_v29 = vrot.slane %v273_v7, 2  ;;  %v304_v41 = vrot.slane %v3797_v16, 4  ;;  %v6490_v42 = vlaneseq }
  0x25   : > { %v257_v32 = vadd.f32 %v256_v3, %v255_v60  ;;  %v266_v37 = vadd.f32 %v265_v6, %v264_v61  ;;  %v221_v43 = vmax.f32 %v219_v62, %v220_v26  ;;  %v230_v44 = vmax.f32 %v228_v1, %v229_v30 }
  0x26   : > { %v249_v36 = vrot.slane %v248_v5, 1  ;;  %v275_v38 = vadd.f32 %v274_v29, %v273_v7  ;;  %v239_v45 = vmax.f32 %v237_v2, %v238_v31  ;;  %v213_v47 = vrot.slane %v212_v35, 1 }
  0x27   : > { %v258_v46 = vrot.slane %v257_v32, 1  ;;  %v267_v49 = vrot.slane %v266_v37, 1  ;;  %v305_v51 = vmax.f32 %v3797_v16, %v304_v41  ;;  %v3884_v52 = vshrl.u32 %v6490_v42, 7 }
  0x28   : > { %v250_v48 = vadd.f32 %v249_v36, %v248_v5  ;;  %v276_v50 = vrot.slane %v275_v38, 1  ;;  %v222_v53 = vrot.slane %v221_v43, 1  ;;  %v231_v56 = vrot.slane %v230_v44, 1 }
  0x29   : > { %6666 = vst [vmem:[#allocation19_spill] sm:$0xff] %v3884_v52  ;;  %v240_v57 = vrot.slane %v239_v45, 1  ;;  %v259_v58 = vadd.f32 %v258_v46, %v257_v32  ;;  %v310_v59 = vrot.slane %v3801_v17, 4  ;;  %v214_v60 = vmax.f32 %v212_v35, %v213_v47 }
  0x2a   : > { %v268_v61 = vadd.f32 %v267_v49, %v266_v37  ;;  %v279_v62 = vmul.f32 0.03125, %v250_v48  ;;  %v316_v63 = vrot.slane %v3819_v22, 4  ;;  %v277_v0 = vadd.f32 %v276_v50, %v275_v38 }
  0x2b   : > { %v306_v16 = vrot.slane %v305_v51, 2  ;;  %v322_v1 = vrot.slane %v3823_v23, 4  ;;  %v223_v4 = vmax.f32 %v221_v43, %v222_v53  ;;  %v328_v5 = vmax.f32 %v3812_v20, %v3852_v33 }
  0x2c   : > { %v3897_v6 = vcombine.low %v3772_v8, %v3775_v9  ;;  %v232_v7 = vmax.f32 %v230_v44, %v231_v56  ;;  %v241_v26 = vmax.f32 %v239_v45, %v240_v57  ;;  %v280_v29 = vmul.f32 0.03125, %v259_v58 }
  0x2d   : > { %v311_v30 = vmax.f32 %v3801_v17, %v310_v59  ;;  %v281_v31 = vmul.f32 0.03125, %v268_v61  ;;  %v3900_v32 = vadd.f32 %v279_v62, %v214_v60  ;;  %v317_v35 = vmax.f32 %v3819_v22, %v316_v63 }
  0x2e   : > { %6667 = vst [vmem:[#allocation20_spill] sm:$0xff] %v3897_v6  ;;  %v356_v36 = vrot.slane %v3805_v18, 4  ;;  %v282_v37 = vmul.f32 0.03125, %v277_v0  ;;  %v3904_v38 = vmax.f32 %v305_v51, %v306_v16  ;;  %v323_v41 = vmax.f32 %v3823_v23, %v322_v1 }
  0x2f   : > { %6668 = vst [vmem:[#allocation21_spill] sm:$0xff] %v3900_v32  ;;  %v335_v43 = vmax.f32 %v3815_v21, %v3855_v34  ;;  %v329_v44 = vrot.slane %v328_v5, 4  ;;  %v342_v45 = vmax.f32 %v3837_v27, %v3866_v39  ;;  %v349_v17 = vmax.f32 %v3840_v28, %v3869_v40 }
  0x30   : > { %v362_v46 = vrot.slane %v3809_v19, 4  ;;  %v312_v22 = vrot.slane %v311_v30, 2  ;;  %v357_v47 = vadd.f32 %v356_v36, %v3805_v18  ;;  %v368_v48 = vrot.slane %v3827_v24, 4 }
  0x31   : > { %v374_v49 = vrot.slane %v3831_v25, 4  ;;  %v3917_v23 = vadd.f32 %v280_v29, %v223_v4  ;;  %v3919_v50 = vadd.f32 %v281_v31, %v232_v7  ;;  %v318_v51 = vrot.slane %v317_v35, 2 }
  0x32   : > { %v363_v53 = vadd.f32 %v362_v46, %v3809_v19  ;;  %v324_v56 = vrot.slane %v323_v41, 2  ;;  %v336_v57 = vrot.slane %v335_v43, 4  ;;  %v369_v58 = vadd.f32 %v368_v48, %v3827_v24 }
  0x33   : > { %6669 = vst [vmem:[#allocation22_spill] sm:$0xff] %v3917_v23  ;;  %6670 = vst [vmem:[#allocation23_spill] sm:$0xff] %v3919_v50  ;;  %v375_v59 = vadd.f32 %v374_v49, %v3831_v25  ;;  %v3924_v60 = vadd.f32 %v282_v37, %v241_v26  ;;  %v330_v18 = vmax.f32 %v328_v5, %v329_v44  ;;  %v343_v61 = vrot.slane %v342_v45, 4 }
  0x34   : > { %v350_v62 = vrot.slane %v349_v17, 4  ;;  %v308_v63 = vrot.slane %v3904_v38, 1  ;;  %v313_v0 = vmax.f32 %v311_v30, %v312_v22  ;;  %v358_v16 = vrot.slane %v357_v47, 2 }
  0x35   : > { %6671 = vst [vmem:[#allocation24_spill] sm:$0xff] %v3924_v60  ;;  %v364_v1 = vrot.slane %v363_v53, 2  ;;  %v319_v4 = vmax.f32 %v317_v35, %v318_v51  ;;  %v370_v7 = vrot.slane %v369_v58, 2  ;;  %v376_v29 = vrot.slane %v375_v59, 2 }
  0x36   : > { %v380_v19 = vadd.f32 %v3852_v33, %v3812_v20  ;;  %v325_v31 = vmax.f32 %v323_v41, %v324_v56  ;;  %v337_v24 = vmax.f32 %v335_v43, %v336_v57  ;;  %v387_v25 = vadd.f32 %v3855_v34, %v3815_v21 }
  0x37   : > { %v394_v5 = vadd.f32 %v3866_v39, %v3837_v27  ;;  %v331_v26 = vrot.slane %v330_v18, 2  ;;  %v344_v36 = vmax.f32 %v342_v45, %v343_v61  ;;  %v351_v37 = vmax.f32 %v349_v17, %v350_v62 }
  0x38   : > { %v381_v30 = vrot.slane %v380_v19, 4  ;;  %v359_v44 = vadd.f32 %v358_v16, %v357_v47  ;;  %v365_v46 = vadd.f32 %v364_v1, %v363_v53  ;;  %v388_v35 = vrot.slane %v387_v25, 4 }
  0x39   : > { %v395_v22 = vrot.slane %v394_v5, 4  ;;  %v371_v48 = vadd.f32 %v370_v7, %v369_v58  ;;  %v377_v49 = vadd.f32 %v376_v29, %v375_v59  ;;  %v401_v41 = vadd.f32 %v3869_v40, %v3840_v28 }
  0x3a   : > { %v382_v51 = vadd.f32 %v381_v30, %v380_v19  ;;  %v314_v43 = vrot.slane %v313_v0, 1  ;;  %v320_v56 = vrot.slane %v319_v4, 1  ;;  %v389_v57 = vadd.f32 %v388_v35, %v387_v25 }
  0x3b   : > { %v396_v42 = vadd.f32 %v395_v22, %v394_v5  ;;  %v338_v3 = vrot.slane %v337_v24, 2  ;;  %v345_v2 = vrot.slane %v344_v36, 2  ;;  %v402_v45 = vrot.slane %v401_v41, 4 }
  0x3c   : > { %v383_v55 = vrot.slane %v382_v51, 2  ;;  %v332_v17 = vmax.f32 %v330_v18, %v331_v26  ;;  %v352_v61 = vrot.slane %v351_v37, 2  ;;  %v360_v47 = vrot.slane %v359_v44, 1 }
  0x3d   : > { %v366_v53 = vrot.slane %v365_v46, 1  ;;  %v372_v62 = vrot.slane %v371_v48, 1  ;;  %v378_v16 = vrot.slane %v377_v49, 1  ;;  %v390_v58 = vrot.slane %v389_v57, 2 }
  0x3e   : > { %v403_v59 = vadd.f32 %v402_v45, %v401_v41  ;;  %v309_v1 = vmax.f32 %v3904_v38, %v308_v63  ;;  %v326_v7 = vrot.slane %v325_v31, 1  ;;  %v384_v29 = vadd.f32 %v383_v55, %v382_v51 }
  0x3f   : > { %v397_v19 = vrot.slane %v396_v42, 2  ;;  %v315_v30 = vmax.f32 %v313_v0, %v314_v43  ;;  %v321_v25 = vmax.f32 %v319_v4, %v320_v56  ;;  %v339_v5 = vmax.f32 %v337_v24, %v338_v3 }
  0x40   : > { %v346_v35 = vmax.f32 %v344_v36, %v345_v2  ;;  %v333_v22 = vrot.slane %v332_v17, 1  ;;  %v353_v54 = vmax.f32 %v351_v37, %v352_v61  ;;  %v361_v60 = vadd.f32 %v360_v47, %v359_v44 }
  0x41   : > { %v367_v18 = vadd.f32 %v366_v53, %v365_v46  ;;  %v373_v26 = vadd.f32 %v372_v62, %v371_v48  ;;  %v379_v52 = vadd.f32 %v378_v16, %v377_v49  ;;  %v391_v50 = vadd.f32 %v390_v58, %v389_v57 }
  0x42   : > { %v404_v23 = vrot.slane %v403_v59, 2  ;;  %v327_v32 = vmax.f32 %v325_v31, %v326_v7  ;;  %v385_v6 = vrot.slane %v384_v29, 1  ;;  %v398_v41 = vadd.f32 %v397_v19, %v396_v42 }
  0x43   : > { %v6672_v38 = vrot.slane %v3772_v8, 4  ;;  %v340_v63 = vrot.slane %v339_v5, 1  ;;  %v347_v0 = vrot.slane %v346_v35, 1  ;;  %v6673_v3 = vrot.slane %v3775_v9, 4 }
  0x44   : > { %v6674_v4 = vrot.slane %v3778_v10, 4  ;;  %v334_v36 = vmax.f32 %v332_v17, %v333_v22  ;;  %v354_v37 = vrot.slane %v353_v54, 1  ;;  %v409_v44 = vmul.f32 0.0625, %v361_v60 }
  0x45   : > { %v492_v55 = vmax.f32 %v3772_v8, %v6672_v38  ;;  %v498_v2 = vmax.f32 %v3775_v9, %v6673_v3  ;;  %v410_v31 = vmul.f32 0.0625, %v367_v18  ;;  %v392_v46 = vrot.slane %v391_v50, 1 }
  0x46   : > { %v504_v24 = vmax.f32 %v3778_v10, %v6674_v4  ;;  %v405_v42 = vadd.f32 %v404_v23, %v403_v59  ;;  %v411_v48 = vmul.f32 0.0625, %v373_v26  ;;  %v412_v49 = vmul.f32 0.0625, %v379_v52 }
  0x47   : > { %v386_v51 = vadd.f32 %v385_v6, %v384_v29  ;;  %v399_v43 = vrot.slane %v398_v41, 1  ;;  %v493_v56 = vrot.slane %v492_v55, 2  ;;  %v509_v57 = vrot.slane %v3787_v13, 4 }
  0x48   : > { %v341_v45 = vmax.f32 %v339_v5, %v340_v63  ;;  %v348_v61 = vmax.f32 %v346_v35, %v347_v0  ;;  %v499_v47 = vrot.slane %v498_v2, 2  ;;  %v505_v53 = vrot.slane %v504_v24, 2 }
  0x49   : > { %v355_v62 = vmax.f32 %v353_v54, %v354_v37  ;;  %v3946_v16 = vadd.f32 %v409_v44, %v309_v1  ;;  %v3948_v17 = vadd.f32 %v410_v31, %v315_v30  ;;  %v510_v23 = vmax.f32 %v3787_v13, %v509_v57 }
  0x4a   : > { %v393_v60 = vadd.f32 %v392_v46, %v391_v50  ;;  %v406_v52 = vrot.slane %v405_v42, 1  ;;  %v3953_v6 = vadd.f32 %v411_v48, %v321_v25  ;;  %v3955_v58 = vadd.f32 %v412_v49, %v327_v32 }
  0x4b   : > { %6675 = vst [vmem:[#allocation25_spill] sm:$0xff] %v3946_v16  ;;  %6676 = vst [vmem:[#allocation26_spill] sm:$0xff] %v3948_v17  ;;  %v400_v59 = vadd.f32 %v399_v43, %v398_v41  ;;  %v413_v7 = vmul.f32 0.0625, %v386_v51  ;;  %v494_v29 = vmax.f32 %v492_v55, %v493_v56  ;;  %v6505_v19 = vrot.slane %v3781_v11, 4 }
  0x4c   : > { %6677 = vst [vmem:[#allocation27_spill] sm:$0xff] %v3953_v6  ;;  %6678 = vst [vmem:[#allocation28_spill] sm:$0xff] %v3955_v58  ;;  %v500_v54 = vmax.f32 %v498_v2, %v499_v47  ;;  %v506_v1 = vmax.f32 %v504_v24, %v505_v53  ;;  %v6503_v30 = vrot.slane %v3784_v12, 4  ;;  %v6502_v5 = vrot.slane %v3790_v14, 4 }
  0x4d   : > { %v511_v35 = vrot.slane %v510_v23, 2  ;;  %v516_v50 = vmax.f32 %v3781_v11, %v6505_v19  ;;  %v6498_v25 = vrot.slane %v3793_v15, 4  ;;  %v6496_v32 = vrot.slane %v3812_v20, 4 }
  0x4e   : > { %v407_v22 = vadd.f32 %v406_v52, %v405_v42  ;;  %v522_v18 = vmax.f32 %v3784_v12, %v6503_v30  ;;  %v528_v26 = vmax.f32 %v3790_v14, %v6502_v5  ;;  %v6495_v41 = vrot.slane %v3815_v21, 4 }
  0x4f   : > { %v534_v38 = vmax.f32 %v3793_v15, %v6498_v25  ;;  %v540_v55 = vmax.f32 %v3812_v20, %v6496_v32  ;;  %v6494_v63 = vrot.slane %v3837_v27, 4  ;;  %v6497_v0 = vrot.slane %v3840_v28, 4 }
  0x50   : > { %v414_v3 = vmul.f32 0.0625, %v393_v60  ;;  %v415_v2 = vmul.f32 0.0625, %v400_v59  ;;  %v495_v4 = vrot.slane %v494_v29, 1  ;;  %v546_v24 = vmax.f32 %v3815_v21, %v6495_v41 }
  0x51   : > { %v501_v37 = vrot.slane %v500_v54, 1  ;;  %v517_v44 = vrot.slane %v516_v50, 2  ;;  %v552_v31 = vmax.f32 %v3837_v27, %v6494_v63  ;;  %v558_v46 = vmax.f32 %v3840_v28, %v6497_v0 }
  0x52   : > { %v3989_v42 = vadd.f32 %v413_v7, %v334_v36  ;;  %v507_v48 = vrot.slane %v506_v1, 1  ;;  %v512_v49 = vmax.f32 %v510_v23, %v511_v35  ;;  %v523_v51 = vrot.slane %v522_v18, 2 }
  0x53   : > { %v416_v43 = vmul.f32 0.0625, %v407_v22  ;;  %v529_v56 = vrot.slane %v528_v26, 2  ;;  %v535_v47 = vrot.slane %v534_v38, 2  ;;  %v541_v53 = vrot.slane %v540_v55, 2 }
  0x54   : > { %6679 = vst [vmem:[#allocation29_spill] sm:$0xff] %v3989_v42  ;;  %v3991_v60 = vadd.f32 %v414_v3, %v341_v45  ;;  %v3993_v52 = vadd.f32 %v415_v2, %v348_v61  ;;  %v3995_v59 = vmax.f32 %v494_v29, %v495_v4  ;;  %v547_v63 = vrot.slane %v546_v24, 2 }
  0x55   : > { %v3997_v41 = vmax.f32 %v500_v54, %v501_v37  ;;  %v518_v32 = vmax.f32 %v516_v50, %v517_v44  ;;  %v553_v0 = vrot.slane %v552_v31, 2  ;;  %v559_v36 = vrot.slane %v558_v46, 2 }
  0x56   : > { %6680 = vst [vmem:[#allocation30_spill] sm:$0xff] %v3991_v60  ;;  %6681 = vst [vmem:[#allocation31_spill] sm:$0xff] %v3993_v52  ;;  %v3999_v7 = vmax.f32 %v506_v1, %v507_v48  ;;  %v513_v23 = vrot.slane %v512_v49, 1  ;;  %v524_v35 = vmax.f32 %v522_v18, %v523_v51  ;;  %v6501_v22 = vrot.slane %v3852_v33, 4 }
  0x57   : > { %v4002_v25 = vadd.f32 %v416_v43, %v355_v62  ;;  %v530_v45 = vmax.f32 %v528_v26, %v529_v56  ;;  %v536_v3 = vmax.f32 %v534_v38, %v535_v47  ;;  %v542_v61 = vmax.f32 %v540_v55, %v541_v53 }
  0x58   : > { %v548_v2 = vmax.f32 %v546_v24, %v547_v63  ;;  %v564_v29 = vmax.f32 %v3852_v33, %v6501_v22  ;;  %v6500_v54 = vrot.slane %v3855_v34, 4  ;;  %v6499_v50 = vrot.slane %v3866_v39, 4 }
  0x59   : > { %6682 = vst [vmem:[#allocation32_spill] sm:$0xff] %v4002_v25  ;;  %v519_v1 = vrot.slane %v518_v32, 1  ;;  %v554_v4 = vmax.f32 %v552_v31, %v553_v0  ;;  %v560_v37 = vmax.f32 %v558_v46, %v559_v36  ;;  %v6683_v18 = vrot.slane %v3772_v8, 4 }
  0x5a   : > { %v525_v44 = vrot.slane %v524_v35, 1  ;;  %v570_v26 = vmax.f32 %v3855_v34, %v6500_v54  ;;  %v576_v38 = vmax.f32 %v3866_v39, %v6499_v50  ;;  %v6504_v55 = vrot.slane %v3869_v40, 4 }
  0x5b   : > { %v588_v62 = vadd.f32 %v6683_v18, %v3772_v8  ;;  %v4019_v63 = vmax.f32 %v512_v49, %v513_v23  ;;  %v531_v24 = vrot.slane %v530_v45, 1  ;;  %v537_v0 = vrot.slane %v536_v3, 1 }
  0x5c   : > { %v6684_v31 = vrot.slane %v3775_v9, 4  ;;  %v543_v48 = vrot.slane %v542_v61, 1  ;;  %v549_v51 = vrot.slane %v548_v2, 1  ;;  %v565_v43 = vrot.slane %v564_v29, 2 }
  0x5d   : > { %v582_v56 = vmax.f32 %v3869_v40, %v6504_v55  ;;  %v555_v47 = vrot.slane %v554_v4, 1  ;;  %v561_v53 = vrot.slane %v560_v37, 1  ;;  %v589_v36 = vrot.slane %v588_v62, 2 }
  0x5e   : > { %v594_v46 = vadd.f32 %v6684_v31, %v3775_v9  ;;  %v6685_v49 = vrot.slane %v3778_v10, 4  ;;  %v4030_v18 = vmax.f32 %v518_v32, %v519_v1  ;;  %v4032_v50 = vmax.f32 %v524_v35, %v525_v44 }
  0x5f   : > { %v571_v54 = vrot.slane %v570_v26, 2  ;;  %v577_v31 = vrot.slane %v576_v38, 2  ;;  %v4034_v22 = vmax.f32 %v530_v45, %v531_v24  ;;  %v4036_v5 = vmax.f32 %v536_v3, %v537_v0 }
  0x60   : > { %v600_v23 = vadd.f32 %v6685_v49, %v3778_v10  ;;  %v595_v30 = vrot.slane %v594_v46, 2  ;;  %v606_v55 = vadd.f32 %v509_v57, %v3787_v13  ;;  %v4041_v19 = vmax.f32 %v542_v61, %v543_v48 }
  0x61   : > { %v4043_v58 = vmax.f32 %v548_v2, %v549_v51  ;;  %v566_v49 = vmax.f32 %v564_v29, %v565_v43  ;;  %v583_v32 = vrot.slane %v582_v56, 2  ;;  %v4045_v1 = vmax.f32 %v554_v4, %v555_v47 }
  0x62   : > { %v4047_v35 = vmax.f32 %v560_v37, %v561_v53  ;;  %v590_v44 = vadd.f32 %v589_v36, %v588_v62  ;;  %v601_v45 = vrot.slane %v600_v23, 2  ;;  %v572_v24 = vmax.f32 %v570_v26, %v571_v54 }
  0x63   : > { %v578_v3 = vmax.f32 %v576_v38, %v577_v31  ;;  %v6686_v0 = vrot.slane %v3781_v11, 4  ;;  %v6687_v57 = vrot.slane %v3784_v12, 4  ;;  %v596_v2 = vadd.f32 %v595_v30, %v594_v46 }
  0x64   : > { %v607_v48 = vrot.slane %v606_v55, 2  ;;  %v6688_v29 = vrot.slane %v3790_v14, 4  ;;  %v6689_v37 = vrot.slane %v3793_v15, 4  ;;  %v567_v54 = vrot.slane %v566_v49, 1 }
  0x65   : > { %v612_v6 = vadd.f32 %v6686_v0, %v3781_v11  ;;  %v618_v61 = vadd.f32 %v6687_v57, %v3784_v12  ;;  %v584_v26 = vmax.f32 %v582_v56, %v583_v32  ;;  %v6690_v38 = vrot.slane %v3812_v20, 4 }
  0x66   : > { %v624_v4 = vadd.f32 %v6688_v29, %v3790_v14  ;;  %v630_v62 = vadd.f32 %v6689_v37, %v3793_v15  ;;  %v6691_v43 = vrot.slane %v3815_v21, 4  ;;  %v591_v30 = vrot.slane %v590_v44, 1 }
  0x67   : > { %v636_v51 = vadd.f32 %v6690_v38, %v3812_v20  ;;  %v602_v46 = vadd.f32 %v601_v45, %v600_v23  ;;  %v6692_v53 = vrot.slane %v3837_v27, 4  ;;  %v6693_v31 = vrot.slane %v3840_v28, 4 }
  0x68   : > { %v642_v47 = vadd.f32 %v6691_v43, %v3815_v21  ;;  %v573_v57 = vrot.slane %v572_v24, 1  ;;  %v579_v56 = vrot.slane %v578_v3, 1  ;;  %v613_v32 = vrot.slane %v612_v6, 2 }
  0x69   : > { %v648_v36 = vadd.f32 %v6692_v53, %v3837_v27  ;;  %v654_v0 = vadd.f32 %v6693_v31, %v3840_v28  ;;  %v619_v29 = vrot.slane %v618_v61, 2  ;;  %v597_v37 = vrot.slane %v596_v2, 1 }
  0x6a   : > { %v608_v38 = vadd.f32 %v607_v48, %v606_v55  ;;  %v625_v17 = vrot.slane %v624_v4, 2  ;;  %v631_v16 = vrot.slane %v630_v62, 2  ;;  %v4073_v25 = vmax.f32 %v566_v49, %v567_v54 }
  0x6b   : > { %v585_v43 = vrot.slane %v584_v26, 1  ;;  %v637_v23 = vrot.slane %v636_v51, 2  ;;  %v643_v45 = vrot.slane %v642_v47, 2  ;;  %v592_v52 = vadd.f32 %v591_v30, %v590_v44 }
  0x6c   : > { %v603_v60 = vrot.slane %v602_v46, 1  ;;  %v649_v53 = vrot.slane %v648_v36, 2  ;;  %v655_v42 = vrot.slane %v654_v0, 2  ;;  %v614_v27 = vadd.f32 %v613_v32, %v612_v6 }
  0x6d   : > { %v620_v20 = vadd.f32 %v619_v29, %v618_v61  ;;  %v6694_v31 = vrot.slane %v3852_v33, 4  ;;  %v6695_v55 = vrot.slane %v3855_v34, 4  ;;  %v626_v21 = vadd.f32 %v625_v17, %v624_v4 }
  0x6e   : > { %v632_v49 = vadd.f32 %v631_v16, %v630_v62  ;;  %v6696_v54 = vrot.slane %v3866_v39, 4  ;;  %v6697_v44 = vrot.slane %v3869_v40, 4  ;;  %v638_v6 = vadd.f32 %v637_v23, %v636_v51 }
  0x6f   : > { %v660_v28 = vadd.f32 %v6694_v31, %v3852_v33  ;;  %v666_v48 = vadd.f32 %v6695_v55, %v3855_v34  ;;  %v644_v61 = vadd.f32 %v643_v45, %v642_v47  ;;  %v650_v15 = vadd.f32 %v649_v53, %v648_v36 }
  0x70   : > { %v672_v14 = vadd.f32 %v6696_v54, %v3866_v39  ;;  %v678_v30 = vadd.f32 %v6697_v44, %v3869_v40  ;;  %v656_v31 = vadd.f32 %v655_v42, %v654_v0  ;;  %v4087_v12 = vmax.f32 %v572_v24, %v573_v57 }
  0x71   : > { %v661_v32 = vrot.slane %v660_v28, 2  ;;  %v667_v29 = vrot.slane %v666_v48, 2  ;;  %v4089_v17 = vmax.f32 %v578_v3, %v579_v56  ;;  %v609_v62 = vrot.slane %v608_v38, 1 }
  0x72   : > { %v673_v33 = vrot.slane %v672_v14, 2  ;;  %v679_v11 = vrot.slane %v678_v30, 2  ;;  %v615_v55 = vrot.slane %v614_v27, 1  ;;  %v621_v34 = vrot.slane %v620_v20, 1 }
  0x73   : > { %6698 = vst [vmem:[#allocation33_spill] sm:$0xff] %v4089_v17  ;;  %v662_v16 = vadd.f32 %v661_v32, %v660_v28  ;;  %v668_v4 = vadd.f32 %v667_v29, %v666_v48  ;;  %v627_v44 = vrot.slane %v626_v21, 1  ;;  %v633_v51 = vrot.slane %v632_v49, 1 }
  0x74   : > { %v674_v54 = vadd.f32 %v673_v33, %v672_v14  ;;  %v680_v39 = vadd.f32 %v679_v11, %v678_v30  ;;  %v639_v47 = vrot.slane %v638_v6, 1  ;;  %v645_v23 = vrot.slane %v644_v61, 1 }
  0x75   : > { %v651_v45 = vrot.slane %v650_v15, 1  ;;  %v657_v36 = vrot.slane %v656_v31, 1  ;;  %v663_v42 = vrot.slane %v662_v16, 1  ;;  %v586_v0 = vmax.f32 %v584_v26, %v585_v43 }
  0x76   : > { %v598_v53 = vadd.f32 %v597_v37, %v596_v2  ;;  %v669_v24 = vrot.slane %v668_v4, 1  ;;  %v675_v57 = vrot.slane %v674_v54, 1  ;;  %v604_v3 = vadd.f32 %v603_v60, %v602_v46 }
  0x77   : > { %v610_v56 = vadd.f32 %v609_v62, %v608_v38  ;;  %v616_v28 = vadd.f32 %v615_v55, %v614_v27  ;;  %v681_v48 = vrot.slane %v680_v39, 1  ;;  %v622_v32 = vadd.f32 %v621_v34, %v620_v20  ;;  %v6709_v55 = vld [vmem:[#allocation20_spill] sm:$0xff] }
  0x78   : > { %v628_v29 = vadd.f32 %v627_v44, %v626_v21  ;;  %v634_v14 = vadd.f32 %v633_v51, %v632_v49  ;;  %v640_v11 = vadd.f32 %v639_v47, %v638_v6  ;;  %v646_v33 = vadd.f32 %v645_v23, %v644_v61 }
  0x79   : > { %v652_v30 = vadd.f32 %v651_v45, %v650_v15  ;;  %v658_v40 = vadd.f32 %v657_v36, %v656_v31  ;;  %v664_v8 = vadd.f32 %v663_v42, %v662_v16  ;;  %v670_v9 = vadd.f32 %v669_v24, %v668_v4  ;;  %v6710_v42 = vld [vmem:[#allocation7_spill] sm:$0xff] }
  0x7a   : > { %v676_v10 = vadd.f32 %v675_v57, %v674_v54  ;;  %v684_v13 = vmul.f32 0.125, %v592_v52  ;;  %v685_v17 = vmul.f32 0.125, %v598_v53  ;;  %v682_v26 = vadd.f32 %v681_v48, %v680_v39  ;;  %v6714_v57 = vld [vmem:[#allocation10_spill] sm:$0xff] }
  0x7b   : > { %v686_v2 = vmul.f32 0.125, %v604_v3  ;;  %v687_v37 = vmul.f32 0.125, %v610_v56  ;;  %v688_v43 = vmul.f32 0.125, %v616_v28  ;;  %v689_v60 = vmul.f32 0.125, %v622_v32  ;;  %v6715_v3 = vld [vmem:[#allocation9_spill] sm:$0xff]  ;;  %v6719_v32 = vld [vmem:[#allocation12_spill] sm:$0xff] }
  0x7c   : > { %v690_v46 = vmul.f32 0.125, %v628_v29  ;;  %v691_v27 = vmul.f32 0.125, %v634_v14  ;;  %v692_v38 = vmul.f32 0.125, %v640_v11  ;;  %v693_v20 = vmul.f32 0.125, %v646_v33  ;;  %v6720_v29 = vld [vmem:[#allocation11_spill] sm:$0xff] }
  0x7d   : > { %v694_v21 = vmul.f32 0.125, %v652_v30  ;;  %v695_v34 = vmul.f32 0.125, %v658_v40  ;;  %v696_v49 = vmul.f32 0.125, %v664_v8  ;;  %v697_v6 = vmul.f32 0.125, %v670_v9 }
  0x7e   : > { %v698_v15 = vmul.f32 0.125, %v676_v10  ;;  %v4092_v61 = vadd.f32 %v684_v13, %v3995_v59  ;;  %v4095_v52 = vadd.f32 %v685_v17, %v3997_v41  ;;  %v699_v39 = vmul.f32 0.125, %v682_v26 }
  0x7f   : > { %v4098_v31 = vadd.f32 %v686_v2, %v3999_v7  ;;  %v4101_v16 = vadd.f32 %v687_v37, %v4019_v63  ;;  %v4104_v4 = vadd.f32 %v688_v43, %v4030_v18  ;;  %v4107_v8 = vadd.f32 %v689_v60, %v4032_v50  ;;  %v6701_v63 = vld [vmem:[#allocation5_spill] sm:$0xff]  ;;  %v6723_v43 = vld [vmem:[#allocation14_spill] sm:$0xff] }
  0x80   : > { %v4110_v9 = vadd.f32 %v690_v46, %v4034_v22  ;;  %v4113_v10 = vadd.f32 %v691_v27, %v4036_v5  ;;  %v4116_v13 = vadd.f32 %v692_v38, %v4041_v19  ;;  %v4119_v40 = vadd.f32 %v693_v20, %v4043_v58  ;;  %v6699_v5 = vld [vmem:[#allocation33_spill] sm:$0xff]  ;;  %v6700_v19 = vld [vmem:[#allocation8_spill] sm:$0xff] }
  0x81   : > { %v4122_v41 = vadd.f32 %v694_v21, %v4045_v1  ;;  %v4125_v59 = vadd.f32 %v695_v34, %v4047_v35  ;;  %v4128_v7 = vadd.f32 %v696_v49, %v4073_v25  ;;  %v4131_v22 = vadd.f32 %v697_v6, %v4087_v12  ;;  %v6703_v58 = vld [vmem:[#allocation4_spill] sm:$0xff]  ;;  %v6705_v25 = vld [vmem:[#allocation3_spill] sm:$0xff]  ;;  %v6724_v60 = vld [vmem:[#allocation13_spill] sm:$0xff] }
  0x82   : > { %v4134_v50 = vadd.f32 %v698_v15, %v6699_v5  ;;  %v4138_v18 = vcombine.low %v6701_v63, %v6700_v19  ;;  %v4142_v1 = vcombine.low %v6703_v58, %v6703_v58  ;;  %v4144_v17 = vadd.f32 %v699_v39, %v586_v0  ;;  %v6711_v0 = vld [vmem:[#allocation6_spill] sm:$0xff]  ;;  %v6727_v21 = vld [vmem:[#allocation16_spill] sm:$0xff]  ;;  %v6728_v34 = vld [vmem:[#allocation15_spill] sm:$0xff] }
  0x83   : > { %v4148_v35 = vcombine.high %v6705_v25, %v6703_v58  ;;  %v4152_v12 = vcombine.low %v6700_v19, %v6700_v19  ;;  %v4156_v62 = vcombine.high %v6701_v63, %v6700_v19  ;;  %v899_v54 = vsel %vm786_vm0, %v6709_v55, -inf  ;;  %v6732_v5 = vld [vmem:[#allocation18_spill] sm:$0xff]  ;;  %v6733_v63 = vld [vmem:[#allocation17_spill] sm:$0xff] }
  0x84   : > { %6702 = vst [vmem:[#allocation33_spill] sm:$0xff] %v4138_v18  ;;  %6704 = vst [vmem:[#allocation8_spill] sm:$0xff] %v4142_v1  ;;  %v906_v44 = vsel %vm786_vm0, %v4142_v1, -inf  ;;  %v913_v51 = vsel %vm786_vm0, %v4138_v18, -inf  ;;  %v900_v47 = vrot.slane %v899_v54, 4  ;;  %v4168_v53 = vcombine.low %v6711_v0, %v6710_v42 }
  0x85   : > { %6706 = vst [vmem:[#allocation5_spill] sm:$0xff] %v4148_v35  ;;  %6707 = vst [vmem:[#allocation4_spill] sm:$0xff] %v4152_v12  ;;  %v907_v23 = vrot.slane %v906_v44, 4  ;;  %v914_v45 = vrot.slane %v913_v51, 4  ;;  %v920_v36 = vsel %vm786_vm0, %v4152_v12, -inf  ;;  %v4172_v24 = vcombine.high %v6711_v0, %v6710_v42 }
  0x86   : > { %6708 = vst [vmem:[#allocation3_spill] sm:$0xff] %v4156_v62  ;;  %6712 = vst [vmem:[#allocation7_spill] sm:$0xff] %v4168_v53  ;;  %v4176_v56 = vcombine.low %v6715_v3, %v6714_v57  ;;  %v4180_v28 = vcombine.high %v6703_v58, %v6703_v58  ;;  %v4184_v48 = vcombine.high %v6715_v3, %v6714_v57  ;;  %v921_v11 = vrot.slane %v920_v36, 4 }
  0x87   : > { %6713 = vst [vmem:[#allocation6_spill] sm:$0xff] %v4172_v24  ;;  %v4188_v14 = vcombine.low %v6720_v29, %v6719_v32  ;;  %v927_v33 = vsel %vm786_vm0, %v4148_v35, -inf  ;;  %v4194_v30 = vcombine.high %v6720_v29, %v6719_v32  ;;  %v901_v26 = vmax.f32 %v899_v54, %v900_v47 }
  0x88   : > { %6716 = vst [vmem:[#allocation10_spill] sm:$0xff] %v4176_v56  ;;  %6717 = vst [vmem:[#allocation9_spill] sm:$0xff] %v4180_v28  ;;  %v934_v2 = vsel %vm786_vm0, %v4180_v28, -inf  ;;  %v941_v37 = vsel %vm786_vm0, %v4156_v62, -inf  ;;  %v4202_v46 = vcombine.low %v6724_v60, %v6723_v43  ;;  %v4206_v27 = vcombine.high %v6724_v60, %v6723_v43 }
  0x89   : > { %6718 = vst [vmem:[#allocation34_spill] sm:$0xff] %v4184_v48  ;;  %6721 = vst [vmem:[#allocation12_spill] sm:$0xff] %v4188_v14  ;;  %v908_v38 = vmax.f32 %v906_v44, %v907_v23  ;;  %v915_v20 = vmax.f32 %v913_v51, %v914_v45  ;;  %v4210_v49 = vcombine.low %v6728_v34, %v6727_v21  ;;  %v928_v39 = vrot.slane %v927_v33, 4 }
  0x8a   : > { %6722 = vst [vmem:[#allocation11_spill] sm:$0xff] %v4194_v30  ;;  %6725 = vst [vmem:[#allocation14_spill] sm:$0xff] %v4202_v46  ;;  %v4214_v6 = vcombine.high %v6728_v34, %v6727_v21  ;;  %v4218_v15 = vcombine.high %v6700_v19, %v6700_v19  ;;  %v4222_v58 = vcombine.low %v6733_v63, %v6732_v5  ;;  %v935_v54 = vrot.slane %v934_v2, 4  ;;  %v6751_v30 = vld [vmem:[#allocation28_spill] sm:$0xff] }
  0x8b   : > { %6726 = vst [vmem:[#allocation13_spill] sm:$0xff] %v4206_v27  ;;  %6729 = vst [vmem:[#allocation16_spill] sm:$0xff] %v4210_v49  ;;  %v922_v25 = vmax.f32 %v920_v36, %v921_v11  ;;  %v942_v44 = vrot.slane %v941_v37, 4  ;;  %v4226_v51 = vcombine.high %v6733_v63, %v6732_v5  ;;  %v4230_v47 = vcombine.low %v6710_v42, %v6710_v42  ;;  %v6750_v27 = vld [vmem:[#allocation27_spill] sm:$0xff] }
  0x8c   : > { %6730 = vst [vmem:[#allocation15_spill] sm:$0xff] %v4214_v6  ;;  %6731 = vst [vmem:[#allocation35_spill] sm:$0xff] %v4218_v15  ;;  %v902_v23 = vrot.slane %v901_v26, 2  ;;  %v948_v19 = vsel %vm786_vm0, %v4218_v15, -inf  ;;  %v4236_v45 = vcombine.low %v6714_v57, %v6714_v57  ;;  %v4240_v36 = vcombine.high %v6710_v42, %v6710_v42  ;;  %v6746_v6 = vld [vmem:[#allocation31_spill] sm:$0xff] }
  0x8d   : > { %6734 = vst [vmem:[#allocation18_spill] sm:$0xff] %v4222_v58  ;;  %6735 = vst [vmem:[#allocation17_spill] sm:$0xff] %v4226_v51  ;;  %v909_v0 = vrot.slane %v908_v38, 2  ;;  %v916_v3 = vrot.slane %v915_v20, 2  ;;  %v4244_v29 = vcombine.high %v6714_v57, %v6714_v57  ;;  %v4248_v11 = vcombine.low %v6719_v32, %v6719_v32  ;;  %v6748_v58 = vld [vmem:[#allocation25_spill] sm:$0xff] }
  0x8e   : > { %v4252_v60 = vcombine.low %v6723_v43, %v6723_v43  ;;  %v929_v34 = vmax.f32 %v927_v33, %v928_v39  ;;  %v923_v15 = vrot.slane %v922_v25, 2  ;;  %v936_v42 = vmax.f32 %v934_v2, %v935_v54 }
  0x8f   : > { %v943_v62 = vmax.f32 %v941_v37, %v942_v44  ;;  %v949_v28 = vrot.slane %v948_v19, 4  ;;  %v4258_v35 = vcombine.high %v6719_v32, %v6719_v32  ;;  %v4262_v57 = vcombine.high %v6723_v43, %v6723_v43 }
  0x90   : > { %v4254_v63 = vpop.permute.xlu0 %289  ;;  %v4266_v12 = vcombine.low %v6727_v21, %v6727_v21  ;;  %v903_v18 = vmax.f32 %v901_v26, %v902_v23  ;;  %v910_v2 = vmax.f32 %v908_v38, %v909_v0  ;;  %v917_v37 = vmax.f32 %v915_v20, %v916_v3  ;;  %v6744_v20 = vld [vmem:[#allocation29_spill] sm:$0xff]  ;;  %v6745_v3 = vld [vmem:[#allocation30_spill] sm:$0xff] }
  0x91   : > { %6736 = vst [vmem:[#allocation36_spill] sm:$0xff] %v4254_v63  ;;  %6737 = vst [vmem:[#allocation37_spill] sm:$0xff] %v4258_v35  ;;  %v425_v33 = vrot.slane %v4254_v63, 1  ;;  %v426_v39 = vrot.slane %v4254_v63, 2  ;;  %v4272_v32 = vcombine.low %v6732_v5, %v6732_v5  ;;  %v4276_v43 = vcombine.high %v6727_v21, %v6727_v21 }
  0x92   : > { %6738 = vst [vmem:[#allocation38_spill] sm:$0xff] %v4262_v57  ;;  %6739 = vst [vmem:[#allocation39_spill] sm:$0xff] %v4266_v12  ;;  %v4280_v54 = vcombine.high %v6732_v5, %v6732_v5  ;;  %v930_v26 = vrot.slane %v929_v34, 2  ;;  %v4282_v44 = vmax.f32 %v922_v25, %v923_v15  ;;  %v937_v23 = vrot.slane %v936_v42, 2  ;;  %v6749_v25 = vld [vmem:[#allocation26_spill] sm:$0xff] }
  0x93   : > { %6740 = vst [vmem:[#allocation40_spill] sm:$0xff] %v4272_v32  ;;  %6741 = vst [vmem:[#allocation41_spill] sm:$0xff] %v4276_v43  ;;  %v944_v1 = vrot.slane %v943_v62, 2  ;;  %v4284_v55 = vmax.f32 %v948_v19, %v949_v28  ;;  %v433_v0 = vmul.f32 %v426_v39, %v6744_v20  ;;  %v434_v51 = vmul.f32 %v426_v39, %v6745_v3  ;;  %v6747_v43 = vld [vmem:[#allocation32_spill] sm:$0xff] }
  0x94   : > { %6742 = vst [vmem:[#allocation42_spill] sm:$0xff] %v4280_v54  ;;  %v4286_v38 = vpop.permute.xlu0 %1414  ;;  %v435_v21 = vmul.f32 %v426_v39, %v6746_v6  ;;  %v436_v32 = vmul.f32 %v426_v39, %v6747_v43  ;;  %v429_v5 = vmul.f32 %v425_v33, %v6748_v58  ;;  %v904_v54 = vrot.slane %v903_v18, 1 }
  0x95   : > { %6743 = vst [vmem:[#allocation43_spill] sm:$0xff] %v4286_v38  ;;  %v911_v12 = vrot.slane %v910_v2, 1  ;;  %v918_v15 = vrot.slane %v917_v37, 1  ;;  %v430_v49 = vmul.f32 %v425_v33, %v6749_v25  ;;  %v445_v57 = vrot.slane %v433_v0, 7 }
  0x96   : > { %v448_v28 = vrot.slane %v434_v51, 7  ;;  %v450_v19 = vrot.slane %v435_v21, 7  ;;  %v431_v38 = vmul.f32 %v425_v33, %v6750_v27  ;;  %v452_v35 = vrot.slane %v436_v32, 7 }
  0x97   : > { %v717_v20 = vrot.slane %v4254_v63, 4  ;;  %v4296_v3 = vmax.f32 %v929_v34, %v930_v26  ;;  %v447_v6 = vsel %vm446_vm1, %v445_v57, %v429_v5  ;;  %v718_v58 = vrot.slane %v4254_v63, 5 }
  0x98   : > { %v449_v39 = vsel %vm446_vm1, %v448_v28, %v430_v49  ;;  %v432_v25 = vmul.f32 %v425_v33, %v6751_v30  ;;  %v451_v51 = vsel %vm446_vm1, %v450_v19, %v431_v38  ;;  %v4304_v0 = vmax.f32 %v936_v42, %v937_v23  ;;  %v4308_v32 = vpop.permute.xlu0 %3428  ;;  %v6754_v28 = vld [vmem:[#allocation22_spill] sm:$0xff] }
  0x99   : > { %v4306_v27 = vmax.f32 %v943_v62, %v944_v1  ;;  %6752 = vst [vmem:[#allocation29_spill] sm:$0xff] %v4308_v32  ;;  %v459_v34 = vsel %vm458_vm2, %v447_v6, 0.0  ;;  %v716_v57 = vrot.slane %v4254_v63, 3  ;;  %v4312_v49 = vmax.f32 %v903_v18, %v904_v54  ;;  %v6753_v54 = vld [vmem:[#allocation21_spill] sm:$0xff] }
  0x9a   : > { %v453_v21 = vsel %vm446_vm1, %v452_v35, %v432_v25  ;;  %v466_v30 = vsel %vm458_vm2, %v449_v39, 0.0  ;;  %v728_v33 = vmul.f32 %v717_v20, %v4104_v4  ;;  %v4318_v42 = vmax.f32 %v910_v2, %v911_v12 }
  0x9b   : > { %v473_v1 = vsel %vm458_vm2, %v451_v51, 0.0  ;;  %v719_v62 = vrot.slane %v4254_v63, 6  ;;  %v729_v23 = vmul.f32 %v717_v20, %v4107_v8  ;;  %v732_v18 = vmul.f32 %v718_v58, %v4116_v13 }
  0x9c   : > { %v4326_v38 = vmul.f32 %v4254_v63, %v6753_v54  ;;  %v460_v35 = vrot.slane %v459_v34, 4  ;;  %v4328_v5 = vmax.f32 %v917_v37, %v918_v15  ;;  %v932_v4 = vrot.slane %v4296_v3, 1  ;;  %v4339_v51 = vpop.permute.xlu0 %3436 }
  0x9d   : > { %v4333_v12 = vmul.f32 %v4254_v63, %v6754_v28  ;;  %v467_v2 = vrot.slane %v466_v30, 4  ;;  %v480_v19 = vsel %vm458_vm2, %v453_v21, 0.0  ;;  %v724_v8 = vmul.f32 %v716_v57, %v4092_v61  ;;  %6755 = vst [vmem:[#allocation30_spill] sm:$0xff] %v4339_v51 }
  0x9e   : > { %v474_v6 = vrot.slane %v473_v1, 4  ;;  %v725_v13 = vmul.f32 %v716_v57, %v4095_v52  ;;  %v733_v39 = vmul.f32 %v718_v58, %v4119_v40  ;;  %v756_v25 = vrot.slane %v728_v33, 7 }
  0x9f   : > { %v730_v37 = vmul.f32 %v717_v20, %v4110_v9  ;;  %v736_v15 = vmul.f32 %v719_v62, %v4128_v7  ;;  %v758_v54 = vrot.slane %v732_v18, 6  ;;  %v764_v28 = vrot.slane %v729_v23, 7 }
  0xa0   : > { %v461_v26 = vadd.f32 %v460_v35, %v459_v34  ;;  %v481_v43 = vrot.slane %v480_v19, 4  ;;  %v726_v21 = vmul.f32 %v716_v57, %v4098_v31  ;;  %v757_v61 = vsel %vm446_vm1, %v756_v25, %v724_v8  ;;  %v6756_v8 = vld [vmem:[#allocation23_spill] sm:$0xff] }
  0xa1   : > { %v468_v32 = vadd.f32 %v467_v2, %v466_v30  ;;  %v731_v52 = vmul.f32 %v717_v20, %v4113_v10  ;;  %v734_v40 = vmul.f32 %v718_v58, %v4122_v41  ;;  %v735_v33 = vmul.f32 %v718_v58, %v4125_v59  ;;  %v199_v59 = vpop.permute.xlu0 %198 }
  0xa2   : > { %v475_v51 = vadd.f32 %v474_v6, %v473_v1  ;;  %v737_v9 = vmul.f32 %v719_v62, %v4131_v22  ;;  %v738_v7 = vmul.f32 %v719_v62, %v4134_v50  ;;  %v766_v18 = vrot.slane %v733_v39, 6 }
  0xa3   : > { %v760_v34 = vsel %vm759_vm3, %v758_v54, %v757_v61  ;;  %v761_v23 = vrot.slane %v736_v15, 5  ;;  %v765_v31 = vsel %vm446_vm1, %v764_v28, %v725_v13  ;;  %v770_v35 = vrot.slane %v730_v37, 7 }
  0xa4   : > { %v294_v30 = vmul.f32 %v4254_v63, %v6756_v8  ;;  %v462_v10 = vrot.slane %v461_v26, 2  ;;  %v482_v20 = vadd.f32 %v481_v43, %v480_v19  ;;  %v727_v41 = vmul.f32 %v716_v57, %v4101_v16  ;;  %v6757_v19 = vld [vmem:[#allocation19_spill] sm:$0xff] }
  0xa5   : > { %v739_v58 = vmul.f32 %v719_v62, %v4144_v17  ;;  %v763_v22 = vsel %vm762_vm4, %v761_v23, %v760_v34  ;;  %v771_v50 = vsel %vm446_vm1, %v770_v35, %v726_v21  ;;  %v772_v1 = vrot.slane %v734_v40, 6 }
  0xa6   : > { %v469_v2 = vrot.slane %v468_v32, 2  ;;  %v476_v6 = vrot.slane %v475_v51, 2  ;;  %v767_v13 = vsel %vm759_vm3, %v766_v18, %v765_v31  ;;  %v768_v39 = vrot.slane %v737_v9, 5  ;;  %v6761_v9 = vld [vmem:[#allocation24_spill] sm:$0xff] }
  0xa7   : > { %v773_v25 = vsel %vm759_vm3, %v772_v1, %v771_v50  ;;  %v774_v37 = vrot.slane %v738_v7, 5  ;;  %v776_v15 = vrot.slane %v731_v52, 7  ;;  %v778_v43 = vrot.slane %v735_v33, 6 }
  0xa8   : > { %v6758_v16 = vsub.s32 0, %v6757_v19  ;;  %v4364_v17 = vadd.f32 %v462_v10, %v461_v26  ;;  %v483_v62 = vrot.slane %v482_v20, 2  ;;  %v787_v54 = vsel %vm786_vm0, %v763_v22, 0.0 }
  0xa9   : > { %v769_v28 = vsel %vm762_vm4, %v768_v39, %v767_v13  ;;  %v775_v21 = vsel %vm762_vm4, %v774_v37, %v773_v25  ;;  %v777_v61 = vsel %vm446_vm1, %v776_v15, %v727_v41  ;;  %v780_v40 = vrot.slane %v739_v58, 5 }
  0xaa   : > { %v4362_v57 = vrot.slane %v199_v59, %v6758_v16  ;;  %6760 = vst [vmem:[#allocation32_spill] sm:$0xff] %v4364_v17  ;;  %v4372_v52 = vmul.f32 %v4254_v63, %v6761_v9  ;;  %v779_v33 = vsel %vm759_vm3, %v778_v43, %v777_v61  ;;  %v6763_v7 = vrot.slane %v4282_v44, 1 }
  0xab   : > { %v4381_v18 = vmax.f32 %v4296_v3, %v932_v4  ;;  %v4383_v34 = vadd.f32 %v469_v2, %v468_v32  ;;  %v4385_v23 = vadd.f32 %v476_v6, %v475_v51  ;;  %v781_v31 = vsel %vm762_vm4, %v780_v40, %v779_v33 }
  0xac   : > { %6759 = vst [vmem:[#allocation31_spill] sm:$0xff] %v4362_v57  ;;  %6762 = vst [vmem:[#allocation25_spill] sm:$0xff] %v4372_v52  ;;  %v4378_v26 = vmax.f32 %v4282_v44, %v6763_v7  ;;  %v788_v35 = vrot.slane %v787_v54, 4  ;;  %v4388_v8 = vadd.f32 %v483_v62, %v482_v20  ;;  %v794_v10 = vsel %vm786_vm0, %v769_v28, 0.0 }
  0xad   : > { %6764 = vst [vmem:[#allocation26_spill] sm:$0xff] %v4383_v34  ;;  %6765 = vst [vmem:[#allocation27_spill] sm:$0xff] %v4385_v23  ;;  %v801_v41 = vsel %vm786_vm0, %v775_v21, 0.0  ;;  %v955_v44 = vsel %vm786_vm0, %v4168_v53, -inf  ;;  %v4396_v3 = vadd.f32 %v4326_v38, %v4362_v57  ;;  %v4400_v32 = vadd.f32 %v4333_v12, %v4362_v57  ;;  %v6781_v23 = vld [vmem:[#allocation11_spill] sm:$0xff] }
  0xae   : > { %6766 = vst [vmem:[#allocation28_spill] sm:$0xff] %v4388_v8  ;;  %v4403_v4 = vadd.f32 %v294_v30, %v4362_v57  ;;  %v808_v20 = vsel %vm786_vm0, %v781_v31, 0.0  ;;  %v956_v59 = vrot.slane %v955_v44, 4  ;;  %v962_v58 = vsel %vm786_vm0, %v4230_v47, -inf }
  0xaf   : > { %6767 = vst [vmem:[#allocation21_spill] sm:$0xff] %v4396_v3  ;;  %6768 = vst [vmem:[#allocation22_spill] sm:$0xff] %v4400_v32  ;;  %v969_v22 = vsel %vm786_vm0, %v4176_v56, -inf  ;;  %v789_v38 = vadd.f32 %v788_v35, %v787_v54  ;;  %v795_v50 = vrot.slane %v794_v10, 4  ;;  %v802_v1 = vrot.slane %v801_v41, 4 }
  0xb0   : > { %6769 = vst [vmem:[#allocation23_spill] sm:$0xff] %v4403_v4  ;;  %v6770_v12 = vrot.slane %v4284_v55, 2  ;;  %v957_v6 = vmax.f32 %v955_v44, %v956_v59  ;;  %v963_v13 = vrot.slane %v962_v58, 4  ;;  %v970_v39 = vrot.slane %v969_v22, 4 }
  0xb1   : > { %v809_v37 = vrot.slane %v808_v20, 4  ;;  %v939_v15 = vrot.slane %v4304_v0, 1  ;;  %v946_v43 = vrot.slane %v4306_v27, 1  ;;  %v976_v28 = vsel %vm786_vm0, %v4236_v45, -inf }
  0xb2   : > { %v952_v2 = vmax.f32 %v4284_v55, %v6770_v12  ;;  %v958_v16 = vrot.slane %v957_v6, 2  ;;  %v964_v62 = vmax.f32 %v962_v58, %v963_v13  ;;  %v971_v54 = vmax.f32 %v969_v22, %v970_v39 }
  0xb3   : > { %v790_v21 = vrot.slane %v789_v38, 2  ;;  %v4420_v55 = vadd.f32 %v795_v50, %v794_v10  ;;  %v4422_v61 = vadd.f32 %v802_v1, %v801_v41  ;;  %v977_v31 = vrot.slane %v976_v28, 4 }
  0xb4   : > { %v953_v40 = vrot.slane %v952_v2, 1  ;;  %v959_v9 = vmax.f32 %v957_v6, %v958_v16  ;;  %v965_v33 = vrot.slane %v964_v62, 2  ;;  %v972_v7 = vrot.slane %v971_v54, 2 }
  0xb5   : > { %6771 = vst [vmem:[#allocation24_spill] sm:$0xff] %v4420_v55  ;;  %6772 = vst [vmem:[#allocation44_spill] sm:$0xff] %v4422_v61  ;;  %v4425_v44 = vadd.f32 %v809_v37, %v808_v20  ;;  %v4428_v59 = vmax.f32 %v4304_v0, %v939_v15  ;;  %v4431_v58 = vmax.f32 %v4306_v27, %v946_v43  ;;  %v983_v6 = vsel %vm786_vm0, %v4172_v24, -inf }
  0xb6   : > { %v960_v22 = vrot.slane %v959_v9, 1  ;;  %v966_v10 = vmax.f32 %v964_v62, %v965_v33  ;;  %v973_v50 = vmax.f32 %v971_v54, %v972_v7  ;;  %v978_v41 = vmax.f32 %v976_v28, %v977_v31 }
  0xb7   : > { %6773 = vst [vmem:[#allocation45_spill] sm:$0xff] %v4425_v44  ;;  %v4433_v1 = vadd.f32 %v790_v21, %v789_v38  ;;  %v990_v20 = vsel %vm786_vm0, %v4240_v36, -inf  ;;  %v4441_v13 = vmax.f32 %v952_v2, %v953_v40  ;;  %v984_v15 = vrot.slane %v983_v6, 4 }
  0xb8   : > { %v967_v27 = vrot.slane %v966_v10, 1  ;;  %v979_v39 = vrot.slane %v978_v41, 2  ;;  %v991_v43 = vrot.slane %v990_v20, 4  ;;  %v997_v38 = vsel %vm786_vm0, %v4184_v48, -inf }
  0xb9   : > { %6774 = vst [vmem:[#allocation46_spill] sm:$0xff] %v4433_v1  ;;  %6775 = vst [vmem:[#allocation47_spill] sm:$0xff] %v4441_v13  ;;  %v4446_v16 = vmax.f32 %v959_v9, %v960_v22  ;;  %v974_v62 = vrot.slane %v973_v50, 1  ;;  %v998_v28 = vrot.slane %v997_v38, 4  ;;  %v985_v21 = vmax.f32 %v983_v6, %v984_v15 }
  0xba   : > { %v980_v54 = vmax.f32 %v978_v41, %v979_v39  ;;  %v992_v33 = vmax.f32 %v990_v20, %v991_v43  ;;  %v1004_v2 = vsel %vm786_vm0, %v4244_v29, -inf  ;;  %v1011_v40 = vsel %vm786_vm0, %v4188_v14, -inf }
  0xbb   : > { %6776 = vst [vmem:[#allocation48_spill] sm:$0xff] %v4446_v16  ;;  %v4452_v7 = vmax.f32 %v966_v10, %v967_v27  ;;  %v999_v31 = vmax.f32 %v997_v38, %v998_v28  ;;  %v1005_v37 = vrot.slane %v1004_v2, 4  ;;  %v1012_v35 = vrot.slane %v1011_v40, 4 }
  0xbc   : > { %v986_v25 = vrot.slane %v985_v21, 2  ;;  %v993_v30 = vrot.slane %v992_v33, 2  ;;  %v1018_v9 = vsel %vm786_vm0, %v4248_v11, -inf  ;;  %v1025_v22 = vsel %vm786_vm0, %v4202_v46, -inf }
  0xbd   : > { %6777 = vst [vmem:[#allocation49_spill] sm:$0xff] %v4452_v7  ;;  %v981_v41 = vrot.slane %v980_v54, 1  ;;  %v1000_v6 = vrot.slane %v999_v31, 2  ;;  %v1006_v20 = vmax.f32 %v1004_v2, %v1005_v37  ;;  %v1013_v39 = vmax.f32 %v1011_v40, %v1012_v35 }
  0xbe   : > { %v987_v15 = vmax.f32 %v985_v21, %v986_v25  ;;  %v994_v43 = vmax.f32 %v992_v33, %v993_v30  ;;  %v1019_v51 = vrot.slane %v1018_v9, 4  ;;  %v1026_v10 = vrot.slane %v1025_v22, 4 }
  0xbf   : > { %v1001_v27 = vmax.f32 %v999_v31, %v1000_v6  ;;  %v1007_v38 = vrot.slane %v1006_v20, 2  ;;  %v1014_v28 = vrot.slane %v1013_v39, 2  ;;  %v1032_v0 = vsel %vm786_vm0, %v4252_v60, -inf }
  0xc0   : > { %v988_v12 = vrot.slane %v987_v15, 1  ;;  %v995_v4 = vrot.slane %v994_v43, 1  ;;  %v1020_v32 = vmax.f32 %v1018_v9, %v1019_v51  ;;  %v1027_v3 = vmax.f32 %v1025_v22, %v1026_v10  ;;  %v6782_v9 = vld [vmem:[#allocation37_spill] sm:$0xff]  ;;  %v6787_v10 = vld [vmem:[#allocation38_spill] sm:$0xff] }
  0xc1   : > { %v1002_v19 = vrot.slane %v1001_v27, 1  ;;  %v1008_v1 = vmax.f32 %v1006_v20, %v1007_v38  ;;  %v1015_v44 = vmax.f32 %v1013_v39, %v1014_v28  ;;  %v1033_v8 = vrot.slane %v1032_v0, 4 }
  0xc2   : > { %v4460_v37 = vmax.f32 %v973_v50, %v974_v62  ;;  %v4462_v25 = vmax.f32 %v980_v54, %v981_v41  ;;  %v1021_v30 = vrot.slane %v1020_v32, 2  ;;  %v1028_v35 = vrot.slane %v1027_v3, 2 }
  0xc3   : > { %v4464_v21 = vmax.f32 %v987_v15, %v988_v12  ;;  %v1009_v33 = vrot.slane %v1008_v1, 1  ;;  %v1016_v2 = vrot.slane %v1015_v44, 1  ;;  %v1034_v40 = vmax.f32 %v1032_v0, %v1033_v8  ;;  %v6786_v15 = vld [vmem:[#allocation13_spill] sm:$0xff] }
  0xc4   : > { %6778 = vst [vmem:[#allocation50_spill] sm:$0xff] %v4460_v37  ;;  %6779 = vst [vmem:[#allocation51_spill] sm:$0xff] %v4462_v25  ;;  %v1022_v31 = vmax.f32 %v1020_v32, %v1021_v30  ;;  %v1029_v6 = vmax.f32 %v1027_v3, %v1028_v35  ;;  %v1039_v51 = vsel %vm786_vm0, %v6781_v23, -inf  ;;  %v1046_v22 = vsel %vm786_vm0, %v6782_v9, -inf  ;;  %v6790_v35 = vld [vmem:[#allocation16_spill] sm:$0xff] }
  0xc5   : > { %6780 = vst [vmem:[#allocation52_spill] sm:$0xff] %v4464_v21  ;;  %v4470_v20 = vmax.f32 %v994_v43, %v995_v4  ;;  %v4472_v50 = vmax.f32 %v1001_v27, %v1002_v19  ;;  %v1035_v62 = vrot.slane %v1034_v40, 2  ;;  %v1040_v54 = vrot.slane %v1039_v51, 4  ;;  %v6806_v21 = vld [vmem:[#allocation20_spill] sm:$0xff] }
  0xc6   : > { %v4474_v41 = vmax.f32 %v1008_v1, %v1009_v33  ;;  %v1023_v12 = vrot.slane %v1022_v31, 1  ;;  %v1047_v39 = vrot.slane %v1046_v22, 4  ;;  %v1053_v8 = vsel %vm786_vm0, %v6786_v15, -inf }
  0xc7   : > { %6783 = vst [vmem:[#allocation37_spill] sm:$0xff] %v4470_v20  ;;  %6784 = vst [vmem:[#allocation53_spill] sm:$0xff] %v4472_v50  ;;  %v1036_v3 = vmax.f32 %v1034_v40, %v1035_v62  ;;  %v1041_v32 = vmax.f32 %v1039_v51, %v1040_v54  ;;  %v1054_v0 = vrot.slane %v1053_v8, 4  ;;  %v1060_v38 = vsel %vm786_vm0, %v6787_v10, -inf  ;;  %v6791_v51 = vld [vmem:[#allocation39_spill] sm:$0xff] }
  0xc8   : > { %6785 = vst [vmem:[#allocation54_spill] sm:$0xff] %v4474_v41  ;;  %v4480_v28 = vmax.f32 %v1015_v44, %v1016_v2  ;;  %v1030_v4 = vrot.slane %v1029_v6, 1  ;;  %v1048_v19 = vmax.f32 %v1046_v22, %v1047_v39  ;;  %v1061_v43 = vrot.slane %v1060_v38, 4 }
  0xc9   : > { %v4482_v27 = vmax.f32 %v1022_v31, %v1023_v12  ;;  %v1042_v1 = vrot.slane %v1041_v32, 2  ;;  %v1055_v30 = vmax.f32 %v1053_v8, %v1054_v0  ;;  %v1067_v33 = vsel %vm786_vm0, %v6790_v35, -inf  ;;  %v6792_v31 = vld [vmem:[#allocation18_spill] sm:$0xff] }
  0xca   : > { %6788 = vst [vmem:[#allocation38_spill] sm:$0xff] %v4480_v28  ;;  %v1049_v34 = vrot.slane %v1048_v19, 2  ;;  %v1062_v17 = vmax.f32 %v1060_v38, %v1061_v43  ;;  %v1068_v40 = vrot.slane %v1067_v33, 4  ;;  %v1074_v62 = vsel %vm786_vm0, %v6791_v51, -inf }
  0xcb   : > { %6789 = vst [vmem:[#allocation55_spill] sm:$0xff] %v4482_v27  ;;  %v1037_v54 = vrot.slane %v1036_v3, 1  ;;  %v1043_v61 = vmax.f32 %v1041_v32, %v1042_v1  ;;  %v1056_v44 = vrot.slane %v1055_v30, 2  ;;  %v1075_v2 = vrot.slane %v1074_v62, 4  ;;  %v6793_v27 = vld [vmem:[#allocation40_spill] sm:$0xff] }
  0xcc   : > { %v1050_v55 = vmax.f32 %v1048_v19, %v1049_v34  ;;  %v1063_v22 = vrot.slane %v1062_v17, 2  ;;  %v1069_v39 = vmax.f32 %v1067_v33, %v1068_v40  ;;  %v1081_v12 = vsel %vm786_vm0, %v6792_v31, -inf }
  0xcd   : > { %v1044_v8 = vrot.slane %v1043_v61, 1  ;;  %v1057_v0 = vmax.f32 %v1055_v30, %v1056_v44  ;;  %v1076_v52 = vmax.f32 %v1074_v62, %v1075_v2  ;;  %v1082_v57 = vrot.slane %v1081_v12, 4  ;;  %v6797_v2 = vld [vmem:[#allocation15_spill] sm:$0xff] }
  0xce   : > { %v1051_v63 = vrot.slane %v1050_v55, 1  ;;  %v1064_v38 = vmax.f32 %v1062_v17, %v1063_v22  ;;  %v1070_v43 = vrot.slane %v1069_v39, 2  ;;  %v1088_v28 = vsel %vm786_vm0, %v6793_v27, -inf }
  0xcf   : > { %v4492_v41 = vmax.f32 %v1029_v6, %v1030_v4  ;;  %v1058_v32 = vrot.slane %v1057_v0, 1  ;;  %v1077_v1 = vrot.slane %v1076_v52, 2  ;;  %v1083_v34 = vmax.f32 %v1081_v12, %v1082_v57 }
  0xd0   : > { %v4494_v19 = vmax.f32 %v1036_v3, %v1037_v54  ;;  %v4496_v33 = vmax.f32 %v1043_v61, %v1044_v8  ;;  %v1071_v40 = vmax.f32 %v1069_v39, %v1070_v43  ;;  %v1089_v50 = vrot.slane %v1088_v28, 4  ;;  %v6800_v3 = vld [vmem:[#allocation41_spill] sm:$0xff] }
  0xd1   : > { %6794 = vst [vmem:[#allocation39_spill] sm:$0xff] %v4492_v41  ;;  %v1065_v30 = vrot.slane %v1064_v38, 1  ;;  %v1078_v62 = vmax.f32 %v1076_v52, %v1077_v1  ;;  %v1084_v44 = vrot.slane %v1083_v34, 2  ;;  %v1095_v17 = vsel %vm786_vm0, %v6797_v2, -inf  ;;  %v6801_v54 = vld [vmem:[#allocation17_spill] sm:$0xff] }
  0xd2   : > { %6795 = vst [vmem:[#allocation40_spill] sm:$0xff] %v4494_v19  ;;  %6796 = vst [vmem:[#allocation56_spill] sm:$0xff] %v4496_v33  ;;  %v4500_v22 = vmax.f32 %v1050_v55, %v1051_v63  ;;  %v1072_v20 = vrot.slane %v1071_v40, 1  ;;  %v1090_v6 = vmax.f32 %v1088_v28, %v1089_v50  ;;  %v1096_v4 = vrot.slane %v1095_v17, 4  ;;  %v6804_v50 = vld [vmem:[#allocation42_spill] sm:$0xff] }
  0xd3   : > { %v4502_v41 = vmax.f32 %v1057_v0, %v1058_v32  ;;  %v1079_v57 = vrot.slane %v1078_v62, 1  ;;  %v1102_v61 = vsel %vm786_vm0, %v6800_v3, -inf  ;;  %v1109_v39 = vsel %vm786_vm0, %v6801_v54, -inf }
  0xd4   : > { %6798 = vst [vmem:[#allocation57_spill] sm:$0xff] %v4500_v22  ;;  %v1085_v12 = vmax.f32 %v1083_v34, %v1084_v44  ;;  %v1091_v52 = vrot.slane %v1090_v6, 2  ;;  %v1097_v8 = vmax.f32 %v1095_v17, %v1096_v4  ;;  %v1103_v43 = vrot.slane %v1102_v61, 4  ;;  %v6807_v44 = vld [vmem:[#allocation8_spill] sm:$0xff] }
  0xd5   : > { %6799 = vst [vmem:[#allocation58_spill] sm:$0xff] %v4502_v41  ;;  %v4508_v1 = vmax.f32 %v1064_v38, %v1065_v30  ;;  %v4510_v63 = vmax.f32 %v1071_v40, %v1072_v20  ;;  %v1110_v55 = vrot.slane %v1109_v39, 4  ;;  %v1116_v28 = vsel %vm786_vm0, %v6804_v50, -inf }
  0xd6   : > { %v1092_v0 = vmax.f32 %v1090_v6, %v1091_v52  ;;  %v1098_v32 = vrot.slane %v1097_v8, 2  ;;  %v1104_v41 = vmax.f32 %v1102_v61, %v1103_v43  ;;  %v1117_v22 = vrot.slane %v1116_v28, 4  ;;  %v6808_v6 = vld [vmem:[#allocation33_spill] sm:$0xff] }
  0xd7   : > { %6802 = vst [vmem:[#allocation41_spill] sm:$0xff] %v4508_v1  ;;  %6803 = vst [vmem:[#allocation59_spill] sm:$0xff] %v4510_v63  ;;  %v4514_v33 = vmax.f32 %v1078_v62, %v1079_v57  ;;  %v1111_v19 = vmax.f32 %v1109_v39, %v1110_v55  ;;  %v1123_v34 = vsel %vm786_vm0, %v6806_v21, 0.0  ;;  %v1130_v38 = vsel %vm786_vm0, %v6807_v44, 0.0 }
  0xd8   : > { %v1086_v30 = vrot.slane %v1085_v12, 1  ;;  %v1099_v20 = vmax.f32 %v1097_v8, %v1098_v32  ;;  %v1105_v40 = vrot.slane %v1104_v41, 2  ;;  %v1118_v17 = vmax.f32 %v1116_v28, %v1117_v22  ;;  %v6810_v32 = vld [vmem:[#allocation4_spill] sm:$0xff] }
  0xd9   : > { %6805 = vst [vmem:[#allocation42_spill] sm:$0xff] %v4514_v33  ;;  %v1112_v4 = vrot.slane %v1111_v19, 2  ;;  %v1124_v63 = vrot.slane %v1123_v34, 4  ;;  %v1131_v1 = vrot.slane %v1130_v38, 4  ;;  %v1137_v61 = vsel %vm786_vm0, %v6808_v6, 0.0 }
  0xda   : > { %v1093_v52 = vrot.slane %v1092_v0, 1  ;;  %v1100_v62 = vrot.slane %v1099_v20, 1  ;;  %v1106_v57 = vmax.f32 %v1104_v41, %v1105_v40  ;;  %v1119_v39 = vrot.slane %v1118_v17, 2 }
  0xdb   : > { %v1113_v43 = vmax.f32 %v1111_v19, %v1112_v4  ;;  %v1125_v55 = vadd.f32 %v1124_v63, %v1123_v34  ;;  %v1132_v21 = vadd.f32 %v1131_v1, %v1130_v38  ;;  %v1138_v33 = vrot.slane %v1137_v61, 4  ;;  %v6813_v19 = vld [vmem:[#allocation5_spill] sm:$0xff] }
  0xdc   : > { %v4522_v25 = vmax.f32 %v1085_v12, %v1086_v30  ;;  %v1107_v44 = vrot.slane %v1106_v57, 1  ;;  %v1120_v8 = vmax.f32 %v1118_v17, %v1119_v39  ;;  %v1144_v22 = vsel %vm786_vm0, %v6810_v32, 0.0  ;;  %v6815_v4 = vld [vmem:[#allocation9_spill] sm:$0xff]  ;;  %v6817_v32 = vld [vmem:[#allocation3_spill] sm:$0xff] }
  0xdd   : > { %v1114_v28 = vrot.slane %v1113_v43, 1  ;;  %v1126_v37 = vrot.slane %v1125_v55, 2  ;;  %v1133_v7 = vrot.slane %v1132_v21, 2  ;;  %v1139_v16 = vadd.f32 %v1138_v33, %v1137_v61 }
  0xde   : > { %6809 = vst [vmem:[#allocation8_spill] sm:$0xff] %v4522_v25  ;;  %v4526_v6 = vmax.f32 %v1092_v0, %v1093_v52  ;;  %v4528_v13 = vmax.f32 %v1099_v20, %v1100_v62  ;;  %v1145_v41 = vrot.slane %v1144_v22, 4  ;;  %v1151_v1 = vsel %vm786_vm0, %v6813_v19, 0.0 }
  0xdf   : > { %v1121_v63 = vrot.slane %v1120_v8, 1  ;;  %v1127_v12 = vadd.f32 %v1126_v37, %v1125_v55  ;;  %v1134_v34 = vadd.f32 %v1133_v7, %v1132_v21  ;;  %v1140_v38 = vrot.slane %v1139_v16, 2  ;;  %v6818_v37 = vld [vmem:[#allocation35_spill] sm:$0xff] }
  0xe0   : > { %6811 = vst [vmem:[#allocation4_spill] sm:$0xff] %v4526_v6  ;;  %6812 = vst [vmem:[#allocation60_spill] sm:$0xff] %v4528_v13  ;;  %v4532_v30 = vmax.f32 %v1106_v57, %v1107_v44  ;;  %v1146_v40 = vadd.f32 %v1145_v41, %v1144_v22  ;;  %v1152_v17 = vrot.slane %v1151_v1, 4  ;;  %v1158_v39 = vsel %vm786_vm0, %v6815_v4, 0.0 }
  0xe1   : > { %v4536_v33 = vmax.f32 %v1113_v43, %v1114_v28  ;;  %v1128_v0 = vrot.slane %v1127_v12, 1  ;;  %v1141_v20 = vadd.f32 %v1140_v38, %v1139_v16  ;;  %v1159_v61 = vrot.slane %v1158_v39, 4 }
  0xe2   : > { %6814 = vst [vmem:[#allocation61_spill] sm:$0xff] %v4532_v30  ;;  %v1147_v52 = vrot.slane %v1146_v40, 2  ;;  %v1153_v62 = vadd.f32 %v1152_v17, %v1151_v1  ;;  %v1165_v19 = vsel %vm786_vm0, %v6817_v32, 0.0  ;;  %v1172_v7 = vsel %vm786_vm0, %v6818_v37, 0.0 }
  0xe3   : > { %6816 = vst [vmem:[#allocation9_spill] sm:$0xff] %v4536_v33  ;;  %v4542_v21 = vmax.f32 %v1120_v8, %v1121_v63  ;;  %v1135_v57 = vrot.slane %v1134_v34, 1  ;;  %v1142_v55 = vrot.slane %v1141_v20, 1  ;;  %v1160_v44 = vadd.f32 %v1159_v61, %v1158_v39 }
  0xe4   : > { %v1148_v22 = vadd.f32 %v1147_v52, %v1146_v40  ;;  %v1154_v41 = vrot.slane %v1153_v62, 2  ;;  %v1166_v43 = vrot.slane %v1165_v19, 4  ;;  %v1173_v28 = vrot.slane %v1172_v7, 4 }
  0xe5   : > { %6819 = vst [vmem:[#allocation35_spill] sm:$0xff] %v4542_v21  ;;  %v4544_v4 = vadd.f32 %v1128_v0, %v1127_v12  ;;  %v1161_v16 = vrot.slane %v1160_v44, 2  ;;  %v1179_v1 = vsel %vm786_vm0, %v4168_v53, 0.0  ;;  %v1186_v38 = vsel %vm786_vm0, %v4230_v47, 0.0 }
  0xe6   : > { %v1149_v17 = vrot.slane %v1148_v22, 1  ;;  %v1155_v37 = vadd.f32 %v1154_v41, %v1153_v62  ;;  %v1167_v8 = vadd.f32 %v1166_v43, %v1165_v19  ;;  %v1174_v63 = vadd.f32 %v1173_v28, %v1172_v7 }
  0xe7   : > { %v1162_v32 = vadd.f32 %v1161_v16, %v1160_v44  ;;  %v1180_v21 = vrot.slane %v1179_v1, 4  ;;  %v1187_v39 = vrot.slane %v1186_v38, 4  ;;  %v1193_v40 = vsel %vm786_vm0, %v4176_v56, 0.0 }
  0xe8   : > { %v4552_v61 = vadd.f32 %v1135_v57, %v1134_v34  ;;  %v4554_v12 = vadd.f32 %v1142_v55, %v1141_v20  ;;  %v1168_v0 = vrot.slane %v1167_v8, 2  ;;  %v1175_v52 = vrot.slane %v1174_v63, 2 }
  0xe9   : > { %v1156_v53 = vrot.slane %v1155_v37, 1  ;;  %v1181_v33 = vadd.f32 %v1180_v21, %v1179_v1  ;;  %v1188_v30 = vadd.f32 %v1187_v39, %v1186_v38  ;;  %v1194_v47 = vrot.slane %v1193_v40, 4 }
  0xea   : > { %v1163_v13 = vrot.slane %v1162_v32, 1  ;;  %v1169_v62 = vadd.f32 %v1168_v0, %v1167_v8  ;;  %v1176_v19 = vadd.f32 %v1175_v52, %v1174_v63  ;;  %v1200_v7 = vsel %vm786_vm0, %v4236_v45, 0.0 }
  0xeb   : > { %v4558_v44 = vadd.f32 %v1149_v17, %v1148_v22  ;;  %v1182_v41 = vrot.slane %v1181_v33, 2  ;;  %v1189_v43 = vrot.slane %v1188_v30, 2  ;;  %v1195_v34 = vadd.f32 %v1194_v47, %v1193_v40 }
  0xec   : > { %v1170_v57 = vrot.slane %v1169_v62, 1  ;;  %v1177_v20 = vrot.slane %v1176_v19, 1  ;;  %v1201_v55 = vrot.slane %v1200_v7, 4  ;;  %v1207_v28 = vsel %vm786_vm0, %v4172_v24, 0.0 }
  0xed   : > { %v1183_v21 = vadd.f32 %v1182_v41, %v1181_v33  ;;  %v1190_v16 = vadd.f32 %v1189_v43, %v1188_v30  ;;  %v1196_v1 = vrot.slane %v1195_v34, 2  ;;  %v1208_v38 = vrot.slane %v1207_v28, 4 }
  0xee   : > { %v4562_v8 = vadd.f32 %v1156_v53, %v1155_v37  ;;  %v4564_v63 = vadd.f32 %v1163_v13, %v1162_v32  ;;  %v1202_v45 = vadd.f32 %v1201_v55, %v1200_v7  ;;  %v1214_v22 = vsel %vm786_vm0, %v4240_v36, 0.0 }
  0xef   : > { %v1184_v17 = vrot.slane %v1183_v21, 1  ;;  %v1191_v39 = vrot.slane %v1190_v16, 1  ;;  %v1197_v40 = vadd.f32 %v1196_v1, %v1195_v34  ;;  %v1209_v0 = vadd.f32 %v1208_v38, %v1207_v28 }
  0xf0   : > { %v1203_v52 = vrot.slane %v1202_v45, 2  ;;  %v1215_v47 = vrot.slane %v1214_v22, 4  ;;  %v1221_v33 = vsel %vm786_vm0, %v4184_v48, 0.0  ;;  %v1228_v30 = vsel %vm786_vm0, %v4244_v29, 0.0 }
  0xf1   : > { %v4572_v53 = vadd.f32 %v1170_v57, %v1169_v62  ;;  %v4574_v13 = vadd.f32 %v1177_v20, %v1176_v19  ;;  %v1198_v32 = vrot.slane %v1197_v40, 1  ;;  %v1210_v37 = vrot.slane %v1209_v0, 2 }
  0xf2   : > { %v1204_v7 = vadd.f32 %v1203_v52, %v1202_v45  ;;  %v1216_v36 = vadd.f32 %v1215_v47, %v1214_v22  ;;  %v1222_v41 = vrot.slane %v1221_v33, 4  ;;  %v1229_v43 = vrot.slane %v1228_v30, 4 }
  0xf3   : > { %v4576_v34 = vadd.f32 %v1184_v17, %v1183_v21  ;;  %v1211_v55 = vadd.f32 %v1210_v37, %v1209_v0  ;;  %v1235_v28 = vsel %vm786_vm0, %v4188_v14, 0.0  ;;  %v1242_v1 = vsel %vm786_vm0, %v4248_v11, 0.0 }
  0xf4   : > { %v4582_v29 = vadd.f32 %v1191_v39, %v1190_v16  ;;  %v1217_v62 = vrot.slane %v1216_v36, 2  ;;  %v1223_v19 = vadd.f32 %v1222_v41, %v1221_v33  ;;  %v1230_v57 = vadd.f32 %v1229_v43, %v1228_v30 }
  0xf5   : > { %v4584_v20 = vadd.f32 %v1198_v32, %v1197_v40  ;;  %v1236_v38 = vrot.slane %v1235_v28, 4  ;;  %v1243_v45 = vrot.slane %v1242_v1, 4  ;;  %v1249_v21 = vsel %vm786_vm0, %v4202_v46, 0.0 }
  0xf6   : > { %v1205_v22 = vrot.slane %v1204_v7, 1  ;;  %v1218_v17 = vadd.f32 %v1217_v62, %v1216_v36  ;;  %v1224_v0 = vrot.slane %v1223_v19, 2  ;;  %v1231_v52 = vrot.slane %v1230_v57, 2 }
  0xf7   : > { %v1212_v47 = vrot.slane %v1211_v55, 1  ;;  %v1237_v37 = vadd.f32 %v1236_v38, %v1235_v28  ;;  %v1244_v14 = vadd.f32 %v1243_v45, %v1242_v1  ;;  %v1250_v11 = vrot.slane %v1249_v21, 4 }
  0xf8   : > { %v1219_v16 = vrot.slane %v1218_v17, 1  ;;  %v1225_v39 = vadd.f32 %v1224_v0, %v1223_v19  ;;  %v1232_v48 = vadd.f32 %v1231_v52, %v1230_v57  ;;  %v1256_v40 = vsel %vm786_vm0, %v4252_v60, 0.0 }
  0xf9   : > { %v1238_v33 = vrot.slane %v1237_v37, 2  ;;  %v1245_v30 = vrot.slane %v1244_v14, 2  ;;  %v1251_v32 = vadd.f32 %v1250_v11, %v1249_v21  ;;  %v1257_v41 = vrot.slane %v1256_v40, 4 }
  0xfa   : > { %v4590_v43 = vadd.f32 %v1205_v22, %v1204_v7  ;;  %v1226_v46 = vrot.slane %v1225_v39, 1  ;;  %v1233_v36 = vrot.slane %v1232_v48, 1  ;;  %v1263_v62 = vsel %vm786_vm0, %v6781_v23, 0.0 }
  0xfb   : > { %v1239_v28 = vadd.f32 %v1238_v33, %v1237_v37  ;;  %v1246_v1 = vadd.f32 %v1245_v30, %v1244_v14  ;;  %v1252_v38 = vrot.slane %v1251_v32, 2  ;;  %v1258_v45 = vadd.f32 %v1257_v41, %v1256_v40 }
  0xfc   : > { %v4594_v19 = vadd.f32 %v1212_v47, %v1211_v55  ;;  %v4596_v57 = vadd.f32 %v1219_v16, %v1218_v17  ;;  %v1264_v60 = vrot.slane %v1263_v62, 4  ;;  %v1270_v21 = vsel %vm786_vm0, %v6782_v9, 0.0 }
  0xfd   : > { %v1240_v0 = vrot.slane %v1239_v28, 1  ;;  %v1247_v7 = vrot.slane %v1246_v1, 1  ;;  %v1253_v22 = vadd.f32 %v1252_v38, %v1251_v32  ;;  %v1259_v52 = vrot.slane %v1258_v45, 2 }
  0xfe   : > { %v1265_v11 = vadd.f32 %v1264_v60, %v1263_v62  ;;  %v1271_v24 = vrot.slane %v1270_v21, 4  ;;  %v1277_v37 = vsel %vm786_vm0, %v6786_v15, 0.0  ;;  %v1284_v14 = vsel %vm786_vm0, %v6787_v10, 0.0 }
  0xff   : > { %v4604_v55 = vadd.f32 %v1226_v46, %v1225_v39  ;;  %v4606_v17 = vadd.f32 %v1233_v36, %v1232_v48  ;;  %v1254_v47 = vrot.slane %v1253_v22, 1  ;;  %v1260_v16 = vadd.f32 %v1259_v52, %v1258_v45 }
 0x100   : > { %v1266_v40 = vrot.slane %v1265_v11, 2  ;;  %v1272_v9 = vadd.f32 %v1271_v24, %v1270_v21  ;;  %v1278_v33 = vrot.slane %v1277_v37, 4  ;;  %v1285_v30 = vrot.slane %v1284_v14, 4 }
 0x101   : > { %v4608_v32 = vadd.f32 %v1240_v0, %v1239_v28  ;;  %v4610_v41 = vadd.f32 %v1247_v7, %v1246_v1  ;;  %v1291_v62 = vsel %vm786_vm0, %v6790_v35, 0.0  ;;  %v1298_v10 = vsel %vm786_vm0, %v6791_v51, 0.0 }
 0x102   : > { %v1267_v46 = vadd.f32 %v1266_v40, %v1265_v11  ;;  %v1273_v39 = vrot.slane %v1272_v9, 2  ;;  %v1279_v48 = vadd.f32 %v1278_v33, %v1277_v37  ;;  %v1286_v36 = vadd.f32 %v1285_v30, %v1284_v14 }
 0x103   : > { %v4616_v38 = vadd.f32 %v1254_v47, %v1253_v22  ;;  %v1292_v45 = vrot.slane %v1291_v62, 4  ;;  %v1299_v24 = vrot.slane %v1298_v10, 4  ;;  %v1305_v28 = vsel %vm786_vm0, %v6792_v31, 0.0 }
 0x104   : > { %v1261_v60 = vrot.slane %v1260_v16, 1  ;;  %v1274_v1 = vadd.f32 %v1273_v39, %v1272_v9  ;;  %v1280_v21 = vrot.slane %v1279_v48, 2  ;;  %v1287_v0 = vrot.slane %v1286_v36, 2 }
 0x105   : > { %v1293_v7 = vadd.f32 %v1292_v45, %v1291_v62  ;;  %v1300_v52 = vadd.f32 %v1299_v24, %v1298_v10  ;;  %v1306_v35 = vrot.slane %v1305_v28, 4  ;;  %v1312_v51 = vsel %vm786_vm0, %v6793_v27, 0.0 }
 0x106   : > { %v1268_v11 = vrot.slane %v1267_v46, 1  ;;  %v1275_v37 = vrot.slane %v1274_v1, 1  ;;  %v1281_v14 = vadd.f32 %v1280_v21, %v1279_v48  ;;  %v1288_v22 = vadd.f32 %v1287_v0, %v1286_v36 }
 0x107   : > { %v1294_v47 = vrot.slane %v1293_v7, 2  ;;  %v1301_v40 = vrot.slane %v1300_v52, 2  ;;  %v1307_v33 = vadd.f32 %v1306_v35, %v1305_v28  ;;  %v1313_v30 = vrot.slane %v1312_v51, 4 }
 0x108   : > { %v4622_v15 = vadd.f32 %v1261_v60, %v1260_v16  ;;  %v1282_v31 = vrot.slane %v1281_v14, 1  ;;  %v1289_v9 = vrot.slane %v1288_v22, 1  ;;  %v1319_v62 = vsel %vm786_vm0, %v6797_v2, 0.0 }
 0x109   : > { %v1295_v10 = vadd.f32 %v1294_v47, %v1293_v7  ;;  %v1302_v39 = vadd.f32 %v1301_v40, %v1300_v52  ;;  %v1308_v45 = vrot.slane %v1307_v33, 2  ;;  %v1314_v24 = vadd.f32 %v1313_v30, %v1312_v51 }
 0x10a   : > { %v1269_v27 = vadd.f32 %v1268_v11, %v1267_v46  ;;  %v1276_v23 = vadd.f32 %v1275_v37, %v1274_v1  ;;  %v1320_v56 = vrot.slane %v1319_v62, 4  ;;  %v1326_v48 = vsel %vm786_vm0, %v6800_v3, 0.0 }
 0x10b   : > { %v1296_v36 = vrot.slane %v1295_v10, 1  ;;  %v1303_v35 = vrot.slane %v1302_v39, 1  ;;  %v1309_v28 = vadd.f32 %v1308_v45, %v1307_v33  ;;  %v1315_v16 = vrot.slane %v1314_v24, 2 }
 0x10c   : > { %v1321_v60 = vadd.f32 %v1320_v56, %v1319_v62  ;;  %v1327_v21 = vrot.slane %v1326_v48, 4  ;;  %v1333_v0 = vsel %vm786_vm0, %v6801_v54, 0.0  ;;  %v1340_v7 = vsel %vm786_vm0, %v6804_v50, 0.0 }
 0x10d   : > { %v1283_v52 = vadd.f32 %v1282_v31, %v1281_v14  ;;  %v1290_v51 = vadd.f32 %v1289_v9, %v1288_v22  ;;  %v1310_v46 = vrot.slane %v1309_v28, 1  ;;  %v1316_v1 = vadd.f32 %v1315_v16, %v1314_v24 }
 0x10e   : > { %v1322_v11 = vrot.slane %v1321_v60, 2  ;;  %v1328_v37 = vadd.f32 %v1327_v21, %v1326_v48  ;;  %v1334_v47 = vrot.slane %v1333_v0, 4  ;;  %v1341_v3 = vrot.slane %v1340_v7, 4 }
 0x10f   : > { %v1297_v40 = vadd.f32 %v1296_v36, %v1295_v10  ;;  %v1304_v30 = vadd.f32 %v1303_v35, %v1302_v39  ;;  %v1311_v33 = vadd.f32 %v1310_v46, %v1309_v28  ;;  %v1317_v45 = vrot.slane %v1316_v1, 1 }
 0x110   : > { %v1323_v56 = vadd.f32 %v1322_v11, %v1321_v60  ;;  %v1329_v62 = vrot.slane %v1328_v37, 2  ;;  %v1335_v2 = vadd.f32 %v1334_v47, %v1333_v0  ;;  %v1342_v6 = vadd.f32 %v1341_v3, %v1340_v7 }
 0x111   : > { %v1318_v54 = vadd.f32 %v1317_v45, %v1316_v1  ;;  %v1348_v25 = vmul.f32 0.25, %v4544_v4  ;;  %v1349_v31 = vmul.f32 0.25, %v4552_v61  ;;  %v1350_v50 = vmul.f32 0.25, %v4554_v12 }
 0x112   : > { %v1324_v14 = vrot.slane %v1323_v56, 1  ;;  %v1330_v22 = vadd.f32 %v1329_v62, %v1328_v37  ;;  %v1336_v9 = vrot.slane %v1335_v2, 2  ;;  %v1343_v24 = vrot.slane %v1342_v6, 2 }
 0x113   : > { %v1351_v10 = vmul.f32 0.25, %v4558_v44  ;;  %v1352_v39 = vmul.f32 0.25, %v4562_v8  ;;  %v1353_v48 = vmul.f32 0.25, %v4564_v63  ;;  %v1354_v36 = vmul.f32 0.25, %v4572_v53 }
 0x114   : > { %v1331_v35 = vrot.slane %v1330_v22, 1  ;;  %v1337_v28 = vadd.f32 %v1336_v9, %v1335_v2  ;;  %v1344_v16 = vadd.f32 %v1343_v24, %v1342_v6  ;;  %v1355_v4 = vmul.f32 0.25, %v4574_v13  ;;  %v6827_v9 = vld [vmem:[#allocation53_spill] sm:$0xff]  ;;  %v6828_v24 = vld [vmem:[#allocation54_spill] sm:$0xff] }
 0x115   : > { %v1325_v61 = vadd.f32 %v1324_v14, %v1323_v56  ;;  %v1356_v12 = vmul.f32 0.25, %v4576_v34  ;;  %v1357_v60 = vmul.f32 0.25, %v4582_v29  ;;  %v1358_v21 = vmul.f32 0.25, %v4584_v20 }
 0x116   : > { %v1338_v0 = vrot.slane %v1337_v28, 1  ;;  %v1345_v44 = vrot.slane %v1344_v16, 1  ;;  %v1359_v8 = vmul.f32 0.25, %v4590_v43  ;;  %v1360_v63 = vmul.f32 0.25, %v4594_v19 }
 0x117   : > { %v1332_v7 = vadd.f32 %v1331_v35, %v1330_v22  ;;  %v1361_v53 = vmul.f32 0.25, %v4596_v57  ;;  %v1362_v2 = vmul.f32 0.25, %v4604_v55  ;;  %v1363_v6 = vmul.f32 0.25, %v4606_v17  ;;  %v6823_v22 = vld [vmem:[#allocation50_spill] sm:$0xff] }
 0x118   : > { %v1339_v13 = vadd.f32 %v1338_v0, %v1337_v28  ;;  %v1346_v46 = vadd.f32 %v1345_v44, %v1344_v16  ;;  %v1364_v34 = vmul.f32 0.25, %v4608_v32  ;;  %v1365_v29 = vmul.f32 0.25, %v4610_v41  ;;  %v6832_v28 = vld [vmem:[#allocation40_spill] sm:$0xff]  ;;  %v6836_v44 = vld [vmem:[#allocation41_spill] sm:$0xff] }
 0x119   : > { %v1366_v20 = vmul.f32 0.25, %v4616_v38  ;;  %v1367_v1 = vmul.f32 0.25, %v4622_v15  ;;  %v1368_v43 = vmul.f32 0.25, %v1269_v27  ;;  %v1369_v11 = vmul.f32 0.25, %v1276_v23 }
 0x11a   : > { %v1370_v19 = vmul.f32 0.25, %v1283_v52  ;;  %v1371_v37 = vmul.f32 0.25, %v1290_v51  ;;  %v1372_v47 = vmul.f32 0.25, %v1297_v40  ;;  %v1373_v57 = vmul.f32 0.25, %v1304_v30  ;;  %v6820_v51 = vld [vmem:[#allocation47_spill] sm:$0xff]  ;;  %v6821_v40 = vld [vmem:[#allocation48_spill] sm:$0xff] }
 0x11b   : > { %v1374_v3 = vmul.f32 0.25, %v1311_v33  ;;  %v1375_v55 = vmul.f32 0.25, %v1318_v54  ;;  %v1376_v45 = vmul.f32 0.25, %v1325_v61  ;;  %v1377_v17 = vmul.f32 0.25, %v1332_v7  ;;  %v6822_v33 = vld [vmem:[#allocation49_spill] sm:$0xff] }
 0x11c   : > { %v1378_v56 = vmul.f32 0.25, %v1339_v13  ;;  %v1379_v62 = vmul.f32 0.25, %v1346_v46  ;;  %v1380_v32 = vadd.f32 %v1348_v25, %v4312_v49  ;;  %v1381_v41 = vadd.f32 %v1349_v31, %v4318_v42  ;;  %v6824_v25 = vld [vmem:[#allocation51_spill] sm:$0xff]  ;;  %v6825_v31 = vld [vmem:[#allocation52_spill] sm:$0xff] }
 0x11d   : > { %v1382_v38 = vadd.f32 %v1350_v50, %v4328_v5  ;;  %v1383_v15 = vadd.f32 %v1351_v10, %v4378_v26  ;;  %v1384_v23 = vadd.f32 %v1352_v39, %v4381_v18  ;;  %v1385_v27 = vadd.f32 %v1353_v48, %v4428_v59  ;;  %v6826_v50 = vld [vmem:[#allocation37_spill] sm:$0xff]  ;;  %v6829_v10 = vld [vmem:[#allocation38_spill] sm:$0xff]  ;;  %v6830_v39 = vld [vmem:[#allocation55_spill] sm:$0xff] }
 0x11e   : > { %v1386_v52 = vadd.f32 %v1354_v36, %v4431_v58  ;;  %v1387_v54 = vadd.f32 %v1355_v4, %v6820_v51  ;;  %v1388_v30 = vadd.f32 %v1356_v12, %v6821_v40  ;;  %v1389_v14 = vadd.f32 %v1357_v60, %v6822_v33  ;;  %v6831_v36 = vld [vmem:[#allocation39_spill] sm:$0xff]  ;;  %v6833_v4 = vld [vmem:[#allocation56_spill] sm:$0xff]  ;;  %v6834_v12 = vld [vmem:[#allocation57_spill] sm:$0xff] }
 0x11f   : > { %v1390_v49 = vadd.f32 %v1358_v21, %v6823_v22  ;;  %v1391_v42 = vadd.f32 %v1359_v8, %v6824_v25  ;;  %v1392_v5 = vadd.f32 %v1360_v63, %v6825_v31  ;;  %v1393_v26 = vadd.f32 %v1361_v53, %v6826_v50  ;;  %v6835_v21 = vld [vmem:[#allocation58_spill] sm:$0xff]  ;;  %v6837_v63 = vld [vmem:[#allocation59_spill] sm:$0xff]  ;;  %v6840_v46 = vld [vmem:[#allocation4_spill] sm:$0xff] }
 0x120   : > { %v1394_v18 = vadd.f32 %v1362_v2, %v6827_v9  ;;  %v1395_v59 = vadd.f32 %v1363_v6, %v6828_v24  ;;  %v1396_v58 = vadd.f32 %v1364_v34, %v6829_v10  ;;  %v1397_v48 = vadd.f32 %v1365_v29, %v6830_v39  ;;  %v6838_v53 = vld [vmem:[#allocation42_spill] sm:$0xff]  ;;  %v6839_v6 = vld [vmem:[#allocation8_spill] sm:$0xff]  ;;  %v6842_v51 = vld [vmem:[#allocation61_spill] sm:$0xff] }
 0x121   : > { %v1398_v35 = vadd.f32 %v1366_v20, %v6831_v36  ;;  %v1399_v16 = vadd.f32 %v1367_v1, %v6832_v28  ;;  %v1400_v61 = vadd.f32 %v1368_v43, %v6833_v4  ;;  %v1401_v60 = vadd.f32 %v1369_v11, %v6834_v12  ;;  %v6841_v29 = vld [vmem:[#allocation60_spill] sm:$0xff]  ;;  %v6843_v40 = vld [vmem:[#allocation9_spill] sm:$0xff]  ;;  %v6844_v33 = vld [vmem:[#allocation35_spill] sm:$0xff] }
 0x122   : > { %v1402_v0 = vadd.f32 %v1370_v19, %v6835_v21  ;;  %v1403_v8 = vadd.f32 %v1371_v37, %v6836_v44  ;;  %v1404_v7 = vadd.f32 %v1372_v47, %v6837_v63  ;;  %v1405_v2 = vadd.f32 %v1373_v57, %v6838_v53  ;;  %v6845_v22 = vld [vmem:[#allocation36_spill] sm:$0xff]  ;;  %v6846_v25 = vld [vmem:[#allocation43_spill] sm:$0xff] }
 0x123   : > { %v1406_v13 = vadd.f32 %v1374_v3, %v6839_v6  ;;  %v1407_v34 = vadd.f32 %v1375_v55, %v6840_v46  ;;  %v1408_v20 = vadd.f32 %v1376_v45, %v6841_v29  ;;  %v1409_v1 = vadd.f32 %v1377_v17, %v6842_v51 }
 0x124   : > { %v1410_v43 = vadd.f32 %v1378_v56, %v6843_v40  ;;  %v1411_v11 = vadd.f32 %v1379_v62, %v6844_v33  ;;  %v1416_v19 = vrot.slane %v6845_v22, 7  ;;  %v1417_v37 = vrot.slane %v6846_v25, 1 }
 0x125   : > { %v1418_v47 = vrot.slane %v6846_v25, 2  ;;  %v1419_v57 = vrot.slane %v6846_v25, 3  ;;  %v1420_v3 = vrot.slane %v6846_v25, 4  ;;  %v1421_v55 = vrot.slane %v6846_v25, 5 }
 0x126   : > { %v1422_v45 = vrot.slane %v6846_v25, 6  ;;  %v1431_v31 = vmul.f32 %v1416_v19, %v1380_v32  ;;  %v1432_v17 = vmul.f32 %v1416_v19, %v1381_v41  ;;  %v1435_v56 = vmul.f32 %v6846_v25, %v1384_v23 }
 0x127   : > { %v1433_v50 = vmul.f32 %v1416_v19, %v1382_v38  ;;  %v4692_v62 = vmul.f32 %v1416_v19, %v1383_v15  ;;  %v1436_v9 = vmul.f32 %v6846_v25, %v1385_v27  ;;  %v1437_v24 = vmul.f32 %v6846_v25, %v1386_v52 }
 0x128   : > { %v4697_v10 = vmul.f32 %v6846_v25, %v1387_v54  ;;  %v1439_v39 = vmul.f32 %v1417_v37, %v1388_v30  ;;  %v1440_v36 = vmul.f32 %v1417_v37, %v1389_v14  ;;  %v1441_v28 = vmul.f32 %v1417_v37, %v1390_v49 }
 0x129   : > { %v4699_v4 = vmul.f32 %v1417_v37, %v1391_v42  ;;  %v1443_v12 = vmul.f32 %v1418_v47, %v1392_v5  ;;  %v1444_v32 = vmul.f32 %v1418_v47, %v1393_v26  ;;  %v1445_v41 = vmul.f32 %v1418_v47, %v1394_v18 }
 0x12a   : > { %v4701_v21 = vmul.f32 %v1418_v47, %v1395_v59  ;;  %v1447_v38 = vmul.f32 %v1419_v57, %v1396_v58  ;;  %v1448_v15 = vmul.f32 %v1419_v57, %v1397_v48  ;;  %v1449_v23 = vmul.f32 %v1419_v57, %v1398_v35 }
 0x12b   : > { %v4703_v44 = vmul.f32 %v1419_v57, %v1399_v16  ;;  %v1451_v27 = vmul.f32 %v1420_v3, %v1400_v61  ;;  %v1452_v52 = vmul.f32 %v1420_v3, %v1401_v60  ;;  %v1453_v63 = vmul.f32 %v1420_v3, %v1402_v0 }
 0x12c   : > { %v4705_v54 = vmul.f32 %v1420_v3, %v1403_v8  ;;  %v1455_v30 = vmul.f32 %v1421_v55, %v1404_v7  ;;  %v1456_v14 = vmul.f32 %v1421_v55, %v1405_v2  ;;  %v1457_v49 = vmul.f32 %v1421_v55, %v1406_v13 }
 0x12d   : > { %v4707_v42 = vmul.f32 %v1421_v55, %v1407_v34  ;;  %v1459_v5 = vmul.f32 %v1422_v45, %v1408_v20  ;;  %v1460_v26 = vmul.f32 %v1422_v45, %v1409_v1  ;;  %v1495_v18 = vrot.slane %v1435_v56, 7 }
 0x12e   : > { %v1461_v59 = vmul.f32 %v1422_v45, %v1410_v43  ;;  %v4709_v53 = vmul.f32 %v1422_v45, %v1411_v11  ;;  %v1497_v58 = vrot.slane %v1439_v39, 6  ;;  %v1499_v48 = vrot.slane %v1443_v12, 5 }
 0x12f   : > { %v1496_v35 = vsel %vm446_vm1, %v1495_v18, %v1431_v31  ;;  %v1501_v16 = vrot.slane %v1447_v38, 4  ;;  %v1504_v61 = vrot.slane %v1451_v27, 3  ;;  %v1507_v0 = vrot.slane %v1455_v30, 2 }
 0x130   : > { %v1498_v60 = vsel %vm759_vm3, %v1497_v58, %v1496_v35  ;;  %v1513_v7 = vrot.slane %v1436_v9, 7  ;;  %v1515_v2 = vrot.slane %v1440_v36, 6  ;;  %v1517_v6 = vrot.slane %v1444_v32, 5 }
 0x131   : > { %v1500_v8 = vsel %vm762_vm4, %v1499_v48, %v1498_v60  ;;  %v1510_v46 = vrot.slane %v1459_v5, 1  ;;  %v1519_v34 = vrot.slane %v1448_v15, 4  ;;  %v1521_v51 = vrot.slane %v1452_v52, 3  ;;  %v6849_v48 = vld [vmem:[#allocation24_spill] sm:$0xff] }
 0x132   : > { %v1503_v13 = vsel %vm1502_vm5, %v1501_v16, %v1500_v8  ;;  %v1514_v20 = vsel %vm446_vm1, %v1513_v7, %v1432_v17  ;;  %v1527_v1 = vrot.slane %v1437_v24, 7  ;;  %v1523_v43 = vrot.slane %v1456_v14, 2  ;;  %v6851_v16 = vld [vmem:[#allocation44_spill] sm:$0xff]  ;;  %v6855_v7 = vld [vmem:[#allocation26_spill] sm:$0xff] }
 0x133   : > { %v1506_v29 = vsel %vm1505_vm6, %v1504_v61, %v1503_v13  ;;  %v1516_v40 = vsel %vm759_vm3, %v1515_v2, %v1514_v20  ;;  %v1529_v33 = vrot.slane %v1441_v28, 6  ;;  %v1531_v11 = vrot.slane %v1445_v41, 5  ;;  %v6853_v60 = vld [vmem:[#allocation32_spill] sm:$0xff] }
 0x134   : > { %v1509_v22 = vsel %vm1508_vm7, %v1507_v0, %v1506_v29  ;;  %v1518_v19 = vsel %vm762_vm4, %v1517_v6, %v1516_v40  ;;  %v1525_v37 = vrot.slane %v1460_v26, 1  ;;  %v1528_v47 = vsel %vm446_vm1, %v1527_v1, %v1433_v50 }
 0x135   : > { %v1520_v57 = vsel %vm1502_vm5, %v1519_v34, %v1518_v19  ;;  %v1530_v3 = vsel %vm759_vm3, %v1529_v33, %v1528_v47  ;;  %v1533_v55 = vrot.slane %v1449_v23, 4  ;;  %v1535_v45 = vrot.slane %v1453_v63, 3  ;;  %v6857_v34 = vld [vmem:[#allocation27_spill] sm:$0xff]  ;;  %v6863_v19 = vld [vmem:[#allocation46_spill] sm:$0xff] }
 0x136   : > { %v1522_v31 = vsel %vm1505_vm6, %v1521_v51, %v1520_v57  ;;  %v1532_v17 = vsel %vm762_vm4, %v1531_v11, %v1530_v3  ;;  %v1537_v56 = vrot.slane %v1457_v49, 2  ;;  %v1541_v9 = vrot.slane %v4697_v10, 7  ;;  %v6859_v51 = vld [vmem:[#allocation28_spill] sm:$0xff] }
 0x137   : > { %v1524_v24 = vsel %vm1508_vm7, %v1523_v43, %v1522_v31  ;;  %v1534_v39 = vsel %vm1502_vm5, %v1533_v55, %v1532_v17  ;;  %v1543_v36 = vrot.slane %v4699_v4, 6  ;;  %v1545_v50 = vrot.slane %v4701_v21, 5  ;;  %v6861_v43 = vld [vmem:[#allocation45_spill] sm:$0xff]  ;;  %v6864_v31 = vld [vmem:[#allocation19_spill] sm:$0xff] }
 0x138   : > { %v1512_v28 = vsel %vm1511_vm8, %v1510_v46, %v1509_v22  ;;  %v1536_v12 = vsel %vm1505_vm6, %v1535_v45, %v1534_v39  ;;  %v1539_v32 = vrot.slane %v1461_v59, 1  ;;  %v1542_v41 = vsel %vm446_vm1, %v1541_v9, %v4692_v62  ;;  %v6848_v59 = vld [vmem:[#allocation25_spill] sm:$0xff] }
 0x139   : > { %v1526_v38 = vsel %vm1511_vm8, %v1525_v37, %v1524_v24  ;;  %v1538_v10 = vsel %vm1508_vm7, %v1537_v56, %v1536_v12  ;;  %v1544_v15 = vsel %vm759_vm3, %v1543_v36, %v1542_v41  ;;  %v1547_v23 = vrot.slane %v4703_v44, 4  ;;  %v6847_v44 = vld [vmem:[#allocation31_spill] sm:$0xff]  ;;  %v6865_v56 = vld [vmem:[#allocation21_spill] sm:$0xff]  ;;  %v6867_v24 = vld [vmem:[#allocation22_spill] sm:$0xff] }
 0x13a   : > { %v1540_v4 = vsel %vm1511_vm8, %v1539_v32, %v1538_v10  ;;  %v1546_v21 = vsel %vm762_vm4, %v1545_v50, %v1544_v15  ;;  %v1549_v27 = vrot.slane %v4705_v54, 3  ;;  %v1551_v52 = vrot.slane %v4707_v42, 2  ;;  %v6869_v36 = vld [vmem:[#allocation23_spill] sm:$0xff] }
 0x13b   : > { %v1548_v63 = vsel %vm1502_vm5, %v1547_v23, %v1546_v21  ;;  %v1553_v62 = vrot.slane %v4709_v53, 1  ;;  %v1559_v30 = vrot.slane %v1512_v28, 4  ;;  %v1565_v49 = vrot.slane %v1526_v38, 4  ;;  %v6876_v21 = vld [vmem:[#allocation20_spill] sm:$0xff] }
 0x13c   : > { %v1550_v14 = vsel %vm1505_vm6, %v1549_v27, %v1548_v63  ;;  %v1571_v5 = vrot.slane %v1540_v4, 4  ;;  %v3712_v26 = vmov 1983009808   ;;  %v303_v58 = vadd.f32 %v6848_v59, %v6847_v44 }
 0x13d   : > { %v1588_v18 = vunpack.c.l.s4 %v3712_v26  ;;  %v6850_v35 = vrot.slane %v6849_v48, 2  ;;  %v6852_v42 = vrot.slane %v6851_v16, 2  ;;  %v1552_v53 = vsel %vm1508_vm7, %v1551_v52, %v1550_v14  ;;  %v6877_v52 = vld [vmem:[#allocation33_spill] sm:$0xff]  ;;  %v6879_v14 = vld [vmem:[#allocation3_spill] sm:$0xff] }
 0x13e   : > { %v6854_v0 = vrot.slane %v6853_v60, 1  ;;  %v6856_v2 = vrot.slane %v6855_v7, 1  ;;  %v1554_v13 = vsel %vm1511_vm8, %v1553_v62, %v1552_v53  ;;  %v6858_v29 = vrot.slane %v6857_v34, 1  ;;  %v6878_v62 = vld [vmem:[#allocation5_spill] sm:$0xff] }
 0x13f   : > { %v798_v54 = vadd.f32 %v6850_v35, %v6849_v48  ;;  %v805_v61 = vadd.f32 %v6852_v42, %v6851_v16  ;;  %v1589_v46 = vunpack.c.0.s8 %v1588_v18  ;;  %v6860_v1 = vrot.slane %v6859_v51, 1  ;;  %v6881_v18 = vld [vmem:[#allocation10_spill] sm:$0xff] }
 0x140   : > { %v465_v8 = vadd.f32 %v6854_v0, %v6853_v60  ;;  %v472_v6 = vadd.f32 %v6856_v2, %v6855_v7  ;;  %v479_v20 = vadd.f32 %v6858_v29, %v6857_v34  ;;  %v6862_v33 = vrot.slane %v6861_v43, 2  ;;  %v6884_v48 = vld [vmem:[#allocation6_spill] sm:$0xff]  ;;  %v6888_v60 = vld [vmem:[#allocation12_spill] sm:$0xff]  ;;  %v6889_v2 = vld [vmem:[#allocation11_spill] sm:$0xff] }
 0x141   : > { %v486_v40 = vadd.f32 %v6860_v1, %v6859_v51  ;;  %v1560_v22 = vadd.f32 %v1559_v30, %v1512_v28  ;;  %v792_v37 = vrot.slane %v6863_v19, 1  ;;  %v1566_v47 = vadd.f32 %v1565_v49, %v1526_v38  ;;  %v6891_v51 = vld [vmem:[#allocation13_spill] sm:$0xff] }
 0x142   : > { %v812_v11 = vadd.f32 %v6862_v33, %v6861_v43  ;;  %v1572_v57 = vadd.f32 %v1571_v5, %v1540_v4  ;;  %v1577_v3 = vrot.slane %v1554_v13, 4  ;;  %v799_v55 = vrot.slane %v798_v54, 1  ;;  %v6880_v5 = vld [vmem:[#allocation7_spill] sm:$0xff]  ;;  %v6892_v33 = vld [vmem:[#allocation16_spill] sm:$0xff] }
 0x143   : > { %v806_v45 = vrot.slane %v805_v61, 1  ;;  %v4772_v17 = vsub.s32 %v1589_v46, %v6864_v31  ;;  %v4775_v9 = vadd.f32 %v465_v8, %v6865_v56  ;;  %v4778_v39 = vadd.f32 %v472_v6, %v6867_v24 }
 0x144   : > { %v4781_v50 = vadd.f32 %v479_v20, %v6869_v36  ;;  %v4783_v28 = vadd.f32 %v486_v40, %v303_v58  ;;  %v813_v12 = vrot.slane %v812_v11, 1  ;;  %v1561_v32 = vrot.slane %v1560_v22, 2 }
 0x145   : > { %6866 = vst [vmem:[#allocation47_spill] sm:$0xff] %v4775_v9  ;;  %6868 = vst [vmem:[#allocation48_spill] sm:$0xff] %v4778_v39  ;;  %v4786_v41 = vadd.f32 %v792_v37, %v6863_v19  ;;  %v1567_v38 = vrot.slane %v1566_v47, 2  ;;  %v1573_v10 = vrot.slane %v1572_v57, 2  ;;  %v4788_v15 = vadd.f32 %v1577_v3, %v1554_v13  ;;  %v6890_v13 = vld [vmem:[#allocation14_spill] sm:$0xff] }
 0x146   : > { %6870 = vst [vmem:[#allocation49_spill] sm:$0xff] %v4781_v50  ;;  %6871 = vst [vmem:[#allocation50_spill] sm:$0xff] %v4783_v28  ;;  %v4790_v23 = vadd.f32 %v799_v55, %v798_v54  ;;  %v4792_v4 = vadd.f32 %v806_v45, %v805_v61  ;;  %v1593_v27 = vrot.slane %v6876_v21, %v4772_v17  ;;  %v6885_v54 = vld [vmem:[#allocation34_spill] sm:$0xff]  ;;  %v6895_v55 = vld [vmem:[#allocation17_spill] sm:$0xff] }
 0x147   : > { %6872 = vst [vmem:[#allocation51_spill] sm:$0xff] %v4786_v41  ;;  %6873 = vst [vmem:[#allocation52_spill] sm:$0xff] %v4788_v15  ;;  %v1607_v63 = vrot.slane %v6877_v52, %v4772_v17  ;;  %v1600_v30 = vrot.slane %v6878_v62, %v4772_v17  ;;  %v1614_v49 = vrot.slane %v6879_v14, %v4772_v17 }
 0x148   : > { %6874 = vst [vmem:[#allocation37_spill] sm:$0xff] %v4790_v23  ;;  %6875 = vst [vmem:[#allocation53_spill] sm:$0xff] %v4792_v4  ;;  %v1625_v26 = vrot.slane %v6880_v5, %v4772_v17  ;;  %v1639_v44 = vrot.slane %v6881_v18, %v4772_v17  ;;  %v4806_v59 = vadd.f32 %v813_v12, %v812_v11 }
 0x149   : > { %v4808_v58 = vadd.f32 %v1561_v32, %v1560_v22  ;;  %v1632_v35 = vrot.slane %v6884_v48, %v4772_v17  ;;  %v4814_v16 = vrot.slane %v6885_v54, %v4772_v17  ;;  %v4816_v42 = vadd.f32 %v1567_v38, %v1566_v47  ;;  %v6893_v22 = vld [vmem:[#allocation18_spill] sm:$0xff] }
 0x14a   : > { %6882 = vst [vmem:[#allocation54_spill] sm:$0xff] %v4806_v59  ;;  %v4818_v61 = vadd.f32 %v1573_v10, %v1572_v57  ;;  %v4823_v0 = vrot.slane %v6888_v60, %v4772_v17  ;;  %v1615_v8 = vcombine.low %v1593_v27, %v1607_v63  ;;  %v1616_v7 = vcombine.high %v1593_v27, %v1607_v63  ;;  %v6894_v57 = vld [vmem:[#allocation15_spill] sm:$0xff] }
 0x14b   : > { %6883 = vst [vmem:[#allocation38_spill] sm:$0xff] %v4808_v58  ;;  %6886 = vst [vmem:[#allocation55_spill] sm:$0xff] %v4816_v42  ;;  %v4827_v6 = vrot.slane %v6889_v2, %v4772_v17  ;;  %v4831_v46 = vrot.slane %v6890_v13, %v4772_v17  ;;  %v1617_v34 = vcombine.low %v1600_v30, %v1614_v49 }
 0x14c   : > { %6887 = vst [vmem:[#allocation39_spill] sm:$0xff] %v4818_v61  ;;  %v1618_v29 = vcombine.high %v1600_v30, %v1614_v49  ;;  %v1647_v20 = vcombine.low %v1625_v26, %v1639_v44  ;;  %v4835_v1 = vrot.slane %v6891_v51, %v4772_v17  ;;  %v1648_v40 = vcombine.high %v1625_v26, %v1639_v44 }
 0x14d   : > { %v1649_v43 = vcombine.low %v1632_v35, %v4814_v16  ;;  %v4840_v11 = vrot.slane %v6892_v33, %v4772_v17  ;;  %v4844_v19 = vrot.slane %v6893_v22, %v4772_v17  ;;  %v1650_v37 = vcombine.high %v1632_v35, %v4814_v16 }
 0x14e   : > { %v1679_v47 = vcombine.low %v4823_v0, %v4831_v46  ;;  %v4851_v3 = vrot.slane %v6894_v57, %v4772_v17  ;;  %v4855_v45 = vrot.slane %v6895_v55, %v4772_v17  ;;  %v1680_v56 = vcombine.high %v4823_v0, %v4831_v46 }
 0x14f   : > { %v1681_v24 = vcombine.low %v4827_v6, %v4835_v1  ;;  %v3623_v36 = vcombine.low %v1607_v63, %v1607_v63  ;;  %v4862_v12 = vrot.slane %v1615_v8, %v4772_v17  ;;  %v1682_v32 = vcombine.high %v4827_v6, %v4835_v1 }
 0x150   : > { %v3624_v38 = vcombine.high %v1607_v63, %v1607_v63  ;;  %v4867_v10 = vrot.slane %v1616_v7, %v4772_v17  ;;  %v3625_v21 = vcombine.low %v1614_v49, %v1614_v49  ;;  %v1711_v27 = vcombine.low %v4840_v11, %v4844_v19 }
 0x151   : > { %6896 = vst [vmem:[#allocation40_spill] sm:$0xff] %v4862_v12  ;;  %v1712_v52 = vcombine.high %v4840_v11, %v4844_v19  ;;  %v4874_v62 = vrot.slane %v1617_v34, %v4772_v17  ;;  %v3626_v30 = vcombine.high %v1614_v49, %v1614_v49  ;;  %v4881_v5 = vrot.slane %v3623_v36, %v4772_v17 }
 0x152   : > { %6897 = vst [vmem:[#allocation56_spill] sm:$0xff] %v4867_v10  ;;  %v4884_v26 = vrot.slane %v1618_v29, %v4772_v17  ;;  %v4888_v18 = vcombine.high %v4862_v12, %v4862_v12  ;;  %v4891_v48 = vrot.slane %v3624_v38, %v4772_v17  ;;  %v4894_v49 = vrot.slane %v3625_v21, %v4772_v17 }
 0x153   : > { %6898 = vst [vmem:[#allocation57_spill] sm:$0xff] %v4874_v62  ;;  %6899 = vst [vmem:[#allocation58_spill] sm:$0xff] %v4881_v5  ;;  %v3627_v35 = vcombine.low %v1639_v44, %v1639_v44  ;;  %v4898_v54 = vcombine.high %v4867_v10, %v4867_v10  ;;  %v4901_v60 = vrot.slane %v3626_v30, %v4772_v17  ;;  %v2051_v25 = vsel %vm458_vm2, %v4862_v12, -inf }
 0x154   : > { %6900 = vst [vmem:[#allocation41_spill] sm:$0xff] %v4884_v26  ;;  %6901 = vst [vmem:[#allocation59_spill] sm:$0xff] %v4888_v18  ;;  %v4904_v0 = vrot.slane %v1647_v20, %v4772_v17  ;;  %v3628_v8 = vcombine.high %v1639_v44, %v1639_v44  ;;  %v4908_v7 = vcombine.high %v4874_v62, %v4874_v62  ;;  %v2065_v12 = vsel %vm458_vm2, %v4881_v5, -inf }
 0x155   : > { %6902 = vst [vmem:[#allocation42_spill] sm:$0xff] %v4891_v48  ;;  %6903 = vst [vmem:[#allocation8_spill] sm:$0xff] %v4894_v49  ;;  %v4911_v2 = vrot.slane %v3627_v35, %v4772_v17  ;;  %v4914_v6 = vrot.slane %v1648_v40, %v4772_v17  ;;  %v3629_v13 = vcombine.low %v4814_v16, %v4814_v16 }
 0x156   : > { %6904 = vst [vmem:[#allocation4_spill] sm:$0xff] %v4898_v54  ;;  %6905 = vst [vmem:[#allocation60_spill] sm:$0xff] %v4901_v60  ;;  %v4920_v34 = vcombine.high %v4881_v5, %v4881_v5  ;;  %v4924_v44 = vcombine.high %v4884_v26, %v4884_v26  ;;  %v4927_v29 = vrot.slane %v3628_v8, %v4772_v17 }
 0x157   : > { %6906 = vst [vmem:[#allocation61_spill] sm:$0xff] %v4908_v7  ;;  %v3630_v20 = vcombine.high %v4814_v16, %v4814_v16  ;;  %v4933_v51 = vcombine.high %v4891_v48, %v4891_v48  ;;  %v4937_v40 = vcombine.high %v4894_v49, %v4894_v49  ;;  %v4940_v33 = vrot.slane %v1649_v43, %v4772_v17 }
 0x158   : > { %6907 = vst [vmem:[#allocation9_spill] sm:$0xff] %v4920_v34  ;;  %6908 = vst [vmem:[#allocation35_spill] sm:$0xff] %v4924_v44  ;;  %v4943_v11 = vrot.slane %v3629_v13, %v4772_v17  ;;  %v4947_v22 = vcombine.high %v4901_v60, %v4901_v60  ;;  %v4951_v16 = vcombine.high %v4904_v0, %v4904_v0 }
 0x159   : > { %6909 = vst [vmem:[#allocation36_spill] sm:$0xff] %v4933_v51  ;;  %6910 = vst [vmem:[#allocation31_spill] sm:$0xff] %v4937_v40  ;;  %v4954_v57 = vrot.slane %v1650_v37, %v4772_v17  ;;  %v3631_v55 = vcombine.low %v4831_v46, %v4831_v46  ;;  %v4960_v43 = vcombine.high %v4911_v2, %v4911_v2 }
 0x15a   : > { %6911 = vst [vmem:[#allocation25_spill] sm:$0xff] %v4947_v22  ;;  %v4964_v36 = vcombine.high %v4914_v6, %v4914_v6  ;;  %v4967_v38 = vrot.slane %v3630_v20, %v4772_v17  ;;  %v3632_v21 = vcombine.high %v4831_v46, %v4831_v46  ;;  %v4973_v37 = vcombine.high %v4927_v29, %v4927_v29 }
 0x15b   : > { %v4976_v30 = vrot.slane %v1679_v47, %v4772_v17  ;;  %v4979_v35 = vrot.slane %v3631_v55, %v4772_v17  ;;  %v3633_v8 = vcombine.low %v4835_v1, %v4835_v1  ;;  %v4985_v13 = vcombine.high %v4940_v33, %v4940_v33 }
 0x15c   : > { %v4989_v46 = vcombine.high %v4943_v11, %v4943_v11  ;;  %v4992_v20 = vrot.slane %v1680_v56, %v4772_v17  ;;  %v3634_v47 = vcombine.high %v4835_v1, %v4835_v1  ;;  %v4998_v55 = vcombine.high %v4954_v57, %v4954_v57 }
 0x15d   : > { %v5001_v53 = vrot.slane %v3632_v21, %v4772_v17  ;;  %v5004_v63 = vrot.slane %v1681_v24, %v4772_v17  ;;  %v5007_v14 = vrot.slane %v3633_v8, %v4772_v17  ;;  %v5011_v56 = vcombine.high %v4967_v38, %v4967_v38 }
 0x15e   : > { %v5014_v31 = vrot.slane %v1682_v32, %v4772_v17  ;;  %v5017_v1 = vrot.slane %v3634_v47, %v4772_v17  ;;  %v3635_v21 = vcombine.low %v4844_v19, %v4844_v19  ;;  %v5023_v24 = vcombine.high %v4976_v30, %v4976_v30 }
 0x15f   : > { %6912 = vst [vmem:[#allocation24_spill] sm:$0xff] %v5001_v53  ;;  %6913 = vst [vmem:[#allocation44_spill] sm:$0xff] %v5004_v63  ;;  %v5027_v8 = vcombine.high %v4979_v35, %v4979_v35  ;;  %v5030_v61 = vrot.slane %v1711_v27, %v4772_v17  ;;  %v3636_v32 = vcombine.high %v4844_v19, %v4844_v19 }
 0x160   : > { %6914 = vst [vmem:[#allocation32_spill] sm:$0xff] %v5007_v14  ;;  %6915 = vst [vmem:[#allocation26_spill] sm:$0xff] %v5014_v31  ;;  %v5036_v47 = vcombine.high %v4992_v20, %v4992_v20  ;;  %v5039_v59 = vrot.slane %v3635_v21, %v4772_v17  ;;  %v5042_v28 = vrot.slane %v1712_v52, %v4772_v17 }
 0x161   : > { %6916 = vst [vmem:[#allocation27_spill] sm:$0xff] %v5017_v1  ;;  %6917 = vst [vmem:[#allocation28_spill] sm:$0xff] %v5030_v61  ;;  %v3637_v4 = vcombine.low %v4855_v45, %v4855_v45  ;;  %v5048_v27 = vcombine.high %v5001_v53, %v5001_v53  ;;  %v5052_v19 = vcombine.high %v5004_v63, %v5004_v63 }
 0x162   : > { %6918 = vst [vmem:[#allocation45_spill] sm:$0xff] %v5036_v47  ;;  %6919 = vst [vmem:[#allocation46_spill] sm:$0xff] %v5039_v59  ;;  %v5056_v50 = vcombine.high %v5007_v14, %v5007_v14  ;;  %v3638_v21 = vcombine.high %v4855_v45, %v4855_v45  ;;  %v5062_v52 = vcombine.high %v5014_v31, %v5014_v31 }
 0x163   : > { %6920 = vst [vmem:[#allocation21_spill] sm:$0xff] %v5042_v28  ;;  %6921 = vst [vmem:[#allocation22_spill] sm:$0xff] %v5048_v27  ;;  %v5066_v23 = vcombine.high %v5017_v1, %v5017_v1  ;;  %v5070_v39 = vcombine.high %v5030_v61, %v5030_v61  ;;  %v5073_v41 = vrot.slane %v3636_v32, %v4772_v17 }
 0x164   : > { %6922 = vst [vmem:[#allocation23_spill] sm:$0xff] %v5052_v19  ;;  %6923 = vst [vmem:[#allocation20_spill] sm:$0xff] %v5056_v50  ;;  %v5077_v9 = vcombine.high %v5039_v59, %v5039_v59  ;;  %v5081_v15 = vcombine.high %v5042_v28, %v5042_v28  ;;  %v6929_v42 = vcombine.low %v4851_v3, %v4855_v45  ;;  %v2052_v28 = vrot.slane %v2051_v25, 4 }
 0x165   : > { %6924 = vst [vmem:[#allocation33_spill] sm:$0xff] %v5062_v52  ;;  %6925 = vst [vmem:[#allocation5_spill] sm:$0xff] %v5066_v23  ;;  %v5092_v32 = vrot.slane %v3637_v4, %v4772_v17  ;;  %v2072_v4 = vsel %vm458_vm2, %v4920_v34, -inf  ;;  %v2066_v23 = vrot.slane %v2065_v12, 4 }
 0x166   : > { %6926 = vst [vmem:[#allocation3_spill] sm:$0xff] %v5070_v39  ;;  %6927 = vst [vmem:[#allocation7_spill] sm:$0xff] %v5077_v9  ;;  %v5087_v58 = vrot.slane %v6929_v42, %v4772_v17  ;;  %v6932_v9 = vcombine.high %v4851_v3, %v4855_v45  ;;  %v5103_v39 = vrot.slane %v3638_v21, %v4772_v17  ;;  %v2073_v1 = vrot.slane %v2072_v4, 4 }
 0x167   : > { %6928 = vst [vmem:[#allocation10_spill] sm:$0xff] %v5081_v15  ;;  %6931 = vst [vmem:[#allocation34_spill] sm:$0xff] %v5092_v32  ;;  %v2058_v15 = vsel %vm458_vm2, %v4888_v18, -inf  ;;  %v2053_v61 = vmax.f32 %v2051_v25, %v2052_v28  ;;  %v2086_v18 = vsel %vm458_vm2, %v4898_v54, -inf  ;;  %v2067_v52 = vmax.f32 %v2065_v12, %v2066_v23 }
 0x168   : > { %6930 = vst [vmem:[#allocation6_spill] sm:$0xff] %v5087_v58  ;;  %v5098_v59 = vrot.slane %v6932_v9, %v4772_v17  ;;  %6934 = vst [vmem:[#allocation11_spill] sm:$0xff] %v5103_v39  ;;  %v2059_v42 = vrot.slane %v2058_v15, 4  ;;  %v2079_v9 = vsel %vm458_vm2, %v4867_v10, -inf  ;;  %v2093_v17 = vsel %vm458_vm2, %v4891_v48, -inf }
 0x169   : > { %v2080_v45 = vrot.slane %v2079_v9, 4  ;;  %v2054_v21 = vrot.slane %v2053_v61, 2  ;;  %v2074_v5 = vmax.f32 %v2072_v4, %v2073_v1  ;;  %v2087_v31 = vrot.slane %v2086_v18, 4 }
 0x16a   : > { %6933 = vst [vmem:[#allocation12_spill] sm:$0xff] %v5098_v59  ;;  %v2060_v3 = vmax.f32 %v2058_v15, %v2059_v42  ;;  %v2094_v25 = vrot.slane %v2093_v17, 4  ;;  %v2100_v28 = vsel %vm458_vm2, %v4933_v51, -inf  ;;  %v2068_v10 = vrot.slane %v2067_v52, 2 }
 0x16b   : > { %v2081_v34 = vmax.f32 %v2079_v9, %v2080_v45  ;;  %v2055_v14 = vmax.f32 %v2053_v61, %v2054_v21  ;;  %v2075_v15 = vrot.slane %v2074_v5, 2  ;;  %v2088_v42 = vmax.f32 %v2086_v18, %v2087_v31 }
 0x16c   : > { %v2061_v50 = vrot.slane %v2060_v3, 2  ;;  %v2095_v54 = vmax.f32 %v2093_v17, %v2094_v25  ;;  %v2101_v27 = vrot.slane %v2100_v28, 4  ;;  %v2069_v48 = vmax.f32 %v2067_v52, %v2068_v10 }
 0x16d   : > { %v2082_v63 = vrot.slane %v2081_v34, 2  ;;  %v2056_v53 = vrot.slane %v2055_v14, 1  ;;  %v2076_v47 = vmax.f32 %v2074_v5, %v2075_v15  ;;  %v2089_v23 = vrot.slane %v2088_v42, 2 }
 0x16e   : > { %v2062_v19 = vmax.f32 %v2060_v3, %v2061_v50  ;;  %v2096_v4 = vrot.slane %v2095_v54, 2  ;;  %v2102_v9 = vmax.f32 %v2100_v28, %v2101_v27  ;;  %v5119_v45 = vcombine.high %v5073_v41, %v5073_v41 }
 0x16f   : > { %v2083_v1 = vmax.f32 %v2081_v34, %v2082_v63  ;;  %v5123_v61 = vcombine.high %v5087_v58, %v5087_v58  ;;  %v5127_v31 = vcombine.high %v5092_v32, %v5092_v32  ;;  %v2070_v50 = vrot.slane %v2069_v48, 1 }
 0x170   : > { %v2063_v12 = vrot.slane %v2062_v19, 1  ;;  %6935 = vst [vmem:[#allocation14_spill] sm:$0xff] %v5119_v45  ;;  %v5131_v10 = vcombine.high %v5098_v59, %v5098_v59  ;;  %v2090_v63 = vmax.f32 %v2088_v42, %v2089_v23  ;;  %v2097_v5 = vmax.f32 %v2095_v54, %v2096_v4 }
 0x171   : > { %6936 = vst [vmem:[#allocation13_spill] sm:$0xff] %v5123_v61  ;;  %6937 = vst [vmem:[#allocation16_spill] sm:$0xff] %v5127_v31  ;;  %v2103_v18 = vrot.slane %v2102_v9, 2  ;;  %v5135_v34 = vcombine.high %v5103_v39, %v5103_v39  ;;  %v5137_v27 = vmax.f32 %v2055_v14, %v2056_v53  ;;  %v2077_v52 = vrot.slane %v2076_v47, 1 }
 0x172   : > { %6938 = vst [vmem:[#allocation18_spill] sm:$0xff] %v5131_v10  ;;  %v2107_v3 = vsel %vm458_vm2, %v4874_v62, -inf  ;;  %v5141_v17 = vmax.f32 %v2062_v19, %v2063_v12  ;;  %v2084_v21 = vrot.slane %v2083_v1, 1  ;;  %v5143_v15 = vmax.f32 %v2069_v48, %v2070_v50 }
 0x173   : > { %6939 = vst [vmem:[#allocation15_spill] sm:$0xff] %v5135_v34  ;;  %6940 = vst [vmem:[#allocation17_spill] sm:$0xff] %v5137_v27  ;;  %v2104_v25 = vmax.f32 %v2102_v9, %v2103_v18  ;;  %v2108_v28 = vrot.slane %v2107_v3, 4  ;;  %v2114_v54 = vsel %vm458_vm2, %v4908_v7, -inf  ;;  %v2121_v42 = vsel %vm458_vm2, %v4894_v49, -inf }
 0x174   : > { %6941 = vst [vmem:[#allocation62_spill] sm:$0xff] %v5141_v17  ;;  %6942 = vst [vmem:[#allocation63_spill] sm:$0xff] %v5143_v15  ;;  %v2128_v53 = vsel %vm458_vm2, %v4937_v40, -inf  ;;  %v2091_v14 = vrot.slane %v2090_v63, 1  ;;  %v2098_v23 = vrot.slane %v2097_v5, 1  ;;  %v2115_v27 = vrot.slane %v2114_v54, 4 }
 0x175   : > { %v2109_v4 = vmax.f32 %v2107_v3, %v2108_v28  ;;  %v2122_v19 = vrot.slane %v2121_v42, 4  ;;  %v2129_v12 = vrot.slane %v2128_v53, 4  ;;  %v2135_v9 = vsel %vm458_vm2, %v4884_v26, -inf }
 0x176   : > { %v2142_v48 = vsel %vm458_vm2, %v4924_v44, -inf  ;;  %v2105_v50 = vrot.slane %v2104_v25, 1  ;;  %v2116_v15 = vmax.f32 %v2114_v54, %v2115_v27  ;;  %v2136_v17 = vrot.slane %v2135_v9, 4 }
 0x177   : > { %v2110_v18 = vrot.slane %v2109_v4, 2  ;;  %v2123_v49 = vmax.f32 %v2121_v42, %v2122_v19  ;;  %v2130_v7 = vmax.f32 %v2128_v53, %v2129_v12  ;;  %v2143_v62 = vrot.slane %v2142_v48, 4 }
 0x178   : > { %v2149_v40 = vsel %vm458_vm2, %v4901_v60, -inf  ;;  %v2117_v28 = vrot.slane %v2116_v15, 2  ;;  %v2137_v51 = vmax.f32 %v2135_v9, %v2136_v17  ;;  %v2156_v44 = vsel %vm458_vm2, %v4947_v22, -inf }
 0x179   : > { %v2111_v3 = vmax.f32 %v2109_v4, %v2110_v18  ;;  %v2150_v34 = vrot.slane %v2149_v40, 4  ;;  %v2124_v39 = vrot.slane %v2123_v49, 2  ;;  %v2131_v10 = vrot.slane %v2130_v7, 2 }
 0x17a   : > { %v2144_v26 = vmax.f32 %v2142_v48, %v2143_v62  ;;  %v2118_v31 = vmax.f32 %v2116_v15, %v2117_v28  ;;  %v2138_v27 = vrot.slane %v2137_v51, 2  ;;  %v2157_v12 = vrot.slane %v2156_v44, 4 }
 0x17b   : > { %v2112_v59 = vrot.slane %v2111_v3, 1  ;;  %v2151_v54 = vmax.f32 %v2149_v40, %v2150_v34  ;;  %v2125_v42 = vmax.f32 %v2123_v49, %v2124_v39  ;;  %v2132_v53 = vmax.f32 %v2130_v7, %v2131_v10 }
 0x17c   : > { %v2145_v19 = vrot.slane %v2144_v26, 2  ;;  %v5159_v32 = vmax.f32 %v2076_v47, %v2077_v52  ;;  %v2119_v4 = vrot.slane %v2118_v31, 1  ;;  %v2139_v18 = vmax.f32 %v2137_v51, %v2138_v27 }
 0x17d   : > { %v2152_v17 = vrot.slane %v2151_v54, 2  ;;  %v5161_v9 = vmax.f32 %v2083_v1, %v2084_v21  ;;  %v5163_v60 = vmax.f32 %v2090_v63, %v2091_v14  ;;  %v2126_v62 = vrot.slane %v2125_v42, 1 }
 0x17e   : > { %6943 = vst [vmem:[#allocation64_spill] sm:$0xff] %v5159_v32  ;;  %v2158_v48 = vmax.f32 %v2156_v44, %v2157_v12  ;;  %v5165_v22 = vmax.f32 %v2097_v5, %v2098_v23  ;;  %v5167_v15 = vmax.f32 %v2104_v25, %v2105_v50  ;;  %v2146_v40 = vmax.f32 %v2144_v26, %v2145_v19 }
 0x17f   : > { %6944 = vst [vmem:[#allocation65_spill] sm:$0xff] %v5161_v9  ;;  %6945 = vst [vmem:[#allocation66_spill] sm:$0xff] %v5163_v60  ;;  %v2163_v39 = vsel %vm458_vm2, %v4904_v0, -inf  ;;  %v5171_v49 = vmax.f32 %v2111_v3, %v2112_v59  ;;  %v2133_v7 = vrot.slane %v2132_v53, 1  ;;  %v2153_v47 = vmax.f32 %v2151_v54, %v2152_v17 }
 0x180   : > { %6946 = vst [vmem:[#allocation67_spill] sm:$0xff] %v5165_v22  ;;  %6947 = vst [vmem:[#allocation68_spill] sm:$0xff] %v5167_v15  ;;  %v2159_v51 = vrot.slane %v2158_v48, 2  ;;  %v5173_v10 = vmax.f32 %v2118_v31, %v2119_v4  ;;  %v2140_v1 = vrot.slane %v2139_v18, 1  ;;  %v2164_v63 = vrot.slane %v2163_v39, 4 }
 0x181   : > { %6948 = vst [vmem:[#allocation69_spill] sm:$0xff] %v5171_v49  ;;  %v2170_v44 = vsel %vm458_vm2, %v4951_v16, -inf  ;;  %v5177_v5 = vmax.f32 %v2125_v42, %v2126_v62  ;;  %v2177_v26 = vsel %vm458_vm2, %v4911_v2, -inf  ;;  %v2147_v21 = vrot.slane %v2146_v40, 1 }
 0x182   : > { %6949 = vst [vmem:[#allocation70_spill] sm:$0xff] %v5173_v10  ;;  %v2160_v34 = vmax.f32 %v2158_v48, %v2159_v51  ;;  %v2171_v52 = vrot.slane %v2170_v44, 4  ;;  %v2165_v59 = vmax.f32 %v2163_v39, %v2164_v63  ;;  %v2178_v25 = vrot.slane %v2177_v26, 4 }
 0x183   : > { %6950 = vst [vmem:[#allocation71_spill] sm:$0xff] %v5177_v5  ;;  %v2184_v14 = vsel %vm458_vm2, %v4960_v43, -inf  ;;  %v2154_v31 = vrot.slane %v2153_v47, 1  ;;  %v2191_v3 = vsel %vm458_vm2, %v4914_v6, -inf  ;;  %v2198_v42 = vsel %vm458_vm2, %v4964_v36, -inf }
 0x184   : > { %v2172_v23 = vmax.f32 %v2170_v44, %v2171_v52  ;;  %v2185_v50 = vrot.slane %v2184_v14, 4  ;;  %v2166_v28 = vrot.slane %v2165_v59, 2  ;;  %v2179_v27 = vmax.f32 %v2177_v26, %v2178_v25 }
 0x185   : > { %v2192_v54 = vrot.slane %v2191_v3, 4  ;;  %v2161_v19 = vrot.slane %v2160_v34, 1  ;;  %v2199_v17 = vrot.slane %v2198_v42, 4  ;;  %v2205_v51 = vsel %vm458_vm2, %v4927_v29, -inf }
 0x186   : > { %v2173_v12 = vrot.slane %v2172_v23, 2  ;;  %v2186_v4 = vmax.f32 %v2184_v14, %v2185_v50  ;;  %v2167_v62 = vmax.f32 %v2165_v59, %v2166_v28  ;;  %v2180_v48 = vrot.slane %v2179_v27, 2 }
 0x187   : > { %v2193_v39 = vmax.f32 %v2191_v3, %v2192_v54  ;;  %v2200_v52 = vmax.f32 %v2198_v42, %v2199_v17  ;;  %v2206_v5 = vrot.slane %v2205_v51, 4  ;;  %v2212_v49 = vsel %vm458_vm2, %v4973_v37, -inf }
 0x188   : > { %v2174_v63 = vmax.f32 %v2172_v23, %v2173_v12  ;;  %v2187_v44 = vrot.slane %v2186_v4, 2  ;;  %v2168_v10 = vrot.slane %v2167_v62, 1  ;;  %v2181_v26 = vmax.f32 %v2179_v27, %v2180_v48 }
 0x189   : > { %v2194_v25 = vrot.slane %v2193_v39, 2  ;;  %v2201_v14 = vrot.slane %v2200_v52, 2  ;;  %v2207_v50 = vmax.f32 %v2205_v51, %v2206_v5  ;;  %v5191_v59 = vmax.f32 %v2132_v53, %v2133_v7 }
 0x18a   : > { %v2175_v15 = vrot.slane %v2174_v63, 1  ;;  %v2188_v22 = vmax.f32 %v2186_v4, %v2187_v44  ;;  %v5193_v3 = vmax.f32 %v2139_v18, %v2140_v1  ;;  %v2182_v28 = vrot.slane %v2181_v26, 1 }
 0x18b   : > { %6951 = vst [vmem:[#allocation72_spill] sm:$0xff] %v5191_v59  ;;  %v2213_v54 = vrot.slane %v2212_v49, 4  ;;  %v5195_v23 = vmax.f32 %v2146_v40, %v2147_v21  ;;  %v5197_v42 = vmax.f32 %v2153_v47, %v2154_v31  ;;  %v2195_v27 = vmax.f32 %v2193_v39, %v2194_v25 }
 0x18c   : > { %6952 = vst [vmem:[#allocation73_spill] sm:$0xff] %v5193_v3  ;;  %v2189_v12 = vrot.slane %v2188_v22, 1  ;;  %v5199_v17 = vmax.f32 %v2160_v34, %v2161_v19  ;;  %v2208_v48 = vrot.slane %v2207_v50, 2  ;;  %v2219_v4 = vsel %vm458_vm2, %v4940_v33, -inf }
 0x18d   : > { %6953 = vst [vmem:[#allocation74_spill] sm:$0xff] %v5195_v23  ;;  %6954 = vst [vmem:[#allocation75_spill] sm:$0xff] %v5197_v42  ;;  %v2214_v60 = vmax.f32 %v2212_v49, %v2213_v54  ;;  %v5203_v5 = vmax.f32 %v2167_v62, %v2168_v10  ;;  %v5205_v53 = vmax.f32 %v2174_v63, %v2175_v15  ;;  %v2220_v7 = vrot.slane %v2219_v4, 4 }
 0x18e   : > { %6955 = vst [vmem:[#allocation76_spill] sm:$0xff] %v5199_v17  ;;  %v2202_v18 = vmax.f32 %v2200_v52, %v2201_v14  ;;  %v5207_v1 = vmax.f32 %v2181_v26, %v2182_v28  ;;  %v2226_v47 = vsel %vm458_vm2, %v4985_v13, -inf  ;;  %v2233_v34 = vsel %vm458_vm2, %v4943_v11, -inf }
 0x18f   : > { %6956 = vst [vmem:[#allocation77_spill] sm:$0xff] %v5203_v5  ;;  %6957 = vst [vmem:[#allocation78_spill] sm:$0xff] %v5205_v53  ;;  %v2215_v40 = vrot.slane %v2214_v60, 2  ;;  %v5213_v21 = vmax.f32 %v2188_v22, %v2189_v12  ;;  %v2196_v49 = vrot.slane %v2195_v27, 1  ;;  %v2221_v31 = vmax.f32 %v2219_v4, %v2220_v7 }
 0x190   : > { %6958 = vst [vmem:[#allocation79_spill] sm:$0xff] %v5207_v1  ;;  %v2227_v19 = vrot.slane %v2226_v47, 4  ;;  %v2209_v10 = vmax.f32 %v2207_v50, %v2208_v48  ;;  %v2234_v62 = vrot.slane %v2233_v34, 4  ;;  %v2240_v15 = vsel %vm458_vm2, %v4989_v46, -inf }
 0x191   : > { %6959 = vst [vmem:[#allocation80_spill] sm:$0xff] %v5213_v21  ;;  %v2247_v39 = vsel %vm458_vm2, %v4954_v57, -inf  ;;  %v2216_v51 = vmax.f32 %v2214_v60, %v2215_v40  ;;  %v2222_v63 = vrot.slane %v2221_v31, 2  ;;  %v2241_v52 = vrot.slane %v2240_v15, 4 }
 0x192   : > { %v2228_v44 = vmax.f32 %v2226_v47, %v2227_v19  ;;  %v2203_v26 = vrot.slane %v2202_v18, 1  ;;  %v2235_v25 = vmax.f32 %v2233_v34, %v2234_v62  ;;  %v2248_v14 = vrot.slane %v2247_v39, 4 }
 0x193   : > { %v2254_v22 = vsel %vm458_vm2, %v4998_v55, -inf  ;;  %v2223_v28 = vmax.f32 %v2221_v31, %v2222_v63  ;;  %v2242_v50 = vmax.f32 %v2240_v15, %v2241_v52  ;;  %v2210_v48 = vrot.slane %v2209_v10, 1 }
 0x194   : > { %v2229_v54 = vrot.slane %v2228_v44, 2  ;;  %v2255_v12 = vrot.slane %v2254_v22, 4  ;;  %v2236_v4 = vrot.slane %v2235_v25, 2  ;;  %v2249_v7 = vmax.f32 %v2247_v39, %v2248_v14 }
 0x195   : > { %v2261_v21 = vsel %vm458_vm2, %v4967_v38, -inf  ;;  %v2217_v60 = vrot.slane %v2216_v51, 1  ;;  %v2243_v47 = vrot.slane %v2242_v50, 2  ;;  %v2268_v53 = vsel %vm458_vm2, %v5011_v56, -inf }
 0x196   : > { %v2230_v40 = vmax.f32 %v2228_v44, %v2229_v54  ;;  %v2256_v19 = vmax.f32 %v2254_v22, %v2255_v12  ;;  %v2237_v1 = vmax.f32 %v2235_v25, %v2236_v4  ;;  %v2250_v34 = vrot.slane %v2249_v7, 2 }
 0x197   : > { %v2262_v62 = vrot.slane %v2261_v21, 4  ;;  %v5225_v31 = vmax.f32 %v2195_v27, %v2196_v49  ;;  %v2224_v15 = vrot.slane %v2223_v28, 1  ;;  %v2244_v52 = vmax.f32 %v2242_v50, %v2243_v47 }
 0x198   : > { %v2231_v63 = vrot.slane %v2230_v40, 1  ;;  %v2238_v5 = vrot.slane %v2237_v1, 1  ;;  %v2257_v39 = vrot.slane %v2256_v19, 2  ;;  %v2269_v17 = vrot.slane %v2268_v53, 4 }
 0x199   : > { %6960 = vst [vmem:[#allocation81_spill] sm:$0xff] %v5225_v31  ;;  %v2263_v14 = vmax.f32 %v2261_v21, %v2262_v62  ;;  %v5227_v42 = vmax.f32 %v2202_v18, %v2203_v26  ;;  %v5229_v44 = vmax.f32 %v2209_v10, %v2210_v48  ;;  %v2251_v22 = vmax.f32 %v2249_v7, %v2250_v34 }
 0x19a   : > { %v2275_v25 = vsel %vm458_vm2, %v4976_v30, -inf  ;;  %v5233_v54 = vmax.f32 %v2216_v51, %v2217_v60  ;;  %v2245_v12 = vrot.slane %v2244_v52, 1  ;;  %v2270_v49 = vmax.f32 %v2268_v53, %v2269_v17 }
 0x19b   : > { %6961 = vst [vmem:[#allocation82_spill] sm:$0xff] %v5227_v42  ;;  %6962 = vst [vmem:[#allocation83_spill] sm:$0xff] %v5229_v44  ;;  %v2264_v27 = vrot.slane %v2263_v14, 2  ;;  %v5235_v4 = vmax.f32 %v2223_v28, %v2224_v15  ;;  %v5237_v50 = vmax.f32 %v2230_v40, %v2231_v63  ;;  %v2276_v47 = vrot.slane %v2275_v25, 4 }
 0x19c   : > { %6963 = vst [vmem:[#allocation84_spill] sm:$0xff] %v5233_v54  ;;  %v2282_v18 = vsel %vm458_vm2, %v5023_v24, -inf  ;;  %v5241_v21 = vmax.f32 %v2237_v1, %v2238_v5  ;;  %v2258_v10 = vmax.f32 %v2256_v19, %v2257_v39  ;;  %v2271_v26 = vrot.slane %v2270_v49, 2  ;;  %v6968_v1 = vld [vmem:[#allocation45_spill] sm:$0xff] }
 0x19d   : > { %6964 = vst [vmem:[#allocation85_spill] sm:$0xff] %v5235_v4  ;;  %6965 = vst [vmem:[#allocation86_spill] sm:$0xff] %v5237_v50  ;;  %v2283_v48 = vrot.slane %v2282_v18, 4  ;;  %v2252_v7 = vrot.slane %v2251_v22, 1  ;;  %v2277_v34 = vmax.f32 %v2275_v25, %v2276_v47  ;;  %v2289_v51 = vsel %vm458_vm2, %v4979_v35, -inf }
 0x19e   : > { %6966 = vst [vmem:[#allocation87_spill] sm:$0xff] %v5241_v21  ;;  %v2296_v17 = vsel %vm458_vm2, %v5027_v8, -inf  ;;  %v5247_v53 = vmax.f32 %v2244_v52, %v2245_v12  ;;  %v2265_v28 = vmax.f32 %v2263_v14, %v2264_v27  ;;  %v2290_v40 = vrot.slane %v2289_v51, 4 }
 0x19f   : > { %v2284_v60 = vmax.f32 %v2282_v18, %v2283_v48  ;;  %v2278_v62 = vrot.slane %v2277_v34, 2  ;;  %v2297_v15 = vrot.slane %v2296_v17, 4  ;;  %v2303_v5 = vsel %vm458_vm2, %v4992_v20, -inf  ;;  %v6970_v18 = vld [vmem:[#allocation24_spill] sm:$0xff] }
 0x1a0   : > { %6967 = vst [vmem:[#allocation88_spill] sm:$0xff] %v5247_v53  ;;  %v2310_v19 = vsel %vm458_vm2, %v6968_v1, -inf  ;;  %v2259_v63 = vrot.slane %v2258_v10, 1  ;;  %v2272_v39 = vmax.f32 %v2270_v49, %v2271_v26  ;;  %v2291_v47 = vmax.f32 %v2289_v51, %v2290_v40  ;;  %v6971_v26 = vld [vmem:[#allocation22_spill] sm:$0xff] }
 0x1a1   : > { %v2285_v25 = vrot.slane %v2284_v60, 2  ;;  %v2279_v21 = vmax.f32 %v2277_v34, %v2278_v62  ;;  %v2298_v50 = vmax.f32 %v2296_v17, %v2297_v15  ;;  %v2304_v4 = vrot.slane %v2303_v5, 4 }
 0x1a2   : > { %v2311_v52 = vrot.slane %v2310_v19, 4  ;;  %v5253_v12 = vmax.f32 %v2251_v22, %v2252_v7  ;;  %v2292_v27 = vrot.slane %v2291_v47, 2  ;;  %v2317_v48 = vsel %vm458_vm2, %v6970_v18, -inf }
 0x1a3   : > { %v2286_v14 = vmax.f32 %v2284_v60, %v2285_v25  ;;  %v2266_v53 = vrot.slane %v2265_v28, 1  ;;  %v2299_v54 = vrot.slane %v2298_v50, 2  ;;  %v2305_v44 = vmax.f32 %v2303_v5, %v2304_v4  ;;  %v6974_v5 = vld [vmem:[#allocation44_spill] sm:$0xff] }
 0x1a4   : > { %6969 = vst [vmem:[#allocation45_spill] sm:$0xff] %v5253_v12  ;;  %v2312_v42 = vmax.f32 %v2310_v19, %v2311_v52  ;;  %v2273_v31 = vrot.slane %v2272_v39, 1  ;;  %v2293_v23 = vmax.f32 %v2291_v47, %v2292_v27  ;;  %v2318_v49 = vrot.slane %v2317_v48, 4 }
 0x1a5   : > { %v2324_v34 = vsel %vm458_vm2, %v6971_v26, -inf  ;;  %v2280_v51 = vrot.slane %v2279_v21, 1  ;;  %v2287_v17 = vrot.slane %v2286_v14, 1  ;;  %v2300_v40 = vmax.f32 %v2298_v50, %v2299_v54 }
 0x1a6   : > { %v2306_v22 = vrot.slane %v2305_v44, 2  ;;  %v5259_v7 = vmax.f32 %v2258_v10, %v2259_v63  ;;  %v2313_v60 = vrot.slane %v2312_v42, 2  ;;  %v2319_v62 = vmax.f32 %v2317_v48, %v2318_v49  ;;  %v6978_v10 = vld [vmem:[#allocation23_spill] sm:$0xff] }
 0x1a7   : > { %v2325_v15 = vrot.slane %v2324_v34, 4  ;;  %v5261_v25 = vmax.f32 %v2265_v28, %v2266_v53  ;;  %v2294_v12 = vrot.slane %v2293_v23, 1  ;;  %v2301_v4 = vrot.slane %v2300_v40, 1 }
 0x1a8   : > { %6972 = vst [vmem:[#allocation24_spill] sm:$0xff] %v5259_v7  ;;  %v2331_v19 = vsel %vm458_vm2, %v6974_v5, -inf  ;;  %v2307_v47 = vmax.f32 %v2305_v44, %v2306_v22  ;;  %v2320_v52 = vrot.slane %v2319_v62, 2  ;;  %v5265_v59 = vmax.f32 %v2272_v39, %v2273_v31  ;;  %v6981_v44 = vld [vmem:[#allocation32_spill] sm:$0xff]  ;;  %v6990_v5 = vld [vmem:[#allocation3_spill] sm:$0xff] }
 0x1a9   : > { %6973 = vst [vmem:[#allocation22_spill] sm:$0xff] %v5261_v25  ;;  %v2326_v27 = vmax.f32 %v2324_v34, %v2325_v15  ;;  %v2332_v3 = vrot.slane %v2331_v19, 4  ;;  %v5267_v54 = vmax.f32 %v2279_v21, %v2280_v51  ;;  %v5269_v50 = vmax.f32 %v2286_v14, %v2287_v17  ;;  %v6982_v31 = vld [vmem:[#allocation20_spill] sm:$0xff] }
 0x1aa   : > { %6975 = vst [vmem:[#allocation89_spill] sm:$0xff] %v5265_v59  ;;  %v2338_v63 = vsel %vm458_vm2, %v6978_v10, -inf  ;;  %v2314_v53 = vmax.f32 %v2312_v42, %v2313_v60  ;;  %v5273_v25 = vmax.f32 %v2293_v23, %v2294_v12  ;;  %v5275_v7 = vmax.f32 %v2300_v40, %v2301_v4  ;;  %v6983_v42 = vld [vmem:[#allocation26_spill] sm:$0xff]  ;;  %v6984_v60 = vld [vmem:[#allocation33_spill] sm:$0xff] }
 0x1ab   : > { %6976 = vst [vmem:[#allocation90_spill] sm:$0xff] %v5267_v54  ;;  %6977 = vst [vmem:[#allocation91_spill] sm:$0xff] %v5269_v50  ;;  %v2327_v28 = vrot.slane %v2326_v27, 2  ;;  %v2333_v48 = vmax.f32 %v2331_v19, %v2332_v3  ;;  %v2339_v49 = vrot.slane %v2338_v63, 4  ;;  %v2345_v34 = vsel %vm458_vm2, %v6981_v44, -inf }
 0x1ac   : > { %6979 = vst [vmem:[#allocation92_spill] sm:$0xff] %v5273_v25  ;;  %6980 = vst [vmem:[#allocation93_spill] sm:$0xff] %v5275_v7  ;;  %v2352_v21 = vsel %vm458_vm2, %v6982_v31, -inf  ;;  %v2308_v39 = vrot.slane %v2307_v47, 1  ;;  %v2321_v14 = vmax.f32 %v2319_v62, %v2320_v52  ;;  %v2346_v22 = vrot.slane %v2345_v34, 4 }
 0x1ad   : > { %v2334_v51 = vrot.slane %v2333_v48, 2  ;;  %v2340_v17 = vmax.f32 %v2338_v63, %v2339_v49  ;;  %v2353_v15 = vrot.slane %v2352_v21, 4  ;;  %v2359_v3 = vsel %vm458_vm2, %v6983_v42, -inf  ;;  %v6986_v63 = vld [vmem:[#allocation27_spill] sm:$0xff] }
 0x1ae   : > { %v2366_v23 = vsel %vm458_vm2, %v6984_v60, -inf  ;;  %v2315_v12 = vrot.slane %v2314_v53, 1  ;;  %v2328_v40 = vmax.f32 %v2326_v27, %v2327_v28  ;;  %v2347_v7 = vmax.f32 %v2345_v34, %v2346_v22  ;;  %v6987_v28 = vld [vmem:[#allocation5_spill] sm:$0xff] }
 0x1af   : > { %v2335_v4 = vmax.f32 %v2333_v48, %v2334_v51  ;;  %v2341_v19 = vrot.slane %v2340_v17, 2  ;;  %v2354_v25 = vmax.f32 %v2352_v21, %v2353_v15  ;;  %v2360_v50 = vrot.slane %v2359_v3, 4  ;;  %v6988_v15 = vld [vmem:[#allocation28_spill] sm:$0xff] }
 0x1b0   : > { %v2367_v54 = vrot.slane %v2366_v23, 4  ;;  %v5285_v59 = vmax.f32 %v2307_v47, %v2308_v39  ;;  %v2322_v62 = vrot.slane %v2321_v14, 1  ;;  %v2373_v49 = vsel %vm458_vm2, %v6986_v63, -inf }
 0x1b1   : > { %v2342_v52 = vmax.f32 %v2340_v17, %v2341_v19  ;;  %v2348_v9 = vrot.slane %v2347_v7, 2  ;;  %v2355_v32 = vrot.slane %v2354_v25, 2  ;;  %v2361_v42 = vmax.f32 %v2359_v3, %v2360_v50 }
 0x1b2   : > { %6985 = vst [vmem:[#allocation94_spill] sm:$0xff] %v5285_v59  ;;  %v2368_v31 = vmax.f32 %v2366_v23, %v2367_v54  ;;  %v2329_v60 = vrot.slane %v2328_v40, 1  ;;  %v2336_v44 = vrot.slane %v2335_v4, 1  ;;  %v2374_v27 = vrot.slane %v2373_v49, 4 }
 0x1b3   : > { %v2380_v48 = vsel %vm458_vm2, %v6987_v28, -inf  ;;  %v2343_v34 = vrot.slane %v2342_v52, 1  ;;  %v2349_v21 = vmax.f32 %v2347_v7, %v2348_v9  ;;  %v2356_v51 = vmax.f32 %v2354_v25, %v2355_v32 }
 0x1b4   : > { %v2362_v47 = vrot.slane %v2361_v42, 2  ;;  %v2369_v39 = vrot.slane %v2368_v31, 2  ;;  %v2375_v22 = vmax.f32 %v2373_v49, %v2374_v27  ;;  %v2381_v17 = vrot.slane %v2380_v48, 4 }
 0x1b5   : > { %v2387_v19 = vsel %vm458_vm2, %v6988_v15, -inf  ;;  %v5293_v59 = vmax.f32 %v2314_v53, %v2315_v12  ;;  %v2350_v50 = vrot.slane %v2349_v21, 1  ;;  %v2357_v54 = vrot.slane %v2356_v51, 1 }
 0x1b6   : > { %v2363_v3 = vmax.f32 %v2361_v42, %v2362_v47  ;;  %v2376_v23 = vrot.slane %v2375_v22, 2  ;;  %v2382_v63 = vmax.f32 %v2380_v48, %v2381_v17  ;;  %v2388_v10 = vrot.slane %v2387_v19, 4  ;;  %v6997_v48 = vld [vmem:[#allocation46_spill] sm:$0xff]  ;;  %v6998_v17 = vld [vmem:[#allocation7_spill] sm:$0xff] }
 0x1b7   : > { %6989 = vst [vmem:[#allocation28_spill] sm:$0xff] %v5293_v59  ;;  %v2394_v28 = vsel %vm458_vm2, %v6990_v5, -inf  ;;  %v5297_v9 = vmax.f32 %v2321_v14, %v2322_v62  ;;  %v5299_v32 = vmax.f32 %v2328_v40, %v2329_v60  ;;  %v5301_v7 = vmax.f32 %v2335_v4, %v2336_v44 }
 0x1b8   : > { %v5303_v25 = vmax.f32 %v2342_v52, %v2343_v34  ;;  %v2370_v49 = vmax.f32 %v2368_v31, %v2369_v39  ;;  %v2383_v53 = vrot.slane %v2382_v63, 2  ;;  %v2389_v12 = vmax.f32 %v2387_v19, %v2388_v10  ;;  %v6999_v31 = vld [vmem:[#allocation21_spill] sm:$0xff]  ;;  %v7000_v34 = vld [vmem:[#allocation10_spill] sm:$0xff] }
 0x1b9   : > { %6991 = vst [vmem:[#allocation3_spill] sm:$0xff] %v5297_v9  ;;  %6992 = vst [vmem:[#allocation95_spill] sm:$0xff] %v5299_v32  ;;  %v2395_v27 = vrot.slane %v2394_v28, 4  ;;  %v5305_v59 = vmax.f32 %v2349_v21, %v2350_v50  ;;  %v5307_v42 = vmax.f32 %v2356_v51, %v2357_v54  ;;  %v2401_v47 = vsel %vm458_vm2, %v6997_v48, -inf }
 0x1ba   : > { %6993 = vst [vmem:[#allocation96_spill] sm:$0xff] %v5301_v7  ;;  %6994 = vst [vmem:[#allocation97_spill] sm:$0xff] %v5303_v25  ;;  %v2408_v14 = vsel %vm458_vm2, %v6998_v17, -inf  ;;  %v2364_v60 = vrot.slane %v2363_v3, 1  ;;  %v2377_v40 = vmax.f32 %v2375_v22, %v2376_v23  ;;  %v2390_v44 = vrot.slane %v2389_v12, 2 }
 0x1bb   : > { %6995 = vst [vmem:[#allocation98_spill] sm:$0xff] %v5305_v59  ;;  %6996 = vst [vmem:[#allocation99_spill] sm:$0xff] %v5307_v42  ;;  %v2396_v4 = vmax.f32 %v2394_v28, %v2395_v27  ;;  %v2402_v62 = vrot.slane %v2401_v47, 4  ;;  %v2409_v52 = vrot.slane %v2408_v14, 4  ;;  %v2415_v10 = vsel %vm458_vm2, %v6999_v31, -inf }
 0x1bc   : > { %v2422_v21 = vsel %vm458_vm2, %v7000_v34, -inf  ;;  %v2371_v51 = vrot.slane %v2370_v49, 1  ;;  %v2384_v39 = vmax.f32 %v2382_v63, %v2383_v53  ;;  %v2391_v19 = vmax.f32 %v2389_v12, %v2390_v44 }
 0x1bd   : > { %v2397_v50 = vrot.slane %v2396_v4, 2  ;;  %v2403_v54 = vmax.f32 %v2401_v47, %v2402_v62  ;;  %v2410_v42 = vmax.f32 %v2408_v14, %v2409_v52  ;;  %v2416_v59 = vrot.slane %v2415_v10, 4 }
 0x1be   : > { %v2423_v25 = vrot.slane %v2422_v21, 4  ;;  %v5317_v7 = vmax.f32 %v2363_v3, %v2364_v60  ;;  %v2378_v22 = vrot.slane %v2377_v40, 1  ;;  %v2429_v23 = vsel %vm458_vm2, %v5073_v41, -inf }
 0x1bf   : > { %v2398_v28 = vmax.f32 %v2396_v4, %v2397_v50  ;;  %v2404_v27 = vrot.slane %v2403_v54, 2  ;;  %v2411_v32 = vrot.slane %v2410_v42, 2  ;;  %v2417_v9 = vmax.f32 %v2415_v10, %v2416_v59 }
 0x1c0   : > { %7001 = vst [vmem:[#allocation46_spill] sm:$0xff] %v5317_v7  ;;  %v2424_v31 = vmax.f32 %v2422_v21, %v2423_v25  ;;  %v2385_v34 = vrot.slane %v2384_v39, 1  ;;  %v2392_v17 = vrot.slane %v2391_v19, 1  ;;  %v2430_v63 = vrot.slane %v2429_v23, 4 }
 0x1c1   : > { %v2436_v53 = vsel %vm458_vm2, %v5119_v45, -inf  ;;  %v2399_v12 = vrot.slane %v2398_v28, 1  ;;  %v2405_v47 = vmax.f32 %v2403_v54, %v2404_v27  ;;  %v2412_v14 = vmax.f32 %v2410_v42, %v2411_v32 }
 0x1c2   : > { %v2418_v3 = vrot.slane %v2417_v9, 2  ;;  %v2425_v60 = vrot.slane %v2424_v31, 2  ;;  %v2431_v44 = vmax.f32 %v2429_v23, %v2430_v63  ;;  %v2437_v4 = vrot.slane %v2436_v53, 4 }
 0x1c3   : > { %v2443_v62 = vsel %vm458_vm2, %v5087_v58, -inf  ;;  %v5325_v52 = vmax.f32 %v2370_v49, %v2371_v51  ;;  %v2406_v59 = vrot.slane %v2405_v47, 1  ;;  %v2413_v25 = vrot.slane %v2412_v14, 1  ;;  %v7018_v58 = vld [vmem:[#allocation59_spill] sm:$0xff] }
 0x1c4   : > { %v2419_v10 = vmax.f32 %v2417_v9, %v2418_v3  ;;  %v2432_v21 = vrot.slane %v2431_v44, 2  ;;  %v2438_v50 = vmax.f32 %v2436_v53, %v2437_v4  ;;  %v2444_v7 = vrot.slane %v2443_v62, 4  ;;  %v7009_v53 = vld [vmem:[#allocation34_spill] sm:$0xff]  ;;  %v7010_v4 = vld [vmem:[#allocation16_spill] sm:$0xff] }
 0x1c5   : > { %7002 = vst [vmem:[#allocation100_spill] sm:$0xff] %v5325_v52  ;;  %v2450_v45 = vsel %vm458_vm2, %v5123_v61, -inf  ;;  %v5329_v54 = vmax.f32 %v2377_v40, %v2378_v22  ;;  %v5331_v32 = vmax.f32 %v2384_v39, %v2385_v34  ;;  %v5333_v42 = vmax.f32 %v2391_v19, %v2392_v17 }
 0x1c6   : > { %v5335_v23 = vmax.f32 %v2398_v28, %v2399_v12  ;;  %v2426_v27 = vmax.f32 %v2424_v31, %v2425_v60  ;;  %v2439_v49 = vrot.slane %v2438_v50, 2  ;;  %v2445_v51 = vmax.f32 %v2443_v62, %v2444_v7  ;;  %v7011_v31 = vld [vmem:[#allocation12_spill] sm:$0xff]  ;;  %v7012_v12 = vld [vmem:[#allocation18_spill] sm:$0xff] }
 0x1c7   : > { %7003 = vst [vmem:[#allocation101_spill] sm:$0xff] %v5329_v54  ;;  %7004 = vst [vmem:[#allocation102_spill] sm:$0xff] %v5331_v32  ;;  %v2451_v63 = vrot.slane %v2450_v45, 4  ;;  %v5337_v52 = vmax.f32 %v2405_v47, %v2406_v59  ;;  %v5339_v9 = vmax.f32 %v2412_v14, %v2413_v25  ;;  %v2457_v3 = vsel %vm458_vm2, %v7009_v53, -inf }
 0x1c8   : > { %7005 = vst [vmem:[#allocation103_spill] sm:$0xff] %v5333_v42  ;;  %7006 = vst [vmem:[#allocation104_spill] sm:$0xff] %v5335_v23  ;;  %v2464_v40 = vsel %vm458_vm2, %v7010_v4, -inf  ;;  %v2420_v34 = vrot.slane %v2419_v10, 1  ;;  %v2433_v39 = vmax.f32 %v2431_v44, %v2432_v21  ;;  %v2446_v17 = vrot.slane %v2445_v51, 2  ;;  %v7014_v21 = vld [vmem:[#allocation11_spill] sm:$0xff] }
 0x1c9   : > { %7007 = vst [vmem:[#allocation105_spill] sm:$0xff] %v5337_v52  ;;  %7008 = vst [vmem:[#allocation106_spill] sm:$0xff] %v5339_v9  ;;  %v2452_v19 = vmax.f32 %v2450_v45, %v2451_v63  ;;  %v2458_v22 = vrot.slane %v2457_v3, 4  ;;  %v2465_v28 = vrot.slane %v2464_v40, 4  ;;  %v2471_v7 = vsel %vm458_vm2, %v7011_v31, -inf }
 0x1ca   : > { %v2478_v47 = vsel %vm458_vm2, %v7012_v12, -inf  ;;  %v2427_v14 = vrot.slane %v2426_v27, 1  ;;  %v2440_v60 = vmax.f32 %v2438_v50, %v2439_v49  ;;  %v2447_v62 = vmax.f32 %v2445_v51, %v2446_v17  ;;  %v7015_v49 = vld [vmem:[#allocation15_spill] sm:$0xff] }
 0x1cb   : > { %v2453_v59 = vrot.slane %v2452_v19, 2  ;;  %v2459_v25 = vmax.f32 %v2457_v3, %v2458_v22  ;;  %v2466_v9 = vmax.f32 %v2464_v40, %v2465_v28  ;;  %v2472_v52 = vrot.slane %v2471_v7, 4  ;;  %v7016_v28 = vld [vmem:[#allocation40_spill] sm:$0xff] }
 0x1cc   : > { %v2479_v23 = vrot.slane %v2478_v47, 4  ;;  %v5349_v42 = vmax.f32 %v2419_v10, %v2420_v34  ;;  %v2434_v44 = vrot.slane %v2433_v39, 1  ;;  %v2485_v63 = vsel %vm458_vm2, %v7014_v21, -inf }
 0x1cd   : > { %v2454_v45 = vmax.f32 %v2452_v19, %v2453_v59  ;;  %v2460_v32 = vrot.slane %v2459_v25, 2  ;;  %v2467_v54 = vrot.slane %v2466_v9, 2  ;;  %v2473_v31 = vmax.f32 %v2471_v7, %v2472_v52 }
 0x1ce   : > { %7013 = vst [vmem:[#allocation107_spill] sm:$0xff] %v5349_v42  ;;  %v2480_v4 = vmax.f32 %v2478_v47, %v2479_v23  ;;  %v2441_v12 = vrot.slane %v2440_v60, 1  ;;  %v2448_v53 = vrot.slane %v2447_v62, 1  ;;  %v2486_v50 = vrot.slane %v2485_v63, 4 }
 0x1cf   : > { %v2492_v51 = vsel %vm458_vm2, %v7015_v49, -inf  ;;  %v2455_v3 = vrot.slane %v2454_v45, 1  ;;  %v2461_v40 = vmax.f32 %v2459_v25, %v2460_v32  ;;  %v2468_v17 = vmax.f32 %v2466_v9, %v2467_v54 }
 0x1d0   : > { %v2474_v10 = vrot.slane %v2473_v31, 2  ;;  %v2481_v34 = vrot.slane %v2480_v4, 2  ;;  %v2487_v22 = vmax.f32 %v2485_v63, %v2486_v50  ;;  %v2493_v19 = vrot.slane %v2492_v51, 4 }
 0x1d1   : > { %v2499_v59 = vsel %vm458_vm2, %v7016_v28, 0.0  ;;  %v5357_v42 = vmax.f32 %v2426_v27, %v2427_v14  ;;  %v2462_v52 = vrot.slane %v2461_v40, 1  ;;  %v2469_v23 = vrot.slane %v2468_v17, 1 }
 0x1d2   : > { %v2475_v7 = vmax.f32 %v2473_v31, %v2474_v10  ;;  %v2488_v47 = vrot.slane %v2487_v22, 2  ;;  %v2494_v21 = vmax.f32 %v2492_v51, %v2493_v19  ;;  %v2500_v61 = vrot.slane %v2499_v59, 4  ;;  %v7025_v51 = vld [vmem:[#allocation58_spill] sm:$0xff] }
 0x1d3   : > { %7017 = vst [vmem:[#allocation40_spill] sm:$0xff] %v5357_v42  ;;  %v2506_v49 = vsel %vm458_vm2, %v7018_v58, 0.0  ;;  %v5361_v32 = vmax.f32 %v2433_v39, %v2434_v44  ;;  %v5363_v54 = vmax.f32 %v2440_v60, %v2441_v12  ;;  %v5365_v9 = vmax.f32 %v2447_v62, %v2448_v53  ;;  %v7026_v58 = vld [vmem:[#allocation9_spill] sm:$0xff] }
 0x1d4   : > { %v5367_v25 = vmax.f32 %v2454_v45, %v2455_v3  ;;  %v2482_v63 = vmax.f32 %v2480_v4, %v2481_v34  ;;  %v2495_v27 = vrot.slane %v2494_v21, 2  ;;  %v2501_v14 = vadd.f32 %v2500_v61, %v2499_v59  ;;  %v7027_v4 = vld [vmem:[#allocation56_spill] sm:$0xff]  ;;  %v7034_v42 = vld [vmem:[#allocation61_spill] sm:$0xff] }
 0x1d5   : > { %7019 = vst [vmem:[#allocation59_spill] sm:$0xff] %v5361_v32  ;;  %7020 = vst [vmem:[#allocation108_spill] sm:$0xff] %v5363_v54  ;;  %v2507_v50 = vrot.slane %v2506_v49, 4  ;;  %v5369_v28 = vmax.f32 %v2461_v40, %v2462_v52  ;;  %v5371_v31 = vmax.f32 %v2468_v17, %v2469_v23  ;;  %v2513_v10 = vsel %vm458_vm2, %v7025_v51, 0.0  ;;  %v7028_v3 = vld [vmem:[#allocation4_spill] sm:$0xff] }
 0x1d6   : > { %7021 = vst [vmem:[#allocation109_spill] sm:$0xff] %v5365_v9  ;;  %7022 = vst [vmem:[#allocation110_spill] sm:$0xff] %v5367_v25  ;;  %v2520_v39 = vsel %vm458_vm2, %v7026_v58, 0.0  ;;  %v2476_v12 = vrot.slane %v2475_v7, 1  ;;  %v2489_v60 = vmax.f32 %v2487_v22, %v2488_v47  ;;  %v2502_v53 = vrot.slane %v2501_v14, 2  ;;  %v7030_v47 = vld [vmem:[#allocation42_spill] sm:$0xff] }
 0x1d7   : > { %7023 = vst [vmem:[#allocation111_spill] sm:$0xff] %v5369_v28  ;;  %7024 = vst [vmem:[#allocation112_spill] sm:$0xff] %v5371_v31  ;;  %v2508_v62 = vadd.f32 %v2507_v50, %v2506_v49  ;;  %v2514_v44 = vrot.slane %v2513_v10, 4  ;;  %v2521_v45 = vrot.slane %v2520_v39, 4  ;;  %v2527_v61 = vsel %vm458_vm2, %v7027_v4, 0.0 }
 0x1d8   : > { %v2534_v40 = vsel %vm458_vm2, %v7028_v3, 0.0  ;;  %v2483_v17 = vrot.slane %v2482_v63, 1  ;;  %v2496_v34 = vmax.f32 %v2494_v21, %v2495_v27  ;;  %v2503_v19 = vadd.f32 %v2502_v53, %v2501_v14  ;;  %v7031_v27 = vld [vmem:[#allocation36_spill] sm:$0xff] }
 0x1d9   : > { %v2509_v59 = vrot.slane %v2508_v62, 2  ;;  %v2515_v52 = vadd.f32 %v2514_v44, %v2513_v10  ;;  %v2522_v23 = vadd.f32 %v2521_v45, %v2520_v39  ;;  %v2528_v51 = vrot.slane %v2527_v61, 4  ;;  %v7032_v45 = vld [vmem:[#allocation57_spill] sm:$0xff] }
 0x1da   : > { %v2535_v58 = vrot.slane %v2534_v40, 4  ;;  %v5381_v31 = vmax.f32 %v2475_v7, %v2476_v12  ;;  %v2490_v22 = vrot.slane %v2489_v60, 1  ;;  %v2541_v50 = vsel %vm458_vm2, %v7030_v47, 0.0 }
 0x1db   : > { %v2510_v49 = vadd.f32 %v2509_v59, %v2508_v62  ;;  %v2516_v28 = vrot.slane %v2515_v52, 2  ;;  %v2523_v4 = vrot.slane %v2522_v23, 2  ;;  %v2529_v25 = vadd.f32 %v2528_v51, %v2527_v61 }
 0x1dc   : > { %7029 = vst [vmem:[#allocation58_spill] sm:$0xff] %v5381_v31  ;;  %v2536_v9 = vadd.f32 %v2535_v58, %v2534_v40  ;;  %v2497_v3 = vrot.slane %v2496_v34, 1  ;;  %v2504_v54 = vrot.slane %v2503_v19, 1  ;;  %v2542_v21 = vrot.slane %v2541_v50, 4 }
 0x1dd   : > { %v2548_v14 = vsel %vm458_vm2, %v7031_v27, 0.0  ;;  %v2511_v10 = vrot.slane %v2510_v49, 1  ;;  %v2517_v39 = vadd.f32 %v2516_v28, %v2515_v52  ;;  %v2524_v53 = vadd.f32 %v2523_v4, %v2522_v23 }
 0x1de   : > { %v2530_v7 = vrot.slane %v2529_v25, 2  ;;  %v2537_v12 = vrot.slane %v2536_v9, 2  ;;  %v2543_v44 = vadd.f32 %v2542_v21, %v2541_v50  ;;  %v2549_v62 = vrot.slane %v2548_v14, 4 }
 0x1df   : > { %v2555_v59 = vsel %vm458_vm2, %v7032_v45, 0.0  ;;  %v5389_v47 = vmax.f32 %v2482_v63, %v2483_v17  ;;  %v2518_v61 = vrot.slane %v2517_v39, 1  ;;  %v2525_v40 = vrot.slane %v2524_v53, 1 }
 0x1e0   : > { %v2531_v51 = vadd.f32 %v2530_v7, %v2529_v25  ;;  %v2544_v58 = vrot.slane %v2543_v44, 2  ;;  %v2550_v31 = vadd.f32 %v2549_v62, %v2548_v14  ;;  %v2556_v32 = vrot.slane %v2555_v59, 4  ;;  %v7039_v14 = vld [vmem:[#allocation8_spill] sm:$0xff] }
 0x1e1   : > { %7033 = vst [vmem:[#allocation9_spill] sm:$0xff] %v5389_v47  ;;  %v2562_v27 = vsel %vm458_vm2, %v7034_v42, 0.0  ;;  %v5393_v28 = vmax.f32 %v2489_v60, %v2490_v22  ;;  %v5395_v52 = vmax.f32 %v2496_v34, %v2497_v3  ;;  %v5397_v23 = vadd.f32 %v2504_v54, %v2503_v19  ;;  %v7040_v42 = vld [vmem:[#allocation31_spill] sm:$0xff] }
 0x1e2   : > { %v5399_v50 = vadd.f32 %v2511_v10, %v2510_v49  ;;  %v2538_v4 = vadd.f32 %v2537_v12, %v2536_v9  ;;  %v2551_v63 = vrot.slane %v2550_v31, 2  ;;  %v2557_v17 = vadd.f32 %v2556_v32, %v2555_v59  ;;  %v7041_v9 = vld [vmem:[#allocation41_spill] sm:$0xff]  ;;  %v7042_v10 = vld [vmem:[#allocation35_spill] sm:$0xff] }
 0x1e3   : > { %7035 = vst [vmem:[#allocation56_spill] sm:$0xff] %v5393_v28  ;;  %7036 = vst [vmem:[#allocation4_spill] sm:$0xff] %v5395_v52  ;;  %v2563_v21 = vrot.slane %v2562_v27, 4  ;;  %v5401_v45 = vadd.f32 %v2518_v61, %v2517_v39  ;;  %v5403_v25 = vadd.f32 %v2525_v40, %v2524_v53  ;;  %v2569_v7 = vsel %vm458_vm2, %v7039_v14, 0.0 }
 0x1e4   : > { %v2576_v60 = vsel %vm458_vm2, %v7040_v42, 0.0  ;;  %v2532_v34 = vrot.slane %v2531_v51, 1  ;;  %v2545_v22 = vadd.f32 %v2544_v58, %v2543_v44  ;;  %v2558_v54 = vrot.slane %v2557_v17, 2 }
 0x1e5   : > { %7037 = vst [vmem:[#allocation42_spill] sm:$0xff] %v5401_v45  ;;  %7038 = vst [vmem:[#allocation36_spill] sm:$0xff] %v5403_v25  ;;  %v2564_v19 = vadd.f32 %v2563_v21, %v2562_v27  ;;  %v2570_v49 = vrot.slane %v2569_v7, 4  ;;  %v2577_v3 = vrot.slane %v2576_v60, 4  ;;  %v2583_v32 = vsel %vm458_vm2, %v7041_v9, 0.0  ;;  %v7044_v27 = vld [vmem:[#allocation60_spill] sm:$0xff] }
 0x1e6   : > { %v2590_v39 = vsel %vm458_vm2, %v7042_v10, 0.0  ;;  %v2539_v53 = vrot.slane %v2538_v4, 1  ;;  %v2552_v12 = vadd.f32 %v2551_v63, %v2550_v31  ;;  %v2559_v62 = vadd.f32 %v2558_v54, %v2557_v17  ;;  %v7045_v63 = vld [vmem:[#allocation25_spill] sm:$0xff] }
 0x1e7   : > { %v2565_v59 = vrot.slane %v2564_v19, 2  ;;  %v2571_v61 = vadd.f32 %v2570_v49, %v2569_v7  ;;  %v2578_v40 = vadd.f32 %v2577_v3, %v2576_v60  ;;  %v2584_v14 = vrot.slane %v2583_v32, 4 }
 0x1e8   : > { %v2591_v42 = vrot.slane %v2590_v39, 4  ;;  %v5413_v52 = vadd.f32 %v2532_v34, %v2531_v51  ;;  %v2546_v44 = vrot.slane %v2545_v22, 1  ;;  %v2597_v21 = vsel %vm458_vm2, %v7044_v27, 0.0 }
 0x1e9   : > { %v2566_v58 = vadd.f32 %v2565_v59, %v2564_v19  ;;  %v2572_v28 = vrot.slane %v2571_v61, 2  ;;  %v2579_v9 = vrot.slane %v2578_v40, 2  ;;  %v2585_v47 = vadd.f32 %v2584_v14, %v2583_v32 }
 0x1ea   : > { %7043 = vst [vmem:[#allocation57_spill] sm:$0xff] %v5413_v52  ;;  %v2592_v25 = vadd.f32 %v2591_v42, %v2590_v39  ;;  %v2553_v10 = vrot.slane %v2552_v12, 1  ;;  %v2560_v45 = vrot.slane %v2559_v62, 1  ;;  %v2598_v31 = vrot.slane %v2597_v21, 4 }
 0x1eb   : > { %v2604_v17 = vsel %vm458_vm2, %v7045_v63, 0.0  ;;  %v2567_v7 = vrot.slane %v2566_v58, 1  ;;  %v2573_v60 = vadd.f32 %v2572_v28, %v2571_v61  ;;  %v2580_v54 = vadd.f32 %v2579_v9, %v2578_v40 }
 0x1ec   : > { %v2586_v51 = vrot.slane %v2585_v47, 2  ;;  %v2593_v34 = vrot.slane %v2592_v25, 2  ;;  %v2599_v49 = vadd.f32 %v2598_v31, %v2597_v21  ;;  %v2605_v19 = vrot.slane %v2604_v17, 4 }
 0x1ed   : > { %v2611_v3 = vsel %vm458_vm2, %v4904_v0, 0.0  ;;  %v5421_v59 = vadd.f32 %v2539_v53, %v2538_v4  ;;  %v2574_v32 = vrot.slane %v2573_v60, 1  ;;  %v2581_v39 = vrot.slane %v2580_v54, 1 }
 0x1ee   : > { %v2587_v14 = vadd.f32 %v2586_v51, %v2585_v47  ;;  %v2600_v42 = vrot.slane %v2599_v49, 2  ;;  %v2606_v27 = vadd.f32 %v2605_v19, %v2604_v17  ;;  %v2612_v52 = vrot.slane %v2611_v3, 4 }
 0x1ef   : > { %v2618_v63 = vsel %vm458_vm2, %v4951_v16, 0.0  ;;  %v5425_v28 = vadd.f32 %v2546_v44, %v2545_v22  ;;  %v5427_v61 = vadd.f32 %v2553_v10, %v2552_v12  ;;  %v5429_v40 = vadd.f32 %v2560_v45, %v2559_v62 }
 0x1f0   : > { %v5431_v21 = vadd.f32 %v2567_v7, %v2566_v58  ;;  %v2594_v0 = vadd.f32 %v2593_v34, %v2592_v25  ;;  %v2607_v4 = vrot.slane %v2606_v27, 2  ;;  %v2613_v53 = vadd.f32 %v2612_v52, %v2611_v3 }
 0x1f1   : > { %v2619_v9 = vrot.slane %v2618_v63, 4  ;;  %v5433_v31 = vadd.f32 %v2574_v32, %v2573_v60  ;;  %v5435_v47 = vadd.f32 %v2581_v39, %v2580_v54  ;;  %v2625_v17 = vsel %vm458_vm2, %v4911_v2, 0.0 }
 0x1f2   : > { %v2632_v16 = vsel %vm458_vm2, %v4960_v43, 0.0  ;;  %v2588_v22 = vrot.slane %v2587_v14, 1  ;;  %v2601_v12 = vadd.f32 %v2600_v42, %v2599_v49  ;;  %v2614_v45 = vrot.slane %v2613_v53, 2 }
 0x1f3   : > { %v2620_v62 = vadd.f32 %v2619_v9, %v2618_v63  ;;  %v2626_v44 = vrot.slane %v2625_v17, 4  ;;  %v2633_v58 = vrot.slane %v2632_v16, 4  ;;  %v2639_v52 = vsel %vm458_vm2, %v4914_v6, 0.0 }
 0x1f4   : > { %v2646_v25 = vsel %vm458_vm2, %v4964_v36, 0.0  ;;  %v2595_v10 = vrot.slane %v2594_v0, 1  ;;  %v2608_v7 = vadd.f32 %v2607_v4, %v2606_v27  ;;  %v2615_v60 = vadd.f32 %v2614_v45, %v2613_v53 }
 0x1f5   : > { %v2621_v54 = vrot.slane %v2620_v62, 2  ;;  %v2627_v2 = vadd.f32 %v2626_v44, %v2625_v17  ;;  %v2634_v51 = vadd.f32 %v2633_v58, %v2632_v16  ;;  %v2640_v34 = vrot.slane %v2639_v52, 4 }
 0x1f6   : > { %v2647_v43 = vrot.slane %v2646_v25, 4  ;;  %v5445_v19 = vadd.f32 %v2588_v22, %v2587_v14  ;;  %v2602_v49 = vrot.slane %v2601_v12, 1  ;;  %v2653_v32 = vsel %vm458_vm2, %v4927_v29, 0.0 }
 0x1f7   : > { %v2622_v3 = vadd.f32 %v2621_v54, %v2620_v62  ;;  %v2628_v39 = vrot.slane %v2627_v2, 2  ;;  %v2635_v6 = vrot.slane %v2634_v51, 2  ;;  %v2641_v42 = vadd.f32 %v2640_v34, %v2639_v52 }
 0x1f8   : > { %v2648_v63 = vadd.f32 %v2647_v43, %v2646_v25  ;;  %v2609_v36 = vrot.slane %v2608_v7, 1  ;;  %v2616_v9 = vrot.slane %v2615_v60, 1  ;;  %v2654_v27 = vrot.slane %v2653_v32, 4 }
 0x1f9   : > { %v2660_v4 = vsel %vm458_vm2, %v4973_v37, 0.0  ;;  %v2623_v53 = vrot.slane %v2622_v3, 1  ;;  %v2629_v17 = vadd.f32 %v2628_v39, %v2627_v2  ;;  %v2636_v16 = vadd.f32 %v2635_v6, %v2634_v51 }
 0x1fa   : > { %v2642_v14 = vrot.slane %v2641_v42, 2  ;;  %v2649_v22 = vrot.slane %v2648_v63, 2  ;;  %v2655_v45 = vadd.f32 %v2654_v27, %v2653_v32  ;;  %v2661_v62 = vrot.slane %v2660_v4, 4 }
 0x1fb   : > { %v2667_v29 = vsel %vm458_vm2, %v4940_v33, 0.0  ;;  %v5453_v44 = vadd.f32 %v2595_v10, %v2594_v0  ;;  %v2630_v58 = vrot.slane %v2629_v17, 1  ;;  %v2637_v52 = vrot.slane %v2636_v16, 1 }
 0x1fc   : > { %v2643_v25 = vadd.f32 %v2642_v14, %v2641_v42  ;;  %v2656_v54 = vrot.slane %v2655_v45, 2  ;;  %v2662_v34 = vadd.f32 %v2661_v62, %v2660_v4  ;;  %v2668_v43 = vrot.slane %v2667_v29, 4 }
 0x1fd   : > { %v2674_v37 = vsel %vm458_vm2, %v4985_v13, 0.0  ;;  %v5457_v2 = vadd.f32 %v2602_v49, %v2601_v12  ;;  %v5459_v51 = vadd.f32 %v2609_v36, %v2608_v7  ;;  %v5461_v32 = vadd.f32 %v2616_v9, %v2615_v60 }
 0x1fe   : > { %v5463_v39 = vadd.f32 %v2623_v53, %v2622_v3  ;;  %v2650_v33 = vadd.f32 %v2649_v22, %v2648_v63  ;;  %v2663_v0 = vrot.slane %v2662_v34, 2  ;;  %v2669_v10 = vadd.f32 %v2668_v43, %v2667_v29 }
 0x1ff   : > { %v2675_v6 = vrot.slane %v2674_v37, 4  ;;  %v5465_v27 = vadd.f32 %v2630_v58, %v2629_v17  ;;  %v5467_v42 = vadd.f32 %v2637_v52, %v2636_v16  ;;  %v2681_v4 = vsel %vm458_vm2, %v4943_v11, 0.0 }
 0x200   : > { %v2688_v13 = vsel %vm458_vm2, %v4989_v46, 0.0  ;;  %v2644_v12 = vrot.slane %v2643_v25, 1  ;;  %v2657_v7 = vadd.f32 %v2656_v54, %v2655_v45  ;;  %v2670_v60 = vrot.slane %v2669_v10, 2 }
 0x201   : > { %v2676_v49 = vadd.f32 %v2675_v6, %v2674_v37  ;;  %v2682_v3 = vrot.slane %v2681_v4, 4  ;;  %v2689_v36 = vrot.slane %v2688_v13, 4  ;;  %v2695_v63 = vsel %vm458_vm2, %v4954_v57, 0.0 }
 0x202   : > { %v2702_v9 = vsel %vm458_vm2, %v4998_v55, 0.0  ;;  %v2651_v53 = vrot.slane %v2650_v33, 1  ;;  %v2664_v17 = vadd.f32 %v2663_v0, %v2662_v34  ;;  %v2671_v16 = vadd.f32 %v2670_v60, %v2669_v10 }
 0x203   : > { %v2677_v14 = vrot.slane %v2676_v49, 2  ;;  %v2683_v11 = vadd.f32 %v2682_v3, %v2681_v4  ;;  %v2690_v22 = vadd.f32 %v2689_v36, %v2688_v13  ;;  %v2696_v62 = vrot.slane %v2695_v63, 4 }
 0x204   : > { %v2703_v46 = vrot.slane %v2702_v9, 4  ;;  %v5477_v29 = vadd.f32 %v2644_v12, %v2643_v25  ;;  %v2658_v45 = vrot.slane %v2657_v7, 1  ;;  %v2709_v52 = vsel %vm458_vm2, %v4967_v38, 0.0 }
 0x205   : > { %v2678_v58 = vadd.f32 %v2677_v14, %v2676_v49  ;;  %v2684_v54 = vrot.slane %v2683_v11, 2  ;;  %v2691_v57 = vrot.slane %v2690_v22, 2  ;;  %v2697_v43 = vadd.f32 %v2696_v62, %v2695_v63 }
 0x206   : > { %v2704_v37 = vadd.f32 %v2703_v46, %v2702_v9  ;;  %v2665_v55 = vrot.slane %v2664_v17, 1  ;;  %v2672_v6 = vrot.slane %v2671_v16, 1  ;;  %v2710_v34 = vrot.slane %v2709_v52, 4 }
 0x207   : > { %v2716_v0 = vsel %vm458_vm2, %v5011_v56, 0.0  ;;  %v2679_v10 = vrot.slane %v2678_v58, 1  ;;  %v2685_v4 = vadd.f32 %v2684_v54, %v2683_v11  ;;  %v2692_v13 = vadd.f32 %v2691_v57, %v2690_v22 }
 0x208   : > { %v2698_v25 = vrot.slane %v2697_v43, 2  ;;  %v2705_v12 = vrot.slane %v2704_v37, 2  ;;  %v2711_v60 = vadd.f32 %v2710_v34, %v2709_v52  ;;  %v2717_v49 = vrot.slane %v2716_v0, 4 }
 0x209   : > { %v2723_v38 = vsel %vm458_vm2, %v4976_v30, 0.0  ;;  %v5485_v3 = vadd.f32 %v2651_v53, %v2650_v33  ;;  %v2686_v36 = vrot.slane %v2685_v4, 1  ;;  %v2693_v63 = vrot.slane %v2692_v13, 1 }
 0x20a   : > { %v2699_v9 = vadd.f32 %v2698_v25, %v2697_v43  ;;  %v2712_v14 = vrot.slane %v2711_v60, 2  ;;  %v2718_v62 = vadd.f32 %v2717_v49, %v2716_v0  ;;  %v2724_v46 = vrot.slane %v2723_v38, 4 }
 0x20b   : > { %v2730_v56 = vsel %vm458_vm2, %v5023_v24, 0.0  ;;  %v5489_v11 = vadd.f32 %v2658_v45, %v2657_v7  ;;  %v5491_v22 = vadd.f32 %v2665_v55, %v2664_v17  ;;  %v5493_v52 = vadd.f32 %v2672_v6, %v2671_v16 }
 0x20c   : > { %v5495_v54 = vadd.f32 %v2679_v10, %v2678_v58  ;;  %v2706_v30 = vadd.f32 %v2705_v12, %v2704_v37  ;;  %v2719_v33 = vrot.slane %v2718_v62, 2  ;;  %v2725_v53 = vadd.f32 %v2724_v46, %v2723_v38 }
 0x20d   : > { %v2731_v57 = vrot.slane %v2730_v56, 4  ;;  %v5497_v34 = vadd.f32 %v2686_v36, %v2685_v4  ;;  %v5499_v43 = vadd.f32 %v2693_v63, %v2692_v13  ;;  %v2737_v0 = vsel %vm458_vm2, %v4979_v35, 0.0 }
 0x20e   : > { %v2744_v24 = vsel %vm458_vm2, %v5027_v8, 0.0  ;;  %v2700_v7 = vrot.slane %v2699_v9, 1  ;;  %v2713_v17 = vadd.f32 %v2712_v14, %v2711_v60  ;;  %v2726_v16 = vrot.slane %v2725_v53, 2 }
 0x20f   : > { %7046 = vst [vmem:[#allocation61_spill] sm:$0xff] %v5499_v43  ;;  %v2732_v45 = vadd.f32 %v2731_v57, %v2730_v56  ;;  %v2738_v58 = vrot.slane %v2737_v0, 4  ;;  %v2745_v55 = vrot.slane %v2744_v24, 4  ;;  %v2751_v37 = vsel %vm458_vm2, %v4992_v20, 0.0  ;;  %v7049_v43 = vld [vmem:[#allocation23_spill] sm:$0xff] }
 0x210   : > { %v2758_v6 = vsel %vm458_vm2, %v6968_v1, 0.0  ;;  %v2707_v10 = vrot.slane %v2706_v30, 1  ;;  %v2720_v4 = vadd.f32 %v2719_v33, %v2718_v62  ;;  %v2727_v13 = vadd.f32 %v2726_v16, %v2725_v53 }
 0x211   : > { %v2733_v25 = vrot.slane %v2732_v45, 2  ;;  %v2739_v35 = vadd.f32 %v2738_v58, %v2737_v0  ;;  %v2746_v12 = vadd.f32 %v2745_v55, %v2744_v24  ;;  %v2752_v49 = vrot.slane %v2751_v37, 4  ;;  %v7048_v58 = vld [vmem:[#allocation44_spill] sm:$0xff] }
 0x212   : > { %v2759_v8 = vrot.slane %v2758_v6, 4  ;;  %v5509_v38 = vadd.f32 %v2700_v7, %v2699_v9  ;;  %v2714_v60 = vrot.slane %v2713_v17, 1  ;;  %v2765_v63 = vsel %vm458_vm2, %v6970_v18, 0.0 }
 0x213   : > { %v2734_v36 = vadd.f32 %v2733_v25, %v2732_v45  ;;  %v2740_v14 = vrot.slane %v2739_v35, 2  ;;  %v2747_v20 = vrot.slane %v2746_v12, 2  ;;  %v2753_v46 = vadd.f32 %v2752_v49, %v2751_v37 }
 0x214   : > { %7047 = vst [vmem:[#allocation8_spill] sm:$0xff] %v5509_v38  ;;  %v2760_v56 = vadd.f32 %v2759_v8, %v2758_v6  ;;  %v2721_v1 = vrot.slane %v2720_v4, 1  ;;  %v2728_v57 = vrot.slane %v2727_v13, 1  ;;  %v2766_v62 = vrot.slane %v2765_v63, 4 }
 0x215   : > { %v2772_v33 = vsel %vm458_vm2, %v6971_v26, 0.0  ;;  %v2735_v53 = vrot.slane %v2734_v36, 1  ;;  %v2741_v0 = vadd.f32 %v2740_v14, %v2739_v35  ;;  %v2748_v24 = vadd.f32 %v2747_v20, %v2746_v12 }
 0x216   : > { %v2754_v9 = vrot.slane %v2753_v46, 2  ;;  %v2761_v7 = vrot.slane %v2760_v56, 2  ;;  %v2767_v16 = vadd.f32 %v2766_v62, %v2765_v63  ;;  %v2773_v45 = vrot.slane %v2772_v33, 4 }
 0x217   : > { %v2779_v18 = vsel %vm458_vm2, %v7048_v58, 0.0  ;;  %v5517_v55 = vadd.f32 %v2707_v10, %v2706_v30  ;;  %v2742_v37 = vrot.slane %v2741_v0, 1  ;;  %v2749_v6 = vrot.slane %v2748_v24, 1 }
 0x218   : > { %v2755_v25 = vadd.f32 %v2754_v9, %v2753_v46  ;;  %v2768_v49 = vrot.slane %v2767_v16, 2  ;;  %v2774_v8 = vadd.f32 %v2773_v45, %v2772_v33  ;;  %v2780_v38 = vrot.slane %v2779_v18, 4  ;;  %v7055_v33 = vld [vmem:[#allocation32_spill] sm:$0xff] }
 0x219   : > { %v2786_v26 = vsel %vm458_vm2, %v7049_v43, 0.0  ;;  %v5521_v35 = vadd.f32 %v2714_v60, %v2713_v17  ;;  %v5523_v12 = vadd.f32 %v2721_v1, %v2720_v4  ;;  %v5525_v63 = vadd.f32 %v2728_v57, %v2727_v13  ;;  %v7056_v43 = vld [vmem:[#allocation20_spill] sm:$0xff] }
 0x21a   : > { %v5527_v14 = vadd.f32 %v2735_v53, %v2734_v36  ;;  %v2762_v20 = vadd.f32 %v2761_v7, %v2760_v56  ;;  %v2775_v30 = vrot.slane %v2774_v8, 2  ;;  %v2781_v10 = vadd.f32 %v2780_v38, %v2779_v18  ;;  %v7057_v56 = vld [vmem:[#allocation26_spill] sm:$0xff]  ;;  %v7058_v53 = vld [vmem:[#allocation33_spill] sm:$0xff] }
 0x21b   : > { %7050 = vst [vmem:[#allocation31_spill] sm:$0xff] %v5523_v12  ;;  %7051 = vst [vmem:[#allocation41_spill] sm:$0xff] %v5525_v63  ;;  %v2787_v62 = vrot.slane %v2786_v26, 4  ;;  %v5529_v58 = vadd.f32 %v2742_v37, %v2741_v0  ;;  %v5531_v46 = vadd.f32 %v2749_v6, %v2748_v24  ;;  %v2793_v9 = vsel %vm458_vm2, %v7055_v33, 0.0 }
 0x21c   : > { %7052 = vst [vmem:[#allocation35_spill] sm:$0xff] %v5527_v14  ;;  %v2800_v17 = vsel %vm458_vm2, %v7056_v43, 0.0  ;;  %v2756_v4 = vrot.slane %v2755_v25, 1  ;;  %v2769_v60 = vadd.f32 %v2768_v49, %v2767_v16  ;;  %v2782_v13 = vrot.slane %v2781_v10, 2 }
 0x21d   : > { %7053 = vst [vmem:[#allocation60_spill] sm:$0xff] %v5529_v58  ;;  %7054 = vst [vmem:[#allocation25_spill] sm:$0xff] %v5531_v46  ;;  %v2788_v1 = vadd.f32 %v2787_v62, %v2786_v26  ;;  %v2794_v36 = vrot.slane %v2793_v9, 4  ;;  %v2801_v57 = vrot.slane %v2800_v17, 4  ;;  %v2807_v38 = vsel %vm458_vm2, %v7057_v56, 0.0  ;;  %v7060_v26 = vld [vmem:[#allocation27_spill] sm:$0xff] }
 0x21e   : > { %v2814_v0 = vsel %vm458_vm2, %v7058_v53, 0.0  ;;  %v2763_v24 = vrot.slane %v2762_v20, 1  ;;  %v2776_v7 = vadd.f32 %v2775_v30, %v2774_v8  ;;  %v2783_v45 = vadd.f32 %v2782_v13, %v2781_v10  ;;  %v7061_v30 = vld [vmem:[#allocation5_spill] sm:$0xff] }
 0x21f   : > { %v2789_v18 = vrot.slane %v2788_v1, 2  ;;  %v2795_v37 = vadd.f32 %v2794_v36, %v2793_v9  ;;  %v2802_v6 = vadd.f32 %v2801_v57, %v2800_v17  ;;  %v2808_v33 = vrot.slane %v2807_v38, 4 }
 0x220   : > { %v2815_v43 = vrot.slane %v2814_v0, 4  ;;  %v5541_v46 = vadd.f32 %v2756_v4, %v2755_v25  ;;  %v2770_v16 = vrot.slane %v2769_v60, 1  ;;  %v2821_v62 = vsel %vm458_vm2, %v7060_v26, 0.0 }
 0x221   : > { %v2790_v49 = vadd.f32 %v2789_v18, %v2788_v1  ;;  %v2796_v58 = vrot.slane %v2795_v37, 2  ;;  %v2803_v56 = vrot.slane %v2802_v6, 2  ;;  %v2809_v14 = vadd.f32 %v2808_v33, %v2807_v38 }
 0x222   : > { %7059 = vst [vmem:[#allocation44_spill] sm:$0xff] %v5541_v46  ;;  %v2816_v63 = vadd.f32 %v2815_v43, %v2814_v0  ;;  %v2777_v53 = vrot.slane %v2776_v7, 1  ;;  %v2784_v12 = vrot.slane %v2783_v45, 1  ;;  %v2822_v8 = vrot.slane %v2821_v62, 4 }
 0x223   : > { %v2828_v10 = vsel %vm458_vm2, %v7061_v30, 0.0  ;;  %v2791_v9 = vrot.slane %v2790_v49, 1  ;;  %v2797_v17 = vadd.f32 %v2796_v58, %v2795_v37  ;;  %v2804_v13 = vadd.f32 %v2803_v56, %v2802_v6 }
 0x224   : > { %v2810_v25 = vrot.slane %v2809_v14, 2  ;;  %v2817_v4 = vrot.slane %v2816_v63, 2  ;;  %v2823_v36 = vadd.f32 %v2822_v8, %v2821_v62  ;;  %v2829_v1 = vrot.slane %v2828_v10, 4 }
 0x225   : > { %v2835_v57 = vsel %vm458_vm2, %v6988_v15, 0.0  ;;  %v5549_v18 = vadd.f32 %v2763_v24, %v2762_v20  ;;  %v2798_v38 = vrot.slane %v2797_v17, 1  ;;  %v2805_v0 = vrot.slane %v2804_v13, 1 }
 0x226   : > { %v2811_v33 = vadd.f32 %v2810_v25, %v2809_v14  ;;  %v2824_v43 = vrot.slane %v2823_v36, 2  ;;  %v2830_v26 = vadd.f32 %v2829_v1, %v2828_v10  ;;  %v2836_v46 = vrot.slane %v2835_v57, 4 }
 0x227   : > { %v2842_v30 = vsel %vm458_vm2, %v6990_v5, 0.0  ;;  %v5553_v58 = vadd.f32 %v2770_v16, %v2769_v60  ;;  %v5555_v37 = vadd.f32 %v2777_v53, %v2776_v7  ;;  %v5557_v6 = vadd.f32 %v2784_v12, %v2783_v45  ;;  %v7068_v5 = vld [vmem:[#allocation7_spill] sm:$0xff] }
 0x228   : > { %v5559_v62 = vadd.f32 %v2791_v9, %v2790_v49  ;;  %v2818_v15 = vadd.f32 %v2817_v4, %v2816_v63  ;;  %v2831_v20 = vrot.slane %v2830_v26, 2  ;;  %v2837_v24 = vadd.f32 %v2836_v46, %v2835_v57  ;;  %v7069_v63 = vld [vmem:[#allocation21_spill] sm:$0xff]  ;;  %v7070_v9 = vld [vmem:[#allocation10_spill] sm:$0xff] }
 0x229   : > { %7062 = vst [vmem:[#allocation23_spill] sm:$0xff] %v5553_v58  ;;  %7063 = vst [vmem:[#allocation32_spill] sm:$0xff] %v5555_v37  ;;  %v2843_v56 = vrot.slane %v2842_v30, 4  ;;  %v5561_v8 = vadd.f32 %v2798_v38, %v2797_v17  ;;  %v5563_v14 = vadd.f32 %v2805_v0, %v2804_v13  ;;  %v2849_v10 = vsel %vm458_vm2, %v6997_v48, 0.0 }
 0x22a   : > { %7064 = vst [vmem:[#allocation20_spill] sm:$0xff] %v5557_v6  ;;  %7065 = vst [vmem:[#allocation26_spill] sm:$0xff] %v5559_v62  ;;  %v2856_v60 = vsel %vm458_vm2, %v7068_v5, 0.0  ;;  %v2812_v7 = vrot.slane %v2811_v33, 1  ;;  %v2825_v16 = vadd.f32 %v2824_v43, %v2823_v36  ;;  %v2838_v12 = vrot.slane %v2837_v24, 2 }
 0x22b   : > { %7066 = vst [vmem:[#allocation33_spill] sm:$0xff] %v5561_v8  ;;  %7067 = vst [vmem:[#allocation27_spill] sm:$0xff] %v5563_v14  ;;  %v2844_v45 = vadd.f32 %v2843_v56, %v2842_v30  ;;  %v2850_v49 = vrot.slane %v2849_v10, 4  ;;  %v2857_v53 = vrot.slane %v2856_v60, 4  ;;  %v2863_v46 = vsel %vm458_vm2, %v7069_v63, 0.0 }
 0x22c   : > { %v2870_v17 = vsel %vm458_vm2, %v7070_v9, 0.0  ;;  %v2819_v13 = vrot.slane %v2818_v15, 1  ;;  %v2832_v25 = vadd.f32 %v2831_v20, %v2830_v26  ;;  %v2839_v4 = vadd.f32 %v2838_v12, %v2837_v24  ;;  %v7072_v20 = vld [vmem:[#allocation14_spill] sm:$0xff] }
 0x22d   : > { %v2845_v1 = vrot.slane %v2844_v45, 2  ;;  %v2851_v48 = vadd.f32 %v2850_v49, %v2849_v10  ;;  %v2858_v57 = vadd.f32 %v2857_v53, %v2856_v60  ;;  %v2864_v38 = vrot.slane %v2863_v46, 4  ;;  %v7073_v53 = vld [vmem:[#allocation6_spill] sm:$0xff] }
 0x22e   : > { %v2871_v0 = vrot.slane %v2870_v17, 4  ;;  %v5573_v5 = vadd.f32 %v2812_v7, %v2811_v33  ;;  %v2826_v36 = vrot.slane %v2825_v16, 1  ;;  %v2877_v30 = vsel %vm458_vm2, %v5073_v41, 0.0 }
 0x22f   : > { %v2846_v43 = vadd.f32 %v2845_v1, %v2844_v45  ;;  %v2852_v56 = vrot.slane %v2851_v48, 2  ;;  %v2859_v63 = vrot.slane %v2858_v57, 2  ;;  %v2865_v14 = vadd.f32 %v2864_v38, %v2863_v46 }
 0x230   : > { %7071 = vst [vmem:[#allocation5_spill] sm:$0xff] %v5573_v5  ;;  %v2872_v8 = vadd.f32 %v2871_v0, %v2870_v17  ;;  %v2833_v9 = vrot.slane %v2832_v25, 1  ;;  %v2840_v62 = vrot.slane %v2839_v4, 1  ;;  %v2878_v26 = vrot.slane %v2877_v30, 4 }
 0x231   : > { %v2884_v24 = vsel %vm458_vm2, %v7072_v20, 0.0  ;;  %v2847_v10 = vrot.slane %v2846_v43, 1  ;;  %v2853_v60 = vadd.f32 %v2852_v56, %v2851_v48  ;;  %v2860_v12 = vadd.f32 %v2859_v63, %v2858_v57  ;;  %v7076_v20 = vld [vmem:[#allocation13_spill] sm:$0xff] }
 0x232   : > { %v2866_v33 = vrot.slane %v2865_v14, 2  ;;  %v2873_v7 = vrot.slane %v2872_v8, 2  ;;  %v2879_v49 = vadd.f32 %v2878_v26, %v2877_v30  ;;  %v2885_v45 = vrot.slane %v2884_v24, 4 }
 0x233   : > { %v2891_v41 = vsel %vm458_vm2, %v7073_v53, 0.0  ;;  %v5581_v1 = vadd.f32 %v2819_v13, %v2818_v15  ;;  %v5583_v46 = vadd.f32 %v2826_v36, %v2825_v16  ;;  %v2854_v17 = vrot.slane %v2853_v60, 1 }
 0x234   : > { %v2861_v38 = vrot.slane %v2860_v12, 1  ;;  %v2880_v0 = vrot.slane %v2879_v49, 2  ;;  %v2886_v5 = vadd.f32 %v2885_v45, %v2884_v24  ;;  %v2892_v6 = vrot.slane %v2891_v41, 4  ;;  %v7082_v24 = vld [vmem:[#allocation34_spill] sm:$0xff] }
 0x235   : > { %7074 = vst [vmem:[#allocation7_spill] sm:$0xff] %v5581_v1  ;;  %7075 = vst [vmem:[#allocation21_spill] sm:$0xff] %v5583_v46  ;;  %v2898_v48 = vsel %vm458_vm2, %v7076_v20, 0.0  ;;  %v5587_v57 = vadd.f32 %v2833_v9, %v2832_v25  ;;  %v5589_v56 = vadd.f32 %v2840_v62, %v2839_v4  ;;  %v5591_v30 = vadd.f32 %v2847_v10, %v2846_v43  ;;  %v7083_v46 = vld [vmem:[#allocation16_spill] sm:$0xff] }
 0x236   : > { %v2867_v63 = vadd.f32 %v2866_v33, %v2865_v14  ;;  %v2874_v26 = vadd.f32 %v2873_v7, %v2872_v8  ;;  %v2887_v15 = vrot.slane %v2886_v5, 2  ;;  %v2893_v13 = vadd.f32 %v2892_v6, %v2891_v41  ;;  %v7084_v8 = vld [vmem:[#allocation12_spill] sm:$0xff]  ;;  %v7085_v33 = vld [vmem:[#allocation18_spill] sm:$0xff] }
 0x237   : > { %7077 = vst [vmem:[#allocation10_spill] sm:$0xff] %v5587_v57  ;;  %7078 = vst [vmem:[#allocation14_spill] sm:$0xff] %v5589_v56  ;;  %v2899_v16 = vrot.slane %v2898_v48, 4  ;;  %v5593_v36 = vadd.f32 %v2854_v17, %v2853_v60  ;;  %v5595_v53 = vadd.f32 %v2861_v38, %v2860_v12  ;;  %v2905_v45 = vsel %vm458_vm2, %v7082_v24, 0.0  ;;  %v7087_v57 = vld [vmem:[#allocation15_spill] sm:$0xff] }
 0x238   : > { %7079 = vst [vmem:[#allocation6_spill] sm:$0xff] %v5591_v30  ;;  %v2912_v25 = vsel %vm458_vm2, %v7083_v46, 0.0  ;;  %v2881_v9 = vadd.f32 %v2880_v0, %v2879_v49  ;;  %v2888_v62 = vadd.f32 %v2887_v15, %v2886_v5  ;;  %v2894_v4 = vrot.slane %v2893_v13, 2 }
 0x239   : > { %7080 = vst [vmem:[#allocation13_spill] sm:$0xff] %v5593_v36  ;;  %7081 = vst [vmem:[#allocation113_spill] sm:$0xff] %v5595_v53  ;;  %v2900_v43 = vadd.f32 %v2899_v16, %v2898_v48  ;;  %v2906_v10 = vrot.slane %v2905_v45, 4  ;;  %v2913_v14 = vrot.slane %v2912_v25, 4  ;;  %v2919_v6 = vsel %vm458_vm2, %v7084_v8, 0.0  ;;  %v7086_v48 = vld [vmem:[#allocation11_spill] sm:$0xff] }
 0x23a   : > { %v2926_v60 = vsel %vm458_vm2, %v7085_v33, 0.0  ;;  %v2868_v12 = vrot.slane %v2867_v63, 1  ;;  %v2875_v7 = vrot.slane %v2874_v26, 1  ;;  %v2895_v41 = vadd.f32 %v2894_v4, %v2893_v13 }
 0x23b   : > { %v2901_v17 = vrot.slane %v2900_v43, 2  ;;  %v2907_v38 = vadd.f32 %v2906_v10, %v2905_v45  ;;  %v2914_v20 = vadd.f32 %v2913_v14, %v2912_v25  ;;  %v2920_v24 = vrot.slane %v2919_v6, 4 }
 0x23c   : > { %v2927_v46 = vrot.slane %v2926_v60, 4  ;;  %v2882_v49 = vrot.slane %v2881_v9, 1  ;;  %v2889_v5 = vrot.slane %v2888_v62, 1  ;;  %v2933_v15 = vsel %vm458_vm2, %v7086_v48, 0.0 }
 0x23d   : > { %v2902_v0 = vadd.f32 %v2901_v17, %v2900_v43  ;;  %v2908_v16 = vrot.slane %v2907_v38, 2  ;;  %v2915_v53 = vrot.slane %v2914_v20, 2  ;;  %v2921_v8 = vadd.f32 %v2920_v24, %v2919_v6 }
 0x23e   : > { %v2928_v36 = vadd.f32 %v2927_v46, %v2926_v60  ;;  %v2896_v30 = vrot.slane %v2895_v41, 1  ;;  %v2934_v56 = vrot.slane %v2933_v15, 4  ;;  %v2940_v13 = vsel %vm458_vm2, %v7087_v57, 0.0 }
 0x23f   : > { %v2903_v33 = vrot.slane %v2902_v0, 1  ;;  %v2909_v45 = vadd.f32 %v2908_v16, %v2907_v38  ;;  %v2916_v25 = vadd.f32 %v2915_v53, %v2914_v20  ;;  %v2922_v4 = vrot.slane %v2921_v8, 2 }
 0x240   : > { %v2929_v10 = vrot.slane %v2928_v36, 2  ;;  %v5609_v14 = vadd.f32 %v2868_v12, %v2867_v63  ;;  %v5611_v43 = vadd.f32 %v2875_v7, %v2874_v26  ;;  %v2935_v17 = vadd.f32 %v2934_v56, %v2933_v15  ;;  %v7090_v15 = vld [vmem:[#allocation57_spill] sm:$0xff] }
 0x241   : > { %v2941_v48 = vrot.slane %v2940_v13, 4  ;;  %v2910_v1 = vrot.slane %v2909_v45, 1  ;;  %v2917_v37 = vrot.slane %v2916_v25, 1  ;;  %v2923_v6 = vadd.f32 %v2922_v4, %v2921_v8 }
 0x242   : > { %v2930_v60 = vadd.f32 %v2929_v10, %v2928_v36  ;;  %v5613_v24 = vadd.f32 %v2882_v49, %v2881_v9  ;;  %v5615_v46 = vadd.f32 %v2889_v5, %v2888_v62  ;;  %v2936_v58 = vrot.slane %v2935_v17, 2  ;;  %v7088_v62 = vld [vmem:[#allocation42_spill] sm:$0xff] }
 0x243   : > { %v2942_v57 = vadd.f32 %v2941_v48, %v2940_v13  ;;  %v5617_v38 = vadd.f32 %v2896_v30, %v2895_v41  ;;  %v5619_v53 = vadd.f32 %v2903_v33, %v2902_v0  ;;  %v2924_v63 = vrot.slane %v2923_v6, 1  ;;  %v7089_v30 = vld [vmem:[#allocation36_spill] sm:$0xff] }
 0x244   : > { %v2931_v12 = vrot.slane %v2930_v60, 1  ;;  %v2937_v26 = vadd.f32 %v2936_v58, %v2935_v17  ;;  %v5622_v56 = vmul.f32 0.5, %v5397_v23  ;;  %v5625_v20 = vmul.f32 0.5, %v5399_v50 }
 0x245   : > { %v2943_v7 = vrot.slane %v2942_v57, 2  ;;  %v5627_v36 = vadd.f32 %v2910_v1, %v2909_v45  ;;  %v5629_v9 = vadd.f32 %v2917_v37, %v2916_v25  ;;  %v5632_v49 = vmul.f32 0.5, %v7088_v62 }
 0x246   : > { %v5635_v41 = vmul.f32 0.5, %v7089_v30  ;;  %v2925_v5 = vadd.f32 %v2924_v63, %v2923_v6  ;;  %v2938_v0 = vrot.slane %v2937_v26, 1  ;;  %v5638_v16 = vmul.f32 0.5, %v7090_v15  ;;  %v7096_v63 = vld [vmem:[#allocation60_spill] sm:$0xff]  ;;  %v7099_v30 = vld [vmem:[#allocation23_spill] sm:$0xff] }
 0x247   : > { %v2944_v58 = vadd.f32 %v2943_v7, %v2942_v57  ;;  %v2932_v23 = vadd.f32 %v2931_v12, %v2930_v60  ;;  %v5641_v50 = vmul.f32 0.5, %v5421_v59  ;;  %v5644_v1 = vmul.f32 0.5, %v5425_v28 }
 0x248   : > { %v5647_v37 = vmul.f32 0.5, %v5427_v61  ;;  %v5650_v33 = vmul.f32 0.5, %v5429_v40  ;;  %v5653_v13 = vmul.f32 0.5, %v5431_v21  ;;  %v5656_v45 = vmul.f32 0.5, %v5433_v31 }
 0x249   : > { %v2945_v8 = vrot.slane %v2944_v58, 1  ;;  %v2939_v25 = vadd.f32 %v2938_v0, %v2937_v26  ;;  %v5659_v59 = vmul.f32 0.5, %v5435_v47  ;;  %v5662_v28 = vmul.f32 0.5, %v5445_v19  ;;  %v7097_v26 = vld [vmem:[#allocation25_spill] sm:$0xff] }
 0x24a   : > { %v5665_v61 = vmul.f32 0.5, %v5453_v44  ;;  %v5668_v4 = vmul.f32 0.5, %v5457_v2  ;;  %v5671_v40 = vmul.f32 0.5, %v5459_v51  ;;  %v5674_v21 = vmul.f32 0.5, %v5461_v32 }
 0x24b   : > { %v5677_v31 = vmul.f32 0.5, %v5463_v39  ;;  %v2946_v47 = vadd.f32 %v2945_v8, %v2944_v58  ;;  %v5680_v10 = vmul.f32 0.5, %v5465_v27  ;;  %v5683_v19 = vmul.f32 0.5, %v5467_v42  ;;  %v7101_v58 = vld [vmem:[#allocation32_spill] sm:$0xff] }
 0x24c   : > { %v5686_v44 = vmul.f32 0.5, %v5477_v29  ;;  %v5689_v2 = vmul.f32 0.5, %v5485_v3  ;;  %v5692_v51 = vmul.f32 0.5, %v5489_v11  ;;  %v5695_v32 = vmul.f32 0.5, %v5491_v22  ;;  %v7091_v29 = vld [vmem:[#allocation61_spill] sm:$0xff]  ;;  %v7092_v3 = vld [vmem:[#allocation8_spill] sm:$0xff] }
 0x24d   : > { %v5698_v39 = vmul.f32 0.5, %v5493_v52  ;;  %v5701_v27 = vmul.f32 0.5, %v5495_v54  ;;  %v5704_v42 = vmul.f32 0.5, %v5497_v34  ;;  %v5707_v17 = vmul.f32 0.5, %v7091_v29  ;;  %v7093_v52 = vld [vmem:[#allocation31_spill] sm:$0xff]  ;;  %v7094_v54 = vld [vmem:[#allocation41_spill] sm:$0xff] }
 0x24e   : > { %v5710_v48 = vmul.f32 0.5, %v7092_v3  ;;  %v5713_v11 = vmul.f32 0.5, %v5517_v55  ;;  %v5716_v22 = vmul.f32 0.5, %v5521_v35  ;;  %v5719_v6 = vmul.f32 0.5, %v7093_v52  ;;  %v7095_v34 = vld [vmem:[#allocation35_spill] sm:$0xff]  ;;  %v7098_v55 = vld [vmem:[#allocation44_spill] sm:$0xff] }
 0x24f   : > { %v5722_v60 = vmul.f32 0.5, %v7094_v54  ;;  %v5725_v57 = vmul.f32 0.5, %v7095_v34  ;;  %v5728_v12 = vmul.f32 0.5, %v7096_v63  ;;  %v5731_v7 = vmul.f32 0.5, %v7097_v26  ;;  %v7103_v8 = vld [vmem:[#allocation20_spill] sm:$0xff]  ;;  %v7105_v3 = vld [vmem:[#allocation26_spill] sm:$0xff] }
 0x250   : > { %v5734_v62 = vmul.f32 0.5, %v7098_v55  ;;  %v5737_v35 = vmul.f32 0.5, %v5549_v18  ;;  %v5740_v0 = vmul.f32 0.5, %v7099_v30  ;;  %v5743_v15 = vmul.f32 0.5, %v7101_v58  ;;  %v7107_v54 = vld [vmem:[#allocation33_spill] sm:$0xff]  ;;  %v7109_v63 = vld [vmem:[#allocation27_spill] sm:$0xff] }
 0x251   : > { %v5746_v29 = vmul.f32 0.5, %v7103_v8  ;;  %v5749_v52 = vmul.f32 0.5, %v7105_v3  ;;  %v5752_v34 = vmul.f32 0.5, %v7107_v54  ;;  %v5755_v26 = vmul.f32 0.5, %v7109_v63  ;;  %v7111_v18 = vld [vmem:[#allocation5_spill] sm:$0xff]  ;;  %v7113_v30 = vld [vmem:[#allocation7_spill] sm:$0xff] }
 0x252   : > { %7100 = vst [vmem:[#allocation34_spill] sm:$0xff] %v5740_v0  ;;  %7102 = vst [vmem:[#allocation16_spill] sm:$0xff] %v5743_v15  ;;  %v5758_v55 = vmul.f32 0.5, %v7111_v18  ;;  %v5761_v0 = vmul.f32 0.5, %v7113_v30  ;;  %v7114_v58 = vld [vmem:[#allocation21_spill] sm:$0xff]  ;;  %v7115_v8 = vld [vmem:[#allocation10_spill] sm:$0xff] }
 0x253   : > { %7104 = vst [vmem:[#allocation12_spill] sm:$0xff] %v5746_v29  ;;  %7106 = vst [vmem:[#allocation18_spill] sm:$0xff] %v5749_v52  ;;  %v5764_v15 = vmul.f32 0.5, %v7114_v58  ;;  %v5767_v29 = vmul.f32 0.5, %v7115_v8  ;;  %v7116_v3 = vld [vmem:[#allocation14_spill] sm:$0xff]  ;;  %v7118_v63 = vld [vmem:[#allocation13_spill] sm:$0xff] }
 0x254   : > { %7108 = vst [vmem:[#allocation11_spill] sm:$0xff] %v5752_v34  ;;  %7110 = vst [vmem:[#allocation15_spill] sm:$0xff] %v5755_v26  ;;  %v5770_v52 = vmul.f32 0.5, %v7116_v3  ;;  %v7117_v54 = vld [vmem:[#allocation6_spill] sm:$0xff]  ;;  %v5776_v26 = vmul.f32 0.5, %v7118_v63  ;;  %v7119_v18 = vld [vmem:[#allocation113_spill] sm:$0xff] }
 0x255   : > { %7112 = vst [vmem:[#allocation42_spill] sm:$0xff] %v5758_v55  ;;  %v5773_v34 = vmul.f32 0.5, %v7117_v54  ;;  %v5779_v55 = vmul.f32 0.5, %v7119_v18  ;;  %v5782_v30 = vmul.f32 0.5, %v5609_v14  ;;  %v5785_v58 = vmul.f32 0.5, %v5611_v43 }
 0x256   : > { %v5788_v8 = vmul.f32 0.5, %v5613_v24  ;;  %v5791_v3 = vmul.f32 0.5, %v5615_v46  ;;  %v5794_v54 = vmul.f32 0.5, %v5617_v38  ;;  %v5797_v63 = vmul.f32 0.5, %v5619_v53  ;;  %v7125_v53 = vld [vmem:[#allocation62_spill] sm:$0xff] }
 0x257   : > { %7120 = vst [vmem:[#allocation36_spill] sm:$0xff] %v5785_v58  ;;  %v5800_v18 = vmul.f32 0.5, %v5627_v36  ;;  %v5803_v14 = vmul.f32 0.5, %v5629_v9  ;;  %v5805_v43 = vmul.f32 0.5, %v2925_v5  ;;  %v5807_v58 = vmul.f32 0.5, %v2932_v23  ;;  %v7126_v36 = vld [vmem:[#allocation63_spill] sm:$0xff] }
 0x258   : > { %7121 = vst [vmem:[#allocation57_spill] sm:$0xff] %v5791_v3  ;;  %7122 = vst [vmem:[#allocation61_spill] sm:$0xff] %v5797_v63  ;;  %v5809_v24 = vmul.f32 0.5, %v2939_v25  ;;  %v5811_v46 = vmul.f32 0.5, %v2946_v47  ;;  %v7124_v3 = vld [vmem:[#allocation17_spill] sm:$0xff]  ;;  %v5819_v63 = vadd.f32 %v5625_v20, %v7125_v53  ;;  %v5823_v9 = vadd.f32 %v5632_v49, %v7126_v36  ;;  %v7127_v5 = vld [vmem:[#allocation64_spill] sm:$0xff] }
 0x259   : > { %v5815_v38 = vadd.f32 %v5622_v56, %v7124_v3  ;;  %v5827_v23 = vadd.f32 %v5635_v41, %v7127_v5  ;;  %v7128_v25 = vld [vmem:[#allocation65_spill] sm:$0xff]  ;;  %v7130_v3 = vld [vmem:[#allocation67_spill] sm:$0xff]  ;;  %v7131_v53 = vld [vmem:[#allocation68_spill] sm:$0xff] }
 0x25a   : > { %7123 = vst [vmem:[#allocation8_spill] sm:$0xff] %v5811_v46  ;;  %v5831_v47 = vadd.f32 %v5638_v16, %v7128_v25  ;;  %v7129_v46 = vld [vmem:[#allocation66_spill] sm:$0xff]  ;;  %v5839_v20 = vadd.f32 %v5644_v1, %v7130_v3  ;;  %v5843_v49 = vadd.f32 %v5647_v37, %v7131_v53  ;;  %v7132_v36 = vld [vmem:[#allocation69_spill] sm:$0xff]  ;;  %v7134_v25 = vld [vmem:[#allocation71_spill] sm:$0xff] }
 0x25b   : > { %v5835_v56 = vadd.f32 %v5641_v50, %v7129_v46  ;;  %v5847_v41 = vadd.f32 %v5650_v33, %v7132_v36  ;;  %v7133_v5 = vld [vmem:[#allocation70_spill] sm:$0xff]  ;;  %v5855_v50 = vadd.f32 %v5656_v45, %v7134_v25  ;;  %v7135_v46 = vld [vmem:[#allocation72_spill] sm:$0xff]  ;;  %v7136_v3 = vld [vmem:[#allocation73_spill] sm:$0xff] }
 0x25c   : > { %v5851_v16 = vadd.f32 %v5653_v13, %v7133_v5  ;;  %v5859_v1 = vadd.f32 %v5659_v59, %v7135_v46  ;;  %v5863_v37 = vadd.f32 %v5662_v28, %v7136_v3  ;;  %v7137_v53 = vld [vmem:[#allocation74_spill] sm:$0xff]  ;;  %v7138_v36 = vld [vmem:[#allocation75_spill] sm:$0xff]  ;;  %v7139_v5 = vld [vmem:[#allocation76_spill] sm:$0xff] }
 0x25d   : > { %v5867_v33 = vadd.f32 %v5665_v61, %v7137_v53  ;;  %v5871_v13 = vadd.f32 %v5668_v4, %v7138_v36  ;;  %v5875_v45 = vadd.f32 %v5671_v40, %v7139_v5  ;;  %v7140_v25 = vld [vmem:[#allocation77_spill] sm:$0xff]  ;;  %v7141_v46 = vld [vmem:[#allocation78_spill] sm:$0xff]  ;;  %v7142_v3 = vld [vmem:[#allocation79_spill] sm:$0xff] }
 0x25e   : > { %v5879_v59 = vadd.f32 %v5674_v21, %v7140_v25  ;;  %v5883_v28 = vadd.f32 %v5677_v31, %v7141_v46  ;;  %v5887_v61 = vadd.f32 %v5680_v10, %v7142_v3  ;;  %v7143_v53 = vld [vmem:[#allocation80_spill] sm:$0xff]  ;;  %v7144_v36 = vld [vmem:[#allocation81_spill] sm:$0xff]  ;;  %v7145_v5 = vld [vmem:[#allocation82_spill] sm:$0xff] }
 0x25f   : > { %v5891_v4 = vadd.f32 %v5683_v19, %v7143_v53  ;;  %v5895_v40 = vadd.f32 %v5686_v44, %v7144_v36  ;;  %v5899_v21 = vadd.f32 %v5689_v2, %v7145_v5  ;;  %v7146_v25 = vld [vmem:[#allocation83_spill] sm:$0xff]  ;;  %v7147_v46 = vld [vmem:[#allocation84_spill] sm:$0xff]  ;;  %v7148_v3 = vld [vmem:[#allocation85_spill] sm:$0xff] }
 0x260   : > { %v5903_v31 = vadd.f32 %v5692_v51, %v7146_v25  ;;  %v5907_v10 = vadd.f32 %v5695_v32, %v7147_v46  ;;  %v5911_v19 = vadd.f32 %v5698_v39, %v7148_v3  ;;  %v7149_v53 = vld [vmem:[#allocation86_spill] sm:$0xff]  ;;  %v7150_v36 = vld [vmem:[#allocation87_spill] sm:$0xff]  ;;  %v7151_v5 = vld [vmem:[#allocation88_spill] sm:$0xff] }
 0x261   : > { %v5915_v44 = vadd.f32 %v5701_v27, %v7149_v53  ;;  %v5919_v2 = vadd.f32 %v5704_v42, %v7150_v36  ;;  %v5923_v51 = vadd.f32 %v5707_v17, %v7151_v5  ;;  %v7153_v25 = vld [vmem:[#allocation45_spill] sm:$0xff]  ;;  %v7154_v46 = vld [vmem:[#allocation24_spill] sm:$0xff]  ;;  %v7155_v3 = vld [vmem:[#allocation22_spill] sm:$0xff]  ;;  %v3079_v5 = vpop.permute.xlu1 %3078 }
 0x262   : > { %v5927_v32 = vadd.f32 %v5710_v48, %v7153_v25  ;;  %v5931_v39 = vadd.f32 %v5713_v11, %v7154_v46  ;;  %v5935_v27 = vadd.f32 %v5716_v22, %v7155_v3  ;;  %v7156_v53 = vld [vmem:[#allocation89_spill] sm:$0xff]  ;;  %v7157_v36 = vld [vmem:[#allocation90_spill] sm:$0xff]  ;;  %v7161_v25 = vld [vmem:[#allocation92_spill] sm:$0xff] }
 0x263   : > { %7152 = vst [vmem:[#allocation31_spill] sm:$0xff] %v5923_v51  ;;  %v5939_v42 = vadd.f32 %v5719_v6, %v7156_v53  ;;  %v5943_v17 = vadd.f32 %v5722_v60, %v7157_v36  ;;  %v7159_v51 = vld [vmem:[#allocation91_spill] sm:$0xff]  ;;  %v5951_v11 = vadd.f32 %v5728_v12, %v7161_v25  ;;  %v7163_v46 = vld [vmem:[#allocation93_spill] sm:$0xff]  ;;  %v7165_v3 = vld [vmem:[#allocation94_spill] sm:$0xff] }
 0x264   : > { %v5947_v48 = vadd.f32 %v5725_v57, %v7159_v51  ;;  %v5955_v22 = vadd.f32 %v5731_v7, %v7163_v46  ;;  %v5959_v6 = vadd.f32 %v5734_v62, %v7165_v3  ;;  %v7167_v53 = vld [vmem:[#allocation28_spill] sm:$0xff]  ;;  %v7169_v36 = vld [vmem:[#allocation3_spill] sm:$0xff]  ;;  %v7176_v46 = vld [vmem:[#allocation97_spill] sm:$0xff] }
 0x265   : > { %7158 = vst [vmem:[#allocation41_spill] sm:$0xff] %v5943_v17  ;;  %7162 = vst [vmem:[#allocation60_spill] sm:$0xff] %v5951_v11  ;;  %v5963_v60 = vadd.f32 %v5737_v35, %v7167_v53  ;;  %v7170_v17 = vld [vmem:[#allocation34_spill] sm:$0xff]  ;;  %v7172_v51 = vld [vmem:[#allocation95_spill] sm:$0xff] }
 0x266   : > { %7160 = vst [vmem:[#allocation35_spill] sm:$0xff] %v5947_v48  ;;  %7164 = vst [vmem:[#allocation25_spill] sm:$0xff] %v5955_v22  ;;  %v5967_v57 = vadd.f32 %v7170_v17, %v7169_v36  ;;  %v7173_v48 = vld [vmem:[#allocation16_spill] sm:$0xff]  ;;  %v7177_v22 = vld [vmem:[#allocation18_spill] sm:$0xff] }
 0x267   : > { %7166 = vst [vmem:[#allocation44_spill] sm:$0xff] %v5959_v6  ;;  %7168 = vst [vmem:[#allocation23_spill] sm:$0xff] %v5963_v60  ;;  %v5971_v12 = vadd.f32 %v7173_v48, %v7172_v51  ;;  %v7174_v25 = vld [vmem:[#allocation96_spill] sm:$0xff]  ;;  %v5979_v62 = vadd.f32 %v7177_v22, %v7176_v46  ;;  %v7178_v3 = vld [vmem:[#allocation98_spill] sm:$0xff] }
 0x268   : > { %7171 = vst [vmem:[#allocation32_spill] sm:$0xff] %v5967_v57  ;;  %v7175_v11 = vld [vmem:[#allocation12_spill] sm:$0xff]  ;;  %v7179_v6 = vld [vmem:[#allocation11_spill] sm:$0xff]  ;;  %v7182_v36 = vld [vmem:[#allocation46_spill] sm:$0xff] }
 0x269   : > { %v5975_v7 = vadd.f32 %v7175_v11, %v7174_v25  ;;  %v5983_v35 = vadd.f32 %v7179_v6, %v7178_v3  ;;  %v7180_v53 = vld [vmem:[#allocation99_spill] sm:$0xff]  ;;  %v7183_v57 = vld [vmem:[#allocation42_spill] sm:$0xff]  ;;  %v7184_v51 = vld [vmem:[#allocation100_spill] sm:$0xff] }
 0x26a   : > { %v7181_v60 = vld [vmem:[#allocation15_spill] sm:$0xff]  ;;  %v5991_v48 = vadd.f32 %v7183_v57, %v7182_v36  ;;  %v5995_v11 = vadd.f32 %v5761_v0, %v7184_v51  ;;  %v7185_v25 = vld [vmem:[#allocation101_spill] sm:$0xff]  ;;  %v7186_v46 = vld [vmem:[#allocation102_spill] sm:$0xff] }
 0x26b   : > { %v5987_v17 = vadd.f32 %v7181_v60, %v7180_v53  ;;  %v5999_v22 = vadd.f32 %v5764_v15, %v7185_v25  ;;  %v6003_v6 = vadd.f32 %v5767_v29, %v7186_v46  ;;  %v7188_v3 = vld [vmem:[#allocation103_spill] sm:$0xff]  ;;  %v7189_v53 = vld [vmem:[#allocation104_spill] sm:$0xff]  ;;  %v7191_v36 = vld [vmem:[#allocation105_spill] sm:$0xff] }
 0x26c   : > { %v6007_v60 = vadd.f32 %v5770_v52, %v7188_v3  ;;  %v6011_v57 = vadd.f32 %v5773_v34, %v7189_v53  ;;  %v6015_v0 = vadd.f32 %v5776_v26, %v7191_v36  ;;  %v7192_v51 = vld [vmem:[#allocation106_spill] sm:$0xff]  ;;  %v7193_v25 = vld [vmem:[#allocation107_spill] sm:$0xff]  ;;  %v7195_v46 = vld [vmem:[#allocation40_spill] sm:$0xff] }
 0x26d   : > { %7187 = vst [vmem:[#allocation20_spill] sm:$0xff] %v6003_v6  ;;  %v6019_v15 = vadd.f32 %v5779_v55, %v7192_v51  ;;  %v6023_v29 = vadd.f32 %v5782_v30, %v7193_v25  ;;  %v7196_v6 = vld [vmem:[#allocation36_spill] sm:$0xff]  ;;  %v7198_v3 = vld [vmem:[#allocation59_spill] sm:$0xff]  ;;  %v7203_v36 = vld [vmem:[#allocation109_spill] sm:$0xff]  ;;  %v6041_v51 = vpop.permute.xlu1 %3082 }
 0x26e   : > { %7190 = vst [vmem:[#allocation26_spill] sm:$0xff] %v6011_v57  ;;  %v6027_v52 = vadd.f32 %v7196_v6, %v7195_v46  ;;  %v6031_v34 = vadd.f32 %v5788_v8, %v7198_v3  ;;  %v7200_v53 = vld [vmem:[#allocation108_spill] sm:$0xff]  ;;  %v7201_v57 = vld [vmem:[#allocation57_spill] sm:$0xff]  ;;  %v6039_v55 = vadd.f32 %v5794_v54, %v7203_v36  ;;  %7205 = vst [vmem:[#allocation10_spill] sm:$0xff] %v6041_v51 }
 0x26f   : > { %7194 = vst [vmem:[#allocation33_spill] sm:$0xff] %v6023_v29  ;;  %v6035_v26 = vadd.f32 %v7201_v57, %v7200_v53  ;;  %v7206_v30 = vld [vmem:[#allocation110_spill] sm:$0xff]  ;;  %v7207_v25 = vld [vmem:[#allocation61_spill] sm:$0xff]  ;;  %v7209_v6 = vld [vmem:[#allocation111_spill] sm:$0xff] }
 0x270   : > { %7197 = vst [vmem:[#allocation27_spill] sm:$0xff] %v6027_v52  ;;  %7199 = vst [vmem:[#allocation5_spill] sm:$0xff] %v6031_v34  ;;  %v6045_v29 = vadd.f32 %v7207_v25, %v7206_v30  ;;  %v6049_v46 = vadd.f32 %v5800_v18, %v7209_v6  ;;  %v7211_v8 = vld [vmem:[#allocation112_spill] sm:$0xff]  ;;  %v7213_v57 = vld [vmem:[#allocation58_spill] sm:$0xff]  ;;  %v6093_v34 = vmul.f32 %v3079_v5, %v5831_v47 }
 0x271   : > { %7202 = vst [vmem:[#allocation7_spill] sm:$0xff] %v6035_v26  ;;  %7204 = vst [vmem:[#allocation21_spill] sm:$0xff] %v6039_v55  ;;  %v6053_v3 = vadd.f32 %v5803_v14, %v7211_v8  ;;  %v6057_v53 = vadd.f32 %v5805_v43, %v7213_v57  ;;  %v7215_v54 = vld [vmem:[#allocation9_spill] sm:$0xff]  ;;  %v7217_v55 = vld [vmem:[#allocation56_spill] sm:$0xff]  ;;  %v3085_v14 = vrot.slane %v3079_v5, 1  ;;  %v3086_v8 = vrot.slane %v3079_v5, 2 }
 0x272   : > { %7208 = vst [vmem:[#allocation14_spill] sm:$0xff] %v6045_v29  ;;  %7210 = vst [vmem:[#allocation6_spill] sm:$0xff] %v6049_v46  ;;  %v6061_v36 = vadd.f32 %v5807_v58, %v7215_v54  ;;  %v6065_v30 = vadd.f32 %v5809_v24, %v7217_v55  ;;  %v7219_v25 = vld [vmem:[#allocation4_spill] sm:$0xff]  ;;  %v7222_v6 = vld [vmem:[#allocation43_spill] sm:$0xff]  ;;  %v3088_v26 = vrot.slane %v3079_v5, 4  ;;  %v3089_v43 = vrot.slane %v3079_v5, 5 }
 0x273   : > { %7212 = vst [vmem:[#allocation13_spill] sm:$0xff] %v6053_v3  ;;  %7214 = vst [vmem:[#allocation113_spill] sm:$0xff] %v6057_v53  ;;  %v7220_v29 = vld [vmem:[#allocation8_spill] sm:$0xff]  ;;  %v3084_v46 = vrot.slane %v7222_v6, 7  ;;  %v3087_v3 = vrot.slane %v3079_v5, 3  ;;  %v3090_v57 = vrot.slane %v3079_v5, 6  ;;  %v6096_v52 = vmul.f32 %v3079_v5, %v5835_v56 }
 0x274   : > { %7216 = vst [vmem:[#allocation17_spill] sm:$0xff] %v6061_v36  ;;  %7218 = vst [vmem:[#allocation62_spill] sm:$0xff] %v6065_v30  ;;  %v6069_v18 = vadd.f32 %v7220_v29, %v7219_v25  ;;  %v3091_v53 = vrot.slane %v3079_v5, 7  ;;  %v3092_v58 = vrot.slane %v6041_v51, 1  ;;  %v3093_v54 = vrot.slane %v6041_v51, 2 }
 0x275   : > { %v3094_v24 = vrot.slane %v6041_v51, 3  ;;  %v3095_v55 = vrot.slane %v6041_v51, 4  ;;  %v3096_v29 = vrot.slane %v6041_v51, 5  ;;  %v6078_v25 = vrot.slane %v6041_v51, 6 }
 0x276   : > { %7221 = vst [vmem:[#allocation63_spill] sm:$0xff] %v6069_v18  ;;  %v6081_v6 = vmul.f32 %v3084_v46, %v5815_v38  ;;  %v6084_v18 = vmul.f32 %v3084_v46, %v5819_v63  ;;  %v6087_v30 = vmul.f32 %v3084_v46, %v5823_v9  ;;  %v6090_v36 = vmul.f32 %v3084_v46, %v5827_v23 }
 0x277   : > { %7223 = vst [vmem:[#allocation64_spill] sm:$0xff] %v6078_v25  ;;  %v6099_v25 = vmul.f32 %v3079_v5, %v5839_v20  ;;  %v6102_v38 = vmul.f32 %v3079_v5, %v5843_v49  ;;  %v6105_v63 = vmul.f32 %v3085_v14, %v5847_v41  ;;  %v6108_v9 = vmul.f32 %v3085_v14, %v5851_v16 }
 0x278   : > { %v6111_v23 = vmul.f32 %v3085_v14, %v5855_v50  ;;  %v6114_v47 = vmul.f32 %v3085_v14, %v5859_v1  ;;  %v6117_v56 = vmul.f32 %v3086_v8, %v5863_v37  ;;  %v6120_v20 = vmul.f32 %v3086_v8, %v5867_v33 }
 0x279   : > { %v6123_v49 = vmul.f32 %v3086_v8, %v5871_v13  ;;  %v6126_v41 = vmul.f32 %v3086_v8, %v5875_v45  ;;  %v6129_v16 = vmul.f32 %v3087_v3, %v5879_v59  ;;  %v6132_v50 = vmul.f32 %v3087_v3, %v5883_v28 }
 0x27a   : > { %v6135_v1 = vmul.f32 %v3087_v3, %v5887_v61  ;;  %v6138_v37 = vmul.f32 %v3087_v3, %v5891_v4  ;;  %v6141_v33 = vmul.f32 %v3088_v26, %v5895_v40  ;;  %v6144_v13 = vmul.f32 %v3088_v26, %v5899_v21  ;;  %v7224_v40 = vld [vmem:[#allocation31_spill] sm:$0xff]  ;;  %v7228_v3 = vld [vmem:[#allocation60_spill] sm:$0xff] }
 0x27b   : > { %v6147_v45 = vmul.f32 %v3088_v26, %v5903_v31  ;;  %v6150_v59 = vmul.f32 %v3088_v26, %v5907_v10  ;;  %v6153_v28 = vmul.f32 %v3089_v43, %v5911_v19  ;;  %v6156_v61 = vmul.f32 %v3089_v43, %v5915_v44  ;;  %v7226_v44 = vld [vmem:[#allocation41_spill] sm:$0xff] }
 0x27c   : > { %v6159_v4 = vmul.f32 %v3089_v43, %v5919_v2  ;;  %v6162_v5 = vmul.f32 %v3089_v43, %v7224_v40  ;;  %v6165_v21 = vmul.f32 %v3090_v57, %v5927_v32  ;;  %v6168_v31 = vmul.f32 %v3090_v57, %v5931_v39  ;;  %v7227_v2 = vld [vmem:[#allocation35_spill] sm:$0xff]  ;;  %v7229_v32 = vld [vmem:[#allocation25_spill] sm:$0xff]  ;;  %v7231_v39 = vld [vmem:[#allocation44_spill] sm:$0xff] }
 0x27d   : > { %v6171_v10 = vmul.f32 %v3090_v57, %v5935_v27  ;;  %v6174_v19 = vmul.f32 %v3090_v57, %v5939_v42  ;;  %v6177_v26 = vmul.f32 %v3091_v53, %v7226_v44  ;;  %v6180_v46 = vmul.f32 %v3091_v53, %v7227_v2  ;;  %v7232_v27 = vld [vmem:[#allocation23_spill] sm:$0xff]  ;;  %v7233_v57 = vld [vmem:[#allocation32_spill] sm:$0xff] }
 0x27e   : > { %v6183_v14 = vmul.f32 %v3091_v53, %v7228_v3  ;;  %v6186_v8 = vmul.f32 %v3091_v53, %v7229_v32  ;;  %v6190_v43 = vmul.f32 %v6041_v51, %v7231_v39  ;;  %v6194_v42 = vmul.f32 %v6041_v51, %v7232_v27 }
 0x27f   : > { %7225 = vst [vmem:[#allocation65_spill] sm:$0xff] %v6174_v19  ;;  %v6198_v40 = vmul.f32 %v6041_v51, %v7233_v57  ;;  %v6202_v44 = vmul.f32 %v6041_v51, %v5971_v12  ;;  %v6205_v2 = vmul.f32 %v3092_v58, %v5975_v7  ;;  %v6208_v53 = vmul.f32 %v3092_v58, %v5979_v62  ;;  %v7236_v7 = vld [vmem:[#allocation20_spill] sm:$0xff] }
 0x280   : > { %7230 = vst [vmem:[#allocation66_spill] sm:$0xff] %v6186_v8  ;;  %v6211_v3 = vmul.f32 %v3092_v58, %v5983_v35  ;;  %v6214_v32 = vmul.f32 %v3092_v58, %v5987_v17  ;;  %v6217_v39 = vmul.f32 %v3093_v54, %v5991_v48  ;;  %v6220_v27 = vmul.f32 %v3093_v54, %v5995_v11  ;;  %v7238_v35 = vld [vmem:[#allocation26_spill] sm:$0xff]  ;;  %v7241_v11 = vld [vmem:[#allocation33_spill] sm:$0xff] }
 0x281   : > { %7234 = vst [vmem:[#allocation67_spill] sm:$0xff] %v6202_v44  ;;  %v6223_v12 = vmul.f32 %v3093_v54, %v5999_v22  ;;  %v6226_v57 = vmul.f32 %v3093_v54, %v7236_v7  ;;  %v6229_v62 = vmul.f32 %v3094_v24, %v6007_v60  ;;  %v6232_v51 = vmul.f32 %v3094_v24, %v7238_v35  ;;  %v7242_v22 = vld [vmem:[#allocation27_spill] sm:$0xff]  ;;  %v7243_v54 = vld [vmem:[#allocation5_spill] sm:$0xff]  ;;  %v7252_v44 = vld [vmem:[#allocation64_spill] sm:$0xff] }
 0x282   : > { %7235 = vst [vmem:[#allocation68_spill] sm:$0xff] %v6214_v32  ;;  %v6235_v17 = vmul.f32 %v3094_v24, %v6015_v0  ;;  %v6238_v48 = vmul.f32 %v3094_v24, %v6019_v15  ;;  %v6241_v58 = vmul.f32 %v3095_v55, %v7241_v11  ;;  %v6244_v19 = vmul.f32 %v3095_v55, %v7242_v22  ;;  %v7244_v60 = vld [vmem:[#allocation7_spill] sm:$0xff]  ;;  %v7246_v35 = vld [vmem:[#allocation21_spill] sm:$0xff]  ;;  %v7247_v0 = vld [vmem:[#allocation14_spill] sm:$0xff] }
 0x283   : > { %7237 = vst [vmem:[#allocation69_spill] sm:$0xff] %v6226_v57  ;;  %v6247_v7 = vmul.f32 %v3095_v55, %v7243_v54  ;;  %v6250_v8 = vmul.f32 %v3095_v55, %v7244_v60  ;;  %v6253_v57 = vmul.f32 %v3096_v29, %v7246_v35  ;;  %v6256_v32 = vmul.f32 %v3096_v29, %v7247_v0  ;;  %v7248_v15 = vld [vmem:[#allocation6_spill] sm:$0xff]  ;;  %v7249_v11 = vld [vmem:[#allocation13_spill] sm:$0xff] }
 0x284   : > { %7239 = vst [vmem:[#allocation70_spill] sm:$0xff] %v6235_v17  ;;  %7240 = vst [vmem:[#allocation71_spill] sm:$0xff] %v6238_v48  ;;  %v6259_v24 = vmul.f32 %v3096_v29, %v7248_v15  ;;  %v6262_v48 = vmul.f32 %v3096_v29, %v7249_v11  ;;  %v7251_v22 = vld [vmem:[#allocation113_spill] sm:$0xff]  ;;  %v3242_v60 = vrot.slane %v6093_v34, 7  ;;  %v3244_v35 = vrot.slane %v6105_v63, 6 }
 0x285   : > { %7245 = vst [vmem:[#allocation72_spill] sm:$0xff] %v6250_v8  ;;  %v6266_v17 = vmul.f32 %v7252_v44, %v7251_v22  ;;  %v7253_v54 = vld [vmem:[#allocation17_spill] sm:$0xff]  ;;  %v3246_v0 = vrot.slane %v6117_v56, 5  ;;  %v3248_v15 = vrot.slane %v6129_v16, 4  ;;  %v3256_v8 = vrot.slane %v6096_v52, 7 }
 0x286   : > { %7250 = vst [vmem:[#allocation73_spill] sm:$0xff] %v6262_v48  ;;  %v6270_v55 = vmul.f32 %v7252_v44, %v7253_v54  ;;  %v3243_v29 = vsel %vm446_vm1, %v3242_v60, %v6081_v6  ;;  %v3250_v11 = vrot.slane %v6141_v33, 3  ;;  %v3252_v22 = vrot.slane %v6153_v28, 2 }
 0x287   : > { %v3258_v54 = vrot.slane %v6108_v9, 6  ;;  %v3245_v48 = vsel %vm759_vm3, %v3244_v35, %v3243_v29  ;;  %v3257_v34 = vsel %vm446_vm1, %v3256_v8, %v6084_v18  ;;  %v3260_v63 = vrot.slane %v6120_v20, 5 }
 0x288   : > { %v3262_v56 = vrot.slane %v6132_v50, 4  ;;  %v3247_v52 = vsel %vm762_vm4, %v3246_v0, %v3245_v48  ;;  %v3264_v6 = vrot.slane %v6144_v13, 3  ;;  %v3270_v33 = vrot.slane %v6099_v25, 7  ;;  %v7254_v13 = vld [vmem:[#allocation62_spill] sm:$0xff] }
 0x289   : > { %v3259_v16 = vsel %vm759_vm3, %v3258_v54, %v3257_v34  ;;  %v3249_v28 = vsel %vm1502_vm5, %v3248_v15, %v3247_v52  ;;  %v3266_v60 = vrot.slane %v6156_v61, 2  ;;  %v3272_v18 = vrot.slane %v6111_v23, 6 }
 0x28a   : > { %v3261_v9 = vsel %vm762_vm4, %v3260_v63, %v3259_v16  ;;  %v3251_v20 = vsel %vm1505_vm6, %v3250_v11, %v3249_v28  ;;  %v3271_v8 = vsel %vm446_vm1, %v3270_v33, %v6087_v30  ;;  %v3274_v48 = vrot.slane %v6123_v49, 5  ;;  %v7255_v63 = vld [vmem:[#allocation63_spill] sm:$0xff] }
 0x28b   : > { %v3263_v50 = vsel %vm1502_vm5, %v3262_v56, %v3261_v9  ;;  %v6302_v25 = vmul.f32 %v7252_v44, %v7254_v13  ;;  %v3273_v0 = vsel %vm759_vm3, %v3272_v18, %v3271_v8  ;;  %v3276_v61 = vrot.slane %v6135_v1, 4 }
 0x28c   : > { %v3265_v35 = vsel %vm1505_vm6, %v3264_v6, %v3263_v50  ;;  %v3253_v23 = vsel %vm1508_vm7, %v3252_v22, %v3251_v20  ;;  %v3275_v29 = vsel %vm762_vm4, %v3274_v48, %v3273_v0  ;;  %v3278_v30 = vrot.slane %v6147_v45, 3 }
 0x28d   : > { %v3267_v15 = vsel %vm1508_vm7, %v3266_v60, %v3265_v35  ;;  %v3254_v49 = vrot.slane %v6165_v21, 1  ;;  %v3268_v11 = vrot.slane %v6168_v31, 1  ;;  %v3277_v54 = vsel %vm1502_vm5, %v3276_v61, %v3275_v29 }
 0x28e   : > { %v3284_v34 = vrot.slane %v6102_v38, 7  ;;  %v6317_v56 = vmul.f32 %v7252_v44, %v7255_v63  ;;  %v3279_v1 = vsel %vm1505_vm6, %v3278_v30, %v3277_v54  ;;  %v3280_v22 = vrot.slane %v6159_v4, 2  ;;  %v7256_v30 = vld [vmem:[#allocation70_spill] sm:$0xff] }
 0x28f   : > { %v3286_v52 = vrot.slane %v6114_v47, 6  ;;  %v6323_v45 = vsel %vm1511_vm8, %v3254_v49, %v3253_v23  ;;  %v3269_v21 = vsel %vm1511_vm8, %v3268_v11, %v3267_v15  ;;  %v3288_v38 = vrot.slane %v6126_v41, 5  ;;  %v7257_v11 = vld [vmem:[#allocation67_spill] sm:$0xff] }
 0x290   : > { %v3285_v31 = vsel %vm446_vm1, %v3284_v34, %v6090_v36  ;;  %v3281_v16 = vsel %vm1508_vm7, %v3280_v22, %v3279_v1  ;;  %v3290_v6 = vrot.slane %v6138_v37, 4  ;;  %v3298_v4 = vrot.slane %v6190_v43, 7  ;;  %v7258_v34 = vld [vmem:[#allocation68_spill] sm:$0xff]  ;;  %v7259_v22 = vld [vmem:[#allocation69_spill] sm:$0xff] }
 0x291   : > { %v3287_v44 = vsel %vm759_vm3, %v3286_v52, %v3285_v31  ;;  %v3282_v47 = vrot.slane %v6171_v10, 1  ;;  %v3300_v28 = vrot.slane %v6205_v2, 6  ;;  %v3302_v9 = vrot.slane %v6217_v39, 5 }
 0x292   : > { %v3289_v33 = vsel %vm762_vm4, %v3288_v38, %v3287_v44  ;;  %v3292_v41 = vrot.slane %v6150_v59, 3  ;;  %v3294_v60 = vrot.slane %v6162_v5, 2  ;;  %v3299_v18 = vsel %vm446_vm1, %v3298_v4, %v6177_v26  ;;  %v7260_v38 = vld [vmem:[#allocation66_spill] sm:$0xff]  ;;  %v7261_v44 = vld [vmem:[#allocation71_spill] sm:$0xff] }
 0x293   : > { %v3291_v36 = vsel %vm1502_vm5, %v3290_v6, %v3289_v33  ;;  %v3283_v37 = vsel %vm1511_vm8, %v3282_v47, %v3281_v16  ;;  %v3301_v43 = vsel %vm759_vm3, %v3300_v28, %v3299_v18  ;;  %v3304_v10 = vrot.slane %v6229_v62, 4  ;;  %v7264_v18 = vld [vmem:[#allocation38_spill] sm:$0xff] }
 0x294   : > { %v3312_v20 = vrot.slane %v6194_v42, 7  ;;  %v3303_v2 = vsel %vm762_vm4, %v3302_v9, %v3301_v43  ;;  %v3306_v39 = vrot.slane %v6241_v58, 3  ;;  %v3314_v50 = vrot.slane %v6208_v53, 6  ;;  %v7262_v9 = vld [vmem:[#allocation65_spill] sm:$0xff] }
 0x295   : > { %v3316_v59 = vrot.slane %v6220_v27, 5  ;;  %v3293_v5 = vsel %vm1505_vm6, %v3292_v41, %v3291_v36  ;;  %v3305_v26 = vsel %vm1502_vm5, %v3304_v10, %v3303_v2  ;;  %v3308_v8 = vrot.slane %v6253_v57, 2 }
 0x296   : > { %v3313_v48 = vsel %vm446_vm1, %v3312_v20, %v6180_v46  ;;  %v3307_v62 = vsel %vm1505_vm6, %v3306_v39, %v3305_v26  ;;  %v3310_v42 = vrot.slane %v6266_v17, 1  ;;  %v3318_v58 = vrot.slane %v6232_v51, 4  ;;  %v7265_v20 = vld [vmem:[#allocation73_spill] sm:$0xff]  ;;  %v7267_v26 = vld [vmem:[#allocation52_spill] sm:$0xff] }
 0x297   : > { %v3315_v13 = vsel %vm759_vm3, %v3314_v50, %v3313_v48  ;;  %v3309_v53 = vsel %vm1508_vm7, %v3308_v8, %v3307_v62  ;;  %v3320_v35 = vrot.slane %v6244_v19, 3  ;;  %v3326_v0 = vrot.slane %v6198_v40, 7  ;;  %v7266_v50 = vld [vmem:[#allocation55_spill] sm:$0xff] }
 0x298   : > { %v3317_v27 = vsel %vm762_vm4, %v3316_v59, %v3315_v13  ;;  %v3322_v46 = vrot.slane %v6256_v32, 2  ;;  %v3328_v61 = vrot.slane %v6211_v3, 6  ;;  %v3330_v17 = vrot.slane %v6223_v12, 5 }
 0x299   : > { %v3319_v57 = vsel %vm1502_vm5, %v3318_v58, %v3317_v27  ;;  %v3311_v23 = vsel %vm1511_vm8, %v3310_v42, %v3309_v53  ;;  %v3324_v15 = vrot.slane %v6270_v55, 1  ;;  %v3327_v29 = vsel %vm446_vm1, %v3326_v0, %v6183_v14  ;;  %v7269_v58 = vld [vmem:[#allocation47_spill] sm:$0xff]  ;;  %v7271_v0 = vld [vmem:[#allocation48_spill] sm:$0xff] }
 0x29a   : > { %v3321_v51 = vsel %vm1505_vm6, %v3320_v35, %v3319_v57  ;;  %v3329_v40 = vsel %vm759_vm3, %v3328_v61, %v3327_v29  ;;  %v3332_v49 = vrot.slane %v7256_v30, 4  ;;  %v3334_v32 = vrot.slane %v6247_v7, 3  ;;  %v7270_v53 = vld [vmem:[#allocation51_spill] sm:$0xff]  ;;  %v3433_v35 = vpop.permute.xlu1 %3432  ;;  %v7274_v61 = vld [vmem:[#allocation53_spill] sm:$0xff]  ;;  %v7276_v29 = vld [vmem:[#allocation54_spill] sm:$0xff] }
 0x29b   : > { %v3323_v19 = vsel %vm1508_vm7, %v3322_v46, %v3321_v51  ;;  %v3331_v12 = vsel %vm762_vm4, %v3330_v17, %v3329_v40  ;;  %v3340_v54 = vrot.slane %v7257_v11, 7  ;;  %v3342_v63 = vrot.slane %v7258_v34, 6  ;;  %v7273_v46 = vld [vmem:[#allocation49_spill] sm:$0xff]  ;;  %v3687_v34 = vld [vmem:[%s3766_s28] sm:$0xff] }
 0x29c   : > { %v3325_v3 = vsel %vm1511_vm8, %v3324_v15, %v3323_v19  ;;  %v3295_v55 = vsel %vm1508_vm7, %v3294_v60, %v3293_v5  ;;  %v3333_v14 = vsel %vm1502_vm5, %v3332_v49, %v3331_v12  ;;  %v3336_v1 = vrot.slane %v6259_v24, 2  ;;  %v7263_v60 = vld [vmem:[#allocation72_spill] sm:$0xff]  ;;  %v7275_v15 = vld [vmem:[#allocation50_spill] sm:$0xff]  ;;  %v7277_v49 = vld [vmem:[#allocation39_spill] sm:$0xff] }
 0x29d   : > { %v3344_v52 = vrot.slane %v7259_v22, 5  ;;  %v3335_v31 = vsel %vm1505_vm6, %v3334_v32, %v3333_v14  ;;  %v3338_v7 = vrot.slane %v6302_v25, 1  ;;  %v3341_v16 = vsel %vm446_vm1, %v3340_v54, %v7260_v38 }
 0x29e   : > { %v3346_v6 = vrot.slane %v7261_v44, 4  ;;  %v3337_v4 = vsel %vm1508_vm7, %v3336_v1, %v3335_v31  ;;  %v3343_v47 = vsel %vm759_vm3, %v3342_v63, %v3341_v16  ;;  %v3362_v33 = vadd.f32 %v3311_v23, %v6323_v45  ;;  %v3689_v1 = vld [vmem:[%s3766_s28 + $0x10] sm:$0xff]  ;;  %v3691_v16 = vld [vmem:[%s3766_s28 + $0x20] sm:$0xff] }
 0x29f   : > { %v3369_v28 = vadd.f32 %v3325_v3, %v3269_v21  ;;  %v3296_v24 = vrot.slane %v7262_v9, 1  ;;  %v3339_v36 = vsel %vm1511_vm8, %v3338_v7, %v3337_v4  ;;  %v3345_v41 = vsel %vm762_vm4, %v3344_v52, %v3343_v47  ;;  %v3690_v52 = vld [vmem:[%s3766_s28 + $0x18] sm:$0xff] }
 0x2a0   : > { %v3348_v25 = vrot.slane %v7263_v60, 3  ;;  %v1563_v43 = vrot.slane %v7264_v18, 1  ;;  %v3347_v10 = vsel %vm1502_vm5, %v3346_v6, %v3345_v41  ;;  %v3350_v2 = vrot.slane %v7265_v20, 2  ;;  %v3692_v6 = vld [vmem:[%s3766_s28 + $0x28] sm:$0xff]  ;;  %v7278_v47 = vld [vmem:[#allocation10_spill] sm:$0xff] }
 0x2a1   : > { %v3376_v39 = vadd.f32 %v3339_v36, %v3283_v37  ;;  %v1569_v59 = vrot.slane %v7266_v50, 1  ;;  %v3297_v45 = vsel %vm1511_vm8, %v3296_v24, %v3295_v55  ;;  %v3352_v5 = vrot.slane %v6317_v56, 1  ;;  %v7272_v56 = vld [vmem:[#allocation37_spill] sm:$0xff]  ;;  %v3688_v55 = vld [vmem:[%s3766_s28 + $0x8] sm:$0xff]  ;;  %v3441_v36 = vpop.permute.xlu1 %3440  ;;  %v3695_v20 = vld [vmem:[%s3766_s28 + $0x40] sm:$0xff] }
 0x2a2   : > { %v3349_v21 = vsel %vm1505_vm6, %v3348_v25, %v3347_v10  ;;  %v7268_v8 = vrot.slane %v7267_v26, 2  ;;  %v3363_v42 = vrot.slane %v3362_v33, 4  ;;  %v3370_v13 = vrot.slane %v3369_v28, 4  ;;  %v3693_v25 = vld [vmem:[%s3766_s28 + $0x30] sm:$0xff] }
 0x2a3   : > { %v3351_v62 = vsel %vm1508_vm7, %v3350_v2, %v3349_v21  ;;  %v6411_v37 = vadd.f32 %v7270_v53, %v7269_v58  ;;  %v6416_v57 = vadd.f32 %v7272_v56, %v7271_v0  ;;  %v6420_v17 = vadd.f32 %v7274_v61, %v7273_v46  ;;  %v3699_v53 = vld [vmem:[%s3766_s28 + $0x60] sm:$0xff] }
 0x2a4   : > { %v6406_v48 = vadd.f32 %v7268_v8, %v7267_v26  ;;  %v3353_v27 = vsel %vm1511_vm8, %v3352_v5, %v3351_v62  ;;  %v3377_v23 = vrot.slane %v3376_v39, 4  ;;  %v6424_v19 = vadd.f32 %v7276_v29, %v7275_v15  ;;  %v3697_v26 = vld [vmem:[%s3766_s28 + $0x50] sm:$0xff]  ;;  %v3698_v62 = vld [vmem:[%s3766_s28 + $0x58] sm:$0xff] }
 0x2a5   : > { %v3383_v51 = vadd.f32 %v3353_v27, %v3297_v45  ;;  %v6427_v40 = vadd.f32 %v1563_v43, %v7264_v18  ;;  %v6430_v30 = vadd.f32 %v1569_v59, %v7266_v50  ;;  %v1575_v32 = vrot.slane %v7277_v49, 1  ;;  %v3694_v43 = vld [vmem:[%s3766_s28 + $0x38] sm:$0xff] }
 0x2a6   : > { %v1581_v3 = vrot.slane %v6406_v48, 1  ;;  %v6434_v12 = vadd.f32 %v3363_v42, %v3362_v33  ;;  %v6436_v11 = vadd.f32 %v3370_v13, %v3369_v28  ;;  %v3410_v63 = vadd.f32 %v3687_v34, %v3687_v34  ;;  %v7279_v28 = vld [vmem:[#allocation29_spill] sm:$0xff]  ;;  %v7280_v45 = vld [vmem:[#allocation30_spill] sm:$0xff]  ;;  %v3700_v34 = vld [vmem:[%s3766_s28 + $0x68] sm:$0xff] }
 0x2a7   : > { %v3384_v54 = vrot.slane %v3383_v51, 4  ;;  %v3411_v14 = vadd.f32 %v3688_v55, %v3688_v55  ;;  %v3412_v22 = vadd.f32 %v3689_v1, %v3689_v1  ;;  %v3413_v31 = vadd.f32 %v3690_v52, %v3690_v52  ;;  %v3701_v1 = vld [vmem:[%s3766_s28 + $0x70] sm:$0xff] }
 0x2a8   : > { %v3378_v7 = vadd.f32 %v3377_v23, %v3376_v39  ;;  %v3414_v44 = vadd.f32 %v3691_v16, %v3691_v16  ;;  %v3415_v4 = vadd.f32 %v3692_v6, %v3692_v6  ;;  %v3443_v33 = vrot.slane %v7278_v47, 7  ;;  %v3696_v39 = vld [vmem:[%s3766_s28 + $0x48] sm:$0xff]  ;;  %v3702_v47 = vld [vmem:[%s3766_s28 + $0x78] sm:$0xff] }
 0x2a9   : > { %v3385_v38 = vadd.f32 %v3384_v54, %v3383_v51  ;;  %v3444_v9 = vrot.slane %v7279_v28, 7  ;;  %v3446_v24 = vrot.slane %v3433_v35, 7  ;;  %v3365_v41 = vrot.slane %v6434_v12, 2 }
 0x2aa   : > { %v3372_v60 = vrot.slane %v6436_v11, 2  ;;  %v3416_v18 = vadd.f32 %v3693_v25, %v3693_v25  ;;  %v3417_v10 = vadd.f32 %v3694_v43, %v3694_v43  ;;  %v3418_v2 = vadd.f32 %v3695_v20, %v3695_v20 }
 0x2ab   : > { %v3419_v50 = vadd.f32 %v3696_v39, %v3696_v39  ;;  %v3445_v59 = vsel %vm3442_vm9, %v3443_v33, %v3444_v9  ;;  %v3448_v21 = vrot.slane %v7280_v45, 7  ;;  %v3379_v5 = vrot.slane %v3378_v7, 2 }
 0x2ac   : > { %v3420_v8 = vadd.f32 %v3697_v26, %v3697_v26  ;;  %v3421_v42 = vadd.f32 %v3698_v62, %v3698_v62  ;;  %v3447_v13 = vsel %vm3442_vm9, %v3444_v9, %v3446_v24  ;;  %v3386_v58 = vrot.slane %v3385_v38, 2 }
 0x2ad   : > { %v3422_v27 = vadd.f32 %v3699_v53, %v3699_v53  ;;  %v3449_v35 = vsel %vm3442_vm9, %v3446_v24, %v3448_v21  ;;  %v3450_v0 = vrot.slane %v3441_v36, 7  ;;  %v3456_v56 = vmul.f32 %v3445_v59, %v3410_v63 }
 0x2ae   : > { %v3457_v46 = vmul.f32 %v3445_v59, %v3411_v14  ;;  %v3458_v61 = vmul.f32 %v3445_v59, %v3412_v22  ;;  %v3459_v23 = vmul.f32 %v3445_v59, %v3413_v31  ;;  %v3460_v51 = vmul.f32 %v3447_v13, %v3414_v44 }
 0x2af   : > { %v3461_v15 = vmul.f32 %v3447_v13, %v3415_v4  ;;  %v3462_v29 = vmul.f32 %v3447_v13, %v3416_v18  ;;  %v3463_v54 = vmul.f32 %v3447_v13, %v3417_v10  ;;  %v3423_v55 = vadd.f32 %v3700_v34, %v3700_v34 }
 0x2b0   : > { %v3424_v52 = vadd.f32 %v3701_v1, %v3701_v1  ;;  %v3464_v16 = vmul.f32 %v3449_v35, %v3418_v2  ;;  %v3465_v6 = vmul.f32 %v3449_v35, %v3419_v50  ;;  %v3425_v33 = vadd.f32 %v3702_v47, %v3702_v47 }
 0x2b1   : > { %v3451_v28 = vsel %vm3442_vm9, %v3448_v21, %v3450_v0  ;;  %v3466_v9 = vmul.f32 %v3449_v35, %v3420_v8  ;;  %v3467_v24 = vmul.f32 %v3449_v35, %v3421_v42  ;;  %v3366_v63 = vadd.f32 %v3365_v41, %v6434_v12 }
 0x2b2   : > { %v3373_v14 = vadd.f32 %v3372_v60, %v6436_v11  ;;  %v3472_v22 = vadd.f32 %v3460_v51, %v3456_v56  ;;  %v3481_v31 = vadd.f32 %v3461_v15, %v3457_v46  ;;  %v3380_v44 = vadd.f32 %v3379_v5, %v3378_v7 }
 0x2b3   : > { %v3387_v4 = vadd.f32 %v3386_v58, %v3385_v38  ;;  %v3490_v36 = vadd.f32 %v3462_v29, %v3458_v61  ;;  %v3499_v25 = vadd.f32 %v3463_v54, %v3459_v23  ;;  %v3468_v18 = vmul.f32 %v3451_v28, %v3422_v27 }
 0x2b4   : > { %v3469_v43 = vmul.f32 %v3451_v28, %v3423_v55  ;;  %v3473_v10 = vadd.f32 %v3472_v22, %v3464_v16  ;;  %v3482_v20 = vadd.f32 %v3481_v31, %v3465_v6  ;;  %v3470_v2 = vmul.f32 %v3451_v28, %v3424_v52  ;;  %v7281_v31 = vld [vmem:[#allocation19_spill] sm:$0xff] }
 0x2b5   : > { %v3471_v39 = vmul.f32 %v3451_v28, %v3425_v33  ;;  %v3491_v50 = vadd.f32 %v3490_v36, %v3466_v9  ;;  %v3500_v59 = vadd.f32 %v3499_v25, %v3467_v24  ;;  %v1576_v12 = vadd.f32 %v1575_v32, %v7277_v49 }
 0x2b6   : > { %v1583_v11 = vadd.f32 %v6427_v40, %v6411_v37  ;;  %v3474_v41 = vadd.f32 %v3473_v10, %v3468_v18  ;;  %v3483_v7 = vadd.f32 %v3482_v20, %v3469_v43  ;;  %v1582_v38 = vadd.f32 %v1581_v3, %v6406_v48 }
 0x2b7   : > { %v3367_v60 = vrot.slane %v3366_v63, 1  ;;  %v3492_v45 = vadd.f32 %v3491_v50, %v3470_v2  ;;  %v3501_v21 = vadd.f32 %v3500_v59, %v3471_v39  ;;  %v3374_v5 = vrot.slane %v3373_v14, 1 }
 0x2b8   : > { %v3381_v26 = vrot.slane %v3380_v44, 1  ;;  %v3475_v8 = vrot.slane %v3474_v41, 4  ;;  %v3484_v62 = vrot.slane %v3483_v7, 4  ;;  %v3388_v42 = vrot.slane %v3387_v4, 1 }
 0x2b9   : > { %v3493_v13 = vrot.slane %v3492_v45, 4  ;;  %v3502_v58 = vrot.slane %v3501_v21, 4  ;;  %v1584_v49 = vadd.f32 %v6430_v30, %v6416_v57  ;;  %v1585_v37 = vadd.f32 %v1576_v12, %v6420_v17 }
 0x2ba   : > { %v3476_v40 = vadd.f32 %v3475_v8, %v3474_v41  ;;  %v3485_v32 = vadd.f32 %v3484_v62, %v3483_v7  ;;  %v1586_v53 = vadd.f32 %v1582_v38, %v6424_v19  ;;  %v3368_v48 = vadd.f32 %v3367_v60, %v3366_v63 }
 0x2bb   : > { %v3494_v3 = vadd.f32 %v3493_v13, %v3492_v45  ;;  %v3503_v27 = vadd.f32 %v3502_v58, %v3501_v21  ;;  %v3375_v35 = vadd.f32 %v3374_v5, %v3373_v14  ;;  %v3713_v46 = vmov 1966171168  }
 0x2bc   : > { %v3477_v0 = vrot.slane %v3476_v40, 2  ;;  %v3486_v56 = vrot.slane %v3485_v32, 2  ;;  %v3519_v61 = vunpack.c.l.s4 %v3713_v46  ;;  %v3382_v23 = vadd.f32 %v3381_v26, %v3380_v44 }
 0x2bd   : > { %v3389_v51 = vadd.f32 %v3388_v42, %v3387_v4  ;;  %v3495_v15 = vrot.slane %v3494_v3, 2  ;;  %v3504_v29 = vrot.slane %v3503_v27, 2  ;;  %v3390_v30 = vadd.f32 %v3368_v48, %v1583_v11 }
 0x2be   : > { %v3478_v54 = vadd.f32 %v3477_v0, %v3476_v40  ;;  %v3487_v57 = vadd.f32 %v3486_v56, %v3485_v32  ;;  %v3391_v55 = vadd.f32 %v3375_v35, %v1584_v49  ;;  %v3520_v52 = vunpack.c.0.s8 %v3519_v61 }
 0x2bf   : > { %v3496_v17 = vadd.f32 %v3495_v15, %v3494_v3  ;;  %v3505_v34 = vadd.f32 %v3504_v29, %v3503_v27  ;;  %v3392_v16 = vadd.f32 %v3382_v23, %v1585_v37  ;;  %v3393_v6 = vadd.f32 %v3389_v51, %v1586_v53 }
 0x2c0   : > { %v3479_v1 = vrot.slane %v3478_v54, 1  ;;  %v3488_v19 = vrot.slane %v3487_v57, 1  ;;  %v3523_v44 = vsub.s32 %v3520_v52, %v7281_v31  ;;  %v7282_v2 = vlaneseq }
 0x2c1   : > { %v3497_v47 = vrot.slane %v3496_v17, 1  ;;  %v3506_v33 = vrot.slane %v3505_v34, 1 }
 0x2c2   : > { %v3480_v28 = vadd.f32 %v3479_v1, %v3478_v54  ;;  %v3489_v9 = vadd.f32 %v3488_v19, %v3487_v57  ;;  %vm3543_vm10 = vcmp.lt.s32.totalorder %v7282_v2, 512 }
 0x2c3   : > { %v3498_v24 = vadd.f32 %v3497_v47, %v3496_v17  ;;  %v3507_v63 = vadd.f32 %v3506_v33, %v3505_v34 }
 0x2c4   : > { %v3508_v14 = vadd.f32 %v3480_v28, %v3390_v30  ;;  %v3509_v22 = vadd.f32 %v3489_v9, %v3391_v55 }
 0x2c5   : > { %v3510_v4 = vadd.f32 %v3498_v24, %v3392_v16  ;;  %v3511_v36 = vadd.f32 %v3507_v63, %v3393_v6 }
 0x2c6   : > { %v3516_v25 = vcombine.low %v3508_v14, %v3509_v22 }
 0x2c7   : > { %v3517_v18 = vcombine.low %v3510_v4, %v3511_v36 }
 0x2c8   : > { %v3524_v43 = vrot.slane %v3516_v25, %v3523_v44 }
 0x2c9   : > { %v3531_v10 = vrot.slane %v3517_v18, %v3523_v44 }
 0x2cb   : > { %v3532_v20 = vcombine.low %v3524_v43, %v3531_v10 }
 0x2cd   : > { %v3539_v39 = vrot.slane %v3532_v20, %v3523_v44 }
 0x2cf   : > { %3545 = vst.msk [vmem:[%s170_s11] sm:$0xf] %vm3543_vm10, %v3539_v39 }
 0x2d0 PF: > { %s15_s14 = sadd.s32 1, %s3709_s14  }
 0x2d1   : > { %p12_p4 = scmp.ge.s32.totalorder %s15_s14, 4  }
 0x2d3   :  { %14 = sbr.rel (!%p12_p4) target bundleno = 3 (0x3), region = 62 }

</bundles_post_ra>
